<compile_context>
chip_gen: v5e
topology: v5e:2x2
jax: 0.10.0
libtpu: 0.0.40
codegen_flags: <defaults>
</compile_context>

<pallas_src>
import functools

import jax
import jax.numpy as jnp
from jax.experimental import pallas as pl
from jax.experimental.pallas import tpu as pltpu

_LANE = 128


def _round_up(x, m):
    return ((x + m - 1) // m) * m


def _cdiv(a, b):
    return (a + b - 1) // b


def _actor_mlp_kernel(x_ref, w1_ref, b1_ref, w2_ref, b2_ref, w3_ref, b3_ref,
                      avail_ref, out_ref, *, num_actions: int, use_relu: bool):
    act = (lambda v: jnp.maximum(v, 0.0)) if use_relu else jnp.tanh

    x = x_ref[...]                                                      # (TB, D)
    h1 = act(jnp.dot(x, w1_ref[...],
                     preferred_element_type=jnp.float32) + b1_ref[...])     # (TB, H)
    h2 = act(jnp.dot(h1, w2_ref[...],
                     preferred_element_type=jnp.float32) + b2_ref[...])     # (TB, H)
    # fc3 runs at a lane-native N (A padded to 128 in the weights only); the
    # slice back to the A real actions is a static lane slice from lane 0.
    logits_pad = jnp.dot(h2, w3_ref[...],
                         preferred_element_type=jnp.float32) + b3_ref[...]  # (TB, A_pad)
    logits = logits_pad[:, :num_actions]                                # (TB, A)

    # x[avail_a_n == 0] = -1e10  (exact-zero compare matches the PyTorch code;
    # avail is expected to be {0.0, 1.0}).
    logits = jnp.where(avail_ref[...] == 0.0, jnp.float32(-1e10), logits)

    # numerically stable softmax(dim=-1) over exactly the A real actions.
    m = jnp.max(logits, axis=-1, keepdims=True)
    e = jnp.exp(logits - m)
    s = jnp.sum(e, axis=-1, keepdims=True)
    # EUP approx reciprocal + one Newton refinement (keeps the divide off the
    # VALU slot, result ~f32-exact so row sums stay within ~1e-6 of 1).
    inv = pl.reciprocal(s, approx=True)
    inv = inv * (2.0 - s * inv)
    out_ref[...] = e * inv


def actor_mlp_forward(actor_input, avail_a_n, params, *, use_relu=False,
                      block_b=2048):
    """Fused Actor_MLP forward.

    actor_input : (B, D) float32
    avail_a_n   : (B, A) float32 (1.0 = available, 0.0 = masked)
    params      : w1 (D,H), b1 (H,), w2 (H,H), b2 (H,), w3 (H,A), b3 (A,)
                  (weights stored transposed vs. PyTorch, i.e. (in, out))
    Returns (B, A) action probabilities.
    """
    actor_input = jnp.asarray(actor_input, jnp.float32)
    avail_a_n = jnp.asarray(avail_a_n, jnp.float32)

    B, D = actor_input.shape
    H = params["w1"].shape[1]
    A = params["w3"].shape[1]

    # --- fc3 weight/bias padded to a lane-native N; avail/output stay at A.
    A_pad = _round_up(A, _LANE)
    w3p = jnp.zeros((H, A_pad), jnp.float32).at[:, :A].set(
        params["w3"].astype(jnp.float32))
    b3p = jnp.zeros((1, A_pad), jnp.float32).at[:, :A].set(
        params["b3"].reshape(1, A).astype(jnp.float32))

    w1 = params["w1"].astype(jnp.float32)
    w2 = params["w2"].astype(jnp.float32)
    b1 = params["b1"].reshape(1, H).astype(jnp.float32)
    b2 = params["b2"].reshape(1, H).astype(jnp.float32)

    # --- batch tiling: one step for modest B; equal-size tiles otherwise so
    # the "parallel" grid axis stays balanced (v7x megacore) and no trailing
    # tiny tile wastes a step on v5e/v6e.
    rows = _round_up(max(B, 8), 8)
    nb = max(1, _cdiv(rows, block_b))
    TB = _round_up(_cdiv(rows, nb), 8)
    nb = _cdiv(rows, TB)
    B_pad = nb * TB
    if B_pad != B:
        actor_input = jnp.pad(actor_input, ((0, B_pad - B), (0, 0)))
        # pad rows with avail=1.0: they are sliced off below, and this keeps
        # their softmax well-defined (no all-masked padded rows).
        avail_a_n = jnp.pad(avail_a_n, ((0, B_pad - B), (0, 0)),
                            constant_values=1.0)

    kernel = functools.partial(_actor_mlp_kernel, num_actions=A,
                               use_relu=use_relu)
    batch_spec = lambda shape: pl.BlockSpec(shape, lambda i: (i, 0))
    resident = lambda shape: pl.BlockSpec(shape, lambda i: (0, 0))

    out = pl.pallas_call(
        kernel,
        out_shape=jax.ShapeDtypeStruct((B_pad, A), jnp.float32),
        grid=(nb,),
        in_specs=[
            batch_spec((TB, D)),                        # actor_input tile
            resident((D, H)), resident((1, H)),         # fc1 (VMEM-resident)
            resident((H, H)), resident((1, H)),         # fc2 (VMEM-resident)
            resident((H, A_pad)), resident((1, A_pad)), # fc3 (padded, resident)
            batch_spec((TB, A)),                        # avail tile (width A)
        ],
        out_specs=batch_spec((TB, A)),
        compiler_params=pltpu.CompilerParams(
            # independent batch tiles -> megacore sharding on v7x
            dimension_semantics=("parallel",),
            # explicit budget: fits v7x's 32 MiB scoped default too
            # (x/avail/out tiles at TB=2048 are ~6 MiB double-buffered).
            vmem_limit_bytes=32 * 1024 * 1024),
    )(actor_input, w1, b1, w2, b2, w3p, b3p, avail_a_n)

    return out[:B]


def actor_mlp_ref(x, avail, params, *, use_relu=False):
    """Pure-JAX reference (high-precision matmuls) for correctness checks."""
    act = (lambda v: jnp.maximum(v, 0.0)) if use_relu else jnp.tanh
    hp = jax.lax.Precision.HIGHEST
    h1 = act(jnp.dot(x, params["w1"], precision=hp) + params["b1"])
    h2 = act(jnp.dot(h1, params["w2"], precision=hp) + params["b2"])
    logits = jnp.dot(h2, params["w3"], precision=hp) + params["b3"]
    logits = jnp.where(avail == 0.0, jnp.float32(-1e10), logits)
    return jax.nn.softmax(logits, axis=-1)


def init_actor_mlp_params(key, actor_input_dim, hidden_dim, action_dim):
    """Orthogonal init matching orthogonal_init() in the module.

    PyTorch Linear weight is (out, in); init at that shape, store transposed
    (in, out) so the kernel computes x @ W directly.
    """
    k1, k2, k3 = jax.random.split(key, 3)
    ortho = lambda k, shape, gain: jax.nn.initializers.orthogonal(scale=gain)(
        k, shape, jnp.float32)
    w1_t = ortho(k1, (hidden_dim, actor_input_dim), 1.0)
    w2_t = ortho(k2, (hidden_dim, hidden_dim), 1.0)
    w3_t = ortho(k3, (action_dim, hidden_dim), 0.01)   # gain=0.01 for fc3
    return {
        "w1": w1_t.T, "b1": jnp.zeros((hidden_dim,), jnp.float32),
        "w2": w2_t.T, "b2": jnp.zeros((hidden_dim,), jnp.float32),
        "w3": w3_t.T, "b3": jnp.zeros((action_dim,), jnp.float32),
    }


def _check(prob, ref, avail, A):
    assert prob.shape == ref.shape
    assert bool(jnp.all(jnp.abs(jnp.sum(prob, axis=-1) - 1.0) < 1e-4))
    assert bool(jnp.all(jnp.where(avail == 0.0, prob, 0.0) < 1e-6))
    assert bool(jnp.max(jnp.abs(prob - ref)) < 2e-3)


if __name__ == "__main__":
    key = jax.random.PRNGKey(0)
    (k_params, k_in, k_av, k_in2, k_av2, k_in3, k_av3) = jax.random.split(key, 7)

    D, H, A = 16, 32, 8          # actor_input_dim, mlp_hidden_dim, action_dim
    USE_RELU = False             # [Tanh, ReLU][use_relu]
    params = init_actor_mlp_params(k_params, D, H, A)

    # --- fused batch (agents x rollout-threads x timesteps), single tile ---
    B = 1024
    x = jax.random.normal(k_in, (B, D), dtype=jnp.float32)
    avail = (jax.random.uniform(k_av, (B, A)) > 0.3).astype(jnp.float32)
    avail = avail.at[:, 0].set(1.0)          # >=1 available action per row
    prob = jax.block_until_ready(
        actor_mlp_forward(x, avail, params, use_relu=USE_RELU))
    _check(prob, actor_mlp_ref(x, avail, params, use_relu=USE_RELU), avail, A)

    # --- small ragged batch: exercises the batch-padding path ---
    B2 = 5
    x2 = jax.random.normal(k_in2, (B2, D), dtype=jnp.float32)
    avail2 = (jax.random.uniform(k_av2, (B2, A)) > 0.3).astype(jnp.float32)
    avail2 = avail2.at[:, 0].set(1.0)
    prob2 = jax.block_until_ready(
        actor_mlp_forward(x2, avail2, params, use_relu=USE_RELU))
    _check(prob2, actor_mlp_ref(x2, avail2, params, use_relu=USE_RELU),
           avail2, A)

    # --- multi-tile + balanced-tile path (forced small block_b) ---
    B3 = 3000
    x3 = jax.random.normal(k_in3, (B3, D), dtype=jnp.float32)
    avail3 = (jax.random.uniform(k_av3, (B3, A)) > 0.3).astype(jnp.float32)
    avail3 = avail3.at[:, 0].set(1.0)
    prob3 = jax.block_until_ready(
        actor_mlp_forward(x3, avail3, params, use_relu=USE_RELU, block_b=1024))
    _check(prob3, actor_mlp_ref(x3, avail3, params, use_relu=USE_RELU),
           avail3, A)

    print("KERNEL_OK")
</pallas_src>

<mosaic_0001>
module attributes {stable_mosaic.version = 11 : i64} {
  func.func @_actor_mlp_kernel(%arg0: i32, %arg1: memref<1024x16xf32, #tpu.memory_space<vmem>>, %arg2: memref<16x32xf32, #tpu.memory_space<vmem>>, %arg3: memref<1x32xf32, #tpu.memory_space<vmem>>, %arg4: memref<32x32xf32, #tpu.memory_space<vmem>>, %arg5: memref<1x32xf32, #tpu.memory_space<vmem>>, %arg6: memref<32x128xf32, #tpu.memory_space<vmem>>, %arg7: memref<1x128xf32, #tpu.memory_space<vmem>>, %arg8: memref<1024x8xf32, #tpu.memory_space<vmem>>, %arg9: memref<1024x8xf32, #tpu.memory_space<vmem>>) attributes {dimension_semantics = [#tpu.dimension_semantics<parallel>], iteration_bounds = array<i64: 1>, scalar_prefetch = 0 : i64, scratch_operands = 0 : i64, tpu.core_type = #tpu.core_type<tc>, window_params = [{transform_indices = @transform_0, window_bounds = array<i64: 1024, 16>}, {pipeline_mode = #tpu.pipeline_mode<synchronous>, transform_indices = @transform_1, window_bounds = array<i64: 16, 32>}, {pipeline_mode = #tpu.pipeline_mode<synchronous>, transform_indices = @transform_2, window_bounds = array<i64: 1, 32>}, {pipeline_mode = #tpu.pipeline_mode<synchronous>, transform_indices = @transform_3, window_bounds = array<i64: 32, 32>}, {pipeline_mode = #tpu.pipeline_mode<synchronous>, transform_indices = @transform_4, window_bounds = array<i64: 1, 32>}, {pipeline_mode = #tpu.pipeline_mode<synchronous>, transform_indices = @transform_5, window_bounds = array<i64: 32, 128>}, {pipeline_mode = #tpu.pipeline_mode<synchronous>, transform_indices = @transform_6, window_bounds = array<i64: 1, 128>}, {transform_indices = @transform_7, window_bounds = array<i64: 1024, 8>}, {transform_indices = @transform_8, window_bounds = array<i64: 1024, 8>}]} {
    %c0 = arith.constant 0 : index
    %c0_0 = arith.constant 0 : index
    %0 = vector.load %arg1[%c0, %c0_0] : memref<1024x16xf32, #tpu.memory_space<vmem>>, vector<1024x16xf32>
    %c0_1 = arith.constant 0 : index
    %c0_2 = arith.constant 0 : index
    %1 = vector.load %arg2[%c0_1, %c0_2] : memref<16x32xf32, #tpu.memory_space<vmem>>, vector<16x32xf32>
    %cst = arith.constant dense<0.000000e+00> : vector<1024x32xf32>
    %2 = tpu.matmul %0, %1, %cst {dimension_numbers = #tpu.dot_dimension_numbers<[1], [0], [0], [1], [0, 0, 1, 1], [], []>} : vector<1024x16xf32>, vector<16x32xf32>, vector<1024x32xf32> -> vector<1024x32xf32>
    %c0_3 = arith.constant 0 : index
    %c0_4 = arith.constant 0 : index
    %3 = vector.load %arg3[%c0_3, %c0_4] : memref<1x32xf32, #tpu.memory_space<vmem>>, vector<1x32xf32>
    %4 = vector.broadcast %3 : vector<1x32xf32> to vector<1024x32xf32>
    %5 = arith.addf %2, %4 : vector<1024x32xf32>
    %6 = math.tanh %5 : vector<1024x32xf32>
    %c0_5 = arith.constant 0 : index
    %c0_6 = arith.constant 0 : index
    %7 = vector.load %arg4[%c0_5, %c0_6] : memref<32x32xf32, #tpu.memory_space<vmem>>, vector<32x32xf32>
    %cst_7 = arith.constant dense<0.000000e+00> : vector<1024x32xf32>
    %8 = tpu.matmul %6, %7, %cst_7 {dimension_numbers = #tpu.dot_dimension_numbers<[1], [0], [0], [1], [0, 0, 1, 1], [], []>} : vector<1024x32xf32>, vector<32x32xf32>, vector<1024x32xf32> -> vector<1024x32xf32>
    %c0_8 = arith.constant 0 : index
    %c0_9 = arith.constant 0 : index
    %9 = vector.load %arg5[%c0_8, %c0_9] : memref<1x32xf32, #tpu.memory_space<vmem>>, vector<1x32xf32>
    %10 = vector.broadcast %9 : vector<1x32xf32> to vector<1024x32xf32>
    %11 = arith.addf %8, %10 : vector<1024x32xf32>
    %12 = math.tanh %11 : vector<1024x32xf32>
    %c0_10 = arith.constant 0 : index
    %c0_11 = arith.constant 0 : index
    %13 = vector.load %arg6[%c0_10, %c0_11] : memref<32x128xf32, #tpu.memory_space<vmem>>, vector<32x128xf32>
    %cst_12 = arith.constant dense<0.000000e+00> : vector<1024x128xf32>
    %14 = tpu.matmul %12, %13, %cst_12 {dimension_numbers = #tpu.dot_dimension_numbers<[1], [0], [0], [1], [0, 0, 1, 1], [], []>} : vector<1024x32xf32>, vector<32x128xf32>, vector<1024x128xf32> -> vector<1024x128xf32>
    %c0_13 = arith.constant 0 : index
    %c0_14 = arith.constant 0 : index
    %15 = vector.load %arg7[%c0_13, %c0_14] : memref<1x128xf32, #tpu.memory_space<vmem>>, vector<1x128xf32>
    %16 = vector.broadcast %15 : vector<1x128xf32> to vector<1024x128xf32>
    %17 = arith.addf %14, %16 : vector<1024x128xf32>
    %18 = vector.extract_strided_slice %17 {offsets = [0, 0], sizes = [1024, 8], strides = [1, 1]} : vector<1024x128xf32> to vector<1024x8xf32>
    %c0_15 = arith.constant 0 : index
    %c0_16 = arith.constant 0 : index
    %19 = vector.load %arg8[%c0_15, %c0_16] : memref<1024x8xf32, #tpu.memory_space<vmem>>, vector<1024x8xf32>
    %cst_17 = arith.constant 0.000000e+00 : f32
    %20 = vector.broadcast %cst_17 : f32 to vector<1024x8xf32>
    %21 = arith.cmpf oeq, %19, %20 : vector<1024x8xf32>
    %cst_18 = arith.constant -1.000000e+10 : f32
    %22 = vector.broadcast %cst_18 : f32 to vector<1024x8xf32>
    %23 = arith.select %21, %22, %18 : vector<1024x8xi1>, vector<1024x8xf32>
    %cst_19 = arith.constant dense<0xFF800000> : vector<1024xf32>
    %24 = vector.multi_reduction <maximumf>, %23, %cst_19 [1] : vector<1024x8xf32> to vector<1024xf32>
    %25 = vector.shape_cast %24 : vector<1024xf32> to vector<1024x1xf32>
    %26 = vector.broadcast %25 : vector<1024x1xf32> to vector<1024x8xf32>
    %27 = arith.subf %23, %26 : vector<1024x8xf32>
    %28 = math.exp %27 : vector<1024x8xf32>
    %cst_20 = arith.constant dense<0.000000e+00> : vector<1024xf32>
    %29 = vector.multi_reduction <add>, %28, %cst_20 [1] : vector<1024x8xf32> to vector<1024xf32>
    %30 = vector.shape_cast %29 : vector<1024xf32> to vector<1024x1xf32>
    %31 = tpu.reciprocal %30 {approx = true} : vector<1024x1xf32> -> vector<1024x1xf32>
    %32 = arith.mulf %30, %31 : vector<1024x1xf32>
    %cst_21 = arith.constant 2.000000e+00 : f32
    %33 = vector.broadcast %cst_21 : f32 to vector<1024x1xf32>
    %34 = arith.subf %33, %32 : vector<1024x1xf32>
    %35 = arith.mulf %31, %34 : vector<1024x1xf32>
    %36 = vector.broadcast %35 : vector<1024x1xf32> to vector<1024x8xf32>
    %37 = arith.mulf %28, %36 : vector<1024x8xf32>
    %c0_22 = arith.constant 0 : index
    %c0_23 = arith.constant 0 : index
    %38 = vector.load %arg9[%c0_22, %c0_23] : memref<1024x8xf32, #tpu.memory_space<vmem>>, vector<1024x8xf32>
    tpu.vector_store %arg9[%c0_22, %c0_23], %37 {strides = array<i32>} : memref<1024x8xf32, #tpu.memory_space<vmem>>, vector<1024x8xf32>,
    return
  }
  func.func @transform_0(%arg0: i32) -> (i32, i32) {
    %c0_i32 = arith.constant 0 : i32
    %c0_i32_0 = arith.constant 0 : i32
    return %arg0, %c0_i32 : i32, i32
  }
  func.func @transform_1(%arg0: i32) -> (i32, i32) {
    %c0_i32 = arith.constant 0 : i32
    %c0_i32_0 = arith.constant 0 : i32
    %c0_i32_1 = arith.constant 0 : i32
    return %c0_i32, %c0_i32_0 : i32, i32
  }
  func.func @transform_2(%arg0: i32) -> (i32, i32) {
    %c0_i32 = arith.constant 0 : i32
    %c0_i32_0 = arith.constant 0 : i32
    %c0_i32_1 = arith.constant 0 : i32
    return %c0_i32, %c0_i32_0 : i32, i32
  }
  func.func @transform_3(%arg0: i32) -> (i32, i32) {
    %c0_i32 = arith.constant 0 : i32
    %c0_i32_0 = arith.constant 0 : i32
    %c0_i32_1 = arith.constant 0 : i32
    return %c0_i32, %c0_i32_0 : i32, i32
  }
  func.func @transform_4(%arg0: i32) -> (i32, i32) {
    %c0_i32 = arith.constant 0 : i32
    %c0_i32_0 = arith.constant 0 : i32
    %c0_i32_1 = arith.constant 0 : i32
    return %c0_i32, %c0_i32_0 : i32, i32
  }
  func.func @transform_5(%arg0: i32) -> (i32, i32) {
    %c0_i32 = arith.constant 0 : i32
    %c0_i32_0 = arith.constant 0 : i32
    %c0_i32_1 = arith.constant 0 : i32
    return %c0_i32, %c0_i32_0 : i32, i32
  }
  func.func @transform_6(%arg0: i32) -> (i32, i32) {
    %c0_i32 = arith.constant 0 : i32
    %c0_i32_0 = arith.constant 0 : i32
    %c0_i32_1 = arith.constant 0 : i32
    return %c0_i32, %c0_i32_0 : i32, i32
  }
  func.func @transform_7(%arg0: i32) -> (i32, i32) {
    %c0_i32 = arith.constant 0 : i32
    %c0_i32_0 = arith.constant 0 : i32
    return %arg0, %c0_i32 : i32, i32
  }
  func.func @transform_8(%arg0: i32) -> (i32, i32) {
    %c0_i32 = arith.constant 0 : i32
    %c0_i32_0 = arith.constant 0 : i32
    return %arg0, %c0_i32 : i32, i32
  }
}

</mosaic_0001>

<bundles_post_ra>
// kernel: tpu_custom_call.1
= control target key start
LH: loop header
LB: loop body
LE: loop exit
PB: predicated region body
PF: predicated region fallthrough
CT: control target
= control target key end

     0   :  { %vm163_vm0 = vcmask 130048   ;;  %vm1085_vm1 = vcmask 261120   ;;  %vm3176_vm3 = vcmask 64512   ;;  %s10247_s1 = inlined_call_operand.vmem [shape: f32[16,32], index: 1, kind: input, shape index: {}]   ;;  %s10248_s0 = inlined_call_operand.vmem [shape: f32[1024,16], index: 0, kind: input, shape index: {}]   ;;  %s10249_s2 = inlined_call_operand.vmem [shape: f32[1,32], index: 2, kind: input, shape index: {}]   ;;  %s10250_s3 = inlined_call_operand.vmem [shape: f32[32,32], index: 3, kind: input, shape index: {}]   ;;  %s10251_s4 = inlined_call_operand.vmem [shape: f32[1,32], index: 4, kind: input, shape index: {}]   ;;  %s10252_s5 = inlined_call_operand.vmem [shape: f32[32,128], index: 5, kind: input, shape index: {}]   ;;  %s10253_s6 = inlined_call_operand.vmem [shape: f32[1,128], index: 6, kind: input, shape index: {}]   ;;  %s10254_s7 = inlined_call_operand.vmem [shape: f32[1024,8], index: 7, kind: input, shape index: {}]   ;;  %s10255_s8 = inlined_call_operand.vmem [shape: f32[1024,8], index: 8, kind: output, shape index: {}]  }
   0x1   :  { %v158_v0 = vld [vmem:[%s10247_s1 + $0x8] sm:$0xff]  ;;  %v157_v1 = vld [vmem:[%s10247_s1] sm:$0xff]  ;;  %v31_v4 = vld [vmem:[%s10248_s0 + $0x10] sm:$0xff] }
   0x2   :  { %562 = vmatpush.msra.mxu0 %v158_v0  ;;  %v29_v2 = vld [vmem:[%s10248_s0] sm:$0xff]  ;;  %5485 = vmatpush.msra.mxu3 %v158_v0  ;;  %v30_v3 = vld [vmem:[%s10248_s0 + $0x8] sm:$0xff]  ;;  %v32_v5 = vld [vmem:[%s10248_s0 + $0x18] sm:$0xff] }
   0x3   :  { %v33_v6 = vld [vmem:[%s10248_s0 + $0x20] sm:$0xff]  ;;  %v34_v7 = vld [vmem:[%s10248_s0 + $0x28] sm:$0xff]  ;;  %v35_v8 = vld [vmem:[%s10248_s0 + $0x30] sm:$0xff] }
   0x4   :  { %563 = vmatpush.msra.mxu0 %v157_v1  ;;  %5486 = vmatpush.msra.mxu3 %v157_v1  ;;  %v36_v9 = vld [vmem:[%s10248_s0 + $0x38] sm:$0xff]  ;;  %v37_v10 = vld [vmem:[%s10248_s0 + $0x40] sm:$0xff]  ;;  %v38_v11 = vld [vmem:[%s10248_s0 + $0x48] sm:$0xff] }
   0x5   :  { %5101 = vmatmul.msk.f32.vlgmr.msra.gmra.mxu0 %vm163_vm0, %v29_v2  ;;  %v39_v12 = vld [vmem:[%s10248_s0 + $0x50] sm:$0xff]  ;;  %v40_v13 = vld [vmem:[%s10248_s0 + $0x58] sm:$0xff]  ;;  %v41_v14 = vld [vmem:[%s10248_s0 + $0x60] sm:$0xff] }
   0x6   :  { %v1080_v15 = vld [vmem:[%s10250_s3 + $0x18] sm:$0xff]  ;;  %v1079_v16 = vld [vmem:[%s10250_s3 + $0x10] sm:$0xff]  ;;  %v1078_v17 = vld [vmem:[%s10250_s3 + $0x8] sm:$0xff] }
   0x7   :  { %1482 = vmatpush.msra.mxu1 %v1080_v15  ;;  %5487 = vmatpush.msrb.mxu3 %v1080_v15  ;;  %v42_v18 = vld [vmem:[%s10248_s0 + $0x68] sm:$0xff]  ;;  %v1077_v19 = vld [vmem:[%s10250_s3] sm:$0xff]  ;;  %v43_v20 = vld [vmem:[%s10248_s0 + $0x70] sm:$0xff] }
   0x8   :  { %v44_v21 = vld [vmem:[%s10248_s0 + $0x78] sm:$0xff]  ;;  %v6673_v22 = vld [vmem:[%s10249_s2] ss:$0 sm:$0xff]  ;;  %v46_v27 = vld [vmem:[%s10248_s0 + $0x88] sm:$0xff] }
   0x9   :  { %1483 = vmatpush.msra.mxu1 %v1079_v16  ;;  %5488 = vmatpush.msrb.mxu3 %v1079_v16  ;;  %v45_v24 = vld [vmem:[%s10248_s0 + $0x80] sm:$0xff]  ;;  %v47_v31 = vld [vmem:[%s10248_s0 + $0x90] sm:$0xff]  ;;  %v48_v35 = vld [vmem:[%s10248_s0 + $0x98] sm:$0xff] }
   0xa   :  { %v49_v39 = vld [vmem:[%s10248_s0 + $0xa0] sm:$0xff]  ;;  %v50_v43 = vld [vmem:[%s10248_s0 + $0xa8] sm:$0xff]  ;;  %v51_v47 = vld [vmem:[%s10248_s0 + $0xb0] sm:$0xff] }
   0xb   :  { %1484 = vmatpush.msra.mxu1 %v1078_v17  ;;  %5489 = vmatpush.msrb.mxu3 %v1078_v17  ;;  %v52_v51 = vld [vmem:[%s10248_s0 + $0xb8] sm:$0xff]  ;;  %v53_v55 = vld [vmem:[%s10248_s0 + $0xc0] sm:$0xff]  ;;  %v54_v59 = vld [vmem:[%s10248_s0 + $0xc8] sm:$0xff] }
   0xc   :  { %v55_v63 = vld [vmem:[%s10248_s0 + $0xd0] sm:$0xff]  ;;  %v2000_v16 = vld [vmem:[%s10252_s5 + $0x8] sm:$0xff]  ;;  %v1999_v17 = vld [vmem:[%s10252_s5] sm:$0xff] }
   0xd   :  { %5102 = vmatmul.msk.f32.gmra.mxu0 %vm163_vm0, %v30_v3  ;;  %1485 = vmatpush.msra.mxu1 %v1077_v19  ;;  %v56_v3 = vld [vmem:[%s10248_s0 + $0xd8] sm:$0xff]  ;;  %v2001_v15 = vld [vmem:[%s10252_s5 + $0x10] sm:$0xff] }
   0xe   :  { %5490 = vmatpush.msrb.mxu3 %v1077_v19  ;;  %v59_v19 = vld [vmem:[%s10248_s0 + $0xf0] sm:$0xff] }
  0x15   :  { %5103 = vmatmul.msk.f32.gmra.mxu0 %vm163_vm0, %v31_v4 }
  0x1d   :  { %5104 = vmatmul.msk.f32.gmra.mxu0 %vm163_vm0, %v32_v5 }
  0x25   :  { %5105 = vmatmul.msk.f32.gmra.mxu0 %vm163_vm0, %v33_v6 }
  0x2d   :  { %5106 = vmatmul.msk.f32.gmra.mxu0 %vm163_vm0, %v34_v7  ;;  %v57_v7 = vld [vmem:[%s10248_s0 + $0xe0] sm:$0xff] }
  0x35   :  { %5107 = vmatmul.msk.f32.gmra.mxu0 %vm163_vm0, %v35_v8 }
  0x3d   :  { %5108 = vmatmul.msk.f32.gmra.mxu0 %vm163_vm0, %v36_v9 }
  0x45   :  { %5109 = vmatmul.msk.f32.gmra.mxu0 %vm163_vm0, %v37_v10 }
  0x4d   :  { %5110 = vmatmul.msk.f32.gmra.mxu0 %vm163_vm0, %v38_v11  ;;  %v58_v11 = vld [vmem:[%s10248_s0 + $0xe8] sm:$0xff] }
  0x55   :  { %5111 = vmatmul.msk.f32.gmra.mxu0 %vm163_vm0, %v39_v12 }
  0x5d   :  { %5112 = vmatmul.msk.f32.gmra.mxu0 %vm163_vm0, %v40_v13 }
  0x65   :  { %5113 = vmatmul.msk.f32.gmra.mxu0 %vm163_vm0, %v41_v14  ;;  %v2002_v14 = vld [vmem:[%s10252_s5 + $0x18] sm:$0xff] }
  0x66   :  { %2403 = vmatpush.msra.mxu2 %v2002_v14 }
  0x68   :  { %2404 = vmatpush.msra.mxu2 %v2001_v15 }
  0x6a   :  { %2405 = vmatpush.msra.mxu2 %v2000_v16 }
  0x6c   :  { %2406 = vmatpush.msra.mxu2 %v1999_v17 }
  0x6d   :  { %5114 = vmatmul.msk.f32.gmra.mxu0 %vm163_vm0, %v42_v18 }
  0x75   :  { %5115 = vmatmul.msk.f32.gmra.mxu0 %vm163_vm0, %v43_v20 }
  0x7d   :  { %5116 = vmatmul.msk.f32.gmra.mxu0 %vm163_vm0, %v44_v21 }
  0x82   :  { %v565_v23 = vpop.f32.mrf.mxu0 }
  0x83   :  { %v566_v25 = vadd.f32 %v6673_v22, %v565_v23 }
  0x85   :  { %5498 = vtanh.f32 %v566_v25  ;;  %5117 = vmatmul.msk.f32.gmra.mxu0 %vm163_vm0, %v45_v24  ;;  %v60_v24 = vld [vmem:[%s10248_s0 + $0xf8] sm:$0xff] }
  0x8a   :  { %v568_v26 = vpop.f32.mrf.mxu0 }
  0x8b   :  { %v5499_v28 = vpop.eup %5498  ;;  %v569_v29 = vadd.f32 %v6673_v22, %v568_v26 }
  0x8c   :  { %5229 = vmatmul.msk.f32.vlgmr.msra.gmra.mxu1 %vm1085_vm1, %v5499_v28  ;;  %v61_v28 = vld [vmem:[%s10248_s0 + $0x100] sm:$0xff] }
  0x8d   :  { %5500 = vtanh.f32 %v569_v29  ;;  %5118 = vmatmul.msk.f32.gmra.mxu0 %vm163_vm0, %v46_v27 }
  0x92   :  { %v571_v30 = vpop.f32.mrf.mxu0 }
  0x93   :  { %v5501_v32 = vpop.eup %5500  ;;  %v572_v33 = vadd.f32 %v6673_v22, %v571_v30 }
  0x94   :  { %5230 = vmatmul.msk.f32.gmra.mxu1 %vm1085_vm1, %v5501_v32 }
  0x95   :  { %5502 = vtanh.f32 %v572_v33  ;;  %5119 = vmatmul.msk.f32.gmra.mxu0 %vm163_vm0, %v47_v31  ;;  %v6791_v31 = vld [vmem:[%s10251_s4] ss:$0 sm:$0xff] }
  0x9a   :  { %v574_v34 = vpop.f32.mrf.mxu0 }
  0x9b   :  { %v5503_v36 = vpop.eup %5502  ;;  %v575_v37 = vadd.f32 %v6673_v22, %v574_v34 }
  0x9c   :  { %5231 = vmatmul.msk.f32.gmra.mxu1 %vm1085_vm1, %v5503_v36 }
  0x9d   :  { %5504 = vtanh.f32 %v575_v37  ;;  %5120 = vmatmul.msk.f32.gmra.mxu0 %vm163_vm0, %v48_v35  ;;  %v62_v35 = vld [vmem:[%s10248_s0 + $0x108] sm:$0xff] }
  0xa2   :  { %v577_v38 = vpop.f32.mrf.mxu0 }
  0xa3   :  { %v5505_v40 = vpop.eup %5504  ;;  %v578_v41 = vadd.f32 %v6673_v22, %v577_v38 }
  0xa4   :  { %5232 = vmatmul.msk.f32.gmra.mxu1 %vm1085_vm1, %v5505_v40 }
  0xa5   :  { %5506 = vtanh.f32 %v578_v41  ;;  %5121 = vmatmul.msk.f32.gmra.mxu0 %vm163_vm0, %v49_v39 }
  0xaa   :  { %v580_v42 = vpop.f32.mrf.mxu0 }
  0xab   :  { %v5507_v44 = vpop.eup %5506  ;;  %v581_v45 = vadd.f32 %v6673_v22, %v580_v42  ;;  %v63_v42 = vld [vmem:[%s10248_s0 + $0x110] sm:$0xff] }
  0xac   :  { %5233 = vmatmul.msk.f32.gmra.mxu1 %vm1085_vm1, %v5507_v44 }
  0xad   :  { %5508 = vtanh.f32 %v581_v45  ;;  %5122 = vmatmul.msk.f32.gmra.mxu0 %vm163_vm0, %v50_v43 }
  0xb2   :  { %v583_v46 = vpop.f32.mrf.mxu0 }
  0xb3   :  { %v5509_v48 = vpop.eup %5508  ;;  %v584_v49 = vadd.f32 %v6673_v22, %v583_v46 }
  0xb4   :  { %5234 = vmatmul.msk.f32.gmra.mxu1 %vm1085_vm1, %v5509_v48 }
  0xb5   :  { %5510 = vtanh.f32 %v584_v49  ;;  %5123 = vmatmul.msk.f32.gmra.mxu0 %vm163_vm0, %v51_v47  ;;  %v64_v49 = vld [vmem:[%s10248_s0 + $0x118] sm:$0xff] }
  0xba   :  { %v586_v50 = vpop.f32.mrf.mxu0 }
  0xbb   :  { %v5511_v52 = vpop.eup %5510  ;;  %v587_v53 = vadd.f32 %v6673_v22, %v586_v50 }
  0xbc   :  { %5235 = vmatmul.msk.f32.gmra.mxu1 %vm1085_vm1, %v5511_v52 }
  0xbd   :  { %5512 = vtanh.f32 %v587_v53  ;;  %5124 = vmatmul.msk.f32.gmra.mxu0 %vm163_vm0, %v52_v51 }
  0xc2   :  { %v589_v54 = vpop.f32.mrf.mxu0 }
  0xc3   :  { %v5513_v56 = vpop.eup %5512  ;;  %v590_v57 = vadd.f32 %v6673_v22, %v589_v54 }
  0xc4   :  { %5236 = vmatmul.msk.f32.gmra.mxu1 %vm1085_vm1, %v5513_v56  ;;  %v65_v56 = vld [vmem:[%s10248_s0 + $0x120] sm:$0xff] }
  0xc5   :  { %5514 = vtanh.f32 %v590_v57  ;;  %5125 = vmatmul.msk.f32.gmra.mxu0 %vm163_vm0, %v53_v55 }
  0xca   :  { %v592_v58 = vpop.f32.mrf.mxu0 }
  0xcb   :  { %v5515_v60 = vpop.eup %5514  ;;  %v593_v61 = vadd.f32 %v6673_v22, %v592_v58 }
  0xcc   :  { %5237 = vmatmul.msk.f32.gmra.mxu1 %vm1085_vm1, %v5515_v60 }
  0xcd   :  { %5516 = vtanh.f32 %v593_v61  ;;  %5126 = vmatmul.msk.f32.gmra.mxu0 %vm163_vm0, %v54_v59 }
  0xd2   :  { %v595_v62 = vpop.f32.mrf.mxu0 }
  0xd3   :  { %v5517_v0 = vpop.eup %5516  ;;  %v596_v1 = vadd.f32 %v6673_v22, %v595_v62 }
  0xd4   :  { %5238 = vmatmul.msk.f32.gmra.mxu1 %vm1085_vm1, %v5517_v0 }
  0xd5   :  { %5518 = vtanh.f32 %v596_v1  ;;  %5127 = vmatmul.msk.f32.gmra.mxu0 %vm163_vm0, %v55_v63  ;;  %v66_v63 = vld [vmem:[%s10248_s0 + $0x128] sm:$0xff] }
  0xda   :  { %v598_v2 = vpop.f32.mrf.mxu0 }
  0xdb   :  { %v5519_v4 = vpop.eup %5518  ;;  %v599_v5 = vadd.f32 %v6673_v22, %v598_v2 }
  0xdc   :  { %5239 = vmatmul.msk.f32.gmra.mxu1 %vm1085_vm1, %v5519_v4 }
  0xdd   :  { %5520 = vtanh.f32 %v599_v5  ;;  %5128 = vmatmul.msk.f32.gmra.mxu0 %vm163_vm0, %v56_v3 }
  0xe2   :  { %v601_v6 = vpop.f32.mrf.mxu0 }
  0xe3   :  { %v5521_v8 = vpop.eup %5520  ;;  %v602_v9 = vadd.f32 %v6673_v22, %v601_v6  ;;  %v67_v6 = vld [vmem:[%s10248_s0 + $0x130] sm:$0xff] }
  0xe4   :  { %5240 = vmatmul.msk.f32.gmra.mxu1 %vm1085_vm1, %v5521_v8 }
  0xe5   :  { %5522 = vtanh.f32 %v602_v9  ;;  %5129 = vmatmul.msk.f32.gmra.mxu0 %vm163_vm0, %v57_v7 }
  0xea   :  { %v604_v10 = vpop.f32.mrf.mxu0 }
  0xeb   :  { %v5523_v12 = vpop.eup %5522  ;;  %v605_v13 = vadd.f32 %v6673_v22, %v604_v10 }
  0xec   :  { %5241 = vmatmul.msk.f32.gmra.mxu1 %vm1085_vm1, %v5523_v12 }
  0xed   :  { %5524 = vtanh.f32 %v605_v13  ;;  %5130 = vmatmul.msk.f32.gmra.mxu0 %vm163_vm0, %v58_v11  ;;  %v68_v13 = vld [vmem:[%s10248_s0 + $0x138] sm:$0xff] }
  0xf2   :  { %v607_v18 = vpop.f32.mrf.mxu0 }
  0xf3   :  { %v5525_v20 = vpop.eup %5524  ;;  %v608_v21 = vadd.f32 %v6673_v22, %v607_v18 }
  0xf4   :  { %5242 = vmatmul.msk.f32.gmra.mxu1 %vm1085_vm1, %v5525_v20  ;;  %v69_v20 = vld [vmem:[%s10248_s0 + $0x140] sm:$0xff] }
  0xf5   :  { %5526 = vtanh.f32 %v608_v21  ;;  %5131 = vmatmul.msk.f32.gmra.mxu0 %vm163_vm0, %v59_v19 }
  0xfa   :  { %v610_v23 = vpop.f32.mrf.mxu0 }
  0xfb   :  { %v5527_v25 = vpop.eup %5526  ;;  %v611_v26 = vadd.f32 %v6673_v22, %v610_v23 }
  0xfc   :  { %5243 = vmatmul.msk.f32.gmra.mxu1 %vm1085_vm1, %v5527_v25 }
  0xfd   :  { %5528 = vtanh.f32 %v611_v26  ;;  %5132 = vmatmul.msk.f32.gmra.mxu0 %vm163_vm0, %v60_v24 }
 0x102   :  { %v613_v27 = vpop.f32.mrf.mxu0 }
 0x103   :  { %v5529_v29 = vpop.eup %5528  ;;  %v614_v30 = vadd.f32 %v6673_v22, %v613_v27 }
 0x104   :  { %5244 = vmatmul.msk.f32.gmra.mxu1 %vm1085_vm1, %v5529_v29 }
 0x105   :  { %5530 = vtanh.f32 %v614_v30  ;;  %5133 = vmatmul.msk.f32.gmra.mxu0 %vm163_vm0, %v61_v28  ;;  %v70_v28 = vld [vmem:[%s10248_s0 + $0x148] sm:$0xff] }
 0x109   :  { %v1487_v32 = vpop.f32.mrf.mxu1 }
 0x10a   :  { %v1488_v33 = vadd.f32 %v6791_v31, %v1487_v32  ;;  %v616_v34 = vpop.f32.mrf.mxu0 }
 0x10b   :  { %v5531_v36 = vpop.eup %5530  ;;  %v617_v37 = vadd.f32 %v6673_v22, %v616_v34 }
 0x10c   :  { %5532 = vtanh.f32 %v1488_v33  ;;  %5245 = vmatmul.msk.f32.gmra.mxu1 %vm1085_vm1, %v5531_v36  ;;  %v71_v36 = vld [vmem:[%s10248_s0 + $0x150] sm:$0xff] }
 0x10d   :  { %5534 = vtanh.f32 %v617_v37  ;;  %5134 = vmatmul.msk.f32.gmra.mxu0 %vm163_vm0, %v62_v35 }
 0x111   :  { %v1490_v38 = vpop.f32.mrf.mxu1 }
 0x112   :  { %v5533_v39 = vpop.eup %5532  ;;  %v1491_v40 = vadd.f32 %v6791_v31, %v1490_v38  ;;  %v619_v41 = vpop.f32.mrf.mxu0 }
 0x113   :  { %v5535_v43 = vpop.eup %5534  ;;  %v620_v44 = vadd.f32 %v6673_v22, %v619_v41  ;;  %5357 = vmatmul.msk.f32.vlgmr.msra.gmra.mxu2 %vm1085_vm1, %v5533_v39 }
 0x114   :  { %5536 = vtanh.f32 %v1491_v40  ;;  %5246 = vmatmul.msk.f32.gmra.mxu1 %vm1085_vm1, %v5535_v43  ;;  %v72_v43 = vld [vmem:[%s10248_s0 + $0x158] sm:$0xff] }
 0x115   :  { %5538 = vtanh.f32 %v620_v44  ;;  %5135 = vmatmul.msk.f32.gmra.mxu0 %vm163_vm0, %v63_v42 }
 0x119   :  { %v1493_v45 = vpop.f32.mrf.mxu1 }
 0x11a   :  { %v5537_v46 = vpop.eup %5536  ;;  %v1494_v47 = vadd.f32 %v6791_v31, %v1493_v45  ;;  %v622_v48 = vpop.f32.mrf.mxu0 }
 0x11b   :  { %v5539_v50 = vpop.eup %5538  ;;  %v623_v51 = vadd.f32 %v6673_v22, %v622_v48  ;;  %5358 = vmatmul.msk.f32.gmra.mxu2 %vm1085_vm1, %v5537_v46 }
 0x11c   :  { %5540 = vtanh.f32 %v1494_v47  ;;  %5247 = vmatmul.msk.f32.gmra.mxu1 %vm1085_vm1, %v5539_v50  ;;  %v73_v50 = vld [vmem:[%s10248_s0 + $0x160] sm:$0xff] }
 0x11d   :  { %5542 = vtanh.f32 %v623_v51  ;;  %5136 = vmatmul.msk.f32.gmra.mxu0 %vm163_vm0, %v64_v49 }
 0x121   :  { %v1496_v52 = vpop.f32.mrf.mxu1 }
 0x122   :  { %v5541_v53 = vpop.eup %5540  ;;  %v1497_v54 = vadd.f32 %v6791_v31, %v1496_v52  ;;  %v625_v55 = vpop.f32.mrf.mxu0 }
 0x123   :  { %v5543_v57 = vpop.eup %5542  ;;  %v626_v58 = vadd.f32 %v6673_v22, %v625_v55  ;;  %5359 = vmatmul.msk.f32.gmra.mxu2 %vm1085_vm1, %v5541_v53 }
 0x124   :  { %5544 = vtanh.f32 %v1497_v54  ;;  %5248 = vmatmul.msk.f32.gmra.mxu1 %vm1085_vm1, %v5543_v57  ;;  %v74_v57 = vld [vmem:[%s10248_s0 + $0x168] sm:$0xff] }
 0x125   :  { %5546 = vtanh.f32 %v626_v58  ;;  %5137 = vmatmul.msk.f32.gmra.mxu0 %vm163_vm0, %v65_v56 }
 0x129   :  { %v1499_v59 = vpop.f32.mrf.mxu1 }
 0x12a   :  { %v5545_v60 = vpop.eup %5544  ;;  %v1500_v61 = vadd.f32 %v6791_v31, %v1499_v59  ;;  %v628_v62 = vpop.f32.mrf.mxu0 }
 0x12b   :  { %v5547_v0 = vpop.eup %5546  ;;  %v629_v1 = vadd.f32 %v6673_v22, %v628_v62  ;;  %5360 = vmatmul.msk.f32.gmra.mxu2 %vm1085_vm1, %v5545_v60 }
 0x12c   :  { %5548 = vtanh.f32 %v1500_v61  ;;  %5249 = vmatmul.msk.f32.gmra.mxu1 %vm1085_vm1, %v5547_v0  ;;  %v75_v0 = vld [vmem:[%s10248_s0 + $0x170] sm:$0xff] }
 0x12d   :  { %5550 = vtanh.f32 %v629_v1  ;;  %5138 = vmatmul.msk.f32.gmra.mxu0 %vm163_vm0, %v66_v63 }
 0x131   :  { %v1502_v2 = vpop.f32.mrf.mxu1 }
 0x132   :  { %v5549_v3 = vpop.eup %5548  ;;  %v1503_v4 = vadd.f32 %v6791_v31, %v1502_v2  ;;  %v631_v5 = vpop.f32.mrf.mxu0 }
 0x133   :  { %v5551_v7 = vpop.eup %5550  ;;  %v632_v8 = vadd.f32 %v6673_v22, %v631_v5  ;;  %5361 = vmatmul.msk.f32.gmra.mxu2 %vm1085_vm1, %v5549_v3 }
 0x134   :  { %5552 = vtanh.f32 %v1503_v4  ;;  %5250 = vmatmul.msk.f32.gmra.mxu1 %vm1085_vm1, %v5551_v7  ;;  %v76_v7 = vld [vmem:[%s10248_s0 + $0x178] sm:$0xff] }
 0x135   :  { %5554 = vtanh.f32 %v632_v8  ;;  %5139 = vmatmul.msk.f32.gmra.mxu0 %vm163_vm0, %v67_v6 }
 0x139   :  { %v1505_v9 = vpop.f32.mrf.mxu1 }
 0x13a   :  { %v5553_v10 = vpop.eup %5552  ;;  %v1506_v11 = vadd.f32 %v6791_v31, %v1505_v9  ;;  %v634_v12 = vpop.f32.mrf.mxu0 }
 0x13b   :  { %v5555_v14 = vpop.eup %5554  ;;  %v635_v15 = vadd.f32 %v6673_v22, %v634_v12  ;;  %5362 = vmatmul.msk.f32.gmra.mxu2 %vm1085_vm1, %v5553_v10 }
 0x13c   :  { %5556 = vtanh.f32 %v1506_v11  ;;  %5251 = vmatmul.msk.f32.gmra.mxu1 %vm1085_vm1, %v5555_v14  ;;  %v77_v14 = vld [vmem:[%s10248_s0 + $0x180] sm:$0xff] }
 0x13d   :  { %5558 = vtanh.f32 %v635_v15  ;;  %5140 = vmatmul.msk.f32.gmra.mxu0 %vm163_vm0, %v68_v13 }
 0x141   :  { %v1508_v16 = vpop.f32.mrf.mxu1 }
 0x142   :  { %v5557_v17 = vpop.eup %5556  ;;  %v1509_v18 = vadd.f32 %v6791_v31, %v1508_v16  ;;  %v637_v19 = vpop.f32.mrf.mxu0 }
 0x143   :  { %v5559_v21 = vpop.eup %5558  ;;  %v638_v23 = vadd.f32 %v6673_v22, %v637_v19  ;;  %5363 = vmatmul.msk.f32.gmra.mxu2 %vm1085_vm1, %v5557_v17 }
 0x144   :  { %5560 = vtanh.f32 %v1509_v18  ;;  %5252 = vmatmul.msk.f32.gmra.mxu1 %vm1085_vm1, %v5559_v21  ;;  %v78_v21 = vld [vmem:[%s10248_s0 + $0x188] sm:$0xff] }
 0x145   :  { %5562 = vtanh.f32 %v638_v23  ;;  %5141 = vmatmul.msk.f32.gmra.mxu0 %vm163_vm0, %v69_v20 }
 0x149   :  { %v1511_v24 = vpop.f32.mrf.mxu1 }
 0x14a   :  { %v5561_v25 = vpop.eup %5560  ;;  %v1512_v26 = vadd.f32 %v6791_v31, %v1511_v24  ;;  %v640_v27 = vpop.f32.mrf.mxu0 }
 0x14b   :  { %v5563_v29 = vpop.eup %5562  ;;  %v641_v30 = vadd.f32 %v6673_v22, %v640_v27  ;;  %5364 = vmatmul.msk.f32.gmra.mxu2 %vm1085_vm1, %v5561_v25 }
 0x14c   :  { %5564 = vtanh.f32 %v1512_v26  ;;  %5253 = vmatmul.msk.f32.gmra.mxu1 %vm1085_vm1, %v5563_v29  ;;  %v79_v29 = vld [vmem:[%s10248_s0 + $0x190] sm:$0xff] }
 0x14d   :  { %5566 = vtanh.f32 %v641_v30  ;;  %5142 = vmatmul.msk.f32.gmra.mxu0 %vm163_vm0, %v70_v28 }
 0x151   :  { %v1514_v32 = vpop.f32.mrf.mxu1 }
 0x152   :  { %v5565_v33 = vpop.eup %5564  ;;  %v1515_v34 = vadd.f32 %v6791_v31, %v1514_v32  ;;  %v643_v35 = vpop.f32.mrf.mxu0 }
 0x153   :  { %v5567_v37 = vpop.eup %5566  ;;  %v644_v38 = vadd.f32 %v6673_v22, %v643_v35  ;;  %5365 = vmatmul.msk.f32.gmra.mxu2 %vm1085_vm1, %v5565_v33  ;;  %v6937_v33 = vld [vmem:[%s10253_s6] ss:$0 sm:$0xff] }
 0x154   :  { %5568 = vtanh.f32 %v1515_v34  ;;  %5254 = vmatmul.msk.f32.gmra.mxu1 %vm1085_vm1, %v5567_v37  ;;  %v2792_v34 = vld [vmem:[%s10254_s7] sm:$0xff] }
 0x155   :  { %5570 = vtanh.f32 %v644_v38  ;;  %5143 = vmatmul.msk.f32.gmra.mxu0 %vm163_vm0, %v71_v36  ;;  %vm2920_vm2 = vcmp.eq.f32.partialorder %v2792_v34, 0.0 }
 0x159   :  { %v1517_v39 = vpop.f32.mrf.mxu1 }
 0x15a   :  { %v5569_v40 = vpop.eup %5568  ;;  %v1518_v41 = vadd.f32 %v6791_v31, %v1517_v39  ;;  %v646_v42 = vpop.f32.mrf.mxu0 }
 0x15b   :  { %v5571_v44 = vpop.eup %5570  ;;  %v647_v45 = vadd.f32 %v6673_v22, %v646_v42  ;;  %5366 = vmatmul.msk.f32.gmra.mxu2 %vm1085_vm1, %v5569_v40 }
 0x15c   :  { %5572 = vtanh.f32 %v1518_v41  ;;  %5255 = vmatmul.msk.f32.gmra.mxu1 %vm1085_vm1, %v5571_v44 }
 0x15d   :  { %5574 = vtanh.f32 %v647_v45  ;;  %5144 = vmatmul.msk.f32.gmra.mxu0 %vm163_vm0, %v72_v43  ;;  %v80_v43 = vld [vmem:[%s10248_s0 + $0x198] sm:$0xff] }
 0x161   :  { %v1520_v46 = vpop.f32.mrf.mxu1 }
 0x162   :  { %v5573_v47 = vpop.eup %5572  ;;  %v1521_v48 = vadd.f32 %v6791_v31, %v1520_v46  ;;  %v649_v49 = vpop.f32.mrf.mxu0  ;;  %v2793_v46 = vld [vmem:[%s10254_s7 + $0x8] sm:$0xff] }
 0x163   :  { %v5575_v51 = vpop.eup %5574  ;;  %v650_v52 = vadd.f32 %v6673_v22, %v649_v49  ;;  %5367 = vmatmul.msk.f32.gmra.mxu2 %vm1085_vm1, %v5573_v47  ;;  %vm2921_vm4 = vcmp.eq.f32.partialorder %v2793_v46, 0.0  ;;  %v2798_v46 = vld [vmem:[%s10254_s7 + $0x30] sm:$0xff] }
 0x164   :  { %5576 = vtanh.f32 %v1521_v48  ;;  %5256 = vmatmul.msk.f32.gmra.mxu1 %vm1085_vm1, %v5575_v51  ;;  %vm2926_vm9 = vcmp.eq.f32.partialorder %v2798_v46, 0.0 }
 0x165   :  { %5578 = vtanh.f32 %v650_v52  ;;  %5145 = vmatmul.msk.f32.gmra.mxu0 %vm163_vm0, %v73_v50 }
 0x169   :  { %v1523_v53 = vpop.f32.mrf.mxu1 }
 0x16a   :  { %v5577_v54 = vpop.eup %5576  ;;  %v1524_v55 = vadd.f32 %v6791_v31, %v1523_v53  ;;  %v652_v56 = vpop.f32.mrf.mxu0 }
 0x16b   :  { %v5579_v58 = vpop.eup %5578  ;;  %v653_v59 = vadd.f32 %v6673_v22, %v652_v56  ;;  %5368 = vmatmul.msk.f32.gmra.mxu2 %vm1085_vm1, %v5577_v54 }
 0x16c   :  { %5580 = vtanh.f32 %v1524_v55  ;;  %5257 = vmatmul.msk.f32.gmra.mxu1 %vm1085_vm1, %v5579_v58  ;;  %v81_v55 = vld [vmem:[%s10248_s0 + $0x1a0] sm:$0xff]  ;;  %v2794_v58 = vld [vmem:[%s10254_s7 + $0x10] sm:$0xff] }
 0x16d   :  { %5582 = vtanh.f32 %v653_v59  ;;  %5146 = vmatmul.msk.f32.gmra.mxu0 %vm163_vm0, %v74_v57  ;;  %vm2922_vm5 = vcmp.eq.f32.partialorder %v2794_v58, 0.0 }
 0x171   :  { %v1526_v60 = vpop.f32.mrf.mxu1 }
 0x172   :  { %v5581_v61 = vpop.eup %5580  ;;  %v1527_v62 = vadd.f32 %v6791_v31, %v1526_v60  ;;  %v655_v63 = vpop.f32.mrf.mxu0 }
 0x173   :  { %v5583_v1 = vpop.eup %5582  ;;  %v656_v2 = vadd.f32 %v6673_v22, %v655_v63  ;;  %5369 = vmatmul.msk.f32.gmra.mxu2 %vm1085_vm1, %v5581_v61 }
 0x174   :  { %5584 = vtanh.f32 %v1527_v62  ;;  %5258 = vmatmul.msk.f32.gmra.mxu1 %vm1085_vm1, %v5583_v1 }
 0x175   :  { %5586 = vtanh.f32 %v656_v2  ;;  %5147 = vmatmul.msk.f32.gmra.mxu0 %vm163_vm0, %v75_v0 }
 0x179   :  { %v1529_v3 = vpop.f32.mrf.mxu1 }
 0x17a   :  { %v5585_v4 = vpop.eup %5584  ;;  %v1530_v5 = vadd.f32 %v6791_v31, %v1529_v3  ;;  %v658_v6 = vpop.f32.mrf.mxu0  ;;  %v82_v3 = vld [vmem:[%s10248_s0 + $0x1a8] sm:$0xff] }
 0x17b   :  { %v5587_v8 = vpop.eup %5586  ;;  %v659_v9 = vadd.f32 %v6673_v22, %v658_v6  ;;  %5370 = vmatmul.msk.f32.gmra.mxu2 %vm1085_vm1, %v5585_v4  ;;  %v2795_v6 = vld [vmem:[%s10254_s7 + $0x18] sm:$0xff] }
 0x17c   :  { %5588 = vtanh.f32 %v1530_v5  ;;  %5259 = vmatmul.msk.f32.gmra.mxu1 %vm1085_vm1, %v5587_v8  ;;  %vm2923_vm6 = vcmp.eq.f32.partialorder %v2795_v6, 0.0 }
 0x17d   :  { %5590 = vtanh.f32 %v659_v9  ;;  %5148 = vmatmul.msk.f32.gmra.mxu0 %vm163_vm0, %v76_v7 }
 0x181   :  { %v1532_v10 = vpop.f32.mrf.mxu1 }
 0x182   :  { %v5589_v11 = vpop.eup %5588  ;;  %v1533_v12 = vadd.f32 %v6791_v31, %v1532_v10  ;;  %v661_v13 = vpop.f32.mrf.mxu0 }
 0x183   :  { %v5591_v15 = vpop.eup %5590  ;;  %v662_v16 = vadd.f32 %v6673_v22, %v661_v13  ;;  %5371 = vmatmul.msk.f32.gmra.mxu2 %vm1085_vm1, %v5589_v11 }
 0x184   :  { %5592 = vtanh.f32 %v1533_v12  ;;  %5260 = vmatmul.msk.f32.gmra.mxu1 %vm1085_vm1, %v5591_v15  ;;  %v83_v15 = vld [vmem:[%s10248_s0 + $0x1b0] sm:$0xff] }
 0x185   :  { %5594 = vtanh.f32 %v662_v16  ;;  %5149 = vmatmul.msk.f32.gmra.mxu0 %vm163_vm0, %v77_v14 }
 0x189   :  { %v1535_v17 = vpop.f32.mrf.mxu1 }
 0x18a   :  { %v5593_v18 = vpop.eup %5592  ;;  %v1536_v19 = vadd.f32 %v6791_v31, %v1535_v17  ;;  %v664_v20 = vpop.f32.mrf.mxu0 }
 0x18b   :  { %v5595_v23 = vpop.eup %5594  ;;  %v665_v24 = vadd.f32 %v6673_v22, %v664_v20  ;;  %5372 = vmatmul.msk.f32.gmra.mxu2 %vm1085_vm1, %v5593_v18  ;;  %v2796_v18 = vld [vmem:[%s10254_s7 + $0x20] sm:$0xff] }
 0x18c   :  { %5596 = vtanh.f32 %v1536_v19  ;;  %5261 = vmatmul.msk.f32.gmra.mxu1 %vm1085_vm1, %v5595_v23  ;;  %vm2924_vm7 = vcmp.eq.f32.partialorder %v2796_v18, 0.0 }
 0x18d   :  { %5598 = vtanh.f32 %v665_v24  ;;  %5150 = vmatmul.msk.f32.gmra.mxu0 %vm163_vm0, %v78_v21 }
 0x191   :  { %v1538_v25 = vpop.f32.mrf.mxu1 }
 0x192   :  { %v5597_v26 = vpop.eup %5596  ;;  %v1539_v27 = vadd.f32 %v6791_v31, %v1538_v25  ;;  %v667_v28 = vpop.f32.mrf.mxu0 }
 0x193   :  { %v5599_v30 = vpop.eup %5598  ;;  %v668_v32 = vadd.f32 %v6673_v22, %v667_v28  ;;  %5373 = vmatmul.msk.f32.gmra.mxu2 %vm1085_vm1, %v5597_v26  ;;  %v84_v28 = vld [vmem:[%s10248_s0 + $0x1b8] sm:$0xff] }
 0x194   :  { %5600 = vtanh.f32 %v1539_v27  ;;  %5262 = vmatmul.msk.f32.gmra.mxu1 %vm1085_vm1, %v5599_v30 }
 0x195   :  { %5602 = vtanh.f32 %v668_v32  ;;  %5151 = vmatmul.msk.f32.gmra.mxu0 %vm163_vm0, %v79_v29  ;;  %v2797_v32 = vld [vmem:[%s10254_s7 + $0x28] sm:$0xff] }
 0x196   :  { %v2408_v35 = vpop.f32.mrf.mxu2  ;;  %vm2925_vm8 = vcmp.eq.f32.partialorder %v2797_v32, 0.0 }
 0x197   :  { %v2409_v36 = vadd.f32 %v6937_v33, %v2408_v35 }
 0x199   :  { %v1541_v37 = vpop.f32.mrf.mxu1  ;;  %v6945_v38 = vsel %vm2920_vm2, -1e+10, %v2409_v36 }
 0x19a   :  { %v5601_v39 = vpop.eup %5600  ;;  %v1542_v40 = vadd.f32 %v6791_v31, %v1541_v37  ;;  %v670_v41 = vpop.f32.mrf.mxu0  ;;  %v3177_v42 = vsel %vm3176_vm3, %v6945_v38, -inf }
 0x19b   :  { %v5603_v44 = vpop.eup %5602  ;;  %v671_v45 = vadd.f32 %v6673_v22, %v670_v41  ;;  %5374 = vmatmul.msk.f32.gmra.mxu2 %vm1085_vm1, %v5601_v39  ;;  %3178 = vmax.xlane.f32.xlu0 %v3177_v42 }
 0x19c   :  { %5604 = vtanh.f32 %v1542_v40  ;;  %5263 = vmatmul.msk.f32.gmra.mxu1 %vm1085_vm1, %v5603_v44 }
 0x19d   :  { %5606 = vtanh.f32 %v671_v45  ;;  %5152 = vmatmul.msk.f32.gmra.mxu0 %vm163_vm0, %v80_v43  ;;  %v85_v43 = vld [vmem:[%s10248_s0 + $0x1c0] sm:$0xff] }
 0x19e   :  { %v2411_v47 = vpop.f32.mrf.mxu2 }
 0x19f   :  { %v2412_v48 = vadd.f32 %v6937_v33, %v2411_v47 }
 0x1a1   :  { %v1544_v49 = vpop.f32.mrf.mxu1  ;;  %v6961_v50 = vsel %vm2921_vm4, -1e+10, %v2412_v48 }
 0x1a2   :  { %v5605_v51 = vpop.eup %5604  ;;  %v1545_v52 = vadd.f32 %v6791_v31, %v1544_v49  ;;  %v673_v53 = vpop.f32.mrf.mxu0  ;;  %v3180_v54 = vsel %vm3176_vm3, %v6961_v50, -inf }
 0x1a3   :  { %v5607_v56 = vpop.eup %5606  ;;  %v674_v57 = vadd.f32 %v6673_v22, %v673_v53  ;;  %5375 = vmatmul.msk.f32.gmra.mxu2 %vm1085_vm1, %v5605_v51  ;;  %3181 = vmax.xlane.f32.xlu0 %v3180_v54 }
 0x1a4   :  { %5608 = vtanh.f32 %v1545_v52  ;;  %5264 = vmatmul.msk.f32.gmra.mxu1 %vm1085_vm1, %v5607_v56  ;;  %v86_v56 = vld [vmem:[%s10248_s0 + $0x1c8] sm:$0xff] }
 0x1a5   :  { %5610 = vtanh.f32 %v674_v57  ;;  %5153 = vmatmul.msk.f32.gmra.mxu0 %vm163_vm0, %v81_v55 }
 0x1a6   :  { %v2414_v59 = vpop.f32.mrf.mxu2 }
 0x1a7   :  { %v2415_v60 = vadd.f32 %v6937_v33, %v2414_v59  ;;  %v2799_v59 = vld [vmem:[%s10254_s7 + $0x38] sm:$0xff] }
 0x1a8   :  { %vm2927_vm10 = vcmp.eq.f32.partialorder %v2799_v59, 0.0 }
 0x1a9   :  { %v1547_v61 = vpop.f32.mrf.mxu1  ;;  %v6977_v62 = vsel %vm2922_vm5, -1e+10, %v2415_v60 }
 0x1aa   :  { %v5609_v63 = vpop.eup %5608  ;;  %v1548_v0 = vadd.f32 %v6791_v31, %v1547_v61  ;;  %v676_v1 = vpop.f32.mrf.mxu0  ;;  %v3183_v2 = vsel %vm3176_vm3, %v6977_v62, -inf }
 0x1ab   :  { %v5611_v4 = vpop.eup %5610  ;;  %v677_v5 = vadd.f32 %v6673_v22, %v676_v1  ;;  %5376 = vmatmul.msk.f32.gmra.mxu2 %vm1085_vm1, %v5609_v63  ;;  %3184 = vmax.xlane.f32.xlu1 %v3183_v2 }
 0x1ac   :  { %5612 = vtanh.f32 %v1548_v0  ;;  %5265 = vmatmul.msk.f32.gmra.mxu1 %vm1085_vm1, %v5611_v4 }
 0x1ad   :  { %5614 = vtanh.f32 %v677_v5  ;;  %5154 = vmatmul.msk.f32.gmra.mxu0 %vm163_vm0, %v82_v3  ;;  %v87_v5 = vld [vmem:[%s10248_s0 + $0x1d0] sm:$0xff] }
 0x1ae   :  { %v2417_v7 = vpop.f32.mrf.mxu2 }
 0x1af   :  { %v2418_v8 = vadd.f32 %v6937_v33, %v2417_v7 }
 0x1b1   :  { %v1550_v9 = vpop.f32.mrf.mxu1  ;;  %v6993_v10 = vsel %vm2923_vm6, -1e+10, %v2418_v8  ;;  %v2800_v8 = vld [vmem:[%s10254_s7 + $0x40] sm:$0xff] }
 0x1b2   :  { %v5613_v11 = vpop.eup %5612  ;;  %v1551_v12 = vadd.f32 %v6791_v31, %v1550_v9  ;;  %v679_v13 = vpop.f32.mrf.mxu0  ;;  %v3186_v14 = vsel %vm3176_vm3, %v6993_v10, -inf  ;;  %vm2928_vm11 = vcmp.eq.f32.partialorder %v2800_v8, 0.0 }
 0x1b3   :  { %v5615_v16 = vpop.eup %5614  ;;  %v680_v17 = vadd.f32 %v6673_v22, %v679_v13  ;;  %5377 = vmatmul.msk.f32.gmra.mxu2 %vm1085_vm1, %v5613_v11  ;;  %3187 = vmax.xlane.f32.xlu1 %v3186_v14 }
 0x1b4   :  { %5616 = vtanh.f32 %v1551_v12  ;;  %5266 = vmatmul.msk.f32.gmra.mxu1 %vm1085_vm1, %v5615_v16 }
 0x1b5   :  { %5618 = vtanh.f32 %v680_v17  ;;  %5155 = vmatmul.msk.f32.gmra.mxu0 %vm163_vm0, %v83_v15  ;;  %v88_v17 = vld [vmem:[%s10248_s0 + $0x1d8] sm:$0xff] }
 0x1b6   :  { %v2420_v19 = vpop.f32.mrf.mxu2 }
 0x1b7   :  { %v2421_v20 = vadd.f32 %v6937_v33, %v2420_v19  ;;  %v7084_v19 = vld [vmem:[%s10249_s2] ss:$0 sm:$0xff] }
 0x1b9   :  { %v1553_v21 = vpop.f32.mrf.mxu1  ;;  %v7009_v23 = vsel %vm2924_vm7, -1e+10, %v2421_v20 }
 0x1ba   :  { %v5617_v24 = vpop.eup %5616  ;;  %v1554_v25 = vadd.f32 %v6791_v31, %v1553_v21  ;;  %v682_v26 = vpop.f32.mrf.mxu0  ;;  %v3189_v27 = vsel %vm3176_vm3, %v7009_v23, -inf  ;;  %v2801_v21 = vld [vmem:[%s10254_s7 + $0x48] sm:$0xff] }
 0x1bb   :  { %v5619_v29 = vpop.eup %5618  ;;  %v683_v30 = vadd.f32 %v6673_v22, %v682_v26  ;;  %5378 = vmatmul.msk.f32.gmra.mxu2 %vm1085_vm1, %v5617_v24  ;;  %3190 = vmax.xlane.f32.xlu2 %v3189_v27  ;;  %vm2929_vm12 = vcmp.eq.f32.partialorder %v2801_v21, 0.0 }
 0x1bc   :  { %5620 = vtanh.f32 %v1554_v25  ;;  %5267 = vmatmul.msk.f32.gmra.mxu1 %vm1085_vm1, %v5619_v29 }
 0x1bd   :  { %5622 = vtanh.f32 %v683_v30  ;;  %5156 = vmatmul.msk.f32.gmra.mxu0 %vm163_vm0, %v84_v28 }
 0x1be   :  { %v2423_v34 = vpop.f32.mrf.mxu2 }
 0x1bf   :  { %v2424_v35 = vadd.f32 %v6937_v33, %v2423_v34  ;;  %v89_v34 = vld [vmem:[%s10248_s0 + $0x1e0] sm:$0xff] }
 0x1c1   :  { %v1556_v36 = vpop.f32.mrf.mxu1  ;;  %v7025_v37 = vsel %vm2925_vm8, -1e+10, %v2424_v35 }
 0x1c2   :  { %v5621_v39 = vpop.eup %5620  ;;  %v1557_v40 = vadd.f32 %v6791_v31, %v1556_v36  ;;  %v685_v41 = vpop.f32.mrf.mxu0  ;;  %v3192_v42 = vsel %vm3176_vm3, %v7025_v37, -inf }
 0x1c3   :  { %v5623_v44 = vpop.eup %5622  ;;  %v686_v45 = vadd.f32 %v6673_v22, %v685_v41  ;;  %5379 = vmatmul.msk.f32.gmra.mxu2 %vm1085_vm1, %v5621_v39  ;;  %3193 = vmax.xlane.f32.xlu2 %v3192_v42  ;;  %v2802_v39 = vld [vmem:[%s10254_s7 + $0x50] sm:$0xff] }
 0x1c4   :  { %5624 = vtanh.f32 %v1557_v40  ;;  %5268 = vmatmul.msk.f32.gmra.mxu1 %vm1085_vm1, %v5623_v44  ;;  %vm2930_vm13 = vcmp.eq.f32.partialorder %v2802_v39, 0.0 }
 0x1c5   :  { %5626 = vtanh.f32 %v686_v45  ;;  %5157 = vmatmul.msk.f32.gmra.mxu0 %vm163_vm0, %v85_v43 }
 0x1c6   :  { %v2426_v47 = vpop.f32.mrf.mxu2 }
 0x1c7   :  { %v2427_v48 = vadd.f32 %v6937_v33, %v2426_v47 }
 0x1c9   :  { %v1559_v49 = vpop.f32.mrf.mxu1  ;;  %v7041_v51 = vsel %vm2926_vm9, -1e+10, %v2427_v48  ;;  %v90_v48 = vld [vmem:[%s10248_s0 + $0x1e8] sm:$0xff] }
 0x1ca   :  { %v5625_v52 = vpop.eup %5624  ;;  %v1560_v53 = vadd.f32 %v6791_v31, %v1559_v49  ;;  %v688_v54 = vpop.f32.mrf.mxu0  ;;  %v3195_v55 = vsel %vm3176_vm3, %v7041_v51, -inf }
 0x1cb   :  { %v5627_v57 = vpop.eup %5626  ;;  %v689_v58 = vadd.f32 %v6673_v22, %v688_v54  ;;  %5380 = vmatmul.msk.f32.gmra.mxu2 %vm1085_vm1, %v5625_v52  ;;  %3196 = vmax.xlane.f32.xlu0 %v3195_v55 }
 0x1cc   :  { %5628 = vtanh.f32 %v1560_v53  ;;  %5269 = vmatmul.msk.f32.gmra.mxu1 %vm1085_vm1, %v5627_v57  ;;  %v2803_v53 = vld [vmem:[%s10254_s7 + $0x58] sm:$0xff] }
 0x1cd   :  { %5630 = vtanh.f32 %v689_v58  ;;  %5158 = vmatmul.msk.f32.gmra.mxu0 %vm163_vm0, %v86_v56  ;;  %vm2931_vm14 = vcmp.eq.f32.partialorder %v2803_v53, 0.0 }
 0x1ce   :  { %v2429_v60 = vpop.f32.mrf.mxu2 }
 0x1cf   :  { %v2430_v61 = vadd.f32 %v6937_v33, %v2429_v60 }
 0x1d1   :  { %v1562_v63 = vpop.f32.mrf.mxu1  ;;  %v7057_v0 = vsel %vm2927_vm10, -1e+10, %v2430_v61 }
 0x1d2   :  { %v5629_v1 = vpop.eup %5628  ;;  %v1563_v2 = vadd.f32 %v6791_v31, %v1562_v63  ;;  %v691_v3 = vpop.f32.mrf.mxu0  ;;  %v3198_v4 = vsel %vm3176_vm3, %v7057_v0, -inf  ;;  %v91_v63 = vld [vmem:[%s10248_s0 + $0x1f0] sm:$0xff] }
 0x1d3   :  { %v5631_v6 = vpop.eup %5630  ;;  %v692_v7 = vadd.f32 %v6673_v22, %v691_v3  ;;  %5381 = vmatmul.msk.f32.gmra.mxu2 %vm1085_vm1, %v5629_v1  ;;  %3199 = vmax.xlane.f32.xlu1 %v3198_v4  ;;  %v2804_v3 = vld [vmem:[%s10254_s7 + $0x60] sm:$0xff] }
 0x1d4   :  { %5632 = vtanh.f32 %v1563_v2  ;;  %5270 = vmatmul.msk.f32.gmra.mxu1 %vm1085_vm1, %v5631_v6  ;;  %vm2932_vm15 = vcmp.eq.f32.partialorder %v2804_v3, 0.0 }
 0x1d5   :  { %5634 = vtanh.f32 %v692_v7  ;;  %5159 = vmatmul.msk.f32.gmra.mxu0 %vm163_vm0, %v87_v5 }
 0x1d6   :  { %v2432_v9 = vpop.f32.mrf.mxu2 }
 0x1d7   :  { %v2433_v11 = vadd.f32 %v6937_v33, %v2432_v9 }
 0x1d9   :  { %v1565_v12 = vpop.f32.mrf.mxu1  ;;  %v7073_v13 = vsel %vm2928_vm11, -1e+10, %v2433_v11 }
 0x1da   :  { %v5633_v22 = vpop.eup %5632  ;;  %v1566_v14 = vadd.f32 %v6791_v31, %v1565_v12  ;;  %v694_v15 = vpop.f32.mrf.mxu0  ;;  %v3201_v16 = vsel %vm3176_vm3, %v7073_v13, -inf }
 0x1db   :  { %v5635_v18 = vpop.eup %5634  ;;  %v695_v20 = vadd.f32 %v7084_v19, %v694_v15  ;;  %5382 = vmatmul.msk.f32.gmra.mxu2 %vm1085_vm1, %v5633_v22  ;;  %3202 = vmax.xlane.f32.xlu2 %v3201_v16  ;;  %v92_v22 = vld [vmem:[%s10248_s0 + $0x1f8] sm:$0xff]  ;;  %v2805_v16 = vld [vmem:[%s10254_s7 + $0x68] sm:$0xff] }
 0x1dc   :  { %5636 = vtanh.f32 %v1566_v14  ;;  %5271 = vmatmul.msk.f32.gmra.mxu1 %vm1085_vm1, %v5635_v18  ;;  %vm2933_vm2 = vcmp.eq.f32.partialorder %v2805_v16, 0.0 }
 0x1dd   :  { %5638 = vtanh.f32 %v695_v20  ;;  %5160 = vmatmul.msk.f32.gmra.mxu0 %vm163_vm0, %v88_v17 }
 0x1de   :  { %v2435_v24 = vpop.f32.mrf.mxu2 }
 0x1df   :  { %v2436_v25 = vadd.f32 %v6937_v33, %v2435_v24 }
 0x1e1   :  { %v1568_v26 = vpop.f32.mrf.mxu1  ;;  %v7094_v27 = vsel %vm2929_vm12, -1e+10, %v2436_v25 }
 0x1e2   :  { %v5637_v28 = vpop.eup %5636  ;;  %v1569_v29 = vadd.f32 %v6791_v31, %v1568_v26  ;;  %v697_v30 = vpop.f32.mrf.mxu0  ;;  %v3204_v32 = vsel %vm3176_vm3, %v7094_v27, -inf }
 0x1e3   :  { %v5639_v35 = vpop.eup %5638  ;;  %v698_v36 = vadd.f32 %v7084_v19, %v697_v30  ;;  %5383 = vmatmul.msk.f32.gmra.mxu2 %vm1085_vm1, %v5637_v28  ;;  %3205 = vmax.xlane.f32.xlu0 %v3204_v32 }
 0x1e4   :  { %5640 = vtanh.f32 %v1569_v29  ;;  %5272 = vmatmul.msk.f32.gmra.mxu1 %vm1085_vm1, %v5639_v35  ;;  %v93_v29 = vld [vmem:[%s10248_s0 + $0x200] sm:$0xff] }
 0x1e5   :  { %5642 = vtanh.f32 %v698_v36  ;;  %5161 = vmatmul.msk.f32.gmra.mxu0 %vm163_vm0, %v89_v34  ;;  %v2806_v34 = vld [vmem:[%s10254_s7 + $0x70] sm:$0xff] }
 0x1e6   :  { %v2438_v40 = vpop.f32.mrf.mxu2  ;;  %vm2934_vm4 = vcmp.eq.f32.partialorder %v2806_v34, 0.0 }
 0x1e7   :  { %v2439_v41 = vadd.f32 %v6937_v33, %v2438_v40 }
 0x1e9   :  { %v1571_v42 = vpop.f32.mrf.mxu1  ;;  %v7110_v43 = vsel %vm2930_vm13, -1e+10, %v2439_v41 }
 0x1ea   :  { %v5641_v44 = vpop.eup %5640  ;;  %v1572_v45 = vadd.f32 %v6791_v31, %v1571_v42  ;;  %v700_v46 = vpop.f32.mrf.mxu0  ;;  %v3207_v47 = vsel %vm3176_vm3, %v7110_v43, -inf }
 0x1eb   :  { %v5643_v49 = vpop.eup %5642  ;;  %v701_v52 = vadd.f32 %v7084_v19, %v700_v46  ;;  %5384 = vmatmul.msk.f32.gmra.mxu2 %vm1085_vm1, %v5641_v44  ;;  %3208 = vmax.xlane.f32.xlu1 %v3207_v47  ;;  %v94_v46 = vld [vmem:[%s10248_s0 + $0x208] sm:$0xff] }
 0x1ec   :  { %5644 = vtanh.f32 %v1572_v45  ;;  %5273 = vmatmul.msk.f32.gmra.mxu1 %vm1085_vm1, %v5643_v49  ;;  %v2807_v49 = vld [vmem:[%s10254_s7 + $0x78] sm:$0xff] }
 0x1ed   :  { %5646 = vtanh.f32 %v701_v52  ;;  %5162 = vmatmul.msk.f32.gmra.mxu0 %vm163_vm0, %v90_v48  ;;  %vm2935_vm5 = vcmp.eq.f32.partialorder %v2807_v49, 0.0  ;;  %v2810_v49 = vld [vmem:[%s10254_s7 + $0x90] sm:$0xff] }
 0x1ee   :  { %v2441_v54 = vpop.f32.mrf.mxu2  ;;  %vm2938_vm8 = vcmp.eq.f32.partialorder %v2810_v49, 0.0 }
 0x1ef   :  { %v2442_v55 = vadd.f32 %v6937_v33, %v2441_v54 }
 0x1f1   :  { %v1574_v56 = vpop.f32.mrf.mxu1  ;;  %v7126_v57 = vsel %vm2931_vm14, -1e+10, %v2442_v55 }
 0x1f2   :  { %v5645_v58 = vpop.eup %5644  ;;  %v1575_v59 = vadd.f32 %v6791_v31, %v1574_v56  ;;  %v703_v60 = vpop.f32.mrf.mxu0  ;;  %v3210_v61 = vsel %vm3176_vm3, %v7126_v57, -inf }
 0x1f3   :  { %v5647_v1 = vpop.eup %5646  ;;  %v704_v2 = vadd.f32 %v7084_v19, %v703_v60  ;;  %5385 = vmatmul.msk.f32.gmra.mxu2 %vm1085_vm1, %v5645_v58  ;;  %3211 = vmax.xlane.f32.xlu2 %v3210_v61  ;;  %v7196_v60 = vld [vmem:[%s10251_s4] ss:$0 sm:$0xff] }
 0x1f4   :  { %5648 = vtanh.f32 %v1575_v59  ;;  %5274 = vmatmul.msk.f32.gmra.mxu1 %vm1085_vm1, %v5647_v1 }
 0x1f5   :  { %5650 = vtanh.f32 %v704_v2  ;;  %5163 = vmatmul.msk.f32.gmra.mxu0 %vm163_vm0, %v91_v63 }
 0x1f6   :  { %v2444_v4 = vpop.f32.mrf.mxu2 }
 0x1f7   :  { %v2445_v5 = vadd.f32 %v6937_v33, %v2444_v4  ;;  %v2808_v4 = vld [vmem:[%s10254_s7 + $0x80] sm:$0xff] }
 0x1f8   :  { %vm2936_vm6 = vcmp.eq.f32.partialorder %v2808_v4, 0.0 }
 0x1f9   :  { %v1577_v6 = vpop.f32.mrf.mxu1  ;;  %v7142_v7 = vsel %vm2932_vm15, -1e+10, %v2445_v5 }
 0x1fa   :  { %v5649_v8 = vpop.eup %5648  ;;  %v1578_v9 = vadd.f32 %v6791_v31, %v1577_v6  ;;  %v706_v11 = vpop.f32.mrf.mxu0  ;;  %v3213_v12 = vsel %vm3176_vm3, %v7142_v7, -inf }
 0x1fb   :  { %v5651_v14 = vpop.eup %5650  ;;  %v707_v15 = vadd.f32 %v7084_v19, %v706_v11  ;;  %5386 = vmatmul.msk.f32.gmra.mxu2 %vm1085_vm1, %v5649_v8  ;;  %3214 = vmax.xlane.f32.xlu0 %v3213_v12 }
 0x1fc   :  { %5652 = vtanh.f32 %v1578_v9  ;;  %5275 = vmatmul.msk.f32.gmra.mxu1 %vm1085_vm1, %v5651_v14 }
 0x1fd   :  { %5654 = vtanh.f32 %v707_v15  ;;  %5164 = vmatmul.msk.f32.gmra.mxu0 %vm163_vm0, %v92_v22 }
 0x1fe   :  { %v2447_v17 = vpop.f32.mrf.mxu2 }
 0x1ff   :  { %v2448_v18 = vadd.f32 %v6937_v33, %v2447_v17 }
 0x201   :  { %v1580_v20 = vpop.f32.mrf.mxu1  ;;  %v7158_v21 = vsel %vm2933_vm2, -1e+10, %v2448_v18 }
 0x202   :  { %v5653_v24 = vpop.eup %5652  ;;  %v1581_v25 = vadd.f32 %v6791_v31, %v1580_v20  ;;  %v709_v26 = vpop.f32.mrf.mxu0  ;;  %v3216_v28 = vsel %vm3176_vm3, %v7158_v21, -inf }
 0x203   :  { %v5655_v30 = vpop.eup %5654  ;;  %v710_v32 = vadd.f32 %v7084_v19, %v709_v26  ;;  %5387 = vmatmul.msk.f32.gmra.mxu2 %vm1085_vm1, %v5653_v24  ;;  %3217 = vmax.xlane.f32.xlu1 %v3216_v28  ;;  %v2809_v26 = vld [vmem:[%s10254_s7 + $0x88] sm:$0xff] }
 0x204   :  { %5656 = vtanh.f32 %v1581_v25  ;;  %5276 = vmatmul.msk.f32.gmra.mxu1 %vm1085_vm1, %v5655_v30  ;;  %vm2937_vm7 = vcmp.eq.f32.partialorder %v2809_v26, 0.0 }
 0x205   :  { %5658 = vtanh.f32 %v710_v32  ;;  %5165 = vmatmul.msk.f32.gmra.mxu0 %vm163_vm0, %v93_v29 }
 0x206   :  { %v2450_v35 = vpop.f32.mrf.mxu2 }
 0x207   :  { %v2451_v36 = vadd.f32 %v6937_v33, %v2450_v35 }
 0x209   :  { %v1583_v39 = vpop.f32.mrf.mxu1  ;;  %v7174_v40 = vsel %vm2934_vm4, -1e+10, %v2451_v36 }
 0x20a   :  { %v5657_v41 = vpop.eup %5656  ;;  %v1584_v42 = vadd.f32 %v6791_v31, %v1583_v39  ;;  %v712_v44 = vpop.f32.mrf.mxu0  ;;  %v3219_v45 = vsel %vm3176_vm3, %v7174_v40, -inf }
 0x20b   :  { %v5659_v47 = vpop.eup %5658  ;;  %v713_v48 = vadd.f32 %v7084_v19, %v712_v44  ;;  %5388 = vmatmul.msk.f32.gmra.mxu2 %vm1085_vm1, %v5657_v41  ;;  %3220 = vmax.xlane.f32.xlu2 %v3219_v45 }
 0x20c   :  { %5660 = vtanh.f32 %v1584_v42  ;;  %5277 = vmatmul.msk.f32.gmra.mxu1 %vm1085_vm1, %v5659_v47 }
 0x20d   :  { %5662 = vtanh.f32 %v713_v48  ;;  %5166 = vmatmul.msk.f32.gmra.mxu0 %vm163_vm0, %v94_v46 }
 0x20e   :  { %v2453_v31 = vpop.f32.mrf.mxu2  ;;  %v3179_v52 = vpop.xlane.xlu0 %3178 }
 0x20f   :  { %v2454_v53 = vadd.f32 %v6937_v33, %v2453_v31  ;;  %v3561_v54 = vsub.f32 %v6945_v38, %v3179_v52  ;;  %v95_v38 = vld [vmem:[%s10248_s0 + $0x210] sm:$0xff] }
 0x211   :  { %v3689_v55 = vmul.f32 1.442695, %v3561_v54  ;;  %v1586_v56 = vpop.f32.mrf.mxu1  ;;  %v7191_v58 = vsel %vm2935_vm5, -1e+10, %v2454_v53 }
 0x212   :  { %v5661_v59 = vpop.eup %5660  ;;  %v1587_v61 = vadd.f32 %v7196_v60, %v1586_v56  ;;  %v715_v63 = vpop.f32.mrf.mxu0  ;;  %v3222_v1 = vsel %vm3176_vm3, %v7191_v58, -inf }
 0x213   :  { %v5663_v2 = vpop.eup %5662  ;;  %5664 = vpow2.f32 %v3689_v55  ;;  %v716_v3 = vadd.f32 %v7084_v19, %v715_v63  ;;  %5389 = vmatmul.msk.f32.gmra.mxu2 %vm1085_vm1, %v5661_v59  ;;  %3223 = vmax.xlane.f32.xlu0 %v3222_v1 }
 0x214   :  { %5666 = vtanh.f32 %v1587_v61  ;;  %5278 = vmatmul.msk.f32.gmra.mxu1 %vm1085_vm1, %v5663_v2 }
 0x215   :  { %5668 = vtanh.f32 %v716_v3  ;;  %5167 = vmatmul.msk.f32.gmra.mxu0 %vm163_vm0, %v95_v38 }
 0x216   :  { %v2456_v5 = vpop.f32.mrf.mxu2  ;;  %v3182_v6 = vpop.xlane.xlu0 %3181 }
 0x217   :  { %v2457_v8 = vadd.f32 %v6937_v33, %v2456_v5  ;;  %v3562_v9 = vsub.f32 %v6961_v50, %v3182_v6  ;;  %v96_v50 = vld [vmem:[%s10248_s0 + $0x218] sm:$0xff] }
 0x218   :  { %v2811_v6 = vld [vmem:[%s10254_s7 + $0x98] sm:$0xff] }
 0x219   :  { %v7213_v11 = vpop.eup %5664  ;;  %v3691_v12 = vmul.f32 1.442695, %v3562_v9  ;;  %v1589_v22 = vpop.f32.mrf.mxu1  ;;  %v7215_v14 = vsel %vm2936_vm6, -1e+10, %v2457_v8  ;;  %vm2939_vm9 = vcmp.eq.f32.partialorder %v2811_v6, 0.0 }
 0x21a   :  { %v5667_v15 = vpop.eup %5666  ;;  %v1590_v16 = vadd.f32 %v7196_v60, %v1589_v22  ;;  %v718_v17 = vpop.f32.mrf.mxu0  ;;  %v3225_v18 = vsel %vm3176_vm3, %v7215_v14, -inf  ;;  %v3945_v20 = vsel %vm3176_vm3, %v7213_v11, 0.0 }
 0x21b   :  { %v5669_v24 = vpop.eup %5668  ;;  %5670 = vpow2.f32 %v3691_v12  ;;  %v719_v25 = vadd.f32 %v7084_v19, %v718_v17  ;;  %5390 = vmatmul.msk.f32.gmra.mxu2 %vm1085_vm1, %v5667_v15  ;;  %3226 = vmax.xlane.f32.xlu1 %v3225_v18 }
 0x21c   :  { %5672 = vtanh.f32 %v1590_v16  ;;  %3946 = vadd.xlane.f32.xlu2 %v3945_v20  ;;  %5279 = vmatmul.msk.f32.gmra.mxu1 %vm1085_vm1, %v5669_v24 }
 0x21d   :  { %5674 = vtanh.f32 %v719_v25  ;;  %5168 = vmatmul.msk.f32.gmra.mxu0 %vm163_vm0, %v96_v50 }
 0x21e   :  { %v2459_v28 = vpop.f32.mrf.mxu2  ;;  %v3185_v29 = vpop.xlane.xlu1 %3184 }
 0x21f   :  { %v2460_v30 = vadd.f32 %v6937_v33, %v2459_v28  ;;  %v3563_v32 = vsub.f32 %v6977_v62, %v3185_v29  ;;  %v97_v62 = vld [vmem:[%s10248_s0 + $0x220] sm:$0xff] }
 0x221   :  { %v7234_v34 = vpop.eup %5670  ;;  %v3693_v35 = vmul.f32 1.442695, %v3563_v32  ;;  %v1592_v36 = vpop.f32.mrf.mxu1  ;;  %v7236_v39 = vsel %vm2937_vm7, -1e+10, %v2460_v30  ;;  %v2812_v30 = vld [vmem:[%s10254_s7 + $0xa0] sm:$0xff] }
 0x222   :  { %v5673_v41 = vpop.eup %5672  ;;  %v1593_v42 = vadd.f32 %v7196_v60, %v1592_v36  ;;  %v721_v44 = vpop.f32.mrf.mxu0  ;;  %v3228_v45 = vsel %vm3176_vm3, %v7236_v39, -inf  ;;  %v3948_v46 = vsel %vm3176_vm3, %v7234_v34, 0.0  ;;  %vm2940_vm10 = vcmp.eq.f32.partialorder %v2812_v30, 0.0 }
 0x223   :  { %v5675_v47 = vpop.eup %5674  ;;  %5676 = vpow2.f32 %v3693_v35  ;;  %v722_v48 = vadd.f32 %v7084_v19, %v721_v44  ;;  %5391 = vmatmul.msk.f32.gmra.mxu2 %vm1085_vm1, %v5673_v41  ;;  %3949 = vadd.xlane.f32.xlu0 %v3948_v46 }
 0x224   :  { %5678 = vtanh.f32 %v1593_v42  ;;  %3229 = vmax.xlane.f32.xlu2 %v3228_v45  ;;  %5280 = vmatmul.msk.f32.gmra.mxu1 %vm1085_vm1, %v5675_v47 }
 0x225   :  { %5680 = vtanh.f32 %v722_v48  ;;  %5169 = vmatmul.msk.f32.gmra.mxu0 %vm163_vm0, %v97_v62 }
 0x226   :  { %v2462_v31 = vpop.f32.mrf.mxu2  ;;  %v3188_v52 = vpop.xlane.xlu1 %3187 }
 0x227   :  { %v2463_v53 = vadd.f32 %v6937_v33, %v2462_v31  ;;  %v3564_v54 = vsub.f32 %v6993_v10, %v3188_v52  ;;  %v98_v10 = vld [vmem:[%s10248_s0 + $0x228] sm:$0xff] }
 0x229   :  { %v7255_v55 = vpop.eup %5676  ;;  %v3695_v56 = vmul.f32 1.442695, %v3564_v54  ;;  %v1595_v59 = vpop.f32.mrf.mxu1  ;;  %v7257_v61 = vsel %vm2938_vm8, -1e+10, %v2463_v53  ;;  %v2813_v54 = vld [vmem:[%s10254_s7 + $0xa8] sm:$0xff] }
 0x22a   :  { %v5679_v63 = vpop.eup %5678  ;;  %v1596_v1 = vadd.f32 %v7196_v60, %v1595_v59  ;;  %v724_v38 = vpop.f32.mrf.mxu0  ;;  %v3951_v2 = vsel %vm3176_vm3, %v7255_v55, 0.0  ;;  %v3231_v3 = vsel %vm3176_vm3, %v7257_v61, -inf  ;;  %vm2941_vm11 = vcmp.eq.f32.partialorder %v2813_v54, 0.0 }
 0x22b   :  { %v5681_v4 = vpop.eup %5680  ;;  %5682 = vpow2.f32 %v3695_v56  ;;  %v725_v5 = vadd.f32 %v7084_v19, %v724_v38  ;;  %5392 = vmatmul.msk.f32.gmra.mxu2 %vm1085_vm1, %v5679_v63  ;;  %3952 = vadd.xlane.f32.xlu1 %v3951_v2 }
 0x22c   :  { %5684 = vtanh.f32 %v1596_v1  ;;  %3232 = vmax.xlane.f32.xlu0 %v3231_v3  ;;  %5281 = vmatmul.msk.f32.gmra.mxu1 %vm1085_vm1, %v5681_v4 }
 0x22d   :  { %5686 = vtanh.f32 %v725_v5  ;;  %5170 = vmatmul.msk.f32.gmra.mxu0 %vm163_vm0, %v98_v10 }
 0x22e   :  { %v2465_v8 = vpop.f32.mrf.mxu2  ;;  %v3191_v9 = vpop.xlane.xlu2 %3190 }
 0x22f   :  { %v2466_v12 = vadd.f32 %v6937_v33, %v2465_v8  ;;  %v3565_v22 = vsub.f32 %v7009_v23, %v3191_v9  ;;  %v99_v23 = vld [vmem:[%s10248_s0 + $0x230] sm:$0xff] }
 0x231   :  { %v7276_v15 = vpop.eup %5682  ;;  %v3697_v16 = vmul.f32 1.442695, %v3565_v22  ;;  %v1598_v17 = vpop.f32.mrf.mxu1  ;;  %v7278_v18 = vsel %vm2939_vm9, -1e+10, %v2466_v12 }
 0x232   :  { %v5685_v20 = vpop.eup %5684  ;;  %v1599_v50 = vadd.f32 %v7196_v60, %v1598_v17  ;;  %v727_v24 = vpop.f32.mrf.mxu0  ;;  %v3234_v25 = vsel %vm3176_vm3, %v7278_v18, -inf  ;;  %v3954_v26 = vsel %vm3176_vm3, %v7276_v15, 0.0 }
 0x233   :  { %v5687_v28 = vpop.eup %5686  ;;  %5688 = vpow2.f32 %v3697_v16  ;;  %v728_v29 = vadd.f32 %v7084_v19, %v727_v24  ;;  %5393 = vmatmul.msk.f32.gmra.mxu2 %vm1085_vm1, %v5685_v20  ;;  %3235 = vmax.xlane.f32.xlu1 %v3234_v25  ;;  %v2814_v16 = vld [vmem:[%s10254_s7 + $0xb0] sm:$0xff] }
 0x234   :  { %5690 = vtanh.f32 %v1599_v50  ;;  %3955 = vadd.xlane.f32.xlu2 %v3954_v26  ;;  %5282 = vmatmul.msk.f32.gmra.mxu1 %vm1085_vm1, %v5687_v28  ;;  %vm2942_vm12 = vcmp.eq.f32.partialorder %v2814_v16, 0.0 }
 0x235   :  { %5692 = vtanh.f32 %v728_v29  ;;  %5171 = vmatmul.msk.f32.gmra.mxu0 %vm163_vm0, %v99_v23 }
 0x236   :  { %v2468_v32 = vpop.f32.mrf.mxu2  ;;  %v3194_v35 = vpop.xlane.xlu2 %3193 }
 0x237   :  { %v2469_v36 = vadd.f32 %v6937_v33, %v2468_v32  ;;  %v3566_v41 = vsub.f32 %v7025_v37, %v3194_v35  ;;  %v100_v37 = vld [vmem:[%s10248_s0 + $0x238] sm:$0xff] }
 0x239   :  { %v7297_v42 = vpop.eup %5688  ;;  %v3699_v44 = vmul.f32 1.442695, %v3566_v41  ;;  %v1601_v45 = vpop.f32.mrf.mxu1  ;;  %v7299_v46 = vsel %vm2940_vm10, -1e+10, %v2469_v36 }
 0x23a   :  { %v5691_v62 = vpop.eup %5690  ;;  %v1602_v47 = vadd.f32 %v7196_v60, %v1601_v45  ;;  %v730_v48 = vpop.f32.mrf.mxu0  ;;  %v3237_v49 = vsel %vm3176_vm3, %v7299_v46, -inf  ;;  %v3957_v31 = vsel %vm3176_vm3, %v7297_v42, 0.0  ;;  %v2815_v45 = vld [vmem:[%s10254_s7 + $0xb8] sm:$0xff] }
 0x23b   :  { %v5693_v52 = vpop.eup %5692  ;;  %5694 = vpow2.f32 %v3699_v44  ;;  %v731_v53 = vadd.f32 %v7084_v19, %v730_v48  ;;  %5394 = vmatmul.msk.f32.gmra.mxu2 %vm1085_vm1, %v5691_v62  ;;  %3958 = vadd.xlane.f32.xlu0 %v3957_v31  ;;  %vm2943_vm13 = vcmp.eq.f32.partialorder %v2815_v45, 0.0 }
 0x23c   :  { %5696 = vtanh.f32 %v1602_v47  ;;  %3238 = vmax.xlane.f32.xlu2 %v3237_v49  ;;  %5283 = vmatmul.msk.f32.gmra.mxu1 %vm1085_vm1, %v5693_v52 }
 0x23d   :  { %5698 = vtanh.f32 %v731_v53  ;;  %5172 = vmatmul.msk.f32.gmra.mxu0 %vm163_vm0, %v100_v37 }
 0x23e   :  { %v2471_v56 = vpop.f32.mrf.mxu2  ;;  %v3197_v59 = vpop.xlane.xlu0 %3196 }
 0x23f   :  { %v2472_v63 = vadd.f32 %v6937_v33, %v2471_v56  ;;  %v3567_v1 = vsub.f32 %v7041_v51, %v3197_v59  ;;  %v101_v51 = vld [vmem:[%s10248_s0 + $0x240] sm:$0xff] }
 0x241   :  { %v7318_v38 = vpop.eup %5694  ;;  %v3701_v2 = vmul.f32 1.442695, %v3567_v1  ;;  %v1604_v3 = vpop.f32.mrf.mxu1  ;;  %v7320_v10 = vsel %vm2941_vm11, -1e+10, %v2472_v63 }
 0x242   :  { %v5697_v4 = vpop.eup %5696  ;;  %v1605_v5 = vadd.f32 %v7196_v60, %v1604_v3  ;;  %v733_v6 = vpop.f32.mrf.mxu0  ;;  %v3960_v8 = vsel %vm3176_vm3, %v7318_v38, 0.0  ;;  %v3240_v9 = vsel %vm3176_vm3, %v7320_v10, -inf  ;;  %v2816_v3 = vld [vmem:[%s10254_s7 + $0xc0] sm:$0xff] }
 0x243   :  { %v5699_v12 = vpop.eup %5698  ;;  %5700 = vpow2.f32 %v3701_v2  ;;  %v734_v22 = vadd.f32 %v7084_v19, %v733_v6  ;;  %5395 = vmatmul.msk.f32.gmra.mxu2 %vm1085_vm1, %v5697_v4  ;;  %3961 = vadd.xlane.f32.xlu1 %v3960_v8  ;;  %vm2944_vm14 = vcmp.eq.f32.partialorder %v2816_v3, 0.0  ;;  %v7382_v6 = vld [vmem:[%s10253_s6] ss:$0 sm:$0xff] }
 0x244   :  { %5702 = vtanh.f32 %v1605_v5  ;;  %3241 = vmax.xlane.f32.xlu0 %v3240_v9  ;;  %5284 = vmatmul.msk.f32.gmra.mxu1 %vm1085_vm1, %v5699_v12 }
 0x245   :  { %5704 = vtanh.f32 %v734_v22  ;;  %5173 = vmatmul.msk.f32.gmra.mxu0 %vm163_vm0, %v101_v51 }
 0x246   :  { %v2474_v17 = vpop.f32.mrf.mxu2  ;;  %v3200_v20 = vpop.xlane.xlu1 %3199 }
 0x247   :  { %v2475_v50 = vadd.f32 %v6937_v33, %v2474_v17  ;;  %v3568_v24 = vsub.f32 %v7057_v0, %v3200_v20  ;;  %v102_v0 = vld [vmem:[%s10248_s0 + $0x248] sm:$0xff] }
 0x249   :  { %v7339_v25 = vpop.eup %5700  ;;  %v3703_v26 = vmul.f32 1.442695, %v3568_v24  ;;  %v1607_v23 = vpop.f32.mrf.mxu1  ;;  %v7341_v28 = vsel %vm2942_vm12, -1e+10, %v2475_v50 }
 0x24a   :  { %v5703_v29 = vpop.eup %5702  ;;  %v1608_v30 = vadd.f32 %v7196_v60, %v1607_v23  ;;  %v736_v32 = vpop.f32.mrf.mxu0  ;;  %v3243_v35 = vsel %vm3176_vm3, %v7341_v28, -inf  ;;  %v3963_v36 = vsel %vm3176_vm3, %v7339_v25, 0.0 }
 0x24b   :  { %v5705_v41 = vpop.eup %5704  ;;  %5706 = vpow2.f32 %v3703_v26  ;;  %v737_v44 = vadd.f32 %v7084_v19, %v736_v32  ;;  %5396 = vmatmul.msk.f32.gmra.mxu2 %vm1085_vm1, %v5703_v29  ;;  %3244 = vmax.xlane.f32.xlu1 %v3243_v35 }
 0x24c   :  { %5708 = vtanh.f32 %v1608_v30  ;;  %3964 = vadd.xlane.f32.xlu2 %v3963_v36  ;;  %5285 = vmatmul.msk.f32.gmra.mxu1 %vm1085_vm1, %v5705_v41  ;;  %v2817_v30 = vld [vmem:[%s10254_s7 + $0xc8] sm:$0xff] }
 0x24d   :  { %5710 = vtanh.f32 %v737_v44  ;;  %5174 = vmatmul.msk.f32.gmra.mxu0 %vm163_vm0, %v102_v0  ;;  %vm2945_vm15 = vcmp.eq.f32.partialorder %v2817_v30, 0.0 }
 0x24e   :  { %v2477_v62 = vpop.f32.mrf.mxu2  ;;  %v3203_v47 = vpop.xlane.xlu2 %3202 }
 0x24f   :  { %v2478_v48 = vadd.f32 %v6937_v33, %v2477_v62  ;;  %v3569_v49 = vsub.f32 %v7073_v13, %v3203_v47  ;;  %v103_v33 = vld [vmem:[%s10248_s0 + $0x250] sm:$0xff] }
 0x251   :  { %v7360_v31 = vpop.eup %5706  ;;  %v3705_v37 = vmul.f32 1.442695, %v3569_v49  ;;  %v1610_v52 = vpop.f32.mrf.mxu1  ;;  %v7362_v53 = vsel %vm2943_vm13, -1e+10, %v2478_v48 }
 0x252   :  { %v5709_v54 = vpop.eup %5708  ;;  %v1611_v56 = vadd.f32 %v7196_v60, %v1610_v52  ;;  %v739_v59 = vpop.f32.mrf.mxu0  ;;  %v3966_v63 = vsel %vm3176_vm3, %v7360_v31, 0.0  ;;  %v3246_v1 = vsel %vm3176_vm3, %v7362_v53, -inf }
 0x253   :  { %v5711_v13 = vpop.eup %5710  ;;  %5712 = vpow2.f32 %v3705_v37  ;;  %v740_v2 = vadd.f32 %v7084_v19, %v739_v59  ;;  %5397 = vmatmul.msk.f32.gmra.mxu2 %vm1085_vm1, %v5709_v54  ;;  %3967 = vadd.xlane.f32.xlu0 %v3966_v63  ;;  %v2818_v59 = vld [vmem:[%s10254_s7 + $0xd0] sm:$0xff] }
 0x254   :  { %5714 = vtanh.f32 %v1611_v56  ;;  %3247 = vmax.xlane.f32.xlu2 %v3246_v1  ;;  %5286 = vmatmul.msk.f32.gmra.mxu1 %vm1085_vm1, %v5711_v13  ;;  %vm2946_vm2 = vcmp.eq.f32.partialorder %v2818_v59, 0.0  ;;  %v6525_v59 = vld [vmem:[%s10252_s5 + $0x18] sm:$0xff] }
 0x255   :  { %5716 = vtanh.f32 %v740_v2  ;;  %5175 = vmatmul.msk.f32.gmra.mxu0 %vm163_vm0, %v103_v33 }
 0x256   :  { %v2480_v4 = vpop.f32.mrf.mxu2  ;;  %v3206_v5 = vpop.xlane.xlu0 %3205 }
 0x257   :  { %v2481_v8 = vadd.f32 %v7382_v6, %v2480_v4  ;;  %v3570_v9 = vsub.f32 %v7094_v27, %v3206_v5  ;;  %v104_v27 = vld [vmem:[%s10248_s0 + $0x258] sm:$0xff] }
 0x259   :  { %v7386_v51 = vpop.eup %5712  ;;  %v3707_v12 = vmul.f32 1.442695, %v3570_v9  ;;  %v1613_v22 = vpop.f32.mrf.mxu1  ;;  %v7388_v16 = vsel %vm2944_vm14, -1e+10, %v2481_v8 }
 0x25a   :  { %v5715_v17 = vpop.eup %5714  ;;  %v1614_v20 = vadd.f32 %v7196_v60, %v1613_v22  ;;  %v742_v50 = vpop.f32.mrf.mxu0  ;;  %v3969_v24 = vsel %vm3176_vm3, %v7386_v51, 0.0  ;;  %v3249_v26 = vsel %vm3176_vm3, %v7388_v16, -inf }
 0x25b   :  { %v5717_v23 = vpop.eup %5716  ;;  %5718 = vpow2.f32 %v3707_v12  ;;  %v743_v29 = vadd.f32 %v7084_v19, %v742_v50  ;;  %5398 = vmatmul.msk.f32.gmra.mxu2 %vm1085_vm1, %v5715_v17  ;;  %3970 = vadd.xlane.f32.xlu1 %v3969_v24  ;;  %v2819_v24 = vld [vmem:[%s10254_s7 + $0xd8] sm:$0xff] }
 0x25c   :  { %5720 = vtanh.f32 %v1614_v20  ;;  %3250 = vmax.xlane.f32.xlu0 %v3249_v26  ;;  %5287 = vmatmul.msk.f32.gmra.mxu1 %vm1085_vm1, %v5717_v23  ;;  %vm2947_vm4 = vcmp.eq.f32.partialorder %v2819_v24, 0.0 }
 0x25d   :  { %5722 = vtanh.f32 %v743_v29  ;;  %5176 = vmatmul.msk.f32.gmra.mxu0 %vm163_vm0, %v104_v27 }
 0x25e   :  { %v2483_v32 = vpop.f32.mrf.mxu2  ;;  %v3209_v35 = vpop.xlane.xlu1 %3208 }
 0x25f   :  { %v2484_v36 = vadd.f32 %v7382_v6, %v2483_v32  ;;  %v3571_v0 = vsub.f32 %v7110_v43, %v3209_v35  ;;  %v105_v43 = vld [vmem:[%s10248_s0 + $0x260] sm:$0xff] }
 0x261   :  { %v7407_v41 = vpop.eup %5718  ;;  %v3709_v44 = vmul.f32 1.442695, %v3571_v0  ;;  %v1616_v45 = vpop.f32.mrf.mxu1  ;;  %v7409_v62 = vsel %vm2945_vm15, -1e+10, %v2484_v36 }
 0x262   :  { %v5721_v47 = vpop.eup %5720  ;;  %v1617_v48 = vadd.f32 %v7196_v60, %v1616_v45  ;;  %v745_v49 = vpop.f32.mrf.mxu0  ;;  %v3252_v37 = vsel %vm3176_vm3, %v7409_v62, -inf  ;;  %v3972_v52 = vsel %vm3176_vm3, %v7407_v41, 0.0 }
 0x263   :  { %v5723_v54 = vpop.eup %5722  ;;  %5724 = vpow2.f32 %v3709_v44  ;;  %v746_v56 = vadd.f32 %v7084_v19, %v745_v49  ;;  %5399 = vmatmul.msk.f32.gmra.mxu2 %vm1085_vm1, %v5721_v47  ;;  %3253 = vmax.xlane.f32.xlu1 %v3252_v37 }
 0x264   :  { %5726 = vtanh.f32 %v1617_v48  ;;  %3973 = vadd.xlane.f32.xlu2 %v3972_v52  ;;  %5288 = vmatmul.msk.f32.gmra.mxu1 %vm1085_vm1, %v5723_v54  ;;  %v2820_v52 = vld [vmem:[%s10254_s7 + $0xe0] sm:$0xff] }
 0x265   :  { %5728 = vtanh.f32 %v746_v56  ;;  %5177 = vmatmul.msk.f32.gmra.mxu0 %vm163_vm0, %v105_v43  ;;  %v126_v43 = vld [vmem:[%s10248_s0 + $0x308] sm:$0xff]  ;;  %vm2948_vm5 = vcmp.eq.f32.partialorder %v2820_v52, 0.0 }
 0x266   :  { %v2486_v63 = vpop.f32.mrf.mxu2  ;;  %v3212_v1 = vpop.xlane.xlu2 %3211  ;;  %5198 = vmatmul.msk.f32.vlgmr.msra.gmra.mxu3 %vm163_vm0, %v126_v43 }
 0x267   :  { %v2487_v33 = vadd.f32 %v7382_v6, %v2486_v63  ;;  %v3572_v13 = vsub.f32 %v7126_v57, %v3212_v1  ;;  %v106_v57 = vld [vmem:[%s10248_s0 + $0x268] sm:$0xff]  ;;  %5491 = vmatpush.msra.mxu3 %v6525_v59  ;;  %v2822_v59 = vld [vmem:[%s10254_s7 + $0xf0] sm:$0xff] }
 0x268   :  { %vm2950_vm7 = vcmp.eq.f32.partialorder %v2822_v59, 0.0 }
 0x269   :  { %v7428_v2 = vpop.eup %5724  ;;  %v3711_v3 = vmul.f32 1.442695, %v3572_v13  ;;  %v1619_v4 = vpop.f32.mrf.mxu1  ;;  %v7430_v5 = vsel %vm2946_vm2, -1e+10, %v2487_v33  ;;  %v6526_v33 = vld [vmem:[%s10252_s5 + $0x10] sm:$0xff] }
 0x26a   :  { %v5727_v8 = vpop.eup %5726  ;;  %v1620_v9 = vadd.f32 %v7196_v60, %v1619_v4  ;;  %v748_v12 = vpop.f32.mrf.mxu0  ;;  %v3975_v22 = vsel %vm3176_vm3, %v7428_v2, 0.0  ;;  %v3255_v17 = vsel %vm3176_vm3, %v7430_v5, -inf  ;;  %5492 = vmatpush.msra.mxu3 %v6526_v33 }
 0x26b   :  { %v5729_v20 = vpop.eup %5728  ;;  %5730 = vpow2.f32 %v3711_v3  ;;  %v749_v50 = vadd.f32 %v7084_v19, %v748_v12  ;;  %5400 = vmatmul.msk.f32.gmra.mxu2 %vm1085_vm1, %v5727_v8  ;;  %3976 = vadd.xlane.f32.xlu0 %v3975_v22 }
 0x26c   :  { %5732 = vtanh.f32 %v1620_v9  ;;  %3256 = vmax.xlane.f32.xlu2 %v3255_v17  ;;  %5289 = vmatmul.msk.f32.gmra.mxu1 %vm1085_vm1, %v5729_v20  ;;  %v6527_v20 = vld [vmem:[%s10252_s5 + $0x8] sm:$0xff] }
 0x26d   :  { %5734 = vtanh.f32 %v749_v50  ;;  %5178 = vmatmul.msk.f32.gmra.mxu0 %vm163_vm0, %v106_v57  ;;  %v108_v57 = vld [vmem:[%s10248_s0 + $0x278] sm:$0xff]  ;;  %5493 = vmatpush.msra.mxu3 %v6527_v20 }
 0x26e   :  { %v2489_v26 = vpop.f32.mrf.mxu2  ;;  %v3215_v27 = vpop.xlane.xlu0 %3214 }
 0x26f   :  { %v2490_v23 = vadd.f32 %v7382_v6, %v2489_v26  ;;  %v3573_v29 = vsub.f32 %v7142_v7, %v3215_v27  ;;  %v107_v7 = vld [vmem:[%s10248_s0 + $0x270] sm:$0xff]  ;;  %v2821_v26 = vld [vmem:[%s10254_s7 + $0xe8] sm:$0xff] }
 0x270   :  { %v127_v27 = vld [vmem:[%s10248_s0 + $0x310] sm:$0xff]  ;;  %vm2949_vm6 = vcmp.eq.f32.partialorder %v2821_v26, 0.0  ;;  %v7551_v26 = vld [vmem:[%s10249_s2] ss:$0 sm:$0xff] }
 0x271   :  { %v7449_v30 = vpop.eup %5730  ;;  %v3713_v32 = vmul.f32 1.442695, %v3573_v29  ;;  %v1622_v35 = vpop.f32.mrf.mxu1  ;;  %v7451_v36 = vsel %vm2947_vm4, -1e+10, %v2490_v23  ;;  %5199 = vmatmul.msk.f32.gmra.mxu3 %vm163_vm0, %v127_v27 }
 0x272   :  { %v5733_v0 = vpop.eup %5732  ;;  %v1623_v44 = vadd.f32 %v7196_v60, %v1622_v35  ;;  %v751_v45 = vpop.f32.mrf.mxu0  ;;  %v3978_v47 = vsel %vm3176_vm3, %v7449_v30, 0.0  ;;  %v3258_v48 = vsel %vm3176_vm3, %v7451_v36, -inf }
 0x273   :  { %v5735_v49 = vpop.eup %5734  ;;  %5736 = vpow2.f32 %v3713_v32  ;;  %v752_v37 = vadd.f32 %v7084_v19, %v751_v45  ;;  %5401 = vmatmul.msk.f32.gmra.mxu2 %vm1085_vm1, %v5733_v0  ;;  %3979 = vadd.xlane.f32.xlu1 %v3978_v47  ;;  %v6528_v32 = vld [vmem:[%s10252_s5] sm:$0xff] }
 0x274   :  { %5738 = vtanh.f32 %v1623_v44  ;;  %3259 = vmax.xlane.f32.xlu0 %v3258_v48  ;;  %5290 = vmatmul.msk.f32.gmra.mxu1 %vm1085_vm1, %v5735_v49 }
 0x275   :  { %5740 = vtanh.f32 %v752_v37  ;;  %5179 = vmatmul.msk.f32.gmra.mxu0 %vm163_vm0, %v107_v7  ;;  %5494 = vmatpush.msra.mxu3 %v6528_v32 }
 0x276   :  { %v2492_v54 = vpop.f32.mrf.mxu2  ;;  %v3218_v56 = vpop.xlane.xlu1 %3217 }
 0x277   :  { %v2493_v63 = vadd.f32 %v7382_v6, %v2492_v54  ;;  %v3574_v1 = vsub.f32 %v7158_v21, %v3218_v56 }
 0x279   :  { %v7480_v13 = vpop.eup %5736  ;;  %v3715_v3 = vmul.f32 1.442695, %v3574_v1  ;;  %v1625_v4 = vpop.f32.mrf.mxu1  ;;  %v7482_v8 = vsel %vm2948_vm5, -1e+10, %v2493_v63  ;;  %v128_v63 = vld [vmem:[%s10248_s0 + $0x318] sm:$0xff] }
 0x27a   :  { %v5739_v9 = vpop.eup %5738  ;;  %v1626_v12 = vadd.f32 %v7196_v60, %v1625_v4  ;;  %v754_v22 = vpop.f32.mrf.mxu0  ;;  %v3261_v17 = vsel %vm3176_vm3, %v7482_v8, -inf  ;;  %v3981_v21 = vsel %vm3176_vm3, %v7480_v13, 0.0  ;;  %5200 = vmatmul.msk.f32.gmra.mxu3 %vm163_vm0, %v128_v63 }
 0x27b   :  { %v5741_v50 = vpop.eup %5740  ;;  %5742 = vpow2.f32 %v3715_v3  ;;  %v755_v24 = vadd.f32 %v7084_v19, %v754_v22  ;;  %5402 = vmatmul.msk.f32.gmra.mxu2 %vm1085_vm1, %v5739_v9  ;;  %3262 = vmax.xlane.f32.xlu1 %v3261_v17 }
 0x27c   :  { %5744 = vtanh.f32 %v1626_v12  ;;  %3982 = vadd.xlane.f32.xlu2 %v3981_v21  ;;  %5291 = vmatmul.msk.f32.gmra.mxu1 %vm1085_vm1, %v5741_v50 }
 0x27d   :  { %5746 = vtanh.f32 %v755_v24  ;;  %5180 = vmatmul.msk.f32.gmra.mxu0 %vm163_vm0, %v108_v57 }
 0x27e   :  { %v2495_v23 = vpop.f32.mrf.mxu2  ;;  %v3221_v29 = vpop.xlane.xlu2 %3220 }
 0x27f   :  { %v2496_v35 = vadd.f32 %v7382_v6, %v2495_v23  ;;  %v3575_v0 = vsub.f32 %v7174_v40, %v3221_v29  ;;  %v109_v40 = vld [vmem:[%s10248_s0 + $0x280] sm:$0xff]  ;;  %v2823_v23 = vld [vmem:[%s10254_s7 + $0xf8] sm:$0xff] }
 0x280   :  { %v129_v29 = vld [vmem:[%s10248_s0 + $0x320] sm:$0xff]  ;;  %vm2951_vm8 = vcmp.eq.f32.partialorder %v2823_v23, 0.0 }
 0x281   :  { %v7511_v44 = vpop.eup %5742  ;;  %v3717_v45 = vmul.f32 1.442695, %v3575_v0  ;;  %v1628_v47 = vpop.f32.mrf.mxu1  ;;  %v7513_v48 = vsel %vm2949_vm6, -1e+10, %v2496_v35 }
 0x282   :  { %v5745_v7 = vpop.eup %5744  ;;  %v1629_v49 = vadd.f32 %v7196_v60, %v1628_v47  ;;  %v757_v37 = vpop.f32.mrf.mxu0  ;;  %v3984_v52 = vsel %vm3176_vm3, %v7511_v44, 0.0  ;;  %v3264_v43 = vsel %vm3176_vm3, %v7513_v48, -inf  ;;  %5201 = vmatmul.msk.f32.gmra.mxu3 %vm163_vm0, %v129_v29 }
 0x283   :  { %v5747_v54 = vpop.eup %5746  ;;  %5748 = vpow2.f32 %v3717_v45  ;;  %v758_v56 = vadd.f32 %v7084_v19, %v757_v37  ;;  %5403 = vmatmul.msk.f32.gmra.mxu2 %vm1085_vm1, %v5745_v7  ;;  %3985 = vadd.xlane.f32.xlu0 %v3984_v52 }
 0x284   :  { %5750 = vtanh.f32 %v1629_v49  ;;  %3265 = vmax.xlane.f32.xlu2 %v3264_v43  ;;  %5292 = vmatmul.msk.f32.gmra.mxu1 %vm1085_vm1, %v5747_v54 }
 0x285   :  { %5752 = vtanh.f32 %v758_v56  ;;  %5181 = vmatmul.msk.f32.gmra.mxu0 %vm163_vm0, %v109_v40 }
 0x286   :  { %v2498_v19 = vpop.f32.mrf.mxu2  ;;  %v3224_v1 = vpop.xlane.xlu0 %3223 }
 0x287   :  { %v2499_v33 = vadd.f32 %v7382_v6, %v2498_v19  ;;  %v3576_v3 = vsub.f32 %v7191_v58, %v3224_v1  ;;  %v110_v58 = vld [vmem:[%s10248_s0 + $0x288] sm:$0xff]  ;;  %v2824_v1 = vld [vmem:[%s10254_s7 + $0x100] sm:$0xff] }
 0x288   :  { %vm2952_vm9 = vcmp.eq.f32.partialorder %v2824_v1, 0.0 }
 0x289   :  { %v7536_v4 = vpop.eup %5748  ;;  %v3719_v9 = vmul.f32 1.442695, %v3576_v3  ;;  %v1631_v12 = vpop.f32.mrf.mxu1  ;;  %v7538_v22 = vsel %vm2950_vm7, -1e+10, %v2499_v33  ;;  %v130_v33 = vld [vmem:[%s10248_s0 + $0x328] sm:$0xff] }
 0x28a   :  { %v5751_v17 = vpop.eup %5750  ;;  %v1632_v21 = vadd.f32 %v7196_v60, %v1631_v12  ;;  %v760_v57 = vpop.f32.mrf.mxu0  ;;  %v3987_v20 = vsel %vm3176_vm3, %v7536_v4, 0.0  ;;  %v3267_v50 = vsel %vm3176_vm3, %v7538_v22, -inf  ;;  %5202 = vmatmul.msk.f32.gmra.mxu3 %vm163_vm0, %v130_v33 }
 0x28b   :  { %v5753_v24 = vpop.eup %5752  ;;  %5754 = vpow2.f32 %v3719_v9  ;;  %v761_v27 = vadd.f32 %v7551_v26, %v760_v57  ;;  %5404 = vmatmul.msk.f32.gmra.mxu2 %vm1085_vm1, %v5751_v17  ;;  %3988 = vadd.xlane.f32.xlu1 %v3987_v20 }
 0x28c   :  { %5756 = vtanh.f32 %v1632_v21  ;;  %3268 = vmax.xlane.f32.xlu0 %v3267_v50  ;;  %5293 = vmatmul.msk.f32.gmra.mxu1 %vm1085_vm1, %v5753_v24 }
 0x28d   :  { %5758 = vtanh.f32 %v761_v27  ;;  %5182 = vmatmul.msk.f32.gmra.mxu0 %vm163_vm0, %v110_v58 }
 0x28e   :  { %v2501_v32 = vpop.f32.mrf.mxu2  ;;  %v3227_v35 = vpop.xlane.xlu1 %3226 }
 0x28f   :  { %v2502_v0 = vadd.f32 %v7382_v6, %v2501_v32  ;;  %v3577_v45 = vsub.f32 %v7215_v14, %v3227_v35  ;;  %v3947_v47 = vpop.xlane.xlu2 %3946  ;;  %v111_v14 = vld [vmem:[%s10248_s0 + $0x290] sm:$0xff] }
 0x290   :  { %5760 = vrcp.f32 %v3947_v47 }
 0x291   :  { %v7566_v7 = vpop.eup %5754  ;;  %v3721_v49 = vmul.f32 1.442695, %v3577_v45  ;;  %v1634_v37 = vpop.f32.mrf.mxu1  ;;  %v7568_v52 = vsel %vm2951_vm8, -1e+10, %v2502_v0 }
 0x292   :  { %v5757_v43 = vpop.eup %5756  ;;  %v1635_v40 = vadd.f32 %v7196_v60, %v1634_v37  ;;  %v763_v54 = vpop.f32.mrf.mxu0  ;;  %v3270_v56 = vsel %vm3176_vm3, %v7568_v52, -inf  ;;  %v3990_v59 = vsel %vm3176_vm3, %v7566_v7, 0.0 }
 0x293   :  { %v5759_v63 = vpop.eup %5758  ;;  %5762 = vpow2.f32 %v3721_v49  ;;  %v764_v19 = vadd.f32 %v7551_v26, %v763_v54  ;;  %5405 = vmatmul.msk.f32.gmra.mxu2 %vm1085_vm1, %v5757_v43  ;;  %3271 = vmax.xlane.f32.xlu1 %v3270_v56  ;;  %v2825_v43 = vld [vmem:[%s10254_s7 + $0x108] sm:$0xff]  ;;  %v131_v56 = vld [vmem:[%s10248_s0 + $0x330] sm:$0xff] }
 0x294   :  { %5764 = vtanh.f32 %v1635_v40  ;;  %3991 = vadd.xlane.f32.xlu2 %v3990_v59  ;;  %5294 = vmatmul.msk.f32.gmra.mxu1 %vm1085_vm1, %v5759_v63  ;;  %vm2953_vm10 = vcmp.eq.f32.partialorder %v2825_v43, 0.0 }
 0x295   :  { %5766 = vtanh.f32 %v764_v19  ;;  %5183 = vmatmul.msk.f32.gmra.mxu0 %vm163_vm0, %v111_v14  ;;  %5203 = vmatmul.msk.f32.gmra.mxu3 %vm163_vm0, %v131_v56 }
 0x296   :  { %v5761_v3 = vpop.eup %5760  ;;  %v2504_v9 = vpop.f32.mrf.mxu2 }
 0x297   :  { %v3950_v12 = vpop.xlane.xlu0 %3949  ;;  %v4457_v17 = vmul.f32 %v5761_v3, %v3947_v47  ;;  %v2505_v21 = vadd.f32 %v7382_v6, %v2504_v9  ;;  %v3230_v57 = vpop.xlane.xlu2 %3229 }
 0x298   :  { %5768 = vrcp.f32 %v3950_v12  ;;  %v3578_v20 = vsub.f32 %v7236_v39, %v3230_v57  ;;  %v112_v39 = vld [vmem:[%s10248_s0 + $0x298] sm:$0xff] }
 0x299   :  { %v7591_v50 = vpop.eup %5762  ;;  %v4585_v58 = vsub.f32 2.0, %v4457_v17  ;;  %v1637_v24 = vpop.f32.mrf.mxu1  ;;  %v7593_v27 = vsel %vm2952_vm9, -1e+10, %v2505_v21 }
 0x29a   :  { %v5765_v23 = vpop.eup %5764  ;;  %v3723_v29 = vmul.f32 1.442695, %v3578_v20  ;;  %v1638_v32 = vadd.f32 %v7196_v60, %v1637_v24  ;;  %v766_v35 = vpop.f32.mrf.mxu0  ;;  %v3993_v0 = vsel %vm3176_vm3, %v7591_v50, 0.0  ;;  %v3273_v45 = vsel %vm3176_vm3, %v7593_v27, -inf  ;;  %v113_v24 = vld [vmem:[%s10248_s0 + $0x2a0] sm:$0xff] }
 0x29b   :  { %v5767_v47 = vpop.eup %5766  ;;  %v4713_v49 = vmul.f32 %v5761_v3, %v4585_v58  ;;  %v767_v37 = vadd.f32 %v7551_v26, %v766_v35  ;;  %5406 = vmatmul.msk.f32.gmra.mxu2 %vm1085_vm1, %v5765_v23  ;;  %3994 = vadd.xlane.f32.xlu0 %v3993_v0 }
 0x29c   :  { %5770 = vpow2.f32 %v3723_v29  ;;  %3274 = vmax.xlane.f32.xlu2 %v3273_v45  ;;  %5295 = vmatmul.msk.f32.gmra.mxu1 %vm1085_vm1, %v5767_v47  ;;  %v132_v45 = vld [vmem:[%s10248_s0 + $0x338] sm:$0xff] }
 0x29d   :  { %v4841_v54 = vmul.f32 %v7213_v11, %v4713_v49  ;;  %5772 = vtanh.f32 %v1638_v32  ;;  %5184 = vmatmul.msk.f32.gmra.mxu0 %vm163_vm0, %v112_v39  ;;  %v2826_v32 = vld [vmem:[%s10254_s7 + $0x110] sm:$0xff]  ;;  %5204 = vmatmul.msk.f32.gmra.mxu3 %vm163_vm0, %v132_v45 }
 0x29e   :  { %v5769_v40 = vpop.eup %5768  ;;  %5774 = vtanh.f32 %v767_v37  ;;  %v2507_v14 = vpop.f32.mrf.mxu2  ;;  %vm2954_vm11 = vcmp.eq.f32.partialorder %v2826_v32, 0.0 }
 0x29f   :  { %v4458_v59 = vmul.f32 %v5769_v40, %v3950_v12  ;;  %v3953_v63 = vpop.xlane.xlu1 %3952  ;;  %4969 = vst.msk [vmem:[%s10255_s8] sm:$0xff] %vm3176_vm3, %v4841_v54  ;;  %v2508_v11 = vadd.f32 %v7382_v6, %v2507_v14  ;;  %v3233_v19 = vpop.xlane.xlu0 %3232 }
 0x2a0   :  { %5776 = vrcp.f32 %v3953_v63  ;;  %v3579_v33 = vsub.f32 %v7257_v61, %v3233_v19 }
 0x2a1   :  { %v4586_v1 = vsub.f32 2.0, %v4458_v59  ;;  %v1640_v3 = vpop.f32.mrf.mxu1  ;;  %v7621_v9 = vsel %vm2953_vm10, -1e+10, %v2508_v11  ;;  %v7658_v11 = vld [vmem:[%s10251_s4] ss:$0 sm:$0xff] }
 0x2a2   :  { %v7623_v12 = vpop.eup %5770  ;;  %v3725_v21 = vmul.f32 1.442695, %v3579_v33  ;;  %v1641_v57 = vadd.f32 %v7196_v60, %v1640_v3  ;;  %v769_v20 = vpop.f32.mrf.mxu0  ;;  %v3276_v58 = vsel %vm3176_vm3, %v7621_v9, -inf }
 0x2a3   :  { %v4714_v17 = vmul.f32 %v5769_v40, %v4586_v1  ;;  %v5773_v23 = vpop.eup %5772  ;;  %v770_v61 = vadd.f32 %v7551_v26, %v769_v20  ;;  %v3996_v29 = vsel %vm3176_vm3, %v7623_v12, 0.0  ;;  %3277 = vmax.xlane.f32.xlu0 %v3276_v58 }
 0x2a4   :  { %v5775_v60 = vpop.eup %5774  ;;  %5778 = vpow2.f32 %v3725_v21  ;;  %5407 = vmatmul.msk.f32.gmra.mxu2 %vm1085_vm1, %v5773_v23  ;;  %3997 = vadd.xlane.f32.xlu1 %v3996_v29  ;;  %v114_v21 = vld [vmem:[%s10248_s0 + $0x2a8] sm:$0xff] }
 0x2a5   :  { %v4842_v35 = vmul.f32 %v7234_v34, %v4714_v17  ;;  %5780 = vtanh.f32 %v1641_v57  ;;  %5296 = vmatmul.msk.f32.gmra.mxu1 %vm1085_vm1, %v5775_v60  ;;  %5185 = vmatmul.msk.f32.gmra.mxu0 %vm163_vm0, %v113_v24  ;;  %v2827_v57 = vld [vmem:[%s10254_s7 + $0x118] sm:$0xff]  ;;  %v133_v24 = vld [vmem:[%s10248_s0 + $0x340] sm:$0xff] }
 0x2a6   :  { %v5777_v0 = vpop.eup %5776  ;;  %5782 = vtanh.f32 %v770_v61  ;;  %v2510_v39 = vpop.f32.mrf.mxu2  ;;  %vm2955_vm12 = vcmp.eq.f32.partialorder %v2827_v57, 0.0  ;;  %5205 = vmatmul.msk.f32.gmra.mxu3 %vm163_vm0, %v133_v24 }
 0x2a7   :  { %4970 = vst.msk [vmem:[%s10255_s8 + $0x8] sm:$0xff] %vm3176_vm3, %v4842_v35  ;;  %v4459_v34 = vmul.f32 %v5777_v0, %v3953_v63  ;;  %v3236_v47 = vpop.xlane.xlu1 %3235  ;;  %v2511_v49 = vadd.f32 %v7382_v6, %v2510_v39  ;;  %v3956_v43 = vpop.xlane.xlu2 %3955 }
 0x2a8   :  { %v3580_v37 = vsub.f32 %v7278_v18, %v3236_v47  ;;  %5784 = vrcp.f32 %v3956_v43 }
 0x2a9   :  { %v4587_v40 = vsub.f32 2.0, %v4459_v34  ;;  %v1643_v56 = vpop.f32.mrf.mxu1  ;;  %v7651_v59 = vsel %vm2954_vm11, -1e+10, %v2511_v49 }
 0x2aa   :  { %v3727_v54 = vmul.f32 1.442695, %v3580_v37  ;;  %v7653_v14 = vpop.eup %5778  ;;  %v1644_v19 = vadd.f32 %v7658_v11, %v1643_v56  ;;  %v772_v1 = vpop.f32.mrf.mxu0  ;;  %v3279_v18 = vsel %vm3176_vm3, %v7651_v59, -inf }
 0x2ab   :  { %v4715_v63 = vmul.f32 %v5777_v0, %v4587_v40  ;;  %v5781_v33 = vpop.eup %5780  ;;  %v773_v3 = vadd.f32 %v7551_v26, %v772_v1  ;;  %v3999_v17 = vsel %vm3176_vm3, %v7653_v14, 0.0  ;;  %v2828_v1 = vld [vmem:[%s10254_s7 + $0x120] sm:$0xff] }
 0x2ac   :  { %5786 = vpow2.f32 %v3727_v54  ;;  %v5783_v20 = vpop.eup %5782  ;;  %5408 = vmatmul.msk.f32.gmra.mxu2 %vm1085_vm1, %v5781_v33  ;;  %3280 = vmax.xlane.f32.xlu1 %v3279_v18  ;;  %vm2956_vm13 = vcmp.eq.f32.partialorder %v2828_v1, 0.0 }
 0x2ad   :  { %v4843_v58 = vmul.f32 %v7255_v55, %v4715_v63  ;;  %5788 = vtanh.f32 %v1644_v19  ;;  %4000 = vadd.xlane.f32.xlu2 %v3999_v17  ;;  %5297 = vmatmul.msk.f32.gmra.mxu1 %vm1085_vm1, %v5783_v20  ;;  %v115_v19 = vld [vmem:[%s10248_s0 + $0x2b0] sm:$0xff] }
 0x2ae   :  { %5790 = vtanh.f32 %v773_v3  ;;  %v5785_v23 = vpop.eup %5784  ;;  %5186 = vmatmul.msk.f32.gmra.mxu0 %vm163_vm0, %v114_v21  ;;  %v2513_v55 = vpop.f32.mrf.mxu2  ;;  %v134_v3 = vld [vmem:[%s10248_s0 + $0x348] sm:$0xff] }
 0x2af   :  { %4971 = vst.msk [vmem:[%s10255_s8 + $0x10] sm:$0xff] %vm3176_vm3, %v4843_v58  ;;  %v3959_v61 = vpop.xlane.xlu0 %3958  ;;  %v4460_v29 = vmul.f32 %v5785_v23, %v3956_v43  ;;  %v2514_v32 = vadd.f32 %v7382_v6, %v2513_v55  ;;  %v3239_v60 = vpop.xlane.xlu2 %3238  ;;  %5206 = vmatmul.msk.f32.gmra.mxu3 %vm163_vm0, %v134_v3 }
 0x2b0   :  { %5792 = vrcp.f32 %v3959_v61  ;;  %v3581_v35 = vsub.f32 %v7299_v46, %v3239_v60 }
 0x2b1   :  { %v4588_v45 = vsub.f32 2.0, %v4460_v29  ;;  %v1646_v34 = vpop.f32.mrf.mxu1  ;;  %v7688_v39 = vsel %vm2955_vm12, -1e+10, %v2514_v32 }
 0x2b2   :  { %v7686_v0 = vpop.eup %5786  ;;  %v3729_v49 = vmul.f32 1.442695, %v3581_v35  ;;  %v1647_v37 = vadd.f32 %v7658_v11, %v1646_v34  ;;  %v775_v40 = vpop.f32.mrf.mxu0  ;;  %v3282_v54 = vsel %vm3176_vm3, %v7688_v39, -inf }
 0x2b3   :  { %v5789_v47 = vpop.eup %5788  ;;  %v4002_v43 = vsel %vm3176_vm3, %v7686_v0, 0.0  ;;  %v4716_v63 = vmul.f32 %v5785_v23, %v4588_v45  ;;  %v776_v46 = vadd.f32 %v7551_v26, %v775_v40 }
 0x2b4   :  { %v5791_v56 = vpop.eup %5790  ;;  %4003 = vadd.xlane.f32.xlu0 %v4002_v43  ;;  %5794 = vpow2.f32 %v3729_v49  ;;  %5409 = vmatmul.msk.f32.gmra.mxu2 %vm1085_vm1, %v5789_v47 }
 0x2b5   :  { %v4844_v33 = vmul.f32 %v7276_v15, %v4716_v63  ;;  %5796 = vtanh.f32 %v1647_v37  ;;  %3283 = vmax.xlane.f32.xlu2 %v3282_v54  ;;  %5298 = vmatmul.msk.f32.gmra.mxu1 %vm1085_vm1, %v5791_v56  ;;  %v2829_v37 = vld [vmem:[%s10254_s7 + $0x128] sm:$0xff]  ;;  %v135_v56 = vld [vmem:[%s10248_s0 + $0x350] sm:$0xff] }
 0x2b6   :  { %v5793_v18 = vpop.eup %5792  ;;  %5798 = vtanh.f32 %v776_v46  ;;  %5187 = vmatmul.msk.f32.gmra.mxu0 %vm163_vm0, %v115_v19  ;;  %v2516_v21 = vpop.f32.mrf.mxu2  ;;  %vm2957_vm14 = vcmp.eq.f32.partialorder %v2829_v37, 0.0 }
 0x2b7   :  { %v4461_v17 = vmul.f32 %v5793_v18, %v3959_v61  ;;  %v3962_v57 = vpop.xlane.xlu1 %3961  ;;  %4972 = vst.msk [vmem:[%s10255_s8 + $0x18] sm:$0xff] %vm3176_vm3, %v4844_v33  ;;  %v2517_v15 = vadd.f32 %v7382_v6, %v2516_v21  ;;  %v3242_v20 = vpop.xlane.xlu0 %3241  ;;  %5207 = vmatmul.msk.f32.gmra.mxu3 %vm163_vm0, %v135_v56 }
 0x2b8   :  { %5800 = vrcp.f32 %v3962_v57  ;;  %v3582_v24 = vsub.f32 %v7320_v10, %v3242_v20  ;;  %v116_v10 = vld [vmem:[%s10248_s0 + $0x2b8] sm:$0xff] }
 0x2b9   :  { %v4589_v58 = vsub.f32 2.0, %v4461_v17  ;;  %v1649_v23 = vpop.f32.mrf.mxu1  ;;  %v7716_v55 = vsel %vm2956_vm13, -1e+10, %v2517_v15 }
 0x2ba   :  { %v7718_v61 = vpop.eup %5794  ;;  %v3731_v32 = vmul.f32 1.442695, %v3582_v24  ;;  %v1650_v60 = vadd.f32 %v7658_v11, %v1649_v23  ;;  %v778_v35 = vpop.f32.mrf.mxu0  ;;  %v3285_v45 = vsel %vm3176_vm3, %v7716_v55, -inf }
 0x2bb   :  { %v4717_v29 = vmul.f32 %v5793_v18, %v4589_v58  ;;  %v5797_v34 = vpop.eup %5796  ;;  %v779_v47 = vadd.f32 %v7551_v26, %v778_v35  ;;  %v4005_v49 = vsel %vm3176_vm3, %v7718_v61, 0.0 }
 0x2bc   :  { %3286 = vmax.xlane.f32.xlu0 %v3285_v45  ;;  %v5799_v40 = vpop.eup %5798  ;;  %5802 = vpow2.f32 %v3731_v32  ;;  %5410 = vmatmul.msk.f32.gmra.mxu2 %vm1085_vm1, %v5797_v34  ;;  %v117_v32 = vld [vmem:[%s10248_s0 + $0x2c0] sm:$0xff]  ;;  %v136_v34 = vld [vmem:[%s10248_s0 + $0x358] sm:$0xff] }
 0x2bd   :  { %v4845_v43 = vmul.f32 %v7297_v42, %v4717_v29  ;;  %4006 = vadd.xlane.f32.xlu1 %v4005_v49  ;;  %5804 = vtanh.f32 %v1650_v60  ;;  %5299 = vmatmul.msk.f32.gmra.mxu1 %vm1085_vm1, %v5799_v40  ;;  %v2830_v60 = vld [vmem:[%s10254_s7 + $0x130] sm:$0xff] }
 0x2be   :  { %v5801_v54 = vpop.eup %5800  ;;  %5806 = vtanh.f32 %v779_v47  ;;  %5188 = vmatmul.msk.f32.gmra.mxu0 %vm163_vm0, %v116_v10  ;;  %v2519_v42 = vpop.f32.mrf.mxu2  ;;  %vm2958_vm15 = vcmp.eq.f32.partialorder %v2830_v60, 0.0 }
 0x2bf   :  { %4973 = vst.msk [vmem:[%s10255_s8 + $0x20] sm:$0xff] %vm3176_vm3, %v4845_v43  ;;  %v4462_v63 = vmul.f32 %v5801_v54, %v3962_v57  ;;  %v3245_v46 = vpop.xlane.xlu1 %3244  ;;  %v2520_v19 = vadd.f32 %v7382_v6, %v2519_v42  ;;  %v3965_v18 = vpop.xlane.xlu2 %3964  ;;  %5208 = vmatmul.msk.f32.gmra.mxu3 %vm163_vm0, %v136_v34 }
 0x2c0   :  { %v3583_v1 = vsub.f32 %v7341_v28, %v3245_v46  ;;  %5808 = vrcp.f32 %v3965_v18 }
 0x2c1   :  { %v4590_v33 = vsub.f32 2.0, %v4462_v63  ;;  %v1652_v17 = vpop.f32.mrf.mxu1  ;;  %v7746_v21 = vsel %vm2957_vm14, -1e+10, %v2520_v19 }
 0x2c2   :  { %v3733_v3 = vmul.f32 1.442695, %v3583_v1  ;;  %v7748_v57 = vpop.eup %5802  ;;  %v1653_v20 = vadd.f32 %v7658_v11, %v1652_v17  ;;  %v781_v58 = vpop.f32.mrf.mxu0  ;;  %v3288_v24 = vsel %vm3176_vm3, %v7746_v21, -inf }
 0x2c3   :  { %v4718_v15 = vmul.f32 %v5801_v54, %v4590_v33  ;;  %v5805_v23 = vpop.eup %5804  ;;  %v782_v28 = vadd.f32 %v7551_v26, %v781_v58  ;;  %v4008_v29 = vsel %vm3176_vm3, %v7748_v57, 0.0  ;;  %v2831_v58 = vld [vmem:[%s10254_s7 + $0x138] sm:$0xff] }
 0x2c4   :  { %5810 = vpow2.f32 %v3733_v3  ;;  %v5807_v35 = vpop.eup %5806  ;;  %5411 = vmatmul.msk.f32.gmra.mxu2 %vm1085_vm1, %v5805_v23  ;;  %4009 = vadd.xlane.f32.xlu2 %v4008_v29  ;;  %vm2959_vm2 = vcmp.eq.f32.partialorder %v2831_v58, 0.0 }
 0x2c5   :  { %v4846_v45 = vmul.f32 %v7318_v38, %v4718_v15  ;;  %5812 = vtanh.f32 %v1653_v20  ;;  %3289 = vmax.xlane.f32.xlu1 %v3288_v24  ;;  %5300 = vmatmul.msk.f32.gmra.mxu1 %vm1085_vm1, %v5807_v35  ;;  %v118_v20 = vld [vmem:[%s10248_s0 + $0x2c8] sm:$0xff] }
 0x2c6   :  { %5814 = vtanh.f32 %v782_v28  ;;  %v5809_v47 = vpop.eup %5808  ;;  %5189 = vmatmul.msk.f32.gmra.mxu0 %vm163_vm0, %v117_v32  ;;  %v2522_v38 = vpop.f32.mrf.mxu2  ;;  %v137_v28 = vld [vmem:[%s10248_s0 + $0x360] sm:$0xff] }
 0x2c7   :  { %4974 = vst.msk [vmem:[%s10255_s8 + $0x28] sm:$0xff] %vm3176_vm3, %v4846_v45  ;;  %v3968_v49 = vpop.xlane.xlu0 %3967  ;;  %v4463_v10 = vmul.f32 %v5809_v47, %v3965_v18  ;;  %v2523_v37 = vadd.f32 %v7382_v6, %v2522_v38  ;;  %v3248_v40 = vpop.xlane.xlu2 %3247  ;;  %5209 = vmatmul.msk.f32.gmra.mxu3 %vm163_vm0, %v137_v28 }
 0x2c8   :  { %5816 = vrcp.f32 %v3968_v49  ;;  %v3584_v43 = vsub.f32 %v7362_v53, %v3248_v40 }
 0x2c9   :  { %v4591_v56 = vsub.f32 2.0, %v4463_v10  ;;  %v1655_v63 = vpop.f32.mrf.mxu1  ;;  %v7778_v42 = vsel %vm2958_vm15, -1e+10, %v2523_v37 }
 0x2ca   :  { %v7776_v54 = vpop.eup %5810  ;;  %v3735_v19 = vmul.f32 1.442695, %v3584_v43  ;;  %v1656_v1 = vadd.f32 %v7658_v11, %v1655_v63  ;;  %v784_v33 = vpop.f32.mrf.mxu0  ;;  %v3291_v3 = vsel %vm3176_vm3, %v7778_v42, -inf }
 0x2cb   :  { %v5813_v46 = vpop.eup %5812  ;;  %v4011_v18 = vsel %vm3176_vm3, %v7776_v54, 0.0  ;;  %v4719_v15 = vmul.f32 %v5809_v47, %v4591_v56  ;;  %v785_v53 = vadd.f32 %v7551_v26, %v784_v33 }
 0x2cc   :  { %v5815_v17 = vpop.eup %5814  ;;  %4012 = vadd.xlane.f32.xlu0 %v4011_v18  ;;  %5818 = vpow2.f32 %v3735_v19  ;;  %5412 = vmatmul.msk.f32.gmra.mxu2 %vm1085_vm1, %v5813_v46  ;;  %v119_v46 = vld [vmem:[%s10248_s0 + $0x2d0] sm:$0xff]  ;;  %v2832_v19 = vld [vmem:[%s10254_s7 + $0x140] sm:$0xff] }
 0x2cd   :  { %v4847_v23 = vmul.f32 %v7339_v25, %v4719_v15  ;;  %5820 = vtanh.f32 %v1656_v1  ;;  %3292 = vmax.xlane.f32.xlu2 %v3291_v3  ;;  %5301 = vmatmul.msk.f32.gmra.mxu1 %vm1085_vm1, %v5815_v17  ;;  %v138_v3 = vld [vmem:[%s10248_s0 + $0x368] sm:$0xff]  ;;  %vm2960_vm4 = vcmp.eq.f32.partialorder %v2832_v19, 0.0 }
 0x2ce   :  { %v5817_v24 = vpop.eup %5816  ;;  %5822 = vtanh.f32 %v785_v53  ;;  %5190 = vmatmul.msk.f32.gmra.mxu0 %vm163_vm0, %v118_v20  ;;  %v2525_v32 = vpop.f32.mrf.mxu2  ;;  %v7837_v53 = vld [vmem:[%s10253_s6] ss:$0 sm:$0xff] }
 0x2cf   :  { %v4464_v29 = vmul.f32 %v5817_v24, %v3968_v49  ;;  %v3971_v60 = vpop.xlane.xlu1 %3970  ;;  %4975 = vst.msk [vmem:[%s10255_s8 + $0x30] sm:$0xff] %vm3176_vm3, %v4847_v23  ;;  %v2526_v25 = vadd.f32 %v7382_v6, %v2525_v32  ;;  %v3251_v35 = vpop.xlane.xlu0 %3250  ;;  %5210 = vmatmul.msk.f32.gmra.mxu3 %vm163_vm0, %v138_v3 }
 0x2d0   :  { %5824 = vrcp.f32 %v3971_v60  ;;  %v3585_v34 = vsub.f32 %v7388_v16, %v3251_v35 }
 0x2d1   :  { %v4592_v45 = vsub.f32 2.0, %v4464_v29  ;;  %v1658_v47 = vpop.f32.mrf.mxu1  ;;  %v7806_v38 = vsel %vm2959_vm2, -1e+10, %v2526_v25 }
 0x2d2   :  { %v7808_v49 = vpop.eup %5818  ;;  %v3737_v37 = vmul.f32 1.442695, %v3585_v34  ;;  %v1659_v40 = vadd.f32 %v7658_v11, %v1658_v47  ;;  %v787_v43 = vpop.f32.mrf.mxu0  ;;  %v3294_v56 = vsel %vm3176_vm3, %v7806_v38, -inf }
 0x2d3   :  { %v4720_v10 = vmul.f32 %v5817_v24, %v4592_v45  ;;  %v5821_v63 = vpop.eup %5820  ;;  %v788_v6 = vadd.f32 %v7551_v26, %v787_v43  ;;  %v4014_v16 = vsel %vm3176_vm3, %v7808_v49, 0.0 }
 0x2d4   :  { %3295 = vmax.xlane.f32.xlu0 %v3294_v56  ;;  %v5823_v1 = vpop.eup %5822  ;;  %5826 = vpow2.f32 %v3737_v37  ;;  %5413 = vmatmul.msk.f32.gmra.mxu2 %vm1085_vm1, %v5821_v63  ;;  %v120_v37 = vld [vmem:[%s10248_s0 + $0x2d8] sm:$0xff]  ;;  %v139_v63 = vld [vmem:[%s10248_s0 + $0x370] sm:$0xff] }
 0x2d5   :  { %v4848_v33 = vmul.f32 %v7360_v31, %v4720_v10  ;;  %4015 = vadd.xlane.f32.xlu1 %v4014_v16  ;;  %5828 = vtanh.f32 %v1659_v40  ;;  %5302 = vmatmul.msk.f32.gmra.mxu1 %vm1085_vm1, %v5823_v1  ;;  %v2833_v40 = vld [vmem:[%s10254_s7 + $0x148] sm:$0xff] }
 0x2d6   :  { %v5825_v18 = vpop.eup %5824  ;;  %5830 = vtanh.f32 %v788_v6  ;;  %5191 = vmatmul.msk.f32.gmra.mxu0 %vm163_vm0, %v119_v46  ;;  %v2528_v31 = vpop.f32.mrf.mxu2  ;;  %vm2961_vm5 = vcmp.eq.f32.partialorder %v2833_v40, 0.0 }
 0x2d7   :  { %4976 = vst.msk [vmem:[%s10255_s8 + $0x38] sm:$0xff] %vm3176_vm3, %v4848_v33  ;;  %v4465_v17 = vmul.f32 %v5825_v18, %v3971_v60  ;;  %v3254_v15 = vpop.xlane.xlu1 %3253  ;;  %v2529_v20 = vadd.f32 %v7837_v53, %v2528_v31  ;;  %v3974_v24 = vpop.xlane.xlu2 %3973  ;;  %5211 = vmatmul.msk.f32.gmra.mxu3 %vm163_vm0, %v139_v63 }
 0x2d8   :  { %v3586_v58 = vsub.f32 %v7409_v62, %v3254_v15  ;;  %5832 = vrcp.f32 %v3974_v24 }
 0x2d9   :  { %v4593_v23 = vsub.f32 2.0, %v4465_v17  ;;  %v1661_v29 = vpop.f32.mrf.mxu1  ;;  %v7841_v32 = vsel %vm2960_vm4, -1e+10, %v2529_v20 }
 0x2da   :  { %v3739_v28 = vmul.f32 1.442695, %v3586_v58  ;;  %v7843_v60 = vpop.eup %5826  ;;  %v1662_v35 = vadd.f32 %v7658_v11, %v1661_v29  ;;  %v790_v45 = vpop.f32.mrf.mxu0  ;;  %v3297_v34 = vsel %vm3176_vm3, %v7841_v32, -inf }
 0x2db   :  { %v4721_v25 = vmul.f32 %v5825_v18, %v4593_v23  ;;  %v5829_v47 = vpop.eup %5828  ;;  %v791_v62 = vadd.f32 %v7551_v26, %v790_v45  ;;  %v4017_v10 = vsel %vm3176_vm3, %v7843_v60, 0.0  ;;  %v2834_v45 = vld [vmem:[%s10254_s7 + $0x150] sm:$0xff] }
 0x2dc   :  { %5834 = vpow2.f32 %v3739_v28  ;;  %v5831_v43 = vpop.eup %5830  ;;  %5414 = vmatmul.msk.f32.gmra.mxu2 %vm1085_vm1, %v5829_v47  ;;  %4018 = vadd.xlane.f32.xlu2 %v4017_v10  ;;  %vm2962_vm6 = vcmp.eq.f32.partialorder %v2834_v45, 0.0 }
 0x2dd   :  { %v4849_v56 = vmul.f32 %v7386_v51, %v4721_v25  ;;  %5836 = vtanh.f32 %v1662_v35  ;;  %3298 = vmax.xlane.f32.xlu1 %v3297_v34  ;;  %5303 = vmatmul.msk.f32.gmra.mxu1 %vm1085_vm1, %v5831_v43  ;;  %v121_v35 = vld [vmem:[%s10248_s0 + $0x2e0] sm:$0xff] }
 0x2de   :  { %5838 = vtanh.f32 %v791_v62  ;;  %v5833_v6 = vpop.eup %5832  ;;  %5192 = vmatmul.msk.f32.gmra.mxu0 %vm163_vm0, %v120_v37  ;;  %v2531_v51 = vpop.f32.mrf.mxu2  ;;  %v140_v62 = vld [vmem:[%s10248_s0 + $0x378] sm:$0xff] }
 0x2df   :  { %4977 = vst.msk [vmem:[%s10255_s8 + $0x40] sm:$0xff] %vm3176_vm3, %v4849_v56  ;;  %v3977_v16 = vpop.xlane.xlu0 %3976  ;;  %v4466_v46 = vmul.f32 %v5833_v6, %v3974_v24  ;;  %v2532_v19 = vadd.f32 %v7837_v53, %v2531_v51  ;;  %v3257_v1 = vpop.xlane.xlu2 %3256  ;;  %5212 = vmatmul.msk.f32.gmra.mxu3 %vm163_vm0, %v140_v62 }
 0x2e0   :  { %5840 = vrcp.f32 %v3977_v16  ;;  %v3587_v33 = vsub.f32 %v7430_v5, %v3257_v1 }
 0x2e1   :  { %v4594_v3 = vsub.f32 2.0, %v4466_v46  ;;  %v1664_v17 = vpop.f32.mrf.mxu1  ;;  %v7873_v31 = vsel %vm2961_vm5, -1e+10, %v2532_v19 }
 0x2e2   :  { %v7871_v18 = vpop.eup %5834  ;;  %v3741_v20 = vmul.f32 1.442695, %v3587_v33  ;;  %v1665_v58 = vadd.f32 %v7658_v11, %v1664_v17  ;;  %v793_v23 = vpop.f32.mrf.mxu0  ;;  %v3300_v28 = vsel %vm3176_vm3, %v7873_v31, -inf }
 0x2e3   :  { %v5837_v15 = vpop.eup %5836  ;;  %v4020_v24 = vsel %vm3176_vm3, %v7871_v18, 0.0  ;;  %v4722_v25 = vmul.f32 %v5833_v6, %v4594_v3  ;;  %v794_v5 = vadd.f32 %v7551_v26, %v793_v23 }
 0x2e4   :  { %v5839_v29 = vpop.eup %5838  ;;  %4021 = vadd.xlane.f32.xlu0 %v4020_v24  ;;  %5842 = vpow2.f32 %v3741_v20  ;;  %5415 = vmatmul.msk.f32.gmra.mxu2 %vm1085_vm1, %v5837_v15  ;;  %v122_v20 = vld [vmem:[%s10248_s0 + $0x2e8] sm:$0xff] }
 0x2e5   :  { %v4850_v47 = vmul.f32 %v7407_v41, %v4722_v25  ;;  %5844 = vtanh.f32 %v1665_v58  ;;  %3301 = vmax.xlane.f32.xlu2 %v3300_v28  ;;  %5304 = vmatmul.msk.f32.gmra.mxu1 %vm1085_vm1, %v5839_v29  ;;  %v2835_v58 = vld [vmem:[%s10254_s7 + $0x158] sm:$0xff]  ;;  %v141_v29 = vld [vmem:[%s10248_s0 + $0x380] sm:$0xff] }
 0x2e6   :  { %v5841_v34 = vpop.eup %5840  ;;  %5846 = vtanh.f32 %v794_v5  ;;  %5193 = vmatmul.msk.f32.gmra.mxu0 %vm163_vm0, %v121_v35  ;;  %v2534_v37 = vpop.f32.mrf.mxu2  ;;  %vm2963_vm7 = vcmp.eq.f32.partialorder %v2835_v58, 0.0 }
 0x2e7   :  { %v4467_v10 = vmul.f32 %v5841_v34, %v3977_v16  ;;  %v3980_v40 = vpop.xlane.xlu1 %3979  ;;  %4978 = vst.msk [vmem:[%s10255_s8 + $0x48] sm:$0xff] %vm3176_vm3, %v4850_v47  ;;  %v2535_v41 = vadd.f32 %v7837_v53, %v2534_v37  ;;  %v3260_v43 = vpop.xlane.xlu0 %3259  ;;  %5213 = vmatmul.msk.f32.gmra.mxu3 %vm163_vm0, %v141_v29 }
 0x2e8   :  { %5848 = vrcp.f32 %v3980_v40  ;;  %v3588_v63 = vsub.f32 %v7451_v36, %v3260_v43 }
 0x2e9   :  { %v4595_v56 = vsub.f32 2.0, %v4467_v10  ;;  %v1667_v6 = vpop.f32.mrf.mxu1  ;;  %v7901_v51 = vsel %vm2962_vm6, -1e+10, %v2535_v41 }
 0x2ea   :  { %v7903_v16 = vpop.eup %5842  ;;  %v3743_v19 = vmul.f32 1.442695, %v3588_v63  ;;  %v1668_v1 = vadd.f32 %v7658_v11, %v1667_v6  ;;  %v796_v33 = vpop.f32.mrf.mxu0  ;;  %v3303_v3 = vsel %vm3176_vm3, %v7901_v51, -inf }
 0x2eb   :  { %v4723_v46 = vmul.f32 %v5841_v34, %v4595_v56  ;;  %v5845_v17 = vpop.eup %5844  ;;  %v797_v15 = vadd.f32 %v7551_v26, %v796_v33  ;;  %v4023_v36 = vsel %vm3176_vm3, %v7903_v16, 0.0 }
 0x2ec   :  { %3304 = vmax.xlane.f32.xlu0 %v3303_v3  ;;  %v5847_v23 = vpop.eup %5846  ;;  %5850 = vpow2.f32 %v3743_v19  ;;  %5416 = vmatmul.msk.f32.gmra.mxu2 %vm1085_vm1, %v5845_v17  ;;  %v123_v19 = vld [vmem:[%s10248_s0 + $0x2f0] sm:$0xff]  ;;  %v142_v17 = vld [vmem:[%s10248_s0 + $0x388] sm:$0xff] }
 0x2ed   :  { %v4851_v24 = vmul.f32 %v7428_v2, %v4723_v46  ;;  %4024 = vadd.xlane.f32.xlu1 %v4023_v36  ;;  %5852 = vtanh.f32 %v1668_v1  ;;  %5305 = vmatmul.msk.f32.gmra.mxu1 %vm1085_vm1, %v5847_v23  ;;  %v2836_v1 = vld [vmem:[%s10254_s7 + $0x160] sm:$0xff] }
 0x2ee   :  { %v5849_v28 = vpop.eup %5848  ;;  %5854 = vtanh.f32 %v797_v15  ;;  %5194 = vmatmul.msk.f32.gmra.mxu0 %vm163_vm0, %v122_v20  ;;  %v2537_v2 = vpop.f32.mrf.mxu2  ;;  %vm2964_vm8 = vcmp.eq.f32.partialorder %v2836_v1, 0.0 }
 0x2ef   :  { %4979 = vst.msk [vmem:[%s10255_s8 + $0x50] sm:$0xff] %vm3176_vm3, %v4851_v24  ;;  %v4468_v25 = vmul.f32 %v5849_v28, %v3980_v40  ;;  %v3263_v5 = vpop.xlane.xlu1 %3262  ;;  %v2538_v35 = vadd.f32 %v7837_v53, %v2537_v2  ;;  %v3983_v34 = vpop.xlane.xlu2 %3982  ;;  %5214 = vmatmul.msk.f32.gmra.mxu3 %vm163_vm0, %v142_v17 }
 0x2f0   :  { %v3589_v45 = vsub.f32 %v7482_v8, %v3263_v5  ;;  %5856 = vrcp.f32 %v3983_v34  ;;  %v7965_v5 = vpop.f32.mrf.mxu3 }
 0x2f1   :  { %v4596_v47 = vsub.f32 2.0, %v4468_v25  ;;  %v1670_v10 = vpop.f32.mrf.mxu1  ;;  %v7931_v37 = vsel %vm2963_vm7, -1e+10, %v2538_v35 }
 0x2f2   :  { %v3745_v62 = vmul.f32 1.442695, %v3589_v45  ;;  %v7933_v40 = vpop.eup %5850  ;;  %v1671_v43 = vadd.f32 %v7658_v11, %v1670_v10  ;;  %v799_v56 = vpop.f32.mrf.mxu0  ;;  %v3306_v63 = vsel %vm3176_vm3, %v7931_v37, -inf }
 0x2f3   :  { %v4724_v41 = vmul.f32 %v5849_v28, %v4596_v47  ;;  %v5853_v6 = vpop.eup %5852  ;;  %v800_v8 = vadd.f32 %v7551_v26, %v799_v56  ;;  %v4026_v46 = vsel %vm3176_vm3, %v7933_v40, 0.0  ;;  %v124_v56 = vld [vmem:[%s10248_s0 + $0x2f8] sm:$0xff] }
 0x2f4   :  { %5858 = vpow2.f32 %v3745_v62  ;;  %v5855_v33 = vpop.eup %5854  ;;  %5417 = vmatmul.msk.f32.gmra.mxu2 %vm1085_vm1, %v5853_v6  ;;  %4027 = vadd.xlane.f32.xlu2 %v4026_v46 }
 0x2f5   :  { %v4852_v3 = vmul.f32 %v7449_v30, %v4724_v41  ;;  %5860 = vtanh.f32 %v1671_v43  ;;  %3307 = vmax.xlane.f32.xlu1 %v3306_v63  ;;  %5306 = vmatmul.msk.f32.gmra.mxu1 %vm1085_vm1, %v5855_v33  ;;  %v2837_v63 = vld [vmem:[%s10254_s7 + $0x168] sm:$0xff] }
 0x2f6   :  { %5862 = vtanh.f32 %v800_v8  ;;  %v5857_v15 = vpop.eup %5856  ;;  %5195 = vmatmul.msk.f32.gmra.mxu0 %vm163_vm0, %v123_v19  ;;  %v2540_v30 = vpop.f32.mrf.mxu2  ;;  %vm2965_vm9 = vcmp.eq.f32.partialorder %v2837_v63, 0.0 }
 0x2f7   :  { %4980 = vst.msk [vmem:[%s10255_s8 + $0x58] sm:$0xff] %vm3176_vm3, %v4852_v3  ;;  %v3986_v36 = vpop.xlane.xlu0 %3985  ;;  %v4469_v20 = vmul.f32 %v5857_v15, %v3983_v34  ;;  %v2541_v58 = vadd.f32 %v7837_v53, %v2540_v30  ;;  %v3266_v23 = vpop.xlane.xlu2 %3265 }
 0x2f8   :  { %5864 = vrcp.f32 %v3986_v36  ;;  %v3590_v24 = vsub.f32 %v7513_v48, %v3266_v23 }
 0x2f9   :  { %v4597_v29 = vsub.f32 2.0, %v4469_v20  ;;  %v1673_v25 = vpop.f32.mrf.mxu1  ;;  %v7963_v2 = vsel %vm2964_vm8, -1e+10, %v2541_v58 }
 0x2fa   :  { %v7961_v28 = vpop.eup %5858  ;;  %v3747_v45 = vmul.f32 1.442695, %v3590_v24  ;;  %v1674_v47 = vadd.f32 %v7658_v11, %v1673_v25  ;;  %v802_v62 = vpop.f32.mrf.mxu0  ;;  %v3309_v10 = vsel %vm3176_vm3, %v7963_v2, -inf }
 0x2fb   :  { %v5861_v35 = vpop.eup %5860  ;;  %v4029_v34 = vsel %vm3176_vm3, %v7961_v28, 0.0  ;;  %v4725_v41 = vmul.f32 %v5857_v15, %v4597_v29  ;;  %v803_v43 = vadd.f32 %v7551_v26, %v802_v62  ;;  %v143_v26 = vld [vmem:[%s10248_s0 + $0x390] sm:$0xff]  ;;  %v125_v62 = vld [vmem:[%s10248_s0 + $0x300] sm:$0xff] }
 0x2fc   :  { %v5863_v48 = vpop.eup %5862  ;;  %4030 = vadd.xlane.f32.xlu0 %v4029_v34  ;;  %5866 = vpow2.f32 %v3747_v45  ;;  %5418 = vmatmul.msk.f32.gmra.mxu2 %vm1085_vm1, %v5861_v35  ;;  %v2838_v34 = vld [vmem:[%s10254_s7 + $0x170] sm:$0xff] }
 0x2fd   :  { %v4853_v8 = vmul.f32 %v7480_v13, %v4725_v41  ;;  %5868 = vtanh.f32 %v1674_v47  ;;  %3310 = vmax.xlane.f32.xlu2 %v3309_v10  ;;  %5307 = vmatmul.msk.f32.gmra.mxu1 %vm1085_vm1, %v5863_v48  ;;  %vm2966_vm10 = vcmp.eq.f32.partialorder %v2838_v34, 0.0 }
 0x2fe   :  { %v5865_v6 = vpop.eup %5864  ;;  %5870 = vtanh.f32 %v803_v43  ;;  %5196 = vmatmul.msk.f32.gmra.mxu0 %vm163_vm0, %v124_v56  ;;  %v2543_v19 = vpop.f32.mrf.mxu2  ;;  %5215 = vmatmul.msk.f32.gmra.mxu3 %vm163_vm0, %v143_v26  ;;  %v144_v43 = vld [vmem:[%s10248_s0 + $0x398] sm:$0xff] }
 0x2ff   :  { %v4470_v46 = vmul.f32 %v5865_v6, %v3986_v36  ;;  %v3989_v1 = vpop.xlane.xlu1 %3988  ;;  %4981 = vst.msk [vmem:[%s10255_s8 + $0x60] sm:$0xff] %vm3176_vm3, %v4853_v8  ;;  %v2544_v13 = vadd.f32 %v7837_v53, %v2543_v19  ;;  %v3269_v33 = vpop.xlane.xlu0 %3268 }
 0x300   :  { %5872 = vrcp.f32 %v3989_v1  ;;  %v3591_v17 = vsub.f32 %v7538_v22, %v3269_v33  ;;  %v7995_v36 = vpop.f32.mrf.mxu3  ;;  %v8005_v22 = vld [vmem:[%s10249_s2] ss:$0 sm:$0xff] }
 0x301   :  { %v4598_v3 = vsub.f32 2.0, %v4470_v46  ;;  %v1676_v15 = vpop.f32.mrf.mxu1  ;;  %v7993_v30 = vsel %vm2965_vm9, -1e+10, %v2544_v13 }
 0x302   :  { %v7997_v20 = vpop.eup %5866  ;;  %v3749_v23 = vmul.f32 1.442695, %v3591_v17  ;;  %v1677_v24 = vadd.f32 %v7658_v11, %v1676_v15  ;;  %v805_v29 = vpop.f32.mrf.mxu0  ;;  %v3312_v25 = vsel %vm3176_vm3, %v7993_v30, -inf }
 0x303   :  { %v4726_v58 = vmul.f32 %v5865_v6, %v4598_v3  ;;  %v5869_v35 = vpop.eup %5868  ;;  %v806_v45 = vadd.f32 %v8005_v22, %v805_v29  ;;  %v4032_v47 = vsel %vm3176_vm3, %v7997_v20, 0.0 }
 0x304   :  { %3313 = vmax.xlane.f32.xlu0 %v3312_v25  ;;  %v5871_v10 = vpop.eup %5870  ;;  %5874 = vpow2.f32 %v3749_v23  ;;  %5419 = vmatmul.msk.f32.gmra.mxu2 %vm1085_vm1, %v5869_v35  ;;  %v2839_v25 = vld [vmem:[%s10254_s7 + $0x178] sm:$0xff] }
 0x305   :  { %v4854_v48 = vmul.f32 %v7511_v44, %v4726_v58  ;;  %4033 = vadd.xlane.f32.xlu1 %v4032_v47  ;;  %5876 = vtanh.f32 %v1677_v24  ;;  %5308 = vmatmul.msk.f32.gmra.mxu1 %vm1085_vm1, %v5871_v10  ;;  %v145_v47 = vld [vmem:[%s10248_s0 + $0x3a0] sm:$0xff]  ;;  %vm2967_vm11 = vcmp.eq.f32.partialorder %v2839_v25, 0.0  ;;  %v146_v25 = vld [vmem:[%s10248_s0 + $0x3a8] sm:$0xff] }
 0x306   :  { %v5873_v41 = vpop.eup %5872  ;;  %5878 = vtanh.f32 %v806_v45  ;;  %5197 = vmatmul.msk.f32.gmra.mxu0 %vm163_vm0, %v125_v62  ;;  %v2546_v44 = vpop.f32.mrf.mxu2  ;;  %5216 = vmatmul.msk.f32.gmra.mxu3 %vm163_vm0, %v144_v43 }
 0x307   :  { %4982 = vst.msk [vmem:[%s10255_s8 + $0x68] sm:$0xff] %vm3176_vm3, %v4854_v48  ;;  %v4471_v56 = vmul.f32 %v5873_v41, %v3989_v1  ;;  %v3272_v63 = vpop.xlane.xlu1 %3271  ;;  %v2547_v6 = vadd.f32 %v7837_v53, %v2546_v44  ;;  %v3992_v26 = vpop.xlane.xlu2 %3991 }
 0x308   :  { %v3592_v8 = vsub.f32 %v7568_v52, %v3272_v63  ;;  %5880 = vrcp.f32 %v3992_v26  ;;  %v8032_v1 = vpop.f32.mrf.mxu3 }
 0x309   :  { %v4599_v46 = vsub.f32 2.0, %v4471_v56  ;;  %v1679_v13 = vpop.f32.mrf.mxu1  ;;  %v8030_v33 = vsel %vm2966_vm10, -1e+10, %v2547_v6 }
 0x30a   :  { %v3751_v19 = vmul.f32 1.442695, %v3592_v8  ;;  %v8034_v3 = vpop.eup %5874  ;;  %v1680_v15 = vadd.f32 %v7658_v11, %v1679_v13  ;;  %v808_v58 = vpop.f32.mrf.mxu0  ;;  %v3315_v23 = vsel %vm3176_vm3, %v8030_v33, -inf }
 0x30b   :  { %v4727_v17 = vmul.f32 %v5873_v41, %v4599_v46  ;;  %v5877_v24 = vpop.eup %5876  ;;  %v809_v52 = vadd.f32 %v8005_v22, %v808_v58  ;;  %v4035_v29 = vsel %vm3176_vm3, %v8034_v3, 0.0 }
 0x30c   :  { %5882 = vpow2.f32 %v3751_v19  ;;  %v5879_v35 = vpop.eup %5878  ;;  %5420 = vmatmul.msk.f32.gmra.mxu2 %vm1085_vm1, %v5877_v24  ;;  %4036 = vadd.xlane.f32.xlu2 %v4035_v29  ;;  %v2840_v24 = vld [vmem:[%s10254_s7 + $0x180] sm:$0xff] }
 0x30d   :  { %v4855_v45 = vmul.f32 %v7536_v4, %v4727_v17  ;;  %5884 = vtanh.f32 %v1680_v15  ;;  %3316 = vmax.xlane.f32.xlu1 %v3315_v23  ;;  %5309 = vmatmul.msk.f32.gmra.mxu1 %vm1085_vm1, %v5879_v35  ;;  %vm2968_vm12 = vcmp.eq.f32.partialorder %v2840_v24, 0.0 }
 0x30e   :  { %5886 = vtanh.f32 %v809_v52  ;;  %v5881_v62 = vpop.eup %5880  ;;  %v2549_v34 = vpop.f32.mrf.mxu2  ;;  %5217 = vmatmul.msk.f32.gmra.mxu3 %vm163_vm0, %v145_v47 }
 0x30f   :  { %4983 = vst.msk [vmem:[%s10255_s8 + $0x70] sm:$0xff] %vm3176_vm3, %v4855_v45  ;;  %v3995_v4 = vpop.xlane.xlu0 %3994  ;;  %v4472_v10 = vmul.f32 %v5881_v62, %v3992_v26  ;;  %v2550_v48 = vadd.f32 %v7837_v53, %v2549_v34  ;;  %v3275_v41 = vpop.xlane.xlu2 %3274 }
 0x310   :  { %5888 = vrcp.f32 %v3995_v4  ;;  %v3593_v43 = vsub.f32 %v7593_v27, %v3275_v41  ;;  %v8062_v8 = vpop.f32.mrf.mxu3 }
 0x311   :  { %v4600_v44 = vsub.f32 2.0, %v4472_v10  ;;  %v1682_v63 = vpop.f32.mrf.mxu1  ;;  %v8060_v6 = vsel %vm2967_vm11, -1e+10, %v2550_v48 }
 0x312   :  { %v8058_v56 = vpop.eup %5882  ;;  %v3753_v19 = vmul.f32 1.442695, %v3593_v43  ;;  %v1683_v13 = vadd.f32 %v7658_v11, %v1682_v63  ;;  %v811_v17 = vpop.f32.mrf.mxu0  ;;  %v3318_v15 = vsel %vm3176_vm3, %v8060_v6, -inf }
 0x313   :  { %v5885_v46 = vpop.eup %5884  ;;  %v4038_v26 = vsel %vm3176_vm3, %v8058_v56, 0.0  ;;  %v4728_v58 = vmul.f32 %v5881_v62, %v4600_v44  ;;  %v812_v23 = vadd.f32 %v8005_v22, %v811_v17 }
 0x314   :  { %v5887_v27 = vpop.eup %5886  ;;  %4039 = vadd.xlane.f32.xlu0 %v4038_v26  ;;  %5890 = vpow2.f32 %v3753_v19  ;;  %5421 = vmatmul.msk.f32.gmra.mxu2 %vm1085_vm1, %v5885_v46 }
 0x315   :  { %v4856_v29 = vmul.f32 %v7566_v7, %v4728_v58  ;;  %5892 = vtanh.f32 %v1683_v13  ;;  %3319 = vmax.xlane.f32.xlu2 %v3318_v15  ;;  %5310 = vmatmul.msk.f32.gmra.mxu1 %vm1085_vm1, %v5887_v27  ;;  %v2841_v15 = vld [vmem:[%s10254_s7 + $0x188] sm:$0xff] }
 0x316   :  { %v5889_v52 = vpop.eup %5888  ;;  %5894 = vtanh.f32 %v812_v23  ;;  %v2552_v45 = vpop.f32.mrf.mxu2  ;;  %5218 = vmatmul.msk.f32.gmra.mxu3 %vm163_vm0, %v146_v25  ;;  %vm2969_vm13 = vcmp.eq.f32.partialorder %v2841_v15, 0.0 }
 0x317   :  { %v4473_v35 = vmul.f32 %v5889_v52, %v3995_v4  ;;  %v3278_v47 = vpop.xlane.xlu0 %3277  ;;  %4984 = vst.msk [vmem:[%s10255_s8 + $0x78] sm:$0xff] %vm3176_vm3, %v4856_v29  ;;  %v2553_v7 = vadd.f32 %v7837_v53, %v2552_v45  ;;  %v3998_v62 = vpop.xlane.xlu1 %3997 }
 0x318   :  { %v3594_v34 = vsub.f32 %v7621_v9, %v3278_v47  ;;  %5896 = vrcp.f32 %v3998_v62  ;;  %v8088_v43 = vpop.f32.mrf.mxu3 }
 0x319   :  { %v4601_v10 = vsub.f32 2.0, %v4473_v35  ;;  %v1685_v4 = vpop.f32.mrf.mxu1  ;;  %v8086_v41 = vsel %vm2968_vm12, -1e+10, %v2553_v7 }
 0x31a   :  { %v3755_v48 = vmul.f32 1.442695, %v3594_v34  ;;  %v8090_v44 = vpop.eup %5890  ;;  %v1686_v46 = vadd.f32 %v7658_v11, %v1685_v4  ;;  %v814_v19 = vpop.f32.mrf.mxu0  ;;  %v3321_v13 = vsel %vm3176_vm3, %v8086_v41, -inf  ;;  %v147_v11 = vld [vmem:[%s10248_s0 + $0x3b0] sm:$0xff] }
 0x31b   :  { %v4729_v63 = vmul.f32 %v5889_v52, %v4601_v10  ;;  %v5893_v17 = vpop.eup %5892  ;;  %v815_v9 = vadd.f32 %v8005_v22, %v814_v19  ;;  %v4041_v26 = vsel %vm3176_vm3, %v8090_v44, 0.0 }
 0x31c   :  { %5898 = vpow2.f32 %v3755_v48  ;;  %3322 = vmax.xlane.f32.xlu0 %v3321_v13  ;;  %v5895_v27 = vpop.eup %5894  ;;  %5422 = vmatmul.msk.f32.gmra.mxu2 %vm1085_vm1, %v5893_v17  ;;  %v8127_v13 = vld [vmem:[%s10251_s4] ss:$0 sm:$0xff] }
 0x31d   :  { %v4857_v58 = vmul.f32 %v7591_v50, %v4729_v63  ;;  %5900 = vtanh.f32 %v1686_v46  ;;  %4042 = vadd.xlane.f32.xlu1 %v4041_v26  ;;  %5311 = vmatmul.msk.f32.gmra.mxu1 %vm1085_vm1, %v5895_v27  ;;  %v2842_v26 = vld [vmem:[%s10254_s7 + $0x190] sm:$0xff]  ;;  %v148_v27 = vld [vmem:[%s10248_s0 + $0x3b8] sm:$0xff] }
 0x31e   :  { %5902 = vtanh.f32 %v815_v9  ;;  %v5897_v23 = vpop.eup %5896  ;;  %v2555_v24 = vpop.f32.mrf.mxu2  ;;  %5219 = vmatmul.msk.f32.gmra.mxu3 %vm163_vm0, %v147_v11  ;;  %vm2970_vm14 = vcmp.eq.f32.partialorder %v2842_v26, 0.0 }
 0x31f   :  { %4985 = vst.msk [vmem:[%s10255_s8 + $0x80] sm:$0xff] %vm3176_vm3, %v4857_v58  ;;  %v4474_v50 = vmul.f32 %v5897_v23, %v3998_v62  ;;  %v2556_v52 = vadd.f32 %v7837_v53, %v2555_v24  ;;  %v3281_v29 = vpop.xlane.xlu1 %3280 }
 0x320   :  { %v3595_v25 = vsub.f32 %v7651_v59, %v3281_v29  ;;  %v4001_v35 = vpop.xlane.xlu2 %4000  ;;  %v8118_v34 = vpop.f32.mrf.mxu3 }
 0x321   :  { %v4602_v47 = vsub.f32 2.0, %v4474_v50  ;;  %5904 = vrcp.f32 %v4001_v35  ;;  %v8116_v7 = vsel %vm2969_vm13, -1e+10, %v2556_v52 }
 0x322   :  { %v8114_v45 = vpop.eup %5898  ;;  %v3757_v48 = vmul.f32 1.442695, %v3595_v25  ;;  %v1688_v4 = vpop.f32.mrf.mxu1  ;;  %v3324_v62 = vsel %vm3176_vm3, %v8116_v7, -inf }
 0x323   :  { %v5901_v10 = vpop.eup %5900  ;;  %v817_v63 = vpop.f32.mrf.mxu0  ;;  %v4044_v46 = vsel %vm3176_vm3, %v8114_v45, 0.0  ;;  %v4730_v19 = vmul.f32 %v5897_v23, %v4602_v47  ;;  %v1689_v17 = vadd.f32 %v8127_v13, %v1688_v4 }
 0x324   :  { %v5903_v59 = vpop.eup %5902  ;;  %v818_v9 = vadd.f32 %v8005_v22, %v817_v63  ;;  %4045 = vadd.xlane.f32.xlu2 %v4044_v46  ;;  %5906 = vpow2.f32 %v3757_v48  ;;  %5423 = vmatmul.msk.f32.gmra.mxu2 %vm1085_vm1, %v5901_v10 }
 0x325   :  { %3325 = vmax.xlane.f32.xlu1 %v3324_v62  ;;  %v4858_v15 = vmul.f32 %v7623_v12, %v4730_v19  ;;  %5908 = vtanh.f32 %v1689_v17  ;;  %5312 = vmatmul.msk.f32.gmra.mxu1 %vm1085_vm1, %v5903_v59 }
 0x326   :  { %5910 = vtanh.f32 %v818_v9  ;;  %5220 = vmatmul.msk.f32.gmra.mxu3 %vm163_vm0, %v148_v27  ;;  %v2843_v9 = vld [vmem:[%s10254_s7 + $0x198] sm:$0xff] }
 0x327   :  { %v4004_v58 = vpop.xlane.xlu0 %4003  ;;  %v5905_v11 = vpop.eup %5904  ;;  %4986 = vst.msk [vmem:[%s10255_s8 + $0x88] sm:$0xff] %vm3176_vm3, %v4858_v15  ;;  %v149_v15 = vld [vmem:[%s10248_s0 + $0x3c0] sm:$0xff]  ;;  %vm2971_vm15 = vcmp.eq.f32.partialorder %v2843_v9, 0.0 }
 0x328   :  { %v2558_v23 = vpop.f32.mrf.mxu2  ;;  %5912 = vrcp.f32 %v4004_v58  ;;  %v4475_v12 = vmul.f32 %v5905_v11, %v4001_v35  ;;  %v3284_v50 = vpop.xlane.xlu2 %3283  ;;  %v2844_v9 = vld [vmem:[%s10254_s7 + $0x1a0] sm:$0xff] }
 0x329   :  { %v2559_v24 = vadd.f32 %v7837_v53, %v2558_v23  ;;  %v3596_v52 = vsub.f32 %v7688_v39, %v3284_v50  ;;  %v8147_v29 = vpop.f32.mrf.mxu3  ;;  %vm2972_vm2 = vcmp.eq.f32.partialorder %v2844_v9, 0.0 }
 0x32a   :  { %v8149_v25 = vpop.eup %5906  ;;  %v4603_v47 = vsub.f32 2.0, %v4475_v12  ;;  %v1691_v10 = vpop.f32.mrf.mxu1 }
 0x32b   :  { %v8151_v48 = vsel %vm2970_vm14, -1e+10, %v2559_v24  ;;  %v5909_v4 = vpop.eup %5908  ;;  %v3759_v63 = vmul.f32 1.442695, %v3596_v52  ;;  %v1692_v62 = vadd.f32 %v8127_v13, %v1691_v10  ;;  %v820_v46 = vpop.f32.mrf.mxu0  ;;  %v4047_v35 = vsel %vm3176_vm3, %v8149_v25, 0.0 }
 0x32c   :  { %v3327_v59 = vsel %vm3176_vm3, %v8151_v48, -inf  ;;  %v5911_v39 = vpop.eup %5910  ;;  %v4731_v19 = vmul.f32 %v5905_v11, %v4603_v47  ;;  %v821_v17 = vadd.f32 %v8005_v22, %v820_v46  ;;  %5424 = vmatmul.msk.f32.gmra.mxu2 %vm1085_vm1, %v5909_v4  ;;  %4048 = vadd.xlane.f32.xlu0 %v4047_v35 }
 0x32d   :  { %5914 = vpow2.f32 %v3759_v63  ;;  %3328 = vmax.xlane.f32.xlu2 %v3327_v59  ;;  %5313 = vmatmul.msk.f32.gmra.mxu1 %vm1085_vm1, %v5911_v39 }
 0x32e   :  { %v5913_v26 = vpop.eup %5912  ;;  %v4859_v27 = vmul.f32 %v7653_v14, %v4731_v19  ;;  %5916 = vtanh.f32 %v1692_v62  ;;  %5221 = vmatmul.msk.f32.gmra.mxu3 %vm163_vm0, %v149_v15  ;;  %v150_v15 = vld [vmem:[%s10248_s0 + $0x3c8] sm:$0xff] }
 0x32f   :  { %v4476_v11 = vmul.f32 %v5913_v26, %v4004_v58  ;;  %v3287_v23 = vpop.xlane.xlu0 %3286  ;;  %5918 = vtanh.f32 %v821_v17 }
 0x330   :  { %v2561_v12 = vpop.f32.mrf.mxu2  ;;  %v4007_v24 = vpop.xlane.xlu1 %4006  ;;  %v3597_v50 = vsub.f32 %v7716_v55, %v3287_v23  ;;  %4987 = vst.msk [vmem:[%s10255_s8 + $0x90] sm:$0xff] %vm3176_vm3, %v4859_v27 }
 0x331   :  { %v4604_v52 = vsub.f32 2.0, %v4476_v11  ;;  %v2562_v47 = vadd.f32 %v7837_v53, %v2561_v12  ;;  %5920 = vrcp.f32 %v4007_v24  ;;  %v8175_v58 = vpop.f32.mrf.mxu3 }
 0x332   :  { %v3761_v14 = vmul.f32 1.442695, %v3597_v50  ;;  %v1694_v4 = vpop.f32.mrf.mxu1 }
 0x333   :  { %v4732_v10 = vmul.f32 %v5913_v26, %v4604_v52  ;;  %v8177_v63 = vsel %vm2971_vm15, -1e+10, %v2562_v47  ;;  %v8179_v62 = vpop.eup %5914  ;;  %v1695_v55 = vadd.f32 %v8127_v13, %v1694_v4  ;;  %v823_v46 = vpop.f32.mrf.mxu0 }
 0x334   :  { %5922 = vpow2.f32 %v3761_v14  ;;  %v3330_v35 = vsel %vm3176_vm3, %v8177_v63, -inf  ;;  %v5917_v59 = vpop.eup %5916  ;;  %v824_v19 = vadd.f32 %v8005_v22, %v823_v46  ;;  %v4050_v17 = vsel %vm3176_vm3, %v8179_v62, 0.0 }
 0x335   :  { %v4860_v39 = vmul.f32 %v7686_v0, %v4732_v10  ;;  %3331 = vmax.xlane.f32.xlu0 %v3330_v35  ;;  %v5919_v26 = vpop.eup %5918  ;;  %5924 = vtanh.f32 %v1695_v55  ;;  %5425 = vmatmul.msk.f32.gmra.mxu2 %vm1085_vm1, %v5917_v59 }
 0x336   :  { %4051 = vadd.xlane.f32.xlu1 %v4050_v17  ;;  %5926 = vtanh.f32 %v824_v19  ;;  %5314 = vmatmul.msk.f32.gmra.mxu1 %vm1085_vm1, %v5919_v26  ;;  %v2845_v26 = vld [vmem:[%s10254_s7 + $0x1a8] sm:$0xff] }
 0x337   :  { %v5921_v0 = vpop.eup %5920  ;;  %4988 = vst.msk [vmem:[%s10255_s8 + $0x98] sm:$0xff] %vm3176_vm3, %v4860_v39  ;;  %5222 = vmatmul.msk.f32.gmra.mxu3 %vm163_vm0, %v150_v15  ;;  %v4010_v52 = vpop.xlane.xlu2 %4009  ;;  %vm2973_vm4 = vcmp.eq.f32.partialorder %v2845_v26, 0.0 }
 0x338   :  { %v4477_v27 = vmul.f32 %v5921_v0, %v4007_v24  ;;  %v2564_v11 = vpop.f32.mrf.mxu2  ;;  %v3290_v23 = vpop.xlane.xlu1 %3289  ;;  %5928 = vrcp.f32 %v4010_v52 }
 0x339   :  { %v2565_v12 = vadd.f32 %v7837_v53, %v2564_v11  ;;  %v3598_v50 = vsub.f32 %v7746_v21, %v3290_v23  ;;  %v8205_v10 = vpop.f32.mrf.mxu3 }
 0x33a   :  { %v8203_v47 = vpop.eup %5922  ;;  %v4605_v14 = vsub.f32 2.0, %v4477_v27  ;;  %v1697_v55 = vpop.f32.mrf.mxu1 }
 0x33b   :  { %v3763_v4 = vmul.f32 1.442695, %v3598_v50  ;;  %v8207_v46 = vsel %vm2972_vm2, -1e+10, %v2565_v12  ;;  %v4053_v24 = vsel %vm3176_vm3, %v8203_v47, 0.0  ;;  %v5925_v35 = vpop.eup %5924  ;;  %v1698_v39 = vadd.f32 %v8127_v13, %v1697_v55  ;;  %v826_v19 = vpop.f32.mrf.mxu0 }
 0x33c   :  { %v4733_v59 = vmul.f32 %v5921_v0, %v4605_v14  ;;  %v3333_v21 = vsel %vm3176_vm3, %v8207_v46, -inf  ;;  %4054 = vadd.xlane.f32.xlu2 %v4053_v24  ;;  %v5927_v17 = vpop.eup %5926  ;;  %v827_v9 = vadd.f32 %v8005_v22, %v826_v19  ;;  %v151_v0 = vld [vmem:[%s10248_s0 + $0x3d0] sm:$0xff] }
 0x33d   :  { %5930 = vpow2.f32 %v3763_v4  ;;  %5426 = vmatmul.msk.f32.gmra.mxu2 %vm1085_vm1, %v5925_v35 }
 0x33e   :  { %v4861_v15 = vmul.f32 %v7718_v61, %v4733_v59  ;;  %5932 = vtanh.f32 %v1698_v39  ;;  %3334 = vmax.xlane.f32.xlu1 %v3333_v21  ;;  %5315 = vmatmul.msk.f32.gmra.mxu1 %vm1085_vm1, %v5927_v17  ;;  %v5929_v11 = vpop.eup %5928 }
 0x33f   :  { %5934 = vtanh.f32 %v827_v9  ;;  %v4013_v27 = vpop.xlane.xlu0 %4012  ;;  %5223 = vmatmul.msk.f32.gmra.mxu3 %vm163_vm0, %v151_v0  ;;  %v4478_v23 = vmul.f32 %v5929_v11, %v4010_v52  ;;  %v2846_v0 = vld [vmem:[%s10254_s7 + $0x1b0] sm:$0xff] }
 0x340   :  { %4989 = vst.msk [vmem:[%s10255_s8 + $0xa0] sm:$0xff] %vm3176_vm3, %v4861_v15  ;;  %v2567_v61 = vpop.f32.mrf.mxu2  ;;  %5936 = vrcp.f32 %v4013_v27  ;;  %v3293_v50 = vpop.xlane.xlu2 %3292  ;;  %vm2974_vm5 = vcmp.eq.f32.partialorder %v2846_v0, 0.0 }
 0x341   :  { %v2568_v12 = vadd.f32 %v7837_v53, %v2567_v61  ;;  %v3599_v14 = vsub.f32 %v7778_v42, %v3293_v50  ;;  %v8231_v4 = vpop.f32.mrf.mxu3  ;;  %v4606_v24 = vsub.f32 2.0, %v4478_v23  ;;  %v152_v23 = vld [vmem:[%s10248_s0 + $0x3d8] sm:$0xff] }
 0x342   :  { %v1700_v35 = vpop.f32.mrf.mxu1 }
 0x343   :  { %v8233_v55 = vpop.eup %5930  ;;  %v8235_v59 = vsel %vm2973_vm4, -1e+10, %v2568_v12  ;;  %v3765_v19 = vmul.f32 1.442695, %v3599_v14  ;;  %v1701_v21 = vadd.f32 %v8127_v13, %v1700_v35  ;;  %v829_v17 = vpop.f32.mrf.mxu0  ;;  %v4734_v26 = vmul.f32 %v5929_v11, %v4606_v24 }
 0x344   :  { %v5933_v39 = vpop.eup %5932  ;;  %v4056_v52 = vsel %vm3176_vm3, %v8233_v55, 0.0  ;;  %v3336_v9 = vsel %vm3176_vm3, %v8235_v59, -inf  ;;  %v830_v15 = vadd.f32 %v8005_v22, %v829_v17 }
 0x345   :  { %v5935_v42 = vpop.eup %5934  ;;  %4057 = vadd.xlane.f32.xlu0 %v4056_v52  ;;  %3337 = vmax.xlane.f32.xlu2 %v3336_v9  ;;  %5938 = vpow2.f32 %v3765_v19  ;;  %v4862_v12 = vmul.f32 %v7748_v57, %v4734_v26 }
 0x346   :  { %v5937_v61 = vpop.eup %5936  ;;  %5427 = vmatmul.msk.f32.gmra.mxu2 %vm1085_vm1, %v5933_v39  ;;  %5940 = vtanh.f32 %v1701_v21  ;;  %5316 = vmatmul.msk.f32.gmra.mxu1 %vm1085_vm1, %v5935_v42 }
 0x347   :  { %v4479_v50 = vmul.f32 %v5937_v61, %v4013_v27  ;;  %v3296_v11 = vpop.xlane.xlu0 %3295  ;;  %5224 = vmatmul.msk.f32.gmra.mxu3 %vm163_vm0, %v152_v23  ;;  %5942 = vtanh.f32 %v830_v15  ;;  %4990 = vst.msk [vmem:[%s10255_s8 + $0xa8] sm:$0xff] %vm3176_vm3, %v4862_v12  ;;  %v2847_v23 = vld [vmem:[%s10254_s7 + $0x1b8] sm:$0xff] }
 0x348   :  { %v2570_v14 = vpop.f32.mrf.mxu2  ;;  %v4016_v24 = vpop.xlane.xlu1 %4015  ;;  %v3600_v35 = vsub.f32 %v7806_v38, %v3296_v11  ;;  %vm2975_vm6 = vcmp.eq.f32.partialorder %v2847_v23, 0.0 }
 0x349   :  { %v4607_v39 = vsub.f32 2.0, %v4479_v50  ;;  %v2571_v57 = vadd.f32 %v7837_v53, %v2570_v14  ;;  %5944 = vrcp.f32 %v4016_v24  ;;  %v8259_v19 = vpop.f32.mrf.mxu3  ;;  %v153_v50 = vld [vmem:[%s10248_s0 + $0x3e0] sm:$0xff] }
 0x34a   :  { %v3767_v27 = vmul.f32 1.442695, %v3600_v35  ;;  %v1703_v17 = vpop.f32.mrf.mxu1 }
 0x34b   :  { %v4735_v21 = vmul.f32 %v5937_v61, %v4607_v39  ;;  %v8261_v52 = vsel %vm2974_vm5, -1e+10, %v2571_v57  ;;  %v8263_v9 = vpop.eup %5938  ;;  %v1704_v38 = vadd.f32 %v8127_v13, %v1703_v17  ;;  %v832_v42 = vpop.f32.mrf.mxu0  ;;  %v8288_v39 = vld [vmem:[%s10253_s6] ss:$0 sm:$0xff] }
 0x34c   :  { %5946 = vpow2.f32 %v3767_v27  ;;  %v3339_v26 = vsel %vm3176_vm3, %v8261_v52, -inf  ;;  %v5941_v15 = vpop.eup %5940  ;;  %v833_v0 = vadd.f32 %v8005_v22, %v832_v42  ;;  %v4059_v61 = vsel %vm3176_vm3, %v8263_v9, 0.0 }
 0x34d   :  { %v4863_v53 = vmul.f32 %v7776_v54, %v4735_v21  ;;  %3340 = vmax.xlane.f32.xlu0 %v3339_v26  ;;  %v5943_v12 = vpop.eup %5942  ;;  %5948 = vtanh.f32 %v1704_v38  ;;  %4060 = vadd.xlane.f32.xlu1 %v4059_v61 }
 0x34e   :  { %5428 = vmatmul.msk.f32.gmra.mxu2 %vm1085_vm1, %v5941_v15  ;;  %5950 = vtanh.f32 %v833_v0  ;;  %5317 = vmatmul.msk.f32.gmra.mxu1 %vm1085_vm1, %v5943_v12 }
 0x34f   :  { %v5945_v54 = vpop.eup %5944  ;;  %4991 = vst.msk [vmem:[%s10255_s8 + $0xb0] sm:$0xff] %vm3176_vm3, %v4863_v53  ;;  %5225 = vmatmul.msk.f32.gmra.mxu3 %vm163_vm0, %v153_v50  ;;  %v4019_v21 = vpop.xlane.xlu2 %4018 }
 0x350   :  { %v4480_v11 = vmul.f32 %v5945_v54, %v4016_v24  ;;  %v2573_v14 = vpop.f32.mrf.mxu2  ;;  %v3299_v35 = vpop.xlane.xlu1 %3298  ;;  %5952 = vrcp.f32 %v4019_v21 }
 0x351   :  { %v2574_v57 = vadd.f32 %v8288_v39, %v2573_v14  ;;  %v3601_v27 = vsub.f32 %v7841_v32, %v3299_v35  ;;  %v8294_v42 = vpop.f32.mrf.mxu3  ;;  %v2848_v14 = vld [vmem:[%s10254_s7 + $0x1c0] sm:$0xff] }
 0x352   :  { %v8292_v17 = vpop.eup %5946  ;;  %v4608_v38 = vsub.f32 2.0, %v4480_v11  ;;  %v1706_v26 = vpop.f32.mrf.mxu1  ;;  %vm2976_vm7 = vcmp.eq.f32.partialorder %v2848_v14, 0.0 }
 0x353   :  { %v3769_v24 = vmul.f32 1.442695, %v3601_v27  ;;  %v8296_v15 = vsel %vm2975_vm6, -1e+10, %v2574_v57  ;;  %v4062_v53 = vsel %vm3176_vm3, %v8292_v17, 0.0  ;;  %v5949_v0 = vpop.eup %5948  ;;  %v1707_v23 = vadd.f32 %v8127_v13, %v1706_v26  ;;  %v835_v12 = vpop.f32.mrf.mxu0 }
 0x354   :  { %v4736_v61 = vmul.f32 %v5945_v54, %v4608_v38  ;;  %v3342_v32 = vsel %vm3176_vm3, %v8296_v15, -inf  ;;  %4063 = vadd.xlane.f32.xlu2 %v4062_v53  ;;  %v5951_v50 = vpop.eup %5950  ;;  %v836_v11 = vadd.f32 %v8005_v22, %v835_v12  ;;  %v154_v54 = vld [vmem:[%s10248_s0 + $0x3e8] sm:$0xff] }
 0x355   :  { %5954 = vpow2.f32 %v3769_v24  ;;  %3343 = vmax.xlane.f32.xlu1 %v3342_v32 }
 0x356   :  { %v4864_v35 = vmul.f32 %v7808_v49, %v4736_v61  ;;  %5956 = vtanh.f32 %v1707_v23  ;;  %5429 = vmatmul.msk.f32.gmra.mxu2 %vm1085_vm1, %v5949_v0  ;;  %5318 = vmatmul.msk.f32.gmra.mxu1 %vm1085_vm1, %v5951_v50  ;;  %v5953_v27 = vpop.eup %5952 }
 0x357   :  { %5958 = vtanh.f32 %v836_v11  ;;  %v4022_v57 = vpop.xlane.xlu0 %4021  ;;  %5226 = vmatmul.msk.f32.gmra.mxu3 %vm163_vm0, %v154_v54  ;;  %v4481_v38 = vmul.f32 %v5953_v27, %v4019_v21 }
 0x358   :  { %4992 = vst.msk [vmem:[%s10255_s8 + $0xb8] sm:$0xff] %vm3176_vm3, %v4864_v35  ;;  %v2576_v49 = vpop.f32.mrf.mxu2  ;;  %5960 = vrcp.f32 %v4022_v57  ;;  %v3302_v26 = vpop.xlane.xlu2 %3301 }
 0x359   :  { %v2577_v24 = vadd.f32 %v8288_v39, %v2576_v49  ;;  %v3602_v53 = vsub.f32 %v7873_v31, %v3302_v26  ;;  %v8320_v0 = vpop.f32.mrf.mxu3  ;;  %v4609_v23 = vsub.f32 2.0, %v4481_v38  ;;  %v2849_v38 = vld [vmem:[%s10254_s7 + $0x1c8] sm:$0xff] }
 0x35a   :  { %10256 = vst [vmem:[#allocation2_spill] sm:$0xff] %v8320_v0  ;;  %v1709_v12 = vpop.f32.mrf.mxu1  ;;  %vm2977_vm8 = vcmp.eq.f32.partialorder %v2849_v38, 0.0 }
 0x35b   :  { %v8322_v61 = vpop.eup %5954  ;;  %v8324_v32 = vsel %vm2976_vm7, -1e+10, %v2577_v24  ;;  %v3771_v11 = vmul.f32 1.442695, %v3602_v53  ;;  %v1710_v35 = vadd.f32 %v8127_v13, %v1709_v12  ;;  %v838_v54 = vpop.f32.mrf.mxu0  ;;  %v4737_v49 = vmul.f32 %v5953_v27, %v4609_v23  ;;  %v155_v53 = vld [vmem:[%s10248_s0 + $0x3f0] sm:$0xff] }
 0x35c   :  { %v5957_v50 = vpop.eup %5956  ;;  %v4065_v21 = vsel %vm3176_vm3, %v8322_v61, 0.0  ;;  %v3345_v14 = vsel %vm3176_vm3, %v8324_v32, -inf  ;;  %v839_v26 = vadd.f32 %v8005_v22, %v838_v54 }
 0x35d   :  { %v5959_v31 = vpop.eup %5958  ;;  %4066 = vadd.xlane.f32.xlu0 %v4065_v21  ;;  %3346 = vmax.xlane.f32.xlu2 %v3345_v14  ;;  %5962 = vpow2.f32 %v3771_v11  ;;  %v4865_v12 = vmul.f32 %v7843_v60, %v4737_v49 }
 0x35e   :  { %v5961_v24 = vpop.eup %5960  ;;  %5430 = vmatmul.msk.f32.gmra.mxu2 %vm1085_vm1, %v5957_v50  ;;  %5964 = vtanh.f32 %v1710_v35  ;;  %5319 = vmatmul.msk.f32.gmra.mxu1 %vm1085_vm1, %v5959_v31 }
 0x35f   :  { %v4482_v0 = vmul.f32 %v5961_v24, %v4022_v57  ;;  %v3305_v27 = vpop.xlane.xlu0 %3304  ;;  %5227 = vmatmul.msk.f32.gmra.mxu3 %vm163_vm0, %v155_v53  ;;  %5966 = vtanh.f32 %v839_v26  ;;  %4993 = vst.msk [vmem:[%s10255_s8 + $0xc0] sm:$0xff] %vm3176_vm3, %v4865_v12 }
 0x360   :  { %v2579_v23 = vpop.f32.mrf.mxu2  ;;  %v4025_v54 = vpop.xlane.xlu1 %4024  ;;  %v3603_v11 = vsub.f32 %v7901_v51, %v3305_v27  ;;  %v2850_v27 = vld [vmem:[%s10254_s7 + $0x1d0] sm:$0xff] }
 0x361   :  { %v4610_v50 = vsub.f32 2.0, %v4482_v0  ;;  %v2580_v60 = vadd.f32 %v8288_v39, %v2579_v23  ;;  %5968 = vrcp.f32 %v4025_v54  ;;  %v8348_v35 = vpop.f32.mrf.mxu3  ;;  %vm2978_vm9 = vcmp.eq.f32.partialorder %v2850_v27, 0.0 }
 0x362   :  { %v3773_v57 = vmul.f32 1.442695, %v3603_v11  ;;  %10257 = vst [vmem:[#allocation3_spill] sm:$0xff] %v8348_v35  ;;  %v1712_v14 = vpop.f32.mrf.mxu1  ;;  %v156_v11 = vld [vmem:[%s10248_s0 + $0x3f8] sm:$0xff] }
 0x363   :  { %v4738_v21 = vmul.f32 %v5961_v24, %v4610_v50  ;;  %v8350_v31 = vsel %vm2977_vm8, -1e+10, %v2580_v60  ;;  %v8352_v49 = vpop.eup %5962  ;;  %v1713_v51 = vadd.f32 %v8127_v13, %v1712_v14  ;;  %v841_v26 = vpop.f32.mrf.mxu0 }
 0x364   :  { %5970 = vpow2.f32 %v3773_v57  ;;  %v3348_v38 = vsel %vm3176_vm3, %v8350_v31, -inf  ;;  %v5965_v0 = vpop.eup %5964  ;;  %v842_v12 = vadd.f32 %v8005_v22, %v841_v26  ;;  %v4068_v24 = vsel %vm3176_vm3, %v8352_v49, 0.0 }
 0x365   :  { %v4866_v53 = vmul.f32 %v7871_v18, %v4738_v21  ;;  %3349 = vmax.xlane.f32.xlu0 %v3348_v38  ;;  %v5967_v23 = vpop.eup %5966  ;;  %5972 = vtanh.f32 %v1713_v51  ;;  %4069 = vadd.xlane.f32.xlu1 %v4068_v24 }
 0x366   :  { %5431 = vmatmul.msk.f32.gmra.mxu2 %vm1085_vm1, %v5965_v0  ;;  %5974 = vtanh.f32 %v842_v12  ;;  %5320 = vmatmul.msk.f32.gmra.mxu1 %vm1085_vm1, %v5967_v23 }
 0x367   :  { %v5969_v18 = vpop.eup %5968  ;;  %4994 = vst.msk [vmem:[%s10255_s8 + $0xc8] sm:$0xff] %vm3176_vm3, %v4866_v53  ;;  %5228 = vmatmul.msk.f32.gmra.mxu3 %vm163_vm0, %v156_v11  ;;  %v4028_v51 = vpop.xlane.xlu2 %4027 }
 0x368   :  { %v4483_v50 = vmul.f32 %v5969_v18, %v4025_v54  ;;  %v2582_v60 = vpop.f32.mrf.mxu2  ;;  %v3308_v57 = vpop.xlane.xlu1 %3307  ;;  %5976 = vrcp.f32 %v4028_v51 }
 0x369   :  { %v2583_v21 = vadd.f32 %v8288_v39, %v2582_v60  ;;  %v3604_v14 = vsub.f32 %v7931_v37, %v3308_v57  ;;  %v8378_v0 = vpop.f32.mrf.mxu3 }
 0x36a   :  { %v8376_v26 = vpop.eup %5970  ;;  %v4611_v38 = vsub.f32 2.0, %v4483_v50  ;;  %10258 = vst [vmem:[#allocation4_spill] sm:$0xff] %v8378_v0  ;;  %v1715_v12 = vpop.f32.mrf.mxu1 }
 0x36b   :  { %v3775_v53 = vmul.f32 1.442695, %v3604_v14  ;;  %v8380_v24 = vsel %vm2978_vm9, -1e+10, %v2583_v21  ;;  %v4071_v54 = vsel %vm3176_vm3, %v8376_v26, 0.0  ;;  %v5973_v23 = vpop.eup %5972  ;;  %v1716_v11 = vadd.f32 %v8127_v13, %v1715_v12  ;;  %v844_v60 = vpop.f32.mrf.mxu0  ;;  %v2851_v21 = vld [vmem:[%s10254_s7 + $0x1d8] sm:$0xff] }
 0x36c   :  { %v4739_v27 = vmul.f32 %v5969_v18, %v4611_v38  ;;  %v3351_v37 = vsel %vm3176_vm3, %v8380_v24, -inf  ;;  %4072 = vadd.xlane.f32.xlu2 %v4071_v54  ;;  %v5975_v50 = vpop.eup %5974  ;;  %v845_v57 = vadd.f32 %v8005_v22, %v844_v60  ;;  %vm2979_vm0 = vcmp.eq.f32.partialorder %v2851_v21, 0.0 }
 0x36d   :  { %5978 = vpow2.f32 %v3775_v53  ;;  %3352 = vmax.xlane.f32.xlu1 %v3351_v37 }
 0x36e   :  { %v4867_v14 = vmul.f32 %v7903_v16, %v4739_v27  ;;  %5980 = vtanh.f32 %v1716_v11  ;;  %5432 = vmatmul.msk.f32.gmra.mxu2 %vm1085_vm1, %v5973_v23  ;;  %5321 = vmatmul.msk.f32.gmra.mxu1 %vm1085_vm1, %v5975_v50  ;;  %v5977_v38 = vpop.eup %5976 }
 0x36f   :  { %5982 = vtanh.f32 %v845_v57  ;;  %v4031_v18 = vpop.xlane.xlu0 %4030  ;;  %v4484_v12 = vmul.f32 %v5977_v38, %v4028_v51 }
 0x370   :  { %4995 = vst.msk [vmem:[%s10255_s8 + $0xd0] sm:$0xff] %vm3176_vm3, %v4867_v14  ;;  %v2585_v53 = vpop.f32.mrf.mxu2  ;;  %5984 = vrcp.f32 %v4031_v18  ;;  %v3311_v54 = vpop.xlane.xlu2 %3310 }
 0x371   :  { %v2586_v16 = vadd.f32 %v8288_v39, %v2585_v53  ;;  %v3605_v23 = vsub.f32 %v7963_v2, %v3311_v54  ;;  %v8400_v27 = vpop.f32.mrf.mxu3  ;;  %v4612_v60 = vsub.f32 2.0, %v4484_v12  ;;  %v2852_v12 = vld [vmem:[%s10254_s7 + $0x1e0] sm:$0xff] }
 0x372   :  { %10259 = vst [vmem:[#allocation5_spill] sm:$0xff] %v8400_v27  ;;  %v1718_v37 = vpop.f32.mrf.mxu1  ;;  %vm2980_vm10 = vcmp.eq.f32.partialorder %v2852_v12, 0.0  ;;  %v8437_v12 = vld [vmem:[%s10249_s2] ss:$0 sm:$0xff] }
 0x373   :  { %v8402_v11 = vpop.eup %5978  ;;  %v8404_v50 = vsel %vm2979_vm0, -1e+10, %v2586_v16  ;;  %v3777_v0 = vmul.f32 1.442695, %v3605_v23  ;;  %v1719_v14 = vadd.f32 %v8127_v13, %v1718_v37  ;;  %v847_v35 = vpop.f32.mrf.mxu0  ;;  %v4740_v53 = vmul.f32 %v5977_v38, %v4612_v60 }
 0x374   :  { %v5981_v57 = vpop.eup %5980  ;;  %v4074_v51 = vsel %vm3176_vm3, %v8402_v11, 0.0  ;;  %v3354_v21 = vsel %vm3176_vm3, %v8404_v50, -inf  ;;  %v848_v54 = vadd.f32 %v8005_v22, %v847_v35 }
 0x375   :  { %v5983_v2 = vpop.eup %5982  ;;  %4075 = vadd.xlane.f32.xlu0 %v4074_v51  ;;  %3355 = vmax.xlane.f32.xlu2 %v3354_v21  ;;  %5986 = vpow2.f32 %v3777_v0  ;;  %v4868_v23 = vmul.f32 %v7933_v40, %v4740_v53 }
 0x376   :  { %v5985_v16 = vpop.eup %5984  ;;  %5433 = vmatmul.msk.f32.gmra.mxu2 %vm1085_vm1, %v5981_v57  ;;  %5988 = vtanh.f32 %v1719_v14  ;;  %5322 = vmatmul.msk.f32.gmra.mxu1 %vm1085_vm1, %v5983_v2 }
 0x377   :  { %v4485_v37 = vmul.f32 %v5985_v16, %v4031_v18  ;;  %v3314_v27 = vpop.xlane.xlu0 %3313  ;;  %5990 = vtanh.f32 %v848_v54  ;;  %4996 = vst.msk [vmem:[%s10255_s8 + $0xd8] sm:$0xff] %vm3176_vm3, %v4868_v23 }
 0x378   :  { %v2588_v38 = vpop.f32.mrf.mxu2  ;;  %v4034_v22 = vpop.xlane.xlu1 %4033  ;;  %v3606_v35 = vsub.f32 %v7993_v30, %v3314_v27 }
 0x379   :  { %v4613_v0 = vsub.f32 2.0, %v4485_v37  ;;  %v2589_v60 = vadd.f32 %v8288_v39, %v2588_v38  ;;  %5992 = vrcp.f32 %v4034_v22  ;;  %v8426_v51 = vpop.f32.mrf.mxu3  ;;  %v2853_v37 = vld [vmem:[%s10254_s7 + $0x1e8] sm:$0xff] }
 0x37a   :  { %v3779_v40 = vmul.f32 1.442695, %v3606_v35  ;;  %v1721_v57 = vpop.f32.mrf.mxu1  ;;  %vm2981_vm11 = vcmp.eq.f32.partialorder %v2853_v37, 0.0 }
 0x37b   :  { %v4741_v18 = vmul.f32 %v5985_v16, %v4613_v0  ;;  %v8424_v14 = vsel %vm2980_vm10, -1e+10, %v2589_v60  ;;  %v8428_v21 = vpop.eup %5986  ;;  %v1722_v30 = vadd.f32 %v8127_v13, %v1721_v57  ;;  %v850_v27 = vpop.f32.mrf.mxu0 }
 0x37c   :  { %5994 = vpow2.f32 %v3779_v40  ;;  %v3357_v2 = vsel %vm3176_vm3, %v8424_v14, -inf  ;;  %v5989_v53 = vpop.eup %5988  ;;  %v851_v16 = vadd.f32 %v8437_v12, %v850_v27  ;;  %v4077_v23 = vsel %vm3176_vm3, %v8428_v21, 0.0 }
 0x37d   :  { %v4869_v54 = vmul.f32 %v7961_v28, %v4741_v18  ;;  %3358 = vmax.xlane.f32.xlu0 %v3357_v2  ;;  %v5991_v38 = vpop.eup %5990  ;;  %5996 = vtanh.f32 %v1722_v30  ;;  %4078 = vadd.xlane.f32.xlu1 %v4077_v23 }
 0x37e   :  { %5434 = vmatmul.msk.f32.gmra.mxu2 %vm1085_vm1, %v5989_v53  ;;  %5998 = vtanh.f32 %v851_v16  ;;  %5323 = vmatmul.msk.f32.gmra.mxu1 %vm1085_vm1, %v5991_v38 }
 0x37f   :  { %v5993_v28 = vpop.eup %5992  ;;  %4997 = vst.msk [vmem:[%s10255_s8 + $0xe0] sm:$0xff] %vm3176_vm3, %v4869_v54  ;;  %v4037_v57 = vpop.xlane.xlu2 %4036 }
 0x380   :  { %v4486_v35 = vmul.f32 %v5993_v28, %v4034_v22  ;;  %v2591_v0 = vpop.f32.mrf.mxu2  ;;  %v3317_v60 = vpop.xlane.xlu1 %3316  ;;  %6000 = vrcp.f32 %v4037_v57 }
 0x381   :  { %v2592_v40 = vadd.f32 %v8288_v39, %v2591_v0  ;;  %v3607_v18 = vsub.f32 %v8030_v33, %v3317_v60  ;;  %v2854_v60 = vld [vmem:[%s10254_s7 + $0x1f0] sm:$0xff] }
 0x382   :  { %v8453_v30 = vpop.eup %5994  ;;  %v4614_v27 = vsub.f32 2.0, %v4486_v35  ;;  %v1724_v53 = vpop.f32.mrf.mxu1  ;;  %vm2982_vm12 = vcmp.eq.f32.partialorder %v2854_v60, 0.0 }
 0x383   :  { %v3781_v2 = vmul.f32 1.442695, %v3607_v18  ;;  %v8455_v23 = vsel %vm2981_vm11, -1e+10, %v2592_v40  ;;  %v4080_v54 = vsel %vm3176_vm3, %v8453_v30, 0.0  ;;  %v5997_v22 = vpop.eup %5996  ;;  %v1725_v37 = vadd.f32 %v8127_v13, %v1724_v53  ;;  %v853_v38 = vpop.f32.mrf.mxu0 }
 0x384   :  { %v4742_v16 = vmul.f32 %v5993_v28, %v4614_v27  ;;  %v3360_v33 = vsel %vm3176_vm3, %v8455_v23, -inf  ;;  %4081 = vadd.xlane.f32.xlu2 %v4080_v54  ;;  %v5999_v0 = vpop.eup %5998  ;;  %v854_v35 = vadd.f32 %v8437_v12, %v853_v38  ;;  %v8466_v40 = vpop.f32.mrf.mxu3 }
 0x385   :  { %6002 = vpow2.f32 %v3781_v2  ;;  %10260 = vst [vmem:[#allocation6_spill] sm:$0xff] %v8466_v40  ;;  %3361 = vmax.xlane.f32.xlu1 %v3360_v33 }
 0x386   :  { %v4870_v18 = vmul.f32 %v7997_v20, %v4742_v16  ;;  %6004 = vtanh.f32 %v1725_v37  ;;  %5435 = vmatmul.msk.f32.gmra.mxu2 %vm1085_vm1, %v5997_v22  ;;  %5324 = vmatmul.msk.f32.gmra.mxu1 %vm1085_vm1, %v5999_v0  ;;  %v6001_v27 = vpop.eup %6000  ;;  %v857_v37 = vadd.f32 %v8437_v12, %v7965_v5  ;;  %v2855_v5 = vld [vmem:[%s10254_s7 + $0x1f8] sm:$0xff] }
 0x387   :  { %6006 = vtanh.f32 %v854_v35  ;;  %v4040_v28 = vpop.xlane.xlu0 %4039  ;;  %v4487_v53 = vmul.f32 %v6001_v27, %v4037_v57  ;;  %vm2983_vm13 = vcmp.eq.f32.partialorder %v2855_v5, 0.0 }
 0x388   :  { %4998 = vst.msk [vmem:[%s10255_s8 + $0xe8] sm:$0xff] %vm3176_vm3, %v4870_v18  ;;  %v2594_v2 = vpop.f32.mrf.mxu2  ;;  %6008 = vrcp.f32 %v4040_v28  ;;  %v3320_v54 = vpop.xlane.xlu2 %3319 }
 0x389   :  { %v2595_v20 = vadd.f32 %v8288_v39, %v2594_v2  ;;  %v3608_v22 = vsub.f32 %v8060_v6, %v3320_v54  ;;  %v4615_v38 = vsub.f32 2.0, %v4487_v53 }
 0x38a   :  { %v1727_v33 = vpop.f32.mrf.mxu1 }
 0x38b   :  { %v8477_v16 = vpop.eup %6002  ;;  %v8481_v0 = vsel %vm2982_vm12, -1e+10, %v2595_v20  ;;  %v3783_v18 = vmul.f32 1.442695, %v3608_v22  ;;  %v1728_v40 = vadd.f32 %v8127_v13, %v1727_v33  ;;  %v4743_v2 = vmul.f32 %v6001_v27, %v4615_v38 }
 0x38c   :  { %v6005_v35 = vpop.eup %6004  ;;  %v4083_v57 = vsel %vm3176_vm3, %v8477_v16, 0.0  ;;  %v3363_v60 = vsel %vm3176_vm3, %v8481_v0, -inf  ;;  %v8494_v33 = vpop.f32.mrf.mxu3 }
 0x38d   :  { %v6007_v6 = vpop.eup %6006  ;;  %4084 = vadd.xlane.f32.xlu0 %v4083_v57  ;;  %3364 = vmax.xlane.f32.xlu2 %v3363_v60  ;;  %6010 = vpow2.f32 %v3783_v18  ;;  %v4871_v20 = vmul.f32 %v8034_v3, %v4743_v2 }
 0x38e   :  { %v6009_v53 = vpop.eup %6008  ;;  %5436 = vmatmul.msk.f32.gmra.mxu2 %vm1085_vm1, %v6005_v35  ;;  %5325 = vmatmul.msk.f32.vlgmr.msrb.gmra.mxu3 %vm1085_vm1, %v6007_v6  ;;  %6012 = vtanh.f32 %v1728_v40  ;;  %v860_v40 = vadd.f32 %v8437_v12, %v7995_v36  ;;  %v2856_v36 = vld [vmem:[%s10254_s7 + $0x200] sm:$0xff] }
 0x38f   :  { %v4488_v54 = vmul.f32 %v6009_v53, %v4040_v28  ;;  %v3323_v22 = vpop.xlane.xlu0 %3322  ;;  %6014 = vtanh.f32 %v857_v37  ;;  %4999 = vst.msk [vmem:[%s10255_s8 + $0xf0] sm:$0xff] %vm3176_vm3, %v4871_v20  ;;  %vm2984_vm14 = vcmp.eq.f32.partialorder %v2856_v36, 0.0 }
 0x390   :  { %v2597_v27 = vpop.f32.mrf.mxu2  ;;  %v4043_v38 = vpop.xlane.xlu1 %4042  ;;  %v3609_v57 = vsub.f32 %v8086_v41, %v3323_v22 }
 0x391   :  { %v4616_v35 = vsub.f32 2.0, %v4488_v54  ;;  %v2598_v18 = vadd.f32 %v8288_v39, %v2597_v27  ;;  %6016 = vrcp.f32 %v4043_v38 }
 0x392   :  { %v3785_v3 = vmul.f32 1.442695, %v3609_v57  ;;  %v1730_v37 = vpop.f32.mrf.mxu1 }
 0x393   :  { %v4744_v28 = vmul.f32 %v6009_v53, %v4616_v35  ;;  %v8504_v60 = vsel %vm2983_vm13, -1e+10, %v2598_v18  ;;  %v8506_v6 = vpop.eup %6010  ;;  %v1731_v41 = vadd.f32 %v8127_v13, %v1730_v37 }
 0x394   :  { %6018 = vpow2.f32 %v3785_v3  ;;  %v3366_v2 = vsel %vm3176_vm3, %v8504_v60, -inf  ;;  %v6013_v5 = vpop.eup %6012  ;;  %v4086_v54 = vsel %vm3176_vm3, %v8506_v6, 0.0 }
 0x395   :  { %v4872_v20 = vmul.f32 %v8058_v56, %v4744_v28  ;;  %3367 = vmax.xlane.f32.xlu0 %v3366_v2  ;;  %v6015_v53 = vpop.eup %6014  ;;  %6020 = vtanh.f32 %v1731_v41  ;;  %4087 = vadd.xlane.f32.xlu1 %v4086_v54  ;;  %v8525_v28 = vpop.f32.mrf.mxu3  ;;  %v863_v54 = vadd.f32 %v8437_v12, %v8032_v1 }
 0x396   :  { %5437 = vmatmul.msk.f32.gmra.mxu2 %vm1085_vm1, %v6013_v5  ;;  %6022 = vtanh.f32 %v860_v40  ;;  %5326 = vmatmul.msk.f32.gmra.mxu3 %vm1085_vm1, %v6015_v53 }
 0x397   :  { %v6017_v22 = vpop.eup %6016  ;;  %5000 = vst.msk [vmem:[%s10255_s8 + $0xf8] sm:$0xff] %vm3176_vm3, %v4872_v20  ;;  %v4046_v56 = vpop.xlane.xlu2 %4045 }
 0x398   :  { %v4489_v27 = vmul.f32 %v6017_v22, %v4043_v38  ;;  %v2600_v57 = vpop.f32.mrf.mxu2  ;;  %v3326_v35 = vpop.xlane.xlu1 %3325  ;;  %6024 = vrcp.f32 %v4046_v56 }
 0x399   :  { %v2601_v18 = vadd.f32 %v8288_v39, %v2600_v57  ;;  %v3610_v3 = vsub.f32 %v8116_v7, %v3326_v35 }
 0x39a   :  { %v8527_v40 = vpop.eup %6018  ;;  %v4617_v37 = vsub.f32 2.0, %v4489_v27  ;;  %v1733_v2 = vpop.f32.mrf.mxu1  ;;  %v2857_v27 = vld [vmem:[%s10254_s7 + $0x208] sm:$0xff] }
 0x39b   :  { %v3787_v41 = vmul.f32 1.442695, %v3610_v3  ;;  %v8529_v5 = vsel %vm2984_vm14, -1e+10, %v2601_v18  ;;  %v4089_v38 = vsel %vm3176_vm3, %v8527_v40, 0.0  ;;  %v6021_v20 = vpop.eup %6020  ;;  %v1734_v53 = vadd.f32 %v8127_v13, %v1733_v2 }
 0x39c   :  { %v4745_v36 = vmul.f32 %v6017_v22, %v4617_v37  ;;  %v3369_v7 = vsel %vm3176_vm3, %v8529_v5, -inf  ;;  %4090 = vadd.xlane.f32.xlu2 %v4089_v38  ;;  %v6023_v57 = vpop.eup %6022  ;;  %vm2985_vm15 = vcmp.eq.f32.partialorder %v2857_v27, 0.0 }
 0x39d   :  { %6026 = vpow2.f32 %v3787_v41  ;;  %3370 = vmax.xlane.f32.xlu1 %v3369_v7 }
 0x39e   :  { %v6025_v35 = vpop.eup %6024  ;;  %v4873_v18 = vmul.f32 %v8090_v44, %v4745_v36  ;;  %6028 = vtanh.f32 %v1734_v53  ;;  %5438 = vmatmul.msk.f32.gmra.mxu2 %vm1085_vm1, %v6021_v20  ;;  %5327 = vmatmul.msk.f32.gmra.mxu3 %vm1085_vm1, %v6023_v57  ;;  %v8556_v36 = vpop.f32.mrf.mxu3  ;;  %v8561_v57 = vld [vmem:[%s10251_s4] ss:$0 sm:$0xff] }
 0x39f   :  { %v4490_v1 = vmul.f32 %v6025_v35, %v4046_v56  ;;  %6030 = vtanh.f32 %v863_v54  ;;  %v4049_v22 = vpop.xlane.xlu0 %4048  ;;  %v866_v56 = vadd.f32 %v8437_v12, %v8062_v8 }
 0x3a0   :  { %5001 = vst.msk [vmem:[%s10255_s8 + $0x100] sm:$0xff] %vm3176_vm3, %v4873_v18  ;;  %v2603_v13 = vpop.f32.mrf.mxu2  ;;  %v3329_v44 = vpop.xlane.xlu2 %3328  ;;  %6032 = vrcp.f32 %v4049_v22  ;;  %v2858_v18 = vld [vmem:[%s10254_s7 + $0x210] sm:$0xff] }
 0x3a1   :  { %v4618_v3 = vsub.f32 2.0, %v4490_v1  ;;  %v2604_v37 = vadd.f32 %v8288_v39, %v2603_v13  ;;  %v3611_v41 = vsub.f32 %v8151_v48, %v3329_v44  ;;  %vm2986_vm2 = vcmp.eq.f32.partialorder %v2858_v18, 0.0 }
 0x3a2   :  { %v1736_v20 = vpop.f32.mrf.mxu1 }
 0x3a3   :  { %v8550_v2 = vpop.eup %6026  ;;  %v4746_v38 = vmul.f32 %v6025_v35, %v4618_v3  ;;  %v8554_v54 = vsel %vm2985_vm15, -1e+10, %v2604_v37  ;;  %v3789_v7 = vmul.f32 1.442695, %v3611_v41  ;;  %v1737_v48 = vadd.f32 %v8561_v57, %v1736_v20 }
 0x3a4   :  { %v6029_v53 = vpop.eup %6028  ;;  %v4092_v27 = vsel %vm3176_vm3, %v8550_v2, 0.0  ;;  %v3372_v8 = vsel %vm3176_vm3, %v8554_v54, -inf }
 0x3a5   :  { %v4874_v35 = vmul.f32 %v8114_v45, %v4746_v38  ;;  %4093 = vadd.xlane.f32.xlu0 %v4092_v27  ;;  %3373 = vmax.xlane.f32.xlu2 %v3372_v8  ;;  %v6031_v1 = vpop.eup %6030  ;;  %6034 = vpow2.f32 %v3789_v7 }
 0x3a6   :  { %5439 = vmatmul.msk.f32.gmra.mxu2 %vm1085_vm1, %v6029_v53  ;;  %v6033_v13 = vpop.eup %6032  ;;  %6036 = vtanh.f32 %v1737_v48  ;;  %5328 = vmatmul.msk.f32.gmra.mxu3 %vm1085_vm1, %v6031_v1  ;;  %v869_v53 = vadd.f32 %v8437_v12, %v8088_v43  ;;  %v2859_v43 = vld [vmem:[%s10254_s7 + $0x218] sm:$0xff]  ;;  %v8594_v1 = vpop.f32.mrf.mxu3 }
 0x3a7   :  { %5002 = vst.msk [vmem:[%s10255_s8 + $0x108] sm:$0xff] %vm3176_vm3, %v4874_v35  ;;  %6038 = vtanh.f32 %v866_v56  ;;  %v4491_v45 = vmul.f32 %v6033_v13, %v4049_v22  ;;  %vm2987_vm4 = vcmp.eq.f32.partialorder %v2859_v43, 0.0 }
 0x3a8   :  { %v2606_v3 = vpop.f32.mrf.mxu2  ;;  %v3332_v37 = vpop.xlane.xlu0 %3331 }
 0x3a9   :  { %v2607_v44 = vadd.f32 %v8288_v39, %v2606_v3  ;;  %v4052_v41 = vpop.xlane.xlu1 %4051  ;;  %v3612_v38 = vsub.f32 %v8177_v63, %v3332_v37  ;;  %v4619_v20 = vsub.f32 2.0, %v4491_v45 }
 0x3aa   :  { %6040 = vrcp.f32 %v4052_v41  ;;  %v1739_v27 = vpop.f32.mrf.mxu1 }
 0x3ab   :  { %v3791_v7 = vmul.f32 1.442695, %v3612_v38  ;;  %v8582_v48 = vsel %vm2986_vm2, -1e+10, %v2607_v44  ;;  %v8584_v8 = vpop.eup %6034  ;;  %v4747_v22 = vmul.f32 %v6033_v13, %v4619_v20  ;;  %v1740_v56 = vadd.f32 %v8561_v57, %v1739_v27 }
 0x3ac   :  { %v3375_v35 = vsel %vm3176_vm3, %v8582_v48, -inf  ;;  %v6037_v18 = vpop.eup %6036  ;;  %v4095_v63 = vsel %vm3176_vm3, %v8584_v8, 0.0 }
 0x3ad   :  { %6042 = vpow2.f32 %v3791_v7  ;;  %3376 = vmax.xlane.f32.xlu0 %v3375_v35  ;;  %v6039_v45 = vpop.eup %6038  ;;  %v4875_v13 = vmul.f32 %v8149_v25, %v4747_v22  ;;  %4096 = vadd.xlane.f32.xlu1 %v4095_v63  ;;  %v872_v35 = vadd.f32 %v8437_v12, %v8118_v34  ;;  %v2860_v34 = vld [vmem:[%s10254_s7 + $0x220] sm:$0xff] }
 0x3ae   :  { %6044 = vtanh.f32 %v1740_v56  ;;  %5440 = vmatmul.msk.f32.gmra.mxu2 %vm1085_vm1, %v6037_v18  ;;  %5329 = vmatmul.msk.f32.gmra.mxu3 %vm1085_vm1, %v6039_v45  ;;  %vm2988_vm5 = vcmp.eq.f32.partialorder %v2860_v34, 0.0 }
 0x3af   :  { %6046 = vtanh.f32 %v869_v53  ;;  %v4055_v3 = vpop.xlane.xlu2 %4054  ;;  %5003 = vst.msk [vmem:[%s10255_s8 + $0x110] sm:$0xff] %vm3176_vm3, %v4875_v13 }
 0x3b0   :  { %v6041_v37 = vpop.eup %6040  ;;  %v2609_v44 = vpop.f32.mrf.mxu2  ;;  %6048 = vrcp.f32 %v4055_v3 }
 0x3b1   :  { %v4492_v38 = vmul.f32 %v6041_v37, %v4052_v41  ;;  %v2610_v25 = vadd.f32 %v8288_v39, %v2609_v44  ;;  %v3335_v20 = vpop.xlane.xlu1 %3334 }
 0x3b2   :  { %v3613_v7 = vsub.f32 %v8207_v46, %v3335_v20  ;;  %v8622_v20 = vpop.f32.mrf.mxu3 }
 0x3b3   :  { %v8605_v27 = vpop.eup %6042  ;;  %v4620_v53 = vsub.f32 2.0, %v4492_v38  ;;  %v8607_v22 = vsel %vm2987_vm4, -1e+10, %v2610_v25  ;;  %v1742_v63 = vpop.f32.mrf.mxu1 }
 0x3b4   :  { %v6045_v56 = vpop.eup %6044  ;;  %v3793_v18 = vmul.f32 1.442695, %v3613_v7  ;;  %v3378_v43 = vsel %vm3176_vm3, %v8607_v22, -inf  ;;  %v4098_v41 = vsel %vm3176_vm3, %v8605_v27, 0.0  ;;  %v1743_v46 = vadd.f32 %v8561_v57, %v1742_v63 }
 0x3b5   :  { %v6047_v45 = vpop.eup %6046  ;;  %v4748_v13 = vmul.f32 %v6041_v37, %v4620_v53  ;;  %4099 = vadd.xlane.f32.xlu2 %v4098_v41  ;;  %3379 = vmax.xlane.f32.xlu1 %v3378_v43 }
 0x3b6   :  { %v6049_v44 = vpop.eup %6048  ;;  %6050 = vpow2.f32 %v3793_v18  ;;  %5441 = vmatmul.msk.f32.gmra.mxu2 %vm1085_vm1, %v6045_v56  ;;  %5330 = vmatmul.msk.f32.gmra.mxu3 %vm1085_vm1, %v6047_v45 }
 0x3b7   :  { %v4876_v38 = vmul.f32 %v8179_v62, %v4748_v13  ;;  %v4493_v25 = vmul.f32 %v6049_v44, %v4055_v3  ;;  %6052 = vtanh.f32 %v1743_v46 }
 0x3b8   :  { %6054 = vtanh.f32 %v872_v35  ;;  %v3338_v37 = vpop.xlane.xlu2 %3337  ;;  %v4058_v7 = vpop.xlane.xlu0 %4057  ;;  %v875_v35 = vadd.f32 %v8437_v12, %v8147_v29  ;;  %v2861_v29 = vld [vmem:[%s10254_s7 + $0x228] sm:$0xff] }
 0x3b9   :  { %5004 = vst.msk [vmem:[%s10255_s8 + $0x118] sm:$0xff] %vm3176_vm3, %v4876_v38  ;;  %v4621_v53 = vsub.f32 2.0, %v4493_v25  ;;  %v2612_v56 = vpop.f32.mrf.mxu2  ;;  %v3614_v18 = vsub.f32 %v8235_v59, %v3338_v37  ;;  %6056 = vrcp.f32 %v4058_v7  ;;  %vm2989_vm6 = vcmp.eq.f32.partialorder %v2861_v29, 0.0 }
 0x3ba   :  { %v2613_v62 = vadd.f32 %v8288_v39, %v2612_v56 }
 0x3bb   :  { %v4749_v3 = vmul.f32 %v6049_v44, %v4621_v53  ;;  %v3795_v63 = vmul.f32 1.442695, %v3614_v18  ;;  %v1745_v41 = vpop.f32.mrf.mxu1 }
 0x3bc   :  { %v8630_v43 = vpop.eup %6050  ;;  %v8634_v45 = vsel %vm2988_vm5, -1e+10, %v2613_v62  ;;  %v1746_v59 = vadd.f32 %v8561_v57, %v1745_v41  ;;  %v878_v62 = vadd.f32 %v8437_v12, %v8175_v58  ;;  %v8655_v41 = vpop.f32.mrf.mxu3 }
 0x3bd   :  { %v6053_v13 = vpop.eup %6052  ;;  %v4877_v46 = vmul.f32 %v8203_v47, %v4749_v3  ;;  %6058 = vpow2.f32 %v3795_v63  ;;  %v4101_v34 = vsel %vm3176_vm3, %v8630_v43, 0.0  ;;  %v3381_v44 = vsel %vm3176_vm3, %v8634_v45, -inf }
 0x3be   :  { %v6055_v38 = vpop.eup %6054  ;;  %5442 = vmatmul.msk.f32.gmra.mxu2 %vm1085_vm1, %v6053_v13  ;;  %4102 = vadd.xlane.f32.xlu0 %v4101_v34  ;;  %6060 = vtanh.f32 %v1746_v59 }
 0x3bf   :  { %v6057_v25 = vpop.eup %6056  ;;  %5005 = vst.msk [vmem:[%s10255_s8 + $0x120] sm:$0xff] %vm3176_vm3, %v4877_v46  ;;  %3382 = vmax.xlane.f32.xlu2 %v3381_v44  ;;  %5331 = vmatmul.msk.f32.gmra.mxu3 %vm1085_vm1, %v6055_v38  ;;  %6062 = vtanh.f32 %v875_v35 }
 0x3c0   :  { %v4494_v47 = vmul.f32 %v6057_v25, %v4058_v7  ;;  %v3341_v37 = vpop.xlane.xlu0 %3340  ;;  %v4061_v56 = vpop.xlane.xlu1 %4060 }
 0x3c1   :  { %v2615_v53 = vpop.f32.mrf.mxu2  ;;  %v3615_v18 = vsub.f32 %v8261_v52, %v3341_v37  ;;  %6064 = vrcp.f32 %v4061_v56 }
 0x3c2   :  { %v4622_v3 = vsub.f32 2.0, %v4494_v47  ;;  %v2616_v63 = vadd.f32 %v8288_v39, %v2615_v53 }
 0x3c3   :  { %v8657_v13 = vpop.eup %6058  ;;  %v3797_v46 = vmul.f32 1.442695, %v3615_v18  ;;  %v1748_v7 = vpop.f32.mrf.mxu1 }
 0x3c4   :  { %v4750_v35 = vmul.f32 %v6057_v25, %v4622_v3  ;;  %v8659_v59 = vsel %vm2989_vm6, -1e+10, %v2616_v63  ;;  %v4104_v52 = vsel %vm3176_vm3, %v8657_v13, 0.0  ;;  %v6061_v34 = vpop.eup %6060  ;;  %v1749_v58 = vadd.f32 %v8561_v57, %v1748_v7  ;;  %v2862_v25 = vld [vmem:[%s10254_s7 + $0x230] sm:$0xff] }
 0x3c5   :  { %6066 = vpow2.f32 %v3797_v46  ;;  %v3384_v38 = vsel %vm3176_vm3, %v8659_v59, -inf  ;;  %4105 = vadd.xlane.f32.xlu1 %v4104_v52  ;;  %v6063_v44 = vpop.eup %6062  ;;  %vm2990_vm7 = vcmp.eq.f32.partialorder %v2862_v25, 0.0  ;;  %v881_v7 = vadd.f32 %v8437_v12, %v8205_v10  ;;  %v2863_v10 = vld [vmem:[%s10254_s7 + $0x238] sm:$0xff] }
 0x3c6   :  { %6068 = vtanh.f32 %v878_v62  ;;  %v4878_v29 = vmul.f32 %v8233_v55, %v4750_v35  ;;  %5443 = vmatmul.msk.f32.gmra.mxu2 %vm1085_vm1, %v6061_v34  ;;  %3385 = vmax.xlane.f32.xlu0 %v3384_v38  ;;  %v8686_v38 = vpop.f32.mrf.mxu3  ;;  %vm2991_vm8 = vcmp.eq.f32.partialorder %v2863_v10, 0.0 }
 0x3c7   :  { %6070 = vtanh.f32 %v1749_v58  ;;  %5332 = vmatmul.msk.f32.gmra.mxu3 %vm1085_vm1, %v6063_v44  ;;  %v4064_v47 = vpop.xlane.xlu2 %4063  ;;  %v6065_v37 = vpop.eup %6064 }
 0x3c8   :  { %5006 = vst.msk [vmem:[%s10255_s8 + $0x128] sm:$0xff] %vm3176_vm3, %v4878_v29  ;;  %6072 = vrcp.f32 %v4064_v47  ;;  %v4495_v53 = vmul.f32 %v6065_v37, %v4061_v56  ;;  %v3344_v18 = vpop.xlane.xlu1 %3343 }
 0x3c9   :  { %v2618_v55 = vpop.f32.mrf.mxu2  ;;  %v3616_v3 = vsub.f32 %v8296_v15, %v3344_v18 }
 0x3ca   :  { %v2619_v62 = vadd.f32 %v8288_v39, %v2618_v55  ;;  %v4623_v46 = vsub.f32 2.0, %v4495_v53 }
 0x3cb   :  { %v8678_v63 = vpop.eup %6066  ;;  %v3799_v52 = vmul.f32 1.442695, %v3616_v3  ;;  %v1751_v34 = vpop.f32.mrf.mxu1 }
 0x3cc   :  { %v6069_v35 = vpop.eup %6068  ;;  %v8682_v58 = vsel %vm2990_vm7, -1e+10, %v2619_v62  ;;  %v4107_v56 = vsel %vm3176_vm3, %v8678_v63, 0.0  ;;  %v4751_v39 = vmul.f32 %v6065_v37, %v4623_v46  ;;  %v1752_v15 = vadd.f32 %v8561_v57, %v1751_v34 }
 0x3cd   :  { %v6071_v44 = vpop.eup %6070  ;;  %v3387_v29 = vsel %vm3176_vm3, %v8682_v58, -inf  ;;  %4108 = vadd.xlane.f32.xlu2 %v4107_v56  ;;  %6074 = vpow2.f32 %v3799_v52  ;;  %v884_v34 = vadd.f32 %v8437_v12, %v8231_v4  ;;  %v2864_v4 = vld [vmem:[%s10254_s7 + $0x240] sm:$0xff] }
 0x3ce   :  { %v6073_v25 = vpop.eup %6072  ;;  %5444 = vmatmul.msk.f32.gmra.mxu2 %vm1085_vm1, %v6071_v44  ;;  %3388 = vmax.xlane.f32.xlu1 %v3387_v29  ;;  %v4879_v53 = vmul.f32 %v8263_v9, %v4751_v39  ;;  %6076 = vtanh.f32 %v1752_v15  ;;  %v8705_v9 = vld [vmem:[%s10253_s6] ss:$0 sm:$0xff]  ;;  %vm2992_vm9 = vcmp.eq.f32.partialorder %v2864_v4, 0.0  ;;  %v2865_v4 = vld [vmem:[%s10254_s7 + $0x248] sm:$0xff] }
 0x3cf   :  { %v4496_v55 = vmul.f32 %v6073_v25, %v4064_v47  ;;  %5333 = vmatmul.msk.f32.gmra.mxu3 %vm1085_vm1, %v6069_v35  ;;  %6078 = vtanh.f32 %v881_v7  ;;  %vm2993_vm0 = vcmp.eq.f32.partialorder %v2865_v4, 0.0 }
 0x3d0   :  { %v3347_v37 = vpop.xlane.xlu2 %3346  ;;  %v4067_v18 = vpop.xlane.xlu0 %4066  ;;  %5007 = vst.msk [vmem:[%s10255_s8 + $0x130] sm:$0xff] %vm3176_vm3, %v4879_v53 }
 0x3d1   :  { %v4624_v62 = vsub.f32 2.0, %v4496_v55  ;;  %v2621_v3 = vpop.f32.mrf.mxu2  ;;  %v3617_v46 = vsub.f32 %v8324_v32, %v3347_v37  ;;  %6080 = vrcp.f32 %v4067_v18  ;;  %v8724_v53 = vpop.f32.mrf.mxu3 }
 0x3d2   :  { %v2622_v47 = vadd.f32 %v8705_v9, %v2621_v3 }
 0x3d3   :  { %v4752_v35 = vmul.f32 %v6073_v25, %v4624_v62  ;;  %v3801_v7 = vmul.f32 1.442695, %v3617_v46  ;;  %v8708_v52 = vpop.eup %6074  ;;  %v1754_v56 = vpop.f32.mrf.mxu1 }
 0x3d4   :  { %v8712_v44 = vsel %vm2991_vm8, -1e+10, %v2622_v47  ;;  %v6077_v32 = vpop.eup %6076  ;;  %v1755_v15 = vadd.f32 %v8561_v57, %v1754_v56  ;;  %v4110_v29 = vsel %vm3176_vm3, %v8708_v52, 0.0  ;;  %v887_v47 = vadd.f32 %v8437_v12, %v8259_v19 }
 0x3d5   :  { %v4880_v39 = vmul.f32 %v8292_v17, %v4752_v35  ;;  %6082 = vpow2.f32 %v3801_v7  ;;  %v6079_v10 = vpop.eup %6078  ;;  %4111 = vadd.xlane.f32.xlu0 %v4110_v29  ;;  %v3390_v25 = vsel %vm3176_vm3, %v8712_v44, -inf }
 0x3d6   :  { %5445 = vmatmul.msk.f32.gmra.mxu2 %vm1085_vm1, %v6077_v32  ;;  %6084 = vtanh.f32 %v1755_v15  ;;  %3391 = vmax.xlane.f32.xlu2 %v3390_v25 }
 0x3d7   :  { %v6081_v17 = vpop.eup %6080  ;;  %5008 = vst.msk [vmem:[%s10255_s8 + $0x138] sm:$0xff] %vm3176_vm3, %v4880_v39  ;;  %5334 = vmatmul.msk.f32.gmra.mxu3 %vm1085_vm1, %v6079_v10  ;;  %6086 = vtanh.f32 %v884_v34 }
 0x3d8   :  { %v4497_v55 = vmul.f32 %v6081_v17, %v4067_v18  ;;  %v3350_v37 = vpop.xlane.xlu0 %3349  ;;  %v4070_v3 = vpop.xlane.xlu1 %4069 }
 0x3d9   :  { %v2624_v62 = vpop.f32.mrf.mxu2  ;;  %v3618_v46 = vsub.f32 %v8350_v31, %v3350_v37  ;;  %6088 = vrcp.f32 %v4070_v3  ;;  %v8754_v37 = vpop.f32.mrf.mxu3 }
 0x3da   :  { %v4625_v35 = vsub.f32 2.0, %v4497_v55  ;;  %v2625_v7 = vadd.f32 %v8705_v9, %v2624_v62 }
 0x3db   :  { %v8735_v56 = vpop.eup %6082  ;;  %v3803_v32 = vmul.f32 1.442695, %v3618_v46  ;;  %v1757_v15 = vpop.f32.mrf.mxu1 }
 0x3dc   :  { %v4753_v39 = vmul.f32 %v6081_v17, %v4625_v35  ;;  %v8737_v34 = vsel %vm2992_vm9, -1e+10, %v2625_v7  ;;  %v4113_v18 = vsel %vm3176_vm3, %v8735_v56, 0.0  ;;  %v6085_v29 = vpop.eup %6084  ;;  %v1758_v31 = vadd.f32 %v8561_v57, %v1757_v15 }
 0x3dd   :  { %6090 = vpow2.f32 %v3803_v32  ;;  %v3393_v19 = vsel %vm3176_vm3, %v8737_v34, -inf  ;;  %4114 = vadd.xlane.f32.xlu1 %v4113_v18  ;;  %v6087_v10 = vpop.eup %6086  ;;  %v890_v15 = vadd.f32 %v8437_v12, %v8294_v42  ;;  %v2866_v42 = vld [vmem:[%s10254_s7 + $0x250] sm:$0xff] }
 0x3de   :  { %6092 = vtanh.f32 %v887_v47  ;;  %v4881_v25 = vmul.f32 %v8322_v61, %v4753_v39  ;;  %5446 = vmatmul.msk.f32.gmra.mxu2 %vm1085_vm1, %v6085_v29  ;;  %3394 = vmax.xlane.f32.xlu0 %v3393_v19  ;;  %vm2994_vm10 = vcmp.eq.f32.partialorder %v2866_v42, 0.0 }
 0x3df   :  { %6094 = vtanh.f32 %v1758_v31  ;;  %5335 = vmatmul.msk.f32.gmra.mxu3 %vm1085_vm1, %v6087_v10  ;;  %v4073_v17 = vpop.xlane.xlu2 %4072  ;;  %v6089_v55 = vpop.eup %6088 }
 0x3e0   :  { %5009 = vst.msk [vmem:[%s10255_s8 + $0x140] sm:$0xff] %vm3176_vm3, %v4881_v25  ;;  %6096 = vrcp.f32 %v4073_v17  ;;  %v4498_v61 = vmul.f32 %v6089_v55, %v4070_v3  ;;  %v3353_v46 = vpop.xlane.xlu1 %3352 }
 0x3e1   :  { %v2627_v62 = vpop.f32.mrf.mxu2  ;;  %v3619_v35 = vsub.f32 %v8380_v24, %v3353_v46 }
 0x3e2   :  { %v2628_v47 = vadd.f32 %v8705_v9, %v2627_v62  ;;  %v4626_v32 = vsub.f32 2.0, %v4498_v61 }
 0x3e3   :  { %v8758_v7 = vpop.eup %6090  ;;  %v3805_v18 = vmul.f32 1.442695, %v3619_v35  ;;  %v1760_v29 = vpop.f32.mrf.mxu1 }
 0x3e4   :  { %v6093_v39 = vpop.eup %6092  ;;  %v8762_v31 = vsel %vm2993_vm0, -1e+10, %v2628_v47  ;;  %v4116_v3 = vsel %vm3176_vm3, %v8758_v7, 0.0  ;;  %v4754_v10 = vmul.f32 %v6089_v55, %v4626_v32  ;;  %v1761_v25 = vadd.f32 %v8561_v57, %v1760_v29  ;;  %v10261_v29 = vld [vmem:[#allocation2_spill] sm:$0xff] }
 0x3e5   :  { %v6095_v19 = vpop.eup %6094  ;;  %v3396_v24 = vsel %vm3176_vm3, %v8762_v31, -inf  ;;  %4117 = vadd.xlane.f32.xlu2 %v4116_v3  ;;  %6098 = vpow2.f32 %v3805_v18  ;;  %v893_v3 = vadd.f32 %v8437_v12, %v10261_v29 }
 0x3e6   :  { %v6097_v4 = vpop.eup %6096  ;;  %5447 = vmatmul.msk.f32.gmra.mxu2 %vm1085_vm1, %v6095_v19  ;;  %3397 = vmax.xlane.f32.xlu1 %v3396_v24  ;;  %v4882_v61 = vmul.f32 %v8352_v49, %v4754_v10  ;;  %6100 = vtanh.f32 %v1761_v25 }
 0x3e7   :  { %v4499_v62 = vmul.f32 %v6097_v4, %v4073_v17  ;;  %5336 = vmatmul.msk.f32.gmra.mxu3 %vm1085_vm1, %v6093_v39  ;;  %6102 = vtanh.f32 %v890_v15  ;;  %v8781_v17 = vpop.f32.mrf.mxu3 }
 0x3e8   :  { %v3356_v55 = vpop.xlane.xlu2 %3355  ;;  %v4076_v46 = vpop.xlane.xlu0 %4075  ;;  %5010 = vst.msk [vmem:[%s10255_s8 + $0x148] sm:$0xff] %vm3176_vm3, %v4882_v61 }
 0x3e9   :  { %v4627_v47 = vsub.f32 2.0, %v4499_v62  ;;  %v2630_v35 = vpop.f32.mrf.mxu2  ;;  %v3620_v32 = vsub.f32 %v8404_v50, %v3356_v55  ;;  %6104 = vrcp.f32 %v4076_v46  ;;  %v2867_v62 = vld [vmem:[%s10254_s7 + $0x258] sm:$0xff] }
 0x3ea   :  { %v2631_v49 = vadd.f32 %v8705_v9, %v2630_v35  ;;  %vm2995_vm11 = vcmp.eq.f32.partialorder %v2867_v62, 0.0 }
 0x3eb   :  { %v4755_v18 = vmul.f32 %v6097_v4, %v4627_v47  ;;  %v3807_v39 = vmul.f32 1.442695, %v3620_v32  ;;  %v8783_v15 = vpop.eup %6098  ;;  %v1763_v19 = vpop.f32.mrf.mxu1 }
 0x3ec   :  { %v8787_v10 = vsel %vm2994_vm10, -1e+10, %v2631_v49  ;;  %v6101_v25 = vpop.eup %6100  ;;  %v1764_v50 = vadd.f32 %v8561_v57, %v1763_v19  ;;  %v4119_v42 = vsel %vm3176_vm3, %v8783_v15, 0.0 }
 0x3ed   :  { %v4883_v24 = vmul.f32 %v8376_v26, %v4755_v18  ;;  %6106 = vpow2.f32 %v3807_v39  ;;  %v6103_v61 = vpop.eup %6102  ;;  %4120 = vadd.xlane.f32.xlu0 %v4119_v42  ;;  %v3399_v4 = vsel %vm3176_vm3, %v8787_v10, -inf  ;;  %v10262_v18 = vld [vmem:[#allocation3_spill] sm:$0xff] }
 0x3ee   :  { %5448 = vmatmul.msk.f32.gmra.mxu2 %vm1085_vm1, %v6101_v25  ;;  %6108 = vtanh.f32 %v1764_v50  ;;  %3400 = vmax.xlane.f32.xlu2 %v3399_v4  ;;  %v896_v39 = vadd.f32 %v8437_v12, %v10262_v18 }
 0x3ef   :  { %v6105_v55 = vpop.eup %6104  ;;  %5011 = vst.msk [vmem:[%s10255_s8 + $0x150] sm:$0xff] %vm3176_vm3, %v4883_v24  ;;  %5337 = vmatmul.msk.f32.gmra.mxu3 %vm1085_vm1, %v6103_v61  ;;  %6110 = vtanh.f32 %v893_v3  ;;  %v8814_v61 = vpop.f32.mrf.mxu3 }
 0x3f0   :  { %v4500_v26 = vmul.f32 %v6105_v55, %v4076_v46  ;;  %v3359_v47 = vpop.xlane.xlu0 %3358  ;;  %v4079_v32 = vpop.xlane.xlu1 %4078 }
 0x3f1   :  { %v2633_v35 = vpop.f32.mrf.mxu2  ;;  %v3621_v49 = vsub.f32 %v8424_v14, %v3359_v47  ;;  %6112 = vrcp.f32 %v4079_v32  ;;  %v2868_v47 = vld [vmem:[%s10254_s7 + $0x260] sm:$0xff] }
 0x3f2   :  { %v4628_v29 = vsub.f32 2.0, %v4500_v26  ;;  %v2634_v19 = vadd.f32 %v8705_v9, %v2633_v35  ;;  %vm2996_vm12 = vcmp.eq.f32.partialorder %v2868_v47, 0.0 }
 0x3f3   :  { %v8808_v25 = vpop.eup %6106  ;;  %v3809_v24 = vmul.f32 1.442695, %v3621_v49  ;;  %v1766_v42 = vpop.f32.mrf.mxu1 }
 0x3f4   :  { %v4756_v50 = vmul.f32 %v6105_v55, %v4628_v29  ;;  %v8810_v3 = vsel %vm2995_vm11, -1e+10, %v2634_v19  ;;  %v4122_v46 = vsel %vm3176_vm3, %v8808_v25, 0.0  ;;  %v6109_v14 = vpop.eup %6108  ;;  %v1767_v4 = vadd.f32 %v8561_v57, %v1766_v42 }
 0x3f5   :  { %6114 = vpow2.f32 %v3809_v24  ;;  %v3402_v62 = vsel %vm3176_vm3, %v8810_v3, -inf  ;;  %4123 = vadd.xlane.f32.xlu1 %v4122_v46  ;;  %v6111_v26 = vpop.eup %6110  ;;  %v10263_v46 = vld [vmem:[#allocation4_spill] sm:$0xff] }
 0x3f6   :  { %6116 = vtanh.f32 %v896_v39  ;;  %v4884_v55 = vmul.f32 %v8402_v11, %v4756_v50  ;;  %5449 = vmatmul.msk.f32.gmra.mxu2 %vm1085_vm1, %v6109_v14  ;;  %3403 = vmax.xlane.f32.xlu0 %v3402_v62  ;;  %v899_v14 = vadd.f32 %v8437_v12, %v10263_v46 }
 0x3f7   :  { %6118 = vtanh.f32 %v1767_v4  ;;  %5338 = vmatmul.msk.f32.gmra.mxu3 %vm1085_vm1, %v6111_v26  ;;  %v4082_v35 = vpop.xlane.xlu2 %4081  ;;  %v6113_v49 = vpop.eup %6112 }
 0x3f8   :  { %5012 = vst.msk [vmem:[%s10255_s8 + $0x158] sm:$0xff] %vm3176_vm3, %v4884_v55  ;;  %6120 = vrcp.f32 %v4082_v35  ;;  %v4501_v18 = vmul.f32 %v6113_v49, %v4079_v32  ;;  %v3362_v39 = vpop.xlane.xlu1 %3361  ;;  %v8843_v12 = vpop.f32.mrf.mxu3 }
 0x3f9   :  { %v2636_v11 = vpop.f32.mrf.mxu2  ;;  %v3622_v19 = vsub.f32 %v8455_v23, %v3362_v39  ;;  %v2869_v39 = vld [vmem:[%s10254_s7 + $0x268] sm:$0xff] }
 0x3fa   :  { %v2637_v29 = vadd.f32 %v8705_v9, %v2636_v11  ;;  %v4629_v50 = vsub.f32 2.0, %v4501_v18  ;;  %vm2997_vm13 = vcmp.eq.f32.partialorder %v2869_v39, 0.0 }
 0x3fb   :  { %v8831_v24 = vpop.eup %6114  ;;  %v3811_v4 = vmul.f32 1.442695, %v3622_v19  ;;  %v1769_v62 = vpop.f32.mrf.mxu1 }
 0x3fc   :  { %v6117_v42 = vpop.eup %6116  ;;  %v8835_v26 = vsel %vm2996_vm12, -1e+10, %v2637_v29  ;;  %v4125_v32 = vsel %vm3176_vm3, %v8831_v24, 0.0  ;;  %v4757_v47 = vmul.f32 %v6113_v49, %v4629_v50  ;;  %v1770_v11 = vadd.f32 %v8561_v57, %v1769_v62 }
 0x3fd   :  { %v6119_v55 = vpop.eup %6118  ;;  %v3405_v23 = vsel %vm3176_vm3, %v8835_v26, -inf  ;;  %4126 = vadd.xlane.f32.xlu2 %v4125_v32  ;;  %6122 = vpow2.f32 %v3811_v4 }
 0x3fe   :  { %v6121_v18 = vpop.eup %6120  ;;  %5450 = vmatmul.msk.f32.gmra.mxu2 %vm1085_vm1, %v6119_v55  ;;  %3406 = vmax.xlane.f32.xlu1 %v3405_v23  ;;  %v4885_v29 = vmul.f32 %v8428_v21, %v4757_v47  ;;  %6124 = vtanh.f32 %v1770_v11 }
 0x3ff   :  { %v4502_v49 = vmul.f32 %v6121_v18, %v4082_v35  ;;  %5339 = vmatmul.msk.f32.gmra.mxu3 %vm1085_vm1, %v6117_v42  ;;  %6126 = vtanh.f32 %v899_v14  ;;  %v8861_v42 = vld [vmem:[%s10249_s2] ss:$0 sm:$0xff]  ;;  %v10264_v14 = vld [vmem:[#allocation5_spill] sm:$0xff] }
 0x400   :  { %v3365_v19 = vpop.xlane.xlu2 %3364  ;;  %v4085_v50 = vpop.xlane.xlu0 %4084  ;;  %5013 = vst.msk [vmem:[%s10255_s8 + $0x160] sm:$0xff] %vm3176_vm3, %v4885_v29  ;;  %v902_v47 = vadd.f32 %v8861_v42, %v10264_v14 }
 0x401   :  { %v4630_v46 = vsub.f32 2.0, %v4502_v49  ;;  %v2639_v4 = vpop.f32.mrf.mxu2  ;;  %v3623_v62 = vsub.f32 %v8481_v0, %v3365_v19  ;;  %6128 = vrcp.f32 %v4085_v50 }
 0x402   :  { %v2640_v21 = vadd.f32 %v8705_v9, %v2639_v4 }
 0x403   :  { %v4758_v35 = vmul.f32 %v6121_v18, %v4630_v46  ;;  %v3813_v32 = vmul.f32 1.442695, %v3623_v62  ;;  %v8856_v55 = vpop.eup %6122  ;;  %v1772_v11 = vpop.f32.mrf.mxu1  ;;  %v2870_v46 = vld [vmem:[%s10254_s7 + $0x270] sm:$0xff] }
 0x404   :  { %v8865_v23 = vsel %vm2997_vm13, -1e+10, %v2640_v21  ;;  %v6125_v0 = vpop.eup %6124  ;;  %v1773_v18 = vadd.f32 %v8561_v57, %v1772_v11  ;;  %v4128_v29 = vsel %vm3176_vm3, %v8856_v55, 0.0  ;;  %v8882_v62 = vpop.f32.mrf.mxu3  ;;  %vm2998_vm14 = vcmp.eq.f32.partialorder %v2870_v46, 0.0 }
 0x405   :  { %v4886_v39 = vmul.f32 %v8453_v30, %v4758_v35  ;;  %6130 = vpow2.f32 %v3813_v32  ;;  %v6127_v49 = vpop.eup %6126  ;;  %4129 = vadd.xlane.f32.xlu0 %v4128_v29  ;;  %v3408_v19 = vsel %vm3176_vm3, %v8865_v23, -inf }
 0x406   :  { %5451 = vmatmul.msk.f32.gmra.mxu2 %vm1085_vm1, %v6125_v0  ;;  %6132 = vtanh.f32 %v1773_v18  ;;  %3409 = vmax.xlane.f32.xlu2 %v3408_v19 }
 0x407   :  { %v6129_v4 = vpop.eup %6128  ;;  %5014 = vst.msk [vmem:[%s10255_s8 + $0x168] sm:$0xff] %vm3176_vm3, %v4886_v39  ;;  %5340 = vmatmul.msk.f32.gmra.mxu3 %vm1085_vm1, %v6127_v49  ;;  %6134 = vtanh.f32 %v902_v47  ;;  %v905_v39 = vadd.f32 %v8861_v42, %v8426_v51  ;;  %v2871_v51 = vld [vmem:[%s10254_s7 + $0x278] sm:$0xff] }
 0x408   :  { %v4503_v30 = vmul.f32 %v6129_v4, %v4085_v50  ;;  %v3368_v57 = vpop.xlane.xlu0 %3367  ;;  %v4088_v35 = vpop.xlane.xlu1 %4087  ;;  %vm2999_vm15 = vcmp.eq.f32.partialorder %v2871_v51, 0.0 }
 0x409   :  { %v2642_v21 = vpop.f32.mrf.mxu2  ;;  %v3624_v32 = vsub.f32 %v8504_v60, %v3368_v57  ;;  %6136 = vrcp.f32 %v4088_v35 }
 0x40a   :  { %v4631_v14 = vsub.f32 2.0, %v4503_v30  ;;  %v2643_v11 = vadd.f32 %v8705_v9, %v2642_v21 }
 0x40b   :  { %v8886_v0 = vpop.eup %6130  ;;  %v3815_v18 = vmul.f32 1.442695, %v3624_v32 }
 0x40c   :  { %v4759_v47 = vmul.f32 %v6129_v4, %v4631_v14  ;;  %v8890_v50 = vsel %vm2998_vm14, -1e+10, %v2643_v11  ;;  %v4131_v29 = vsel %vm3176_vm3, %v8886_v0, 0.0  ;;  %v6133_v49 = vpop.eup %6132 }
 0x40d   :  { %6138 = vpow2.f32 %v3815_v18  ;;  %v3411_v60 = vsel %vm3176_vm3, %v8890_v50, -inf  ;;  %4132 = vadd.xlane.f32.xlu1 %v4131_v29  ;;  %v6135_v19 = vpop.eup %6134 }
 0x40e   :  { %v4887_v46 = vmul.f32 %v8477_v16, %v4759_v47  ;;  %5452 = vmatmul.msk.f32.gmra.mxu2 %vm1085_vm1, %v6133_v49  ;;  %3412 = vmax.xlane.f32.xlu0 %v3411_v60  ;;  %6140 = vtanh.f32 %v905_v39  ;;  %v10265_v47 = vld [vmem:[#allocation6_spill] sm:$0xff] }
 0x40f   :  { %5341 = vmatmul.msk.f32.gmra.mxu3 %vm1085_vm1, %v6135_v19  ;;  %v4091_v4 = vpop.xlane.xlu2 %4090  ;;  %v6137_v30 = vpop.eup %6136  ;;  %v908_v29 = vadd.f32 %v8861_v42, %v10265_v47 }
 0x410   :  { %5015 = vst.msk [vmem:[%s10255_s8 + $0x170] sm:$0xff] %vm3176_vm3, %v4887_v46  ;;  %6142 = vrcp.f32 %v4091_v4  ;;  %v4504_v57 = vmul.f32 %v6137_v30, %v4088_v35  ;;  %v3371_v21 = vpop.xlane.xlu1 %3370 }
 0x411   :  { %v2645_v16 = vpop.f32.mrf.mxu2  ;;  %v3625_v14 = vsub.f32 %v8529_v5, %v3371_v21  ;;  %v8908_v11 = vpop.f32.mrf.mxu3 }
 0x412   :  { %v2646_v32 = vadd.f32 %v8705_v9, %v2645_v16  ;;  %v4632_v18 = vsub.f32 2.0, %v4504_v57  ;;  %v2872_v57 = vld [vmem:[%s10254_s7 + $0x280] sm:$0xff] }
 0x413   :  { %v8910_v39 = vpop.eup %6138  ;;  %v3817_v49 = vmul.f32 1.442695, %v3625_v14  ;;  %vm3000_vm2 = vcmp.eq.f32.partialorder %v2872_v57, 0.0 }
 0x414   :  { %v8914_v60 = vsel %vm2999_vm15, -1e+10, %v2646_v32  ;;  %v4134_v35 = vsel %vm3176_vm3, %v8910_v39, 0.0  ;;  %v6141_v19 = vpop.eup %6140  ;;  %v4760_v46 = vmul.f32 %v6137_v30, %v4632_v18 }
 0x415   :  { %v3414_v51 = vsel %vm3176_vm3, %v8914_v60, -inf  ;;  %4135 = vadd.xlane.f32.xlu2 %v4134_v35  ;;  %6144 = vpow2.f32 %v3817_v49 }
 0x416   :  { %v6143_v5 = vpop.eup %6142  ;;  %3415 = vmax.xlane.f32.xlu1 %v3414_v51  ;;  %v4888_v16 = vmul.f32 %v8506_v6, %v4760_v46  ;;  %6146 = vtanh.f32 %v908_v29 }
 0x417   :  { %v4505_v21 = vmul.f32 %v6143_v5, %v4091_v4  ;;  %5342 = vmatmul.msk.f32.gmra.mxu3 %vm1085_vm1, %v6141_v19  ;;  %v911_v19 = vadd.f32 %v8861_v42, %v8494_v33 }
 0x418   :  { %v3374_v32 = vpop.xlane.xlu2 %3373  ;;  %v4094_v14 = vpop.xlane.xlu0 %4093  ;;  %5016 = vst.msk [vmem:[%s10255_s8 + $0x178] sm:$0xff] %vm3176_vm3, %v4888_v16 }
 0x419   :  { %v4633_v30 = vsub.f32 2.0, %v4505_v21  ;;  %v2648_v18 = vpop.f32.mrf.mxu2  ;;  %v3626_v47 = vsub.f32 %v8554_v54, %v3374_v32  ;;  %6148 = vrcp.f32 %v4094_v14  ;;  %v8931_v6 = vpop.f32.mrf.mxu3 }
 0x41a   :  { %v2649_v49 = vadd.f32 %v8705_v9, %v2648_v18 }
 0x41b   :  { %v4761_v4 = vmul.f32 %v6143_v5, %v4633_v30  ;;  %v3819_v35 = vmul.f32 1.442695, %v3626_v47  ;;  %v8933_v29 = vpop.eup %6144  ;;  %v2873_v5 = vld [vmem:[%s10254_s7 + $0x288] sm:$0xff] }
 0x41c   :  { %v8937_v46 = vsel %vm3000_vm2, -1e+10, %v2649_v49  ;;  %v4137_v54 = vsel %vm3176_vm3, %v8933_v29, 0.0  ;;  %v6147_v16 = vpop.eup %6146  ;;  %vm3001_vm4 = vcmp.eq.f32.partialorder %v2873_v5, 0.0 }
 0x41d   :  { %v4889_v51 = vmul.f32 %v8527_v40, %v4761_v4  ;;  %6150 = vpow2.f32 %v3819_v35  ;;  %v3417_v57 = vsel %vm3176_vm3, %v8937_v46, -inf  ;;  %4138 = vadd.xlane.f32.xlu0 %v4137_v54 }
 0x41e   :  { %3418 = vmax.xlane.f32.xlu2 %v3417_v57  ;;  %6152 = vtanh.f32 %v911_v19 }
 0x41f   :  { %v6149_v21 = vpop.eup %6148  ;;  %5017 = vst.msk [vmem:[%s10255_s8 + $0x180] sm:$0xff] %vm3176_vm3, %v4889_v51  ;;  %5343 = vmatmul.msk.f32.gmra.mxu3 %vm1085_vm1, %v6147_v16  ;;  %v914_v51 = vadd.f32 %v8861_v42, %v8525_v28 }
 0x420   :  { %v4506_v33 = vmul.f32 %v6149_v21, %v4094_v14  ;;  %v3377_v40 = vpop.xlane.xlu0 %3376  ;;  %v4097_v30 = vpop.xlane.xlu1 %4096 }
 0x421   :  { %v2651_v32 = vpop.f32.mrf.mxu2  ;;  %v3627_v18 = vsub.f32 %v8582_v48, %v3377_v40  ;;  %6154 = vrcp.f32 %v4097_v30  ;;  %v8954_v4 = vpop.f32.mrf.mxu3 }
 0x422   :  { %v4634_v47 = vsub.f32 2.0, %v4506_v33  ;;  %v2652_v49 = vadd.f32 %v8705_v9, %v2651_v32  ;;  %v2874_v33 = vld [vmem:[%s10254_s7 + $0x290] sm:$0xff] }
 0x423   :  { %v8956_v35 = vpop.eup %6150  ;;  %v3821_v54 = vmul.f32 1.442695, %v3627_v18  ;;  %vm3002_vm5 = vcmp.eq.f32.partialorder %v2874_v33, 0.0  ;;  %v2875_v33 = vld [vmem:[%s10254_s7 + $0x298] sm:$0xff] }
 0x424   :  { %v4762_v19 = vmul.f32 %v6149_v21, %v4634_v47  ;;  %v8960_v14 = vsel %vm3001_vm4, -1e+10, %v2652_v49  ;;  %v4140_v57 = vsel %vm3176_vm3, %v8956_v35, 0.0  ;;  %v6153_v16 = vpop.eup %6152  ;;  %vm3003_vm6 = vcmp.eq.f32.partialorder %v2875_v33, 0.0 }
 0x425   :  { %6156 = vpow2.f32 %v3821_v54  ;;  %v3420_v48 = vsel %vm3176_vm3, %v8960_v14, -inf  ;;  %4141 = vadd.xlane.f32.xlu1 %v4140_v57 }
 0x426   :  { %v4890_v5 = vmul.f32 %v8550_v2, %v4762_v19  ;;  %3421 = vmax.xlane.f32.xlu0 %v3420_v48  ;;  %6158 = vtanh.f32 %v914_v51  ;;  %v917_v19 = vadd.f32 %v8861_v42, %v8556_v36 }
 0x427   :  { %5344 = vmatmul.msk.f32.gmra.mxu3 %vm1085_vm1, %v6153_v16  ;;  %v6155_v28 = vpop.eup %6154 }
 0x428   :  { %5018 = vst.msk [vmem:[%s10255_s8 + $0x188] sm:$0xff] %vm3176_vm3, %v4890_v5  ;;  %v4100_v21 = vpop.xlane.xlu2 %4099  ;;  %v4507_v40 = vmul.f32 %v6155_v28, %v4097_v30  ;;  %v3380_v18 = vpop.xlane.xlu1 %3379 }
 0x429   :  { %v2654_v32 = vpop.f32.mrf.mxu2  ;;  %6160 = vrcp.f32 %v4100_v21  ;;  %v3628_v47 = vsub.f32 %v8607_v22, %v3380_v18  ;;  %v8977_v49 = vpop.f32.mrf.mxu3 }
 0x42a   :  { %v2655_v2 = vadd.f32 %v8705_v9, %v2654_v32  ;;  %v4635_v51 = vsub.f32 2.0, %v4507_v40 }
 0x42b   :  { %v8979_v54 = vpop.eup %6156  ;;  %v3823_v48 = vmul.f32 1.442695, %v3628_v47 }
 0x42c   :  { %v8983_v57 = vsel %vm3002_vm5, -1e+10, %v2655_v2  ;;  %v4143_v30 = vsel %vm3176_vm3, %v8979_v54, 0.0  ;;  %v4763_v16 = vmul.f32 %v6155_v28, %v4635_v51  ;;  %v6159_v22 = vpop.eup %6158 }
 0x42d   :  { %v3423_v5 = vsel %vm3176_vm3, %v8983_v57, -inf  ;;  %4144 = vadd.xlane.f32.xlu2 %v4143_v30  ;;  %6162 = vpow2.f32 %v3823_v48 }
 0x42e   :  { %3424 = vmax.xlane.f32.xlu1 %v3423_v5  ;;  %v4891_v36 = vmul.f32 %v8584_v8, %v4763_v16  ;;  %6164 = vtanh.f32 %v917_v19 }
 0x42f   :  { %v6161_v40 = vpop.eup %6160  ;;  %5345 = vmatmul.msk.f32.gmra.mxu3 %vm1085_vm1, %v6159_v22 }
 0x430   :  { %v4508_v32 = vmul.f32 %v6161_v40, %v4100_v21  ;;  %5019 = vst.msk [vmem:[%s10255_s8 + $0x190] sm:$0xff] %vm3176_vm3, %v4891_v36  ;;  %v920_v21 = vadd.f32 %v8861_v42, %v8594_v1 }
 0x431   :  { %v2657_v28 = vpop.f32.mrf.mxu2  ;;  %v4103_v18 = vpop.xlane.xlu0 %4102 }
 0x432   :  { %v4636_v2 = vsub.f32 2.0, %v4508_v32  ;;  %v2658_v47 = vadd.f32 %v8705_v9, %v2657_v28  ;;  %v3383_v51 = vpop.xlane.xlu2 %3382  ;;  %6166 = vrcp.f32 %v4103_v18  ;;  %v8999_v48 = vpop.f32.mrf.mxu3 }
 0x433   :  { %v3629_v8 = vsub.f32 %v8634_v45, %v3383_v51  ;;  %v9002_v30 = vpop.eup %6162  ;;  %v2876_v45 = vld [vmem:[%s10254_s7 + $0x2a0] sm:$0xff] }
 0x434   :  { %v4764_v19 = vmul.f32 %v6161_v40, %v4636_v2  ;;  %v9006_v16 = vsel %vm3003_vm6, -1e+10, %v2658_v47  ;;  %v4146_v22 = vsel %vm3176_vm3, %v9002_v30, 0.0  ;;  %v6165_v36 = vpop.eup %6164  ;;  %vm3004_vm7 = vcmp.eq.f32.partialorder %v2876_v45, 0.0  ;;  %v2877_v45 = vld [vmem:[%s10254_s7 + $0x2a8] sm:$0xff] }
 0x435   :  { %v3825_v5 = vmul.f32 1.442695, %v3629_v8  ;;  %v3426_v33 = vsel %vm3176_vm3, %v9006_v16, -inf  ;;  %4147 = vadd.xlane.f32.xlu0 %v4146_v22  ;;  %vm3005_vm8 = vcmp.eq.f32.partialorder %v2877_v45, 0.0 }
 0x436   :  { %v4892_v32 = vmul.f32 %v8605_v27, %v4764_v19  ;;  %3427 = vmax.xlane.f32.xlu2 %v3426_v33 }
 0x437   :  { %6168 = vpow2.f32 %v3825_v5  ;;  %5346 = vmatmul.msk.f32.gmra.mxu3 %vm1085_vm1, %v6165_v36 }
 0x438   :  { %v6167_v1 = vpop.eup %6166  ;;  %6170 = vtanh.f32 %v920_v21  ;;  %5020 = vst.msk [vmem:[%s10255_s8 + $0x198] sm:$0xff] %vm3176_vm3, %v4892_v32  ;;  %v4106_v40 = vpop.xlane.xlu1 %4105  ;;  %v923_v21 = vadd.f32 %v8861_v42, %v8622_v20 }
 0x439   :  { %v4509_v28 = vmul.f32 %v6167_v1, %v4103_v18  ;;  %v2660_v2 = vpop.f32.mrf.mxu2  ;;  %6172 = vrcp.f32 %v4106_v40  ;;  %v3386_v27 = vpop.xlane.xlu0 %3385 }
 0x43a   :  { %v2661_v47 = vadd.f32 %v8705_v9, %v2660_v2  ;;  %v3630_v51 = vsub.f32 %v8659_v59, %v3386_v27  ;;  %v9023_v8 = vpop.f32.mrf.mxu3 }
 0x43b   :  { %v4637_v19 = vsub.f32 2.0, %v4509_v28 }
 0x43c   :  { %v9027_v5 = vsel %vm3004_vm7, -1e+10, %v2661_v47  ;;  %v3827_v22 = vmul.f32 1.442695, %v3630_v51 }
 0x43d   :  { %v9029_v33 = vpop.eup %6168  ;;  %v4765_v18 = vmul.f32 %v6167_v1, %v4637_v19  ;;  %v3429_v36 = vsel %vm3176_vm3, %v9027_v5, -inf }
 0x43e   :  { %v6171_v32 = vpop.eup %6170  ;;  %6174 = vpow2.f32 %v3827_v22  ;;  %3430 = vmax.xlane.f32.xlu0 %v3429_v36  ;;  %v4149_v59 = vsel %vm3176_vm3, %v9029_v33, 0.0 }
 0x43f   :  { %v6173_v20 = vpop.eup %6172  ;;  %v4893_v28 = vmul.f32 %v8630_v43, %v4765_v18  ;;  %4150 = vadd.xlane.f32.xlu1 %v4149_v59  ;;  %5347 = vmatmul.msk.f32.gmra.mxu3 %vm1085_vm1, %v6171_v32  ;;  %6176 = vtanh.f32 %v923_v21 }
 0x440   :  { %v4510_v1 = vmul.f32 %v6173_v20, %v4106_v40  ;;  %v4109_v2 = vpop.xlane.xlu2 %4108  ;;  %v926_v40 = vadd.f32 %v8861_v42, %v8655_v41 }
 0x441   :  { %5021 = vst.msk [vmem:[%s10255_s8 + $0x1a0] sm:$0xff] %vm3176_vm3, %v4893_v28  ;;  %v2663_v27 = vpop.f32.mrf.mxu2  ;;  %v3389_v47 = vpop.xlane.xlu1 %3388  ;;  %6178 = vrcp.f32 %v4109_v2 }
 0x442   :  { %v4638_v51 = vsub.f32 2.0, %v4510_v1  ;;  %v2664_v19 = vadd.f32 %v8705_v9, %v2663_v27  ;;  %v3631_v43 = vsub.f32 %v8682_v58, %v3389_v47  ;;  %v9046_v22 = vpop.f32.mrf.mxu3  ;;  %v2878_v1 = vld [vmem:[%s10254_s7 + $0x2b0] sm:$0xff] }
 0x443   :  { %vm3006_vm9 = vcmp.eq.f32.partialorder %v2878_v1, 0.0 }
 0x444   :  { %v9048_v18 = vpop.eup %6174  ;;  %v4766_v21 = vmul.f32 %v6173_v20, %v4638_v51  ;;  %v9052_v36 = vsel %vm3005_vm8, -1e+10, %v2664_v19  ;;  %v3829_v32 = vmul.f32 1.442695, %v3631_v43 }
 0x445   :  { %v3432_v59 = vsel %vm3176_vm3, %v9052_v36, -inf  ;;  %v4152_v45 = vsel %vm3176_vm3, %v9048_v18, 0.0  ;;  %v6177_v28 = vpop.eup %6176 }
 0x446   :  { %v4894_v58 = vmul.f32 %v8657_v13, %v4766_v21  ;;  %6180 = vpow2.f32 %v3829_v32  ;;  %4153 = vadd.xlane.f32.xlu2 %v4152_v45 }
 0x447   :  { %v6179_v41 = vpop.eup %6178  ;;  %3433 = vmax.xlane.f32.xlu1 %v3432_v59  ;;  %5348 = vmatmul.msk.f32.gmra.mxu3 %vm1085_vm1, %v6177_v28  ;;  %6182 = vtanh.f32 %v926_v40  ;;  %v929_v40 = vadd.f32 %v8861_v42, %v8686_v38 }
 0x448   :  { %5022 = vst.msk [vmem:[%s10255_s8 + $0x1a8] sm:$0xff] %vm3176_vm3, %v4894_v58  ;;  %v4511_v20 = vmul.f32 %v6179_v41, %v4109_v2  ;;  %v4112_v13 = vpop.xlane.xlu0 %4111 }
 0x449   :  { %v2666_v27 = vpop.f32.mrf.mxu2  ;;  %v3392_v19 = vpop.xlane.xlu2 %3391  ;;  %6184 = vrcp.f32 %v4112_v13 }
 0x44a   :  { %v4639_v47 = vsub.f32 2.0, %v4511_v20  ;;  %v2667_v51 = vadd.f32 %v8705_v9, %v2666_v27  ;;  %v9068_v43 = vpop.f32.mrf.mxu3  ;;  %v3632_v21 = vsub.f32 %v8712_v44, %v3392_v19  ;;  %v2879_v44 = vld [vmem:[%s10254_s7 + $0x2b8] sm:$0xff] }
 0x44b   :  { %vm3007_vm0 = vcmp.eq.f32.partialorder %v2879_v44, 0.0  ;;  %v2880_v44 = vld [vmem:[%s10254_s7 + $0x2c0] sm:$0xff] }
 0x44c   :  { %v9071_v32 = vpop.eup %6180  ;;  %v4767_v59 = vmul.f32 %v6179_v41, %v4639_v47  ;;  %v9075_v45 = vsel %vm3006_vm9, -1e+10, %v2667_v51  ;;  %v3831_v2 = vmul.f32 1.442695, %v3632_v21  ;;  %vm3008_vm10 = vcmp.eq.f32.partialorder %v2880_v44, 0.0 }
 0x44d   :  { %v4155_v28 = vsel %vm3176_vm3, %v9071_v32, 0.0  ;;  %v3435_v58 = vsel %vm3176_vm3, %v9075_v45, -inf  ;;  %v6183_v1 = vpop.eup %6182 }
 0x44e   :  { %v4895_v20 = vmul.f32 %v8678_v63, %v4767_v59  ;;  %4156 = vadd.xlane.f32.xlu0 %v4155_v28  ;;  %3436 = vmax.xlane.f32.xlu2 %v3435_v58  ;;  %6186 = vpow2.f32 %v3831_v2 }
 0x44f   :  { %5349 = vmatmul.msk.f32.gmra.mxu3 %vm1085_vm1, %v6183_v1  ;;  %v6185_v38 = vpop.eup %6184  ;;  %6188 = vtanh.f32 %v929_v40  ;;  %v932_v40 = vadd.f32 %v8861_v42, %v8724_v53 }
 0x450   :  { %5023 = vst.msk [vmem:[%s10255_s8 + $0x1b0] sm:$0xff] %vm3176_vm3, %v4895_v20  ;;  %v4115_v41 = vpop.xlane.xlu1 %4114  ;;  %v4512_v27 = vmul.f32 %v6185_v38, %v4112_v13 }
 0x451   :  { %v2669_v47 = vpop.f32.mrf.mxu2  ;;  %6190 = vrcp.f32 %v4115_v41  ;;  %v3395_v63 = vpop.xlane.xlu0 %3394 }
 0x452   :  { %v2670_v51 = vadd.f32 %v8705_v9, %v2669_v47  ;;  %v3633_v19 = vsub.f32 %v8737_v34, %v3395_v63  ;;  %v9092_v21 = vpop.f32.mrf.mxu3  ;;  %v4640_v59 = vsub.f32 2.0, %v4512_v27 }
 0x454   :  { %v9096_v2 = vsel %vm3007_vm0, -1e+10, %v2670_v51  ;;  %v3833_v28 = vmul.f32 1.442695, %v3633_v19  ;;  %v9098_v58 = vpop.eup %6186  ;;  %v4768_v13 = vmul.f32 %v6185_v38, %v4640_v59 }
 0x455   :  { %v3438_v1 = vsel %vm3176_vm3, %v9096_v2, -inf  ;;  %v6189_v20 = vpop.eup %6188  ;;  %v4158_v34 = vsel %vm3176_vm3, %v9098_v58, 0.0 }
 0x456   :  { %6192 = vpow2.f32 %v3833_v28  ;;  %3439 = vmax.xlane.f32.xlu0 %v3438_v1  ;;  %v4896_v27 = vmul.f32 %v8708_v52, %v4768_v13  ;;  %4159 = vadd.xlane.f32.xlu1 %v4158_v34 }
 0x457   :  { %v6191_v53 = vpop.eup %6190  ;;  %5350 = vmatmul.msk.f32.gmra.mxu3 %vm1085_vm1, %v6189_v20  ;;  %6194 = vtanh.f32 %v932_v40 }
 0x458   :  { %v4513_v38 = vmul.f32 %v6191_v53, %v4115_v41  ;;  %v4118_v47 = vpop.xlane.xlu2 %4117  ;;  %5024 = vst.msk [vmem:[%s10255_s8 + $0x1b8] sm:$0xff] %vm3176_vm3, %v4896_v27  ;;  %v935_v41 = vadd.f32 %v8861_v42, %v8754_v37  ;;  %v2881_v27 = vld [vmem:[%s10254_s7 + $0x2c8] sm:$0xff] }
 0x459   :  { %v2672_v63 = vpop.f32.mrf.mxu2  ;;  %v3398_v51 = vpop.xlane.xlu1 %3397  ;;  %6196 = vrcp.f32 %v4118_v47  ;;  %vm3009_vm11 = vcmp.eq.f32.partialorder %v2881_v27, 0.0 }
 0x45a   :  { %v4641_v19 = vsub.f32 2.0, %v4513_v38  ;;  %v2673_v59 = vadd.f32 %v8705_v9, %v2672_v63  ;;  %v3634_v52 = vsub.f32 %v8762_v31, %v3398_v51  ;;  %v9115_v28 = vpop.f32.mrf.mxu3  ;;  %v9139_v51 = vld [vmem:[%s10253_s6] ss:$0 sm:$0xff] }
 0x45c   :  { %v9117_v13 = vpop.eup %6192  ;;  %v4769_v40 = vmul.f32 %v6191_v53, %v4641_v19  ;;  %v9121_v1 = vsel %vm3008_vm10, -1e+10, %v2673_v59  ;;  %v3835_v20 = vmul.f32 1.442695, %v3634_v52 }
 0x45d   :  { %v3441_v34 = vsel %vm3176_vm3, %v9121_v1, -inf  ;;  %v4161_v44 = vsel %vm3176_vm3, %v9117_v13, 0.0  ;;  %v6195_v9 = vpop.eup %6194 }
 0x45e   :  { %v4897_v31 = vmul.f32 %v8735_v56, %v4769_v40  ;;  %6198 = vpow2.f32 %v3835_v20  ;;  %4162 = vadd.xlane.f32.xlu2 %v4161_v44  ;;  %3442 = vmax.xlane.f32.xlu1 %v3441_v34 }
 0x45f   :  { %v6197_v37 = vpop.eup %6196  ;;  %5351 = vmatmul.msk.f32.gmra.mxu3 %vm1085_vm1, %v6195_v9  ;;  %6200 = vtanh.f32 %v935_v41 }
 0x460   :  { %5025 = vst.msk [vmem:[%s10255_s8 + $0x1c0] sm:$0xff] %vm3176_vm3, %v4897_v31  ;;  %v4514_v53 = vmul.f32 %v6197_v37, %v4118_v47  ;;  %v4121_v56 = vpop.xlane.xlu0 %4120  ;;  %v938_v47 = vadd.f32 %v8861_v42, %v8781_v17 }
 0x461   :  { %v2675_v38 = vpop.f32.mrf.mxu2  ;;  %v3401_v59 = vpop.xlane.xlu2 %3400  ;;  %6202 = vrcp.f32 %v4121_v56 }
 0x462   :  { %v4642_v63 = vsub.f32 2.0, %v4514_v53  ;;  %v2676_v19 = vadd.f32 %v9139_v51, %v2675_v38  ;;  %v9142_v52 = vpop.f32.mrf.mxu3  ;;  %v3635_v41 = vsub.f32 %v8787_v10, %v3401_v59  ;;  %v2882_v10 = vld [vmem:[%s10254_s7 + $0x2d0] sm:$0xff] }
 0x463   :  { %vm3010_vm12 = vcmp.eq.f32.partialorder %v2882_v10, 0.0  ;;  %v2883_v10 = vld [vmem:[%s10254_s7 + $0x2d8] sm:$0xff] }
 0x464   :  { %v9145_v40 = vpop.eup %6198  ;;  %v4770_v20 = vmul.f32 %v6197_v37, %v4642_v63  ;;  %v9149_v34 = vsel %vm3009_vm11, -1e+10, %v2676_v19  ;;  %v3837_v44 = vmul.f32 1.442695, %v3635_v41  ;;  %vm3011_vm13 = vcmp.eq.f32.partialorder %v2883_v10, 0.0 }
 0x465   :  { %v4164_v9 = vsel %vm3176_vm3, %v9145_v40, 0.0  ;;  %v3444_v31 = vsel %vm3176_vm3, %v9149_v34, -inf  ;;  %v6201_v27 = vpop.eup %6200 }
 0x466   :  { %v4898_v53 = vmul.f32 %v8758_v7, %v4770_v20  ;;  %4165 = vadd.xlane.f32.xlu0 %v4164_v9  ;;  %3445 = vmax.xlane.f32.xlu2 %v3444_v31  ;;  %6204 = vpow2.f32 %v3837_v44 }
 0x467   :  { %5352 = vmatmul.msk.f32.gmra.mxu3 %vm1085_vm1, %v6201_v27  ;;  %v6203_v17 = vpop.eup %6202  ;;  %6206 = vtanh.f32 %v938_v47  ;;  %v941_v47 = vadd.f32 %v8861_v42, %v8814_v61 }
 0x468   :  { %5026 = vst.msk [vmem:[%s10255_s8 + $0x1c8] sm:$0xff] %vm3176_vm3, %v4898_v53  ;;  %v4124_v37 = vpop.xlane.xlu1 %4123  ;;  %v4515_v38 = vmul.f32 %v6203_v17, %v4121_v56 }
 0x469   :  { %v2678_v63 = vpop.f32.mrf.mxu2  ;;  %6208 = vrcp.f32 %v4124_v37  ;;  %v3404_v7 = vpop.xlane.xlu0 %3403 }
 0x46a   :  { %v2679_v19 = vadd.f32 %v9139_v51, %v2678_v63  ;;  %v3636_v59 = vsub.f32 %v8810_v3, %v3404_v7  ;;  %v9166_v41 = vpop.f32.mrf.mxu3  ;;  %v4643_v20 = vsub.f32 2.0, %v4515_v38 }
 0x46c   :  { %v9170_v44 = vsel %vm3010_vm12, -1e+10, %v2679_v19  ;;  %v3839_v9 = vmul.f32 1.442695, %v3636_v59  ;;  %v9172_v31 = vpop.eup %6204  ;;  %v4771_v56 = vmul.f32 %v6203_v17, %v4643_v20 }
 0x46d   :  { %v3447_v27 = vsel %vm3176_vm3, %v9170_v44, -inf  ;;  %v6207_v53 = vpop.eup %6206  ;;  %v4167_v3 = vsel %vm3176_vm3, %v9172_v31, 0.0 }
 0x46e   :  { %6210 = vpow2.f32 %v3839_v9  ;;  %3448 = vmax.xlane.f32.xlu0 %v3447_v27  ;;  %v4899_v38 = vmul.f32 %v8783_v15, %v4771_v56  ;;  %4168 = vadd.xlane.f32.xlu1 %v4167_v3 }
 0x46f   :  { %v6209_v61 = vpop.eup %6208  ;;  %5353 = vmatmul.msk.f32.gmra.mxu3 %vm1085_vm1, %v6207_v53  ;;  %6212 = vtanh.f32 %v941_v47 }
 0x470   :  { %v4516_v17 = vmul.f32 %v6209_v61, %v4124_v37  ;;  %v4127_v63 = vpop.xlane.xlu2 %4126  ;;  %5027 = vst.msk [vmem:[%s10255_s8 + $0x1d0] sm:$0xff] %vm3176_vm3, %v4899_v38  ;;  %v944_v37 = vadd.f32 %v8861_v42, %v8843_v12 }
 0x471   :  { %v2681_v7 = vpop.f32.mrf.mxu2  ;;  %v3407_v19 = vpop.xlane.xlu1 %3406  ;;  %6214 = vrcp.f32 %v4127_v63 }
 0x472   :  { %v4644_v59 = vsub.f32 2.0, %v4516_v17  ;;  %v2682_v20 = vadd.f32 %v9139_v51, %v2681_v7  ;;  %v3637_v15 = vsub.f32 %v8835_v26, %v3407_v19  ;;  %v9189_v9 = vpop.f32.mrf.mxu3  ;;  %v2884_v17 = vld [vmem:[%s10254_s7 + $0x2e0] sm:$0xff] }
 0x473   :  { %vm3012_vm14 = vcmp.eq.f32.partialorder %v2884_v17, 0.0 }
 0x474   :  { %v9191_v56 = vpop.eup %6210  ;;  %v4772_v47 = vmul.f32 %v6209_v61, %v4644_v59  ;;  %v9195_v27 = vsel %vm3011_vm13, -1e+10, %v2682_v20  ;;  %v3841_v53 = vmul.f32 1.442695, %v3637_v15 }
 0x475   :  { %v3450_v3 = vsel %vm3176_vm3, %v9195_v27, -inf  ;;  %v4170_v10 = vsel %vm3176_vm3, %v9191_v56, 0.0  ;;  %v6213_v38 = vpop.eup %6212 }
 0x476   :  { %v4900_v26 = vmul.f32 %v8808_v25, %v4772_v47  ;;  %6216 = vpow2.f32 %v3841_v53  ;;  %4171 = vadd.xlane.f32.xlu2 %v4170_v10  ;;  %3451 = vmax.xlane.f32.xlu1 %v3450_v3 }
 0x477   :  { %v6215_v12 = vpop.eup %6214  ;;  %5354 = vmatmul.msk.f32.gmra.mxu3 %vm1085_vm1, %v6213_v38  ;;  %6218 = vtanh.f32 %v944_v37  ;;  %v947_v37 = vadd.f32 %v8861_v42, %v8882_v62 }
 0x478   :  { %5028 = vst.msk [vmem:[%s10255_s8 + $0x1d8] sm:$0xff] %vm3176_vm3, %v4900_v26  ;;  %v4517_v61 = vmul.f32 %v6215_v12, %v4127_v63  ;;  %v4130_v25 = vpop.xlane.xlu0 %4129 }
 0x479   :  { %v2684_v7 = vpop.f32.mrf.mxu2  ;;  %v3410_v20 = vpop.xlane.xlu2 %3409  ;;  %6220 = vrcp.f32 %v4130_v25 }
 0x47a   :  { %v4645_v19 = vsub.f32 2.0, %v4517_v61  ;;  %v2685_v59 = vadd.f32 %v9139_v51, %v2684_v7  ;;  %v9211_v15 = vpop.f32.mrf.mxu3  ;;  %v3638_v47 = vsub.f32 %v8865_v23, %v3410_v20  ;;  %v2885_v23 = vld [vmem:[%s10254_s7 + $0x2e8] sm:$0xff] }
 0x47b   :  { %vm3013_vm15 = vcmp.eq.f32.partialorder %v2885_v23, 0.0  ;;  %v2886_v23 = vld [vmem:[%s10254_s7 + $0x2f0] sm:$0xff] }
 0x47c   :  { %v9214_v53 = vpop.eup %6216  ;;  %v4773_v3 = vmul.f32 %v6215_v12, %v4645_v19  ;;  %v9218_v10 = vsel %vm3012_vm14, -1e+10, %v2685_v59  ;;  %v3843_v63 = vmul.f32 1.442695, %v3638_v47  ;;  %vm3014_vm2 = vcmp.eq.f32.partialorder %v2886_v23, 0.0 }
 0x47d   :  { %v4173_v38 = vsel %vm3176_vm3, %v9214_v53, 0.0  ;;  %v3453_v26 = vsel %vm3176_vm3, %v9218_v10, -inf  ;;  %v6219_v17 = vpop.eup %6218 }
 0x47e   :  { %v4901_v61 = vmul.f32 %v8831_v24, %v4773_v3  ;;  %4174 = vadd.xlane.f32.xlu0 %v4173_v38  ;;  %3454 = vmax.xlane.f32.xlu2 %v3453_v26  ;;  %6222 = vpow2.f32 %v3843_v63 }
 0x47f   :  { %5355 = vmatmul.msk.f32.gmra.mxu3 %vm1085_vm1, %v6219_v17  ;;  %v6221_v42 = vpop.eup %6220  ;;  %6224 = vtanh.f32 %v947_v37  ;;  %v9240_v37 = vld [vmem:[%s10251_s4] ss:$0 sm:$0xff] }
 0x480   :  { %5029 = vst.msk [vmem:[%s10255_s8 + $0x1e0] sm:$0xff] %vm3176_vm3, %v4901_v61  ;;  %v4133_v62 = vpop.xlane.xlu1 %4132  ;;  %v4518_v12 = vmul.f32 %v6221_v42, %v4130_v25  ;;  %v1776_v3 = vadd.f32 %v9240_v37, %v8908_v11 }
 0x481   :  { %v2687_v7 = vpop.f32.mrf.mxu2  ;;  %6226 = vrcp.f32 %v4133_v62  ;;  %v3413_v24 = vpop.xlane.xlu0 %3412 }
 0x482   :  { %v2688_v19 = vadd.f32 %v9139_v51, %v2687_v7  ;;  %v3639_v59 = vsub.f32 %v8890_v50, %v3413_v24  ;;  %v9235_v20 = vpop.f32.mrf.mxu3  ;;  %v4646_v47 = vsub.f32 2.0, %v4518_v12 }
 0x484   :  { %v9244_v25 = vsel %vm3013_vm15, -1e+10, %v2688_v19  ;;  %v3845_v63 = vmul.f32 1.442695, %v3639_v59  ;;  %v9246_v38 = vpop.eup %6222  ;;  %v4774_v26 = vmul.f32 %v6221_v42, %v4646_v47 }
 0x485   :  { %v3456_v50 = vsel %vm3176_vm3, %v9244_v25, -inf  ;;  %v6225_v17 = vpop.eup %6224  ;;  %v4176_v61 = vsel %vm3176_vm3, %v9246_v38, 0.0 }
 0x486   :  { %6228 = vpow2.f32 %v3845_v63  ;;  %3457 = vmax.xlane.f32.xlu0 %v3456_v50  ;;  %v4902_v12 = vmul.f32 %v8856_v55, %v4774_v26  ;;  %4177 = vadd.xlane.f32.xlu1 %v4176_v61 }
 0x487   :  { %v6227_v11 = vpop.eup %6226  ;;  %5356 = vmatmul.msk.f32.gmra.mxu3 %vm1085_vm1, %v6225_v17  ;;  %6230 = vtanh.f32 %v1776_v3 }
 0x488   :  { %v4519_v42 = vmul.f32 %v6227_v11, %v4133_v62  ;;  %v4136_v7 = vpop.xlane.xlu2 %4135  ;;  %5030 = vst.msk [vmem:[%s10255_s8 + $0x1e8] sm:$0xff] %vm3176_vm3, %v4902_v12  ;;  %v1779_v62 = vadd.f32 %v9240_v37, %v8931_v6 }
 0x489   :  { %v2690_v24 = vpop.f32.mrf.mxu2  ;;  %v3416_v19 = vpop.xlane.xlu1 %3415  ;;  %6232 = vrcp.f32 %v4136_v7 }
 0x48a   :  { %v4647_v59 = vsub.f32 2.0, %v4519_v42  ;;  %v2691_v47 = vadd.f32 %v9139_v51, %v2690_v24  ;;  %v3640_v55 = vsub.f32 %v8914_v60, %v3416_v19  ;;  %v9263_v63 = vpop.f32.mrf.mxu3  ;;  %v2887_v42 = vld [vmem:[%s10254_s7 + $0x2f8] sm:$0xff] }
 0x48b   :  { %vm3015_vm4 = vcmp.eq.f32.partialorder %v2887_v42, 0.0 }
 0x48c   :  { %v9265_v26 = vpop.eup %6228  ;;  %v4775_v3 = vmul.f32 %v6227_v11, %v4647_v59  ;;  %v9269_v50 = vsel %vm3014_vm2, -1e+10, %v2691_v47  ;;  %v3847_v17 = vmul.f32 1.442695, %v3640_v55 }
 0x48d   :  { %v3459_v61 = vsel %vm3176_vm3, %v9269_v50, -inf  ;;  %v4179_v23 = vsel %vm3176_vm3, %v9265_v26, 0.0  ;;  %v6231_v12 = vpop.eup %6230 }
 0x48e   :  { %v4903_v60 = vmul.f32 %v8886_v0, %v4775_v3  ;;  %6234 = vpow2.f32 %v3847_v17  ;;  %4180 = vadd.xlane.f32.xlu2 %v4179_v23  ;;  %3460 = vmax.xlane.f32.xlu1 %v3459_v61 }
 0x48f   :  { %v6233_v6 = vpop.eup %6232  ;;  %5453 = vmatmul.msk.f32.vlgmr.msra.gmra.mxu3 %vm1085_vm1, %v6231_v12  ;;  %6236 = vtanh.f32 %v1779_v62  ;;  %v1782_v62 = vadd.f32 %v9240_v37, %v8954_v4 }
 0x490   :  { %5031 = vst.msk [vmem:[%s10255_s8 + $0x1f0] sm:$0xff] %vm3176_vm3, %v4903_v60  ;;  %v4520_v11 = vmul.f32 %v6233_v6, %v4136_v7  ;;  %v4139_v55 = vpop.xlane.xlu0 %4138 }
 0x491   :  { %v2693_v24 = vpop.f32.mrf.mxu2  ;;  %v3419_v0 = vpop.xlane.xlu2 %3418  ;;  %6238 = vrcp.f32 %v4139_v55 }
 0x492   :  { %v4648_v19 = vsub.f32 2.0, %v4520_v11  ;;  %v2694_v59 = vadd.f32 %v9139_v51, %v2693_v24  ;;  %v3641_v47 = vsub.f32 %v8937_v46, %v3419_v0  ;;  %v9286_v3 = vpop.f32.mrf.mxu3 }
 0x494   :  { %v9288_v17 = vpop.eup %6234  ;;  %v4776_v61 = vmul.f32 %v6233_v6, %v4648_v19  ;;  %v9292_v23 = vsel %vm3015_vm4, -1e+10, %v2694_v59  ;;  %v3849_v7 = vmul.f32 1.442695, %v3641_v47  ;;  %v1785_v59 = vadd.f32 %v9240_v37, %v8977_v49 }
 0x495   :  { %v4182_v12 = vsel %vm3176_vm3, %v9288_v17, 0.0  ;;  %v3462_v60 = vsel %vm3176_vm3, %v9292_v23, -inf  ;;  %v6237_v46 = vpop.eup %6236 }
 0x496   :  { %v4904_v42 = vmul.f32 %v8910_v39, %v4776_v61  ;;  %6240 = vpow2.f32 %v3849_v7  ;;  %4183 = vadd.xlane.f32.xlu0 %v4182_v12  ;;  %3463 = vmax.xlane.f32.xlu2 %v3462_v60 }
 0x497   :  { %5454 = vmatmul.msk.f32.gmra.mxu3 %vm1085_vm1, %v6237_v46  ;;  %6242 = vtanh.f32 %v1782_v62  ;;  %v6239_v6 = vpop.eup %6238 }
 0x498   :  { %5032 = vst.msk [vmem:[%s10255_s8 + $0x1f8] sm:$0xff] %vm3176_vm3, %v4904_v42  ;;  %v4142_v4 = vpop.xlane.xlu1 %4141  ;;  %v4521_v11 = vmul.f32 %v6239_v6, %v4139_v55 }
 0x499   :  { %6244 = vrcp.f32 %v4142_v4  ;;  %v3422_v24 = vpop.xlane.xlu0 %3421 }
 0x49a   :  { %v9304_v0 = vpop.f32.mrf.mxu3  ;;  %v3642_v39 = vsub.f32 %v8960_v14, %v3422_v24  ;;  %v4649_v47 = vsub.f32 2.0, %v4521_v11  ;;  %v1788_v24 = vadd.f32 %v9240_v37, %v8999_v48 }
 0x49c   :  { %v9307_v19 = vpop.eup %6240  ;;  %v3851_v62 = vmul.f32 1.442695, %v3642_v39  ;;  %v4777_v12 = vmul.f32 %v6239_v6, %v4649_v47 }
 0x49d   :  { %v4185_v61 = vsel %vm3176_vm3, %v9307_v19, 0.0  ;;  %v6243_v7 = vpop.eup %6242 }
 0x49e   :  { %4186 = vadd.xlane.f32.xlu1 %v4185_v61  ;;  %6246 = vpow2.f32 %v3851_v62  ;;  %v4905_v14 = vmul.f32 %v8933_v29, %v4777_v12 }
 0x49f   :  { %v6245_v60 = vpop.eup %6244  ;;  %5455 = vmatmul.msk.f32.gmra.mxu3 %vm1085_vm1, %v6243_v7  ;;  %6248 = vtanh.f32 %v1785_v59 }
 0x4a0   :  { %v4522_v55 = vmul.f32 %v6245_v60, %v4142_v4  ;;  %v4145_v46 = vpop.xlane.xlu2 %4144  ;;  %5033 = vst.msk [vmem:[%s10255_s8 + $0x200] sm:$0xff] %vm3176_vm3, %v4905_v14 }
 0x4a1   :  { %v3425_v42 = vpop.xlane.xlu1 %3424  ;;  %6250 = vrcp.f32 %v4145_v46 }
 0x4a2   :  { %v4650_v49 = vsub.f32 2.0, %v4522_v55  ;;  %v3643_v6 = vsub.f32 %v8983_v57, %v3425_v42  ;;  %v9320_v11 = vpop.f32.mrf.mxu3  ;;  %v1791_v55 = vadd.f32 %v9240_v37, %v9023_v8 }
 0x4a4   :  { %v4778_v39 = vmul.f32 %v6245_v60, %v4650_v49  ;;  %v3853_v59 = vmul.f32 1.442695, %v3643_v6  ;;  %v9324_v29 = vpop.eup %6246 }
 0x4a5   :  { %v6249_v4 = vpop.eup %6248  ;;  %v4188_v62 = vsel %vm3176_vm3, %v9324_v29, 0.0 }
 0x4a6   :  { %v4906_v47 = vmul.f32 %v8956_v35, %v4778_v39  ;;  %6252 = vpow2.f32 %v3853_v59  ;;  %4189 = vadd.xlane.f32.xlu2 %v4188_v62 }
 0x4a7   :  { %v6251_v61 = vpop.eup %6250  ;;  %5456 = vmatmul.msk.f32.gmra.mxu3 %vm1085_vm1, %v6249_v4  ;;  %6254 = vtanh.f32 %v1788_v24 }
 0x4a8   :  { %5034 = vst.msk [vmem:[%s10255_s8 + $0x208] sm:$0xff] %vm3176_vm3, %v4906_v47  ;;  %v4523_v57 = vmul.f32 %v6251_v61, %v4145_v46  ;;  %v4148_v7 = vpop.xlane.xlu0 %4147 }
 0x4a9   :  { %v3428_v48 = vpop.xlane.xlu2 %3427  ;;  %6256 = vrcp.f32 %v4148_v7 }
 0x4aa   :  { %v4651_v12 = vsub.f32 2.0, %v4523_v57  ;;  %v3644_v35 = vsub.f32 %v9006_v16, %v3428_v48  ;;  %v9335_v60 = vpop.f32.mrf.mxu3 }
 0x4ac   :  { %v9337_v14 = vpop.eup %6252  ;;  %v4779_v42 = vmul.f32 %v6251_v61, %v4651_v12  ;;  %v3855_v49 = vmul.f32 1.442695, %v3644_v35  ;;  %v1794_v61 = vadd.f32 %v9240_v37, %v9046_v22 }
 0x4ad   :  { %v4191_v6 = vsel %vm3176_vm3, %v9337_v14, 0.0  ;;  %v6255_v24 = vpop.eup %6254 }
 0x4ae   :  { %v4907_v46 = vmul.f32 %v8979_v54, %v4779_v42  ;;  %6258 = vpow2.f32 %v3855_v49  ;;  %4192 = vadd.xlane.f32.xlu0 %v4191_v6 }
 0x4af   :  { %5457 = vmatmul.msk.f32.gmra.mxu3 %vm1085_vm1, %v6255_v24  ;;  %v6257_v16 = vpop.eup %6256  ;;  %6260 = vtanh.f32 %v1791_v55 }
 0x4b0   :  { %5035 = vst.msk [vmem:[%s10255_s8 + $0x210] sm:$0xff] %vm3176_vm3, %v4907_v46  ;;  %v4524_v8 = vmul.f32 %v6257_v16, %v4148_v7 }
 0x4b1   :  { %v3431_v39 = vpop.xlane.xlu0 %3430 }
 0x4b2   :  { %v4151_v59 = vpop.xlane.xlu1 %4150  ;;  %v3645_v4 = vsub.f32 %v9027_v5, %v3431_v39  ;;  %v9350_v47 = vpop.f32.mrf.mxu3  ;;  %v4652_v62 = vsub.f32 2.0, %v4524_v8 }
 0x4b3   :  { %6262 = vrcp.f32 %v4151_v59 }
 0x4b4   :  { %v9352_v54 = vpop.eup %6258  ;;  %v3857_v57 = vmul.f32 1.442695, %v3645_v4  ;;  %v4780_v48 = vmul.f32 %v6257_v16, %v4652_v62 }
 0x4b5   :  { %v4194_v12 = vsel %vm3176_vm3, %v9352_v54, 0.0  ;;  %v6261_v35 = vpop.eup %6260 }
 0x4b6   :  { %6264 = vpow2.f32 %v3857_v57  ;;  %4195 = vadd.xlane.f32.xlu1 %v4194_v12  ;;  %v4908_v7 = vmul.f32 %v9002_v30, %v4780_v48  ;;  %v1797_v30 = vadd.f32 %v9240_v37, %v9068_v43 }
 0x4b7   :  { %5458 = vmatmul.msk.f32.gmra.mxu3 %vm1085_vm1, %v6261_v35  ;;  %6266 = vtanh.f32 %v1794_v61  ;;  %v1800_v35 = vadd.f32 %v9240_v37, %v9092_v21 }
 0x4b8   :  { %5036 = vst.msk [vmem:[%s10255_s8 + $0x218] sm:$0xff] %vm3176_vm3, %v4908_v7 }
 0x4b9   :  { %v6263_v5 = vpop.eup %6262  ;;  %v4154_v22 = vpop.xlane.xlu2 %4153 }
 0x4ba   :  { %v4525_v55 = vmul.f32 %v6263_v5, %v4151_v59  ;;  %v3434_v42 = vpop.xlane.xlu1 %3433  ;;  %6268 = vrcp.f32 %v4154_v22  ;;  %v9364_v49 = vpop.f32.mrf.mxu3 }
 0x4bb   :  { %v3646_v6 = vsub.f32 %v9052_v36, %v3434_v42 }
 0x4bc   :  { %v9367_v24 = vpop.eup %6264  ;;  %v4653_v46 = vsub.f32 2.0, %v4525_v55 }
 0x4bd   :  { %v3859_v16 = vmul.f32 1.442695, %v3646_v6  ;;  %v4197_v8 = vsel %vm3176_vm3, %v9367_v24, 0.0  ;;  %v6267_v39 = vpop.eup %6266 }
 0x4be   :  { %v4781_v4 = vmul.f32 %v6263_v5, %v4653_v46  ;;  %4198 = vadd.xlane.f32.xlu2 %v4197_v8 }
 0x4bf   :  { %6270 = vpow2.f32 %v3859_v16  ;;  %5459 = vmatmul.msk.f32.gmra.mxu3 %vm1085_vm1, %v6267_v39  ;;  %v1803_v39 = vadd.f32 %v9240_v37, %v9115_v28 }
 0x4c0   :  { %v6269_v59 = vpop.eup %6268  ;;  %6272 = vtanh.f32 %v1797_v30  ;;  %v4909_v36 = vmul.f32 %v9029_v33, %v4781_v4 }
 0x4c1   :  { %v4526_v62 = vmul.f32 %v6269_v59, %v4154_v22  ;;  %v3437_v61 = vpop.xlane.xlu2 %3436  ;;  %v4157_v57 = vpop.xlane.xlu0 %4156 }
 0x4c2   :  { %5037 = vst.msk [vmem:[%s10255_s8 + $0x220] sm:$0xff] %vm3176_vm3, %v4909_v36  ;;  %v3647_v43 = vsub.f32 %v9075_v45, %v3437_v61  ;;  %6274 = vrcp.f32 %v4157_v57  ;;  %v9380_v48 = vpop.f32.mrf.mxu3 }
 0x4c3   :  { %v4654_v12 = vsub.f32 2.0, %v4526_v62 }
 0x4c4   :  { %v3861_v7 = vmul.f32 1.442695, %v3647_v43 }
 0x4c5   :  { %v9384_v5 = vpop.eup %6270  ;;  %v4782_v33 = vmul.f32 %v6269_v59, %v4654_v12 }
 0x4c6   :  { %v6273_v22 = vpop.eup %6272  ;;  %6276 = vpow2.f32 %v3861_v7  ;;  %v4200_v55 = vsel %vm3176_vm3, %v9384_v5, 0.0 }
 0x4c7   :  { %v4910_v42 = vmul.f32 %v9048_v18, %v4782_v33  ;;  %4201 = vadd.xlane.f32.xlu0 %v4200_v55  ;;  %5460 = vmatmul.msk.f32.gmra.mxu3 %vm1085_vm1, %v6273_v22  ;;  %6278 = vtanh.f32 %v1800_v35 }
 0x4c8   :  { %v6275_v45 = vpop.eup %6274 }
 0x4c9   :  { %5038 = vst.msk [vmem:[%s10255_s8 + $0x228] sm:$0xff] %vm3176_vm3, %v4910_v42  ;;  %v4527_v21 = vmul.f32 %v6275_v45, %v4157_v57  ;;  %v3440_v6 = vpop.xlane.xlu0 %3439  ;;  %v4160_v30 = vpop.xlane.xlu1 %4159 }
 0x4ca   :  { %v3648_v46 = vsub.f32 %v9096_v2, %v3440_v6  ;;  %v9395_v16 = vpop.f32.mrf.mxu3  ;;  %6280 = vrcp.f32 %v4160_v30 }
 0x4cb   :  { %v4655_v8 = vsub.f32 2.0, %v4527_v21 }
 0x4cc   :  { %v9397_v18 = vpop.eup %6276  ;;  %v3863_v4 = vmul.f32 1.442695, %v3648_v46 }
 0x4cd   :  { %v4783_v59 = vmul.f32 %v6275_v45, %v4655_v8  ;;  %v4203_v36 = vsel %vm3176_vm3, %v9397_v18, 0.0  ;;  %v6279_v62 = vpop.eup %6278 }
 0x4ce   :  { %6282 = vpow2.f32 %v3863_v4  ;;  %4204 = vadd.xlane.f32.xlu1 %v4203_v36  ;;  %v1809_v4 = vadd.f32 %v9240_v37, %v9166_v41 }
 0x4cf   :  { %v4911_v61 = vmul.f32 %v9071_v32, %v4783_v59  ;;  %5461 = vmatmul.msk.f32.gmra.mxu3 %vm1085_vm1, %v6279_v62  ;;  %6284 = vtanh.f32 %v1803_v39  ;;  %v1806_v32 = vadd.f32 %v9240_v37, %v9142_v52 }
 0x4d0   :  { %v6281_v2 = vpop.eup %6280 }
 0x4d1   :  { %5039 = vst.msk [vmem:[%s10255_s8 + $0x230] sm:$0xff] %vm3176_vm3, %v4911_v61  ;;  %v4163_v28 = vpop.xlane.xlu2 %4162  ;;  %v4528_v57 = vmul.f32 %v6281_v2, %v4160_v30  ;;  %v3443_v43 = vpop.xlane.xlu1 %3442 }
 0x4d2   :  { %6286 = vrcp.f32 %v4163_v28  ;;  %v9409_v12 = vpop.f32.mrf.mxu3  ;;  %v3649_v35 = vsub.f32 %v9121_v1, %v3443_v43 }
 0x4d3   :  { %v4656_v33 = vsub.f32 2.0, %v4528_v57 }
 0x4d4   :  { %v9412_v7 = vpop.eup %6282  ;;  %v3865_v22 = vmul.f32 1.442695, %v3649_v35 }
 0x4d5   :  { %v4206_v55 = vsel %vm3176_vm3, %v9412_v7, 0.0  ;;  %v6285_v42 = vpop.eup %6284  ;;  %v4784_v45 = vmul.f32 %v6281_v2, %v4656_v33  ;;  %v1812_v33 = vadd.f32 %v9240_v37, %v9189_v9 }
 0x4d6   :  { %4207 = vadd.xlane.f32.xlu2 %v4206_v55  ;;  %6288 = vpow2.f32 %v3865_v22 }
 0x4d7   :  { %5462 = vmatmul.msk.f32.gmra.mxu3 %vm1085_vm1, %v6285_v42  ;;  %6290 = vtanh.f32 %v1806_v32  ;;  %v4912_v1 = vmul.f32 %v9098_v58, %v4784_v45 }
 0x4d8   :  { %v6287_v21 = vpop.eup %6286 }
 0x4d9   :  { %v4529_v6 = vmul.f32 %v6287_v21, %v4163_v28  ;;  %v3446_v30 = vpop.xlane.xlu2 %3445  ;;  %v4166_v46 = vpop.xlane.xlu0 %4165  ;;  %5040 = vst.msk [vmem:[%s10255_s8 + $0x238] sm:$0xff] %vm3176_vm3, %v4912_v1 }
 0x4da   :  { %v3650_v52 = vsub.f32 %v9149_v34, %v3446_v30  ;;  %6292 = vrcp.f32 %v4166_v46  ;;  %v9425_v8 = vpop.f32.mrf.mxu3 }
 0x4db   :  { %v4657_v39 = vsub.f32 2.0, %v4529_v6 }
 0x4dc   :  { %v3867_v59 = vmul.f32 1.442695, %v3650_v52  ;;  %v9429_v36 = vpop.eup %6288 }
 0x4dd   :  { %v4785_v58 = vmul.f32 %v6287_v21, %v4657_v39  ;;  %v6291_v62 = vpop.eup %6290  ;;  %v4209_v61 = vsel %vm3176_vm3, %v9429_v36, 0.0 }
 0x4de   :  { %6294 = vpow2.f32 %v3867_v59  ;;  %4210 = vadd.xlane.f32.xlu0 %v4209_v61 }
 0x4df   :  { %v4913_v2 = vmul.f32 %v9117_v13, %v4785_v58  ;;  %5463 = vmatmul.msk.f32.gmra.mxu3 %vm1085_vm1, %v6291_v62  ;;  %6296 = vtanh.f32 %v1809_v4 }
 0x4e0   :  { %v6293_v34 = vpop.eup %6292 }
 0x4e1   :  { %5041 = vst.msk [vmem:[%s10255_s8 + $0x240] sm:$0xff] %vm3176_vm3, %v4913_v2  ;;  %v4530_v41 = vmul.f32 %v6293_v34, %v4166_v46  ;;  %v3449_v28 = vpop.xlane.xlu0 %3448  ;;  %v4169_v57 = vpop.xlane.xlu1 %4168 }
 0x4e2   :  { %v3651_v43 = vsub.f32 %v9170_v44, %v3449_v28  ;;  %v9440_v35 = vpop.f32.mrf.mxu3  ;;  %6298 = vrcp.f32 %v4169_v57 }
 0x4e3   :  { %v4658_v32 = vsub.f32 2.0, %v4530_v41 }
 0x4e4   :  { %v9442_v13 = vpop.eup %6294  ;;  %v3869_v22 = vmul.f32 1.442695, %v3651_v43  ;;  %v1818_v43 = vadd.f32 %v9240_v37, %v9235_v20 }
 0x4e5   :  { %v4786_v55 = vmul.f32 %v6293_v34, %v4658_v32  ;;  %v4212_v42 = vsel %vm3176_vm3, %v9442_v13, 0.0  ;;  %v6297_v45 = vpop.eup %6296 }
 0x4e6   :  { %6300 = vpow2.f32 %v3869_v22  ;;  %4213 = vadd.xlane.f32.xlu1 %v4212_v42 }
 0x4e7   :  { %v4914_v21 = vmul.f32 %v9145_v40, %v4786_v55  ;;  %5464 = vmatmul.msk.f32.gmra.mxu3 %vm1085_vm1, %v6297_v45  ;;  %6302 = vtanh.f32 %v1812_v33  ;;  %v1815_v40 = vadd.f32 %v9240_v37, %v9211_v15 }
 0x4e8   :  { %v6299_v44 = vpop.eup %6298 }
 0x4e9   :  { %5042 = vst.msk [vmem:[%s10255_s8 + $0x248] sm:$0xff] %vm3176_vm3, %v4914_v21  ;;  %v4172_v9 = vpop.xlane.xlu2 %4171  ;;  %v4531_v1 = vmul.f32 %v6299_v44, %v4169_v57  ;;  %v3452_v6 = vpop.xlane.xlu1 %3451 }
 0x4ea   :  { %6304 = vrcp.f32 %v4172_v9  ;;  %v9454_v30 = vpop.f32.mrf.mxu3  ;;  %v3652_v46 = vsub.f32 %v9195_v27, %v3452_v6  ;;  %v1821_v6 = vadd.f32 %v9240_v37, %v9263_v63 }
 0x4eb   :  { %v4659_v39 = vsub.f32 2.0, %v4531_v1 }
 0x4ec   :  { %v9457_v52 = vpop.eup %6300  ;;  %v3871_v4 = vmul.f32 1.442695, %v3652_v46 }
 0x4ed   :  { %v4215_v59 = vsel %vm3176_vm3, %v9457_v52, 0.0  ;;  %v6303_v58 = vpop.eup %6302  ;;  %v4787_v62 = vmul.f32 %v6299_v44, %v4659_v39 }
 0x4ee   :  { %4216 = vadd.xlane.f32.xlu2 %v4215_v59  ;;  %6306 = vpow2.f32 %v3871_v4 }
 0x4ef   :  { %5465 = vmatmul.msk.f32.gmra.mxu3 %vm1085_vm1, %v6303_v58  ;;  %6308 = vtanh.f32 %v1815_v40  ;;  %v4915_v27 = vmul.f32 %v9172_v31, %v4787_v62 }
 0x4f0   :  { %v6305_v61 = vpop.eup %6304 }
 0x4f1   :  { %v4532_v2 = vmul.f32 %v6305_v61, %v4172_v9  ;;  %v3455_v34 = vpop.xlane.xlu2 %3454  ;;  %v4175_v41 = vpop.xlane.xlu0 %4174  ;;  %5043 = vst.msk [vmem:[%s10255_s8 + $0x250] sm:$0xff] %vm3176_vm3, %v4915_v27 }
 0x4f2   :  { %v3653_v15 = vsub.f32 %v9218_v10, %v3455_v34  ;;  %6310 = vrcp.f32 %v4175_v41  ;;  %v9470_v28 = vpop.f32.mrf.mxu3 }
 0x4f3   :  { %v4660_v57 = vsub.f32 2.0, %v4532_v2 }
 0x4f4   :  { %v3873_v32 = vmul.f32 1.442695, %v3653_v15  ;;  %v9474_v33 = vpop.eup %6306 }
 0x4f5   :  { %v4788_v31 = vmul.f32 %v6305_v61, %v4660_v57  ;;  %v6309_v22 = vpop.eup %6308  ;;  %v4218_v55 = vsel %vm3176_vm3, %v9474_v33, 0.0 }
 0x4f6   :  { %6312 = vpow2.f32 %v3873_v32  ;;  %4219 = vadd.xlane.f32.xlu0 %v4218_v55 }
 0x4f7   :  { %v4916_v42 = vmul.f32 %v9191_v56, %v4788_v31  ;;  %5466 = vmatmul.msk.f32.gmra.mxu3 %vm1085_vm1, %v6309_v22  ;;  %6314 = vtanh.f32 %v1818_v43 }
 0x4f8   :  { %v6311_v10 = vpop.eup %6310 }
 0x4f9   :  { %5044 = vst.msk [vmem:[%s10255_s8 + $0x258] sm:$0xff] %vm3176_vm3, %v4916_v42  ;;  %v4533_v20 = vmul.f32 %v6311_v10, %v4175_v41  ;;  %v3458_v45 = vpop.xlane.xlu0 %3457  ;;  %v4178_v21 = vpop.xlane.xlu1 %4177 }
 0x4fa   :  { %v3654_v44 = vsub.f32 %v9244_v25, %v3458_v45  ;;  %v9485_v9 = vpop.f32.mrf.mxu3  ;;  %6316 = vrcp.f32 %v4178_v21 }
 0x4fb   :  { %v4661_v1 = vsub.f32 2.0, %v4533_v20  ;;  %v1827_v20 = vadd.f32 %v9240_v37, %v9304_v0 }
 0x4fc   :  { %v9487_v56 = vpop.eup %6312  ;;  %v3875_v46 = vmul.f32 1.442695, %v3654_v44 }
 0x4fd   :  { %v4789_v40 = vmul.f32 %v6311_v10, %v4661_v1  ;;  %v4221_v39 = vsel %vm3176_vm3, %v9487_v56, 0.0  ;;  %v6315_v4 = vpop.eup %6314 }
 0x4fe   :  { %6318 = vpow2.f32 %v3875_v46  ;;  %4222 = vadd.xlane.f32.xlu1 %v4221_v39 }
 0x4ff   :  { %v4917_v59 = vmul.f32 %v9214_v53, %v4789_v40  ;;  %5467 = vmatmul.msk.f32.gmra.mxu3 %vm1085_vm1, %v6315_v4  ;;  %6320 = vtanh.f32 %v1821_v6  ;;  %v1824_v53 = vadd.f32 %v9240_v37, %v9286_v3 }
 0x500   :  { %v6317_v25 = vpop.eup %6316 }
 0x501   :  { %5045 = vst.msk [vmem:[%s10255_s8 + $0x260] sm:$0xff] %vm3176_vm3, %v4917_v59  ;;  %v4181_v63 = vpop.xlane.xlu2 %4180  ;;  %v4534_v58 = vmul.f32 %v6317_v25, %v4178_v21  ;;  %v3461_v62 = vpop.xlane.xlu1 %3460 }
 0x502   :  { %6322 = vrcp.f32 %v4181_v63  ;;  %v9499_v61 = vpop.f32.mrf.mxu3  ;;  %v3655_v27 = vsub.f32 %v9269_v50, %v3461_v62 }
 0x503   :  { %v4662_v34 = vsub.f32 2.0, %v4534_v58 }
 0x504   :  { %v9502_v2 = vpop.eup %6318  ;;  %v3877_v41 = vmul.f32 1.442695, %v3655_v27 }
 0x505   :  { %v4224_v15 = vsel %vm3176_vm3, %v9502_v2, 0.0  ;;  %v6321_v57 = vpop.eup %6320  ;;  %v4790_v43 = vmul.f32 %v6317_v25, %v4662_v34  ;;  %v1830_v25 = vadd.f32 %v9240_v37, %v9320_v11 }
 0x506   :  { %4225 = vadd.xlane.f32.xlu2 %v4224_v15  ;;  %6324 = vpow2.f32 %v3877_v41 }
 0x507   :  { %5468 = vmatmul.msk.f32.gmra.mxu3 %vm1085_vm1, %v6321_v57  ;;  %6326 = vtanh.f32 %v1824_v53  ;;  %v4918_v50 = vmul.f32 %v9246_v38, %v4790_v43 }
 0x508   :  { %v6323_v32 = vpop.eup %6322 }
 0x509   :  { %v4535_v31 = vmul.f32 %v6323_v32, %v4181_v63  ;;  %v3464_v22 = vpop.xlane.xlu2 %3463  ;;  %v4184_v55 = vpop.xlane.xlu0 %4183  ;;  %5046 = vst.msk [vmem:[%s10255_s8 + $0x268] sm:$0xff] %vm3176_vm3, %v4918_v50  ;;  %v1833_v50 = vadd.f32 %v9240_v37, %v9335_v60 }
 0x50a   :  { %v3656_v3 = vsub.f32 %v9292_v23, %v3464_v22  ;;  %6328 = vrcp.f32 %v4184_v55  ;;  %v9515_v42 = vpop.f32.mrf.mxu3  ;;  %v2888_v23 = vld [vmem:[%s10254_s7 + $0x300] sm:$0xff] }
 0x50b   :  { %v4663_v10 = vsub.f32 2.0, %v4535_v31  ;;  %vm3016_vm5 = vcmp.eq.f32.partialorder %v2888_v23, 0.0 }
 0x50c   :  { %v3879_v45 = vmul.f32 1.442695, %v3656_v3  ;;  %v9519_v21 = vpop.eup %6324 }
 0x50d   :  { %v4791_v38 = vmul.f32 %v6323_v32, %v4663_v10  ;;  %v6327_v44 = vpop.eup %6326  ;;  %v4227_v1 = vsel %vm3176_vm3, %v9519_v21, 0.0 }
 0x50e   :  { %6330 = vpow2.f32 %v3879_v45  ;;  %4228 = vadd.xlane.f32.xlu0 %v4227_v1  ;;  %v1836_v1 = vadd.f32 %v9240_v37, %v9350_v47 }
 0x50f   :  { %v4919_v6 = vmul.f32 %v9265_v26, %v4791_v38  ;;  %5469 = vmatmul.msk.f32.gmra.mxu3 %vm1085_vm1, %v6327_v44  ;;  %6332 = vtanh.f32 %v1827_v20  ;;  %v2890_v20 = vld [vmem:[%s10254_s7 + $0x310] sm:$0xff] }
 0x510   :  { %v6329_v46 = vpop.eup %6328  ;;  %vm3018_vm7 = vcmp.eq.f32.partialorder %v2890_v20, 0.0 }
 0x511   :  { %5047 = vst.msk [vmem:[%s10255_s8 + $0x270] sm:$0xff] %vm3176_vm3, %v4919_v6  ;;  %v4536_v0 = vmul.f32 %v6329_v46, %v4184_v55  ;;  %v4187_v40 = vpop.xlane.xlu1 %4186 }
 0x512   :  { %6334 = vrcp.f32 %v4187_v40  ;;  %v2696_v39 = vpop.f32.mrf.mxu3 }
 0x513   :  { %v4664_v26 = vsub.f32 2.0, %v4536_v0  ;;  %v2697_v4 = vadd.f32 %v9139_v51, %v2696_v39  ;;  %v2889_v51 = vld [vmem:[%s10254_s7 + $0x308] sm:$0xff]  ;;  %6336 = vtanh.f32 %v1830_v25  ;;  %v2891_v39 = vld [vmem:[%s10254_s7 + $0x318] sm:$0xff] }
 0x514   :  { %v9533_v59 = vpop.eup %6330  ;;  %vm3017_vm6 = vcmp.eq.f32.partialorder %v2889_v51, 0.0  ;;  %vm3019_vm8 = vcmp.eq.f32.partialorder %v2891_v39, 0.0 }
 0x515   :  { %v4792_v63 = vmul.f32 %v6329_v46, %v4664_v26  ;;  %v4230_v58 = vsel %vm3176_vm3, %v9533_v59, 0.0  ;;  %v9539_v62 = vsel %vm3016_vm5, -1e+10, %v2697_v4  ;;  %v6333_v27 = vpop.eup %6332 }
 0x516   :  { %4231 = vadd.xlane.f32.xlu1 %v4230_v58  ;;  %v3465_v53 = vsel %vm3176_vm3, %v9539_v62, -inf }
 0x517   :  { %v4920_v34 = vmul.f32 %v9288_v17, %v4792_v63  ;;  %5470 = vmatmul.msk.f32.gmra.mxu3 %vm1085_vm1, %v6333_v27  ;;  %3466 = vmax.xlane.f32.xlu0 %v3465_v53  ;;  %v9555_v17 = vld [vmem:[%s10253_s6] ss:$0 sm:$0xff]  ;;  %v1839_v53 = vadd.f32 %v9240_v37, %v9364_v49 }
 0x518   :  { %v6335_v11 = vpop.eup %6334 }
 0x519   :  { %5048 = vst.msk [vmem:[%s10255_s8 + $0x278] sm:$0xff] %vm3176_vm3, %v4920_v34  ;;  %v4537_v41 = vmul.f32 %v6335_v11, %v4187_v40  ;;  %v4190_v15 = vpop.xlane.xlu2 %4189  ;;  %v6337_v55 = vpop.eup %6336 }
 0x51a   :  { %v2699_v57 = vpop.f32.mrf.mxu3  ;;  %6338 = vrcp.f32 %v4190_v15 }
 0x51b   :  { %v4665_v43 = vsub.f32 2.0, %v4537_v41  ;;  %v2700_v32 = vadd.f32 %v9555_v17, %v2699_v57  ;;  %6340 = vtanh.f32 %v1833_v50 }
 0x51d   :  { %v4793_v31 = vmul.f32 %v6335_v11, %v4665_v43  ;;  %v9560_v22 = vsel %vm3017_vm6, -1e+10, %v2700_v32 }
 0x51e   :  { %v3468_v3 = vsel %vm3176_vm3, %v9560_v22, -inf }
 0x51f   :  { %v4921_v10 = vmul.f32 %v9307_v19, %v4793_v31  ;;  %5471 = vmatmul.msk.f32.gmra.mxu3 %vm1085_vm1, %v6337_v55  ;;  %3469 = vmax.xlane.f32.xlu1 %v3468_v3  ;;  %v1842_v31 = vadd.f32 %v9240_v37, %v9380_v48 }
 0x520   :  { %v6339_v45 = vpop.eup %6338 }
 0x521   :  { %5049 = vst.msk [vmem:[%s10255_s8 + $0x280] sm:$0xff] %vm3176_vm3, %v4921_v10  ;;  %v4193_v60 = vpop.xlane.xlu0 %4192  ;;  %v4538_v38 = vmul.f32 %v6339_v45, %v4190_v15  ;;  %v6341_v46 = vpop.eup %6340  ;;  %v2892_v15 = vld [vmem:[%s10254_s7 + $0x320] sm:$0xff] }
 0x522   :  { %6342 = vrcp.f32 %v4193_v60  ;;  %v2702_v44 = vpop.f32.mrf.mxu3  ;;  %vm3020_vm9 = vcmp.eq.f32.partialorder %v2892_v15, 0.0 }
 0x523   :  { %v2703_v19 = vadd.f32 %v9555_v17, %v2702_v44  ;;  %v4666_v6 = vsub.f32 2.0, %v4538_v38  ;;  %6344 = vtanh.f32 %v1836_v1 }
 0x525   :  { %v9576_v23 = vsel %vm3018_vm7, -1e+10, %v2703_v19  ;;  %v4794_v0 = vmul.f32 %v6339_v45, %v4666_v6  ;;  %v1845_v6 = vadd.f32 %v9240_v37, %v9395_v16 }
 0x526   :  { %v3471_v40 = vsel %vm3176_vm3, %v9576_v23, -inf }
 0x527   :  { %5472 = vmatmul.msk.f32.gmra.mxu3 %vm1085_vm1, %v6341_v46  ;;  %3472 = vmax.xlane.f32.xlu2 %v3471_v40  ;;  %v4922_v4 = vmul.f32 %v9324_v29, %v4794_v0 }
 0x528   :  { %v6343_v26 = vpop.eup %6342 }
 0x529   :  { %v4539_v47 = vmul.f32 %v6343_v26, %v4193_v60  ;;  %v4196_v25 = vpop.xlane.xlu1 %4195  ;;  %5050 = vst.msk [vmem:[%s10255_s8 + $0x288] sm:$0xff] %vm3176_vm3, %v4922_v4  ;;  %v6345_v29 = vpop.eup %6344  ;;  %v2893_v60 = vld [vmem:[%s10254_s7 + $0x328] sm:$0xff]  ;;  %v2894_v4 = vld [vmem:[%s10254_s7 + $0x330] sm:$0xff] }
 0x52a   :  { %6346 = vrcp.f32 %v4196_v25  ;;  %v2705_v63 = vpop.f32.mrf.mxu3  ;;  %vm3021_vm0 = vcmp.eq.f32.partialorder %v2893_v60, 0.0  ;;  %vm3022_vm10 = vcmp.eq.f32.partialorder %v2894_v4, 0.0 }
 0x52b   :  { %v4667_v58 = vsub.f32 2.0, %v4539_v47  ;;  %v2706_v27 = vadd.f32 %v9555_v17, %v2705_v63  ;;  %6348 = vtanh.f32 %v1839_v53 }
 0x52d   :  { %v4795_v34 = vmul.f32 %v6343_v26, %v4667_v58  ;;  %v9592_v51 = vsel %vm3019_vm8, -1e+10, %v2706_v27  ;;  %v1848_v58 = vadd.f32 %v9240_v37, %v9409_v12 }
 0x52e   :  { %v3474_v11 = vsel %vm3176_vm3, %v9592_v51, -inf }
 0x52f   :  { %v4923_v41 = vmul.f32 %v9337_v14, %v4795_v34  ;;  %5473 = vmatmul.msk.f32.gmra.mxu3 %vm1085_vm1, %v6345_v29  ;;  %3475 = vmax.xlane.f32.xlu0 %v3474_v11 }
 0x530   :  { %v6347_v57 = vpop.eup %6346 }
 0x531   :  { %5051 = vst.msk [vmem:[%s10255_s8 + $0x290] sm:$0xff] %vm3176_vm3, %v4923_v41  ;;  %v4540_v49 = vmul.f32 %v6347_v57, %v4196_v25  ;;  %v4199_v43 = vpop.xlane.xlu2 %4198  ;;  %v6349_v10 = vpop.eup %6348  ;;  %v2895_v41 = vld [vmem:[%s10254_s7 + $0x338] sm:$0xff] }
 0x532   :  { %6350 = vrcp.f32 %v4199_v43  ;;  %v2708_v32 = vpop.f32.mrf.mxu3  ;;  %vm3023_vm11 = vcmp.eq.f32.partialorder %v2895_v41, 0.0 }
 0x533   :  { %v4668_v14 = vsub.f32 2.0, %v4540_v49  ;;  %v2709_v50 = vadd.f32 %v9555_v17, %v2708_v32  ;;  %6352 = vtanh.f32 %v1842_v31 }
 0x535   :  { %v4796_v55 = vmul.f32 %v6347_v57, %v4668_v14  ;;  %v9608_v3 = vsel %vm3020_vm9, -1e+10, %v2709_v50  ;;  %v9657_v14 = vld [vmem:[%s10251_s4] ss:$0 sm:$0xff] }
 0x536   :  { %v3477_v20 = vsel %vm3176_vm3, %v9608_v3, -inf }
 0x537   :  { %v4924_v45 = vmul.f32 %v9352_v54, %v4796_v55  ;;  %5474 = vmatmul.msk.f32.gmra.mxu3 %vm1085_vm1, %v6349_v10  ;;  %3478 = vmax.xlane.f32.xlu1 %v3477_v20 }
 0x538   :  { %v6351_v38 = vpop.eup %6350 }
 0x539   :  { %5052 = vst.msk [vmem:[%s10255_s8 + $0x298] sm:$0xff] %vm3176_vm3, %v4924_v45  ;;  %v4541_v48 = vmul.f32 %v6351_v38, %v4199_v43  ;;  %v6353_v40 = vpop.eup %6352  ;;  %v2896_v45 = vld [vmem:[%s10254_s7 + $0x340] sm:$0xff] }
 0x53a   :  { %v4202_v44 = vpop.xlane.xlu0 %4201  ;;  %v2711_v19 = vpop.f32.mrf.mxu3  ;;  %vm3024_vm12 = vcmp.eq.f32.partialorder %v2896_v45, 0.0 }
 0x53b   :  { %v4669_v1 = vsub.f32 2.0, %v4541_v48  ;;  %6354 = vrcp.f32 %v4202_v44  ;;  %v2712_v54 = vadd.f32 %v9555_v17, %v2711_v19  ;;  %v1854_v19 = vadd.f32 %v9657_v14, %v9440_v35 }
 0x53c   :  { %6356 = vtanh.f32 %v1845_v6 }
 0x53d   :  { %v4797_v46 = vmul.f32 %v6351_v38, %v4669_v1  ;;  %v9624_v0 = vsel %vm3021_vm0, -1e+10, %v2712_v54 }
 0x53e   :  { %v3480_v39 = vsel %vm3176_vm3, %v9624_v0, -inf }
 0x53f   :  { %v4925_v26 = vmul.f32 %v9367_v24, %v4797_v46  ;;  %5475 = vmatmul.msk.f32.gmra.mxu3 %vm1085_vm1, %v6353_v40  ;;  %3481 = vmax.xlane.f32.xlu2 %v3480_v39  ;;  %v2897_v39 = vld [vmem:[%s10254_s7 + $0x348] sm:$0xff] }
 0x540   :  { %vm3025_vm13 = vcmp.eq.f32.partialorder %v2897_v39, 0.0 }
 0x541   :  { %v6355_v47 = vpop.eup %6354  ;;  %5053 = vst.msk [vmem:[%s10255_s8 + $0x2a0] sm:$0xff] %vm3176_vm3, %v4925_v26  ;;  %v4205_v16 = vpop.xlane.xlu1 %4204 }
 0x542   :  { %v4542_v25 = vmul.f32 %v6355_v47, %v4202_v44  ;;  %6358 = vrcp.f32 %v4205_v16  ;;  %v2714_v63 = vpop.f32.mrf.mxu3  ;;  %v6357_v34 = vpop.eup %6356 }
 0x543   :  { %v2715_v24 = vadd.f32 %v9555_v17, %v2714_v63  ;;  %6360 = vtanh.f32 %v1848_v58 }
 0x544   :  { %v4670_v27 = vsub.f32 2.0, %v4542_v25 }
 0x545   :  { %v9640_v53 = vsel %vm3022_vm10, -1e+10, %v2715_v24 }
 0x546   :  { %v4798_v29 = vmul.f32 %v6355_v47, %v4670_v27  ;;  %v3483_v11 = vsel %vm3176_vm3, %v9640_v53, -inf }
 0x547   :  { %5476 = vmatmul.msk.f32.gmra.mxu3 %vm1085_vm1, %v6357_v34  ;;  %3484 = vmax.xlane.f32.xlu0 %v3483_v11  ;;  %v2898_v34 = vld [vmem:[%s10254_s7 + $0x350] sm:$0xff] }
 0x548   :  { %v6359_v15 = vpop.eup %6358  ;;  %v4926_v57 = vmul.f32 %v9384_v5, %v4798_v29  ;;  %v1851_v5 = vadd.f32 %v9657_v14, %v9425_v8  ;;  %vm3026_vm14 = vcmp.eq.f32.partialorder %v2898_v34, 0.0 }
 0x549   :  { %v4543_v37 = vmul.f32 %v6359_v15, %v4205_v16  ;;  %v4208_v12 = vpop.xlane.xlu2 %4207  ;;  %v6361_v55 = vpop.eup %6360  ;;  %v1857_v16 = vadd.f32 %v9657_v14, %v9454_v30 }
 0x54a   :  { %5054 = vst.msk [vmem:[%s10255_s8 + $0x2a8] sm:$0xff] %vm3176_vm3, %v4926_v57  ;;  %6362 = vrcp.f32 %v4208_v12  ;;  %v2717_v49 = vpop.f32.mrf.mxu3 }
 0x54b   :  { %v4671_v43 = vsub.f32 2.0, %v4543_v37  ;;  %v2718_v32 = vadd.f32 %v9555_v17, %v2717_v49  ;;  %6364 = vtanh.f32 %v1851_v5 }
 0x54d   :  { %v4799_v50 = vmul.f32 %v6359_v15, %v4671_v43  ;;  %v9661_v31 = vsel %vm3023_vm11, -1e+10, %v2718_v32 }
 0x54e   :  { %v3486_v10 = vsel %vm3176_vm3, %v9661_v31, -inf }
 0x54f   :  { %v4927_v20 = vmul.f32 %v9397_v18, %v4799_v50  ;;  %5477 = vmatmul.msk.f32.gmra.mxu3 %vm1085_vm1, %v6361_v55  ;;  %3487 = vmax.xlane.f32.xlu1 %v3486_v10  ;;  %v2899_v50 = vld [vmem:[%s10254_s7 + $0x358] sm:$0xff] }
 0x550   :  { %v6363_v60 = vpop.eup %6362  ;;  %vm3027_vm15 = vcmp.eq.f32.partialorder %v2899_v50, 0.0 }
 0x551   :  { %5055 = vst.msk [vmem:[%s10255_s8 + $0x2b0] sm:$0xff] %vm3176_vm3, %v4927_v20  ;;  %v4544_v8 = vmul.f32 %v6363_v60, %v4208_v12  ;;  %v4211_v38 = vpop.xlane.xlu0 %4210  ;;  %v6365_v6 = vpop.eup %6364  ;;  %v1860_v12 = vadd.f32 %v9657_v14, %v9470_v28 }
 0x552   :  { %v2720_v48 = vpop.f32.mrf.mxu3  ;;  %6366 = vrcp.f32 %v4211_v38 }
 0x553   :  { %v4672_v44 = vsub.f32 2.0, %v4544_v8  ;;  %v2721_v18 = vadd.f32 %v9555_v17, %v2720_v48  ;;  %6368 = vtanh.f32 %v1854_v19  ;;  %v2900_v19 = vld [vmem:[%s10254_s7 + $0x360] sm:$0xff] }
 0x554   :  { %vm3028_vm2 = vcmp.eq.f32.partialorder %v2900_v19, 0.0 }
 0x555   :  { %v4800_v1 = vmul.f32 %v6363_v60, %v4672_v44  ;;  %v9677_v54 = vsel %vm3024_vm12, -1e+10, %v2721_v18  ;;  %v1863_v60 = vadd.f32 %v9657_v14, %v9485_v9 }
 0x556   :  { %v3489_v46 = vsel %vm3176_vm3, %v9677_v54, -inf }
 0x557   :  { %v4928_v40 = vmul.f32 %v9412_v7, %v4800_v1  ;;  %5478 = vmatmul.msk.f32.gmra.mxu3 %vm1085_vm1, %v6365_v6  ;;  %3490 = vmax.xlane.f32.xlu2 %v3489_v46 }
 0x558   :  { %v6367_v26 = vpop.eup %6366 }
 0x559   :  { %5056 = vst.msk [vmem:[%s10255_s8 + $0x2b8] sm:$0xff] %vm3176_vm3, %v4928_v40  ;;  %v4214_v35 = vpop.xlane.xlu1 %4213  ;;  %v4545_v4 = vmul.f32 %v6367_v26, %v4211_v38  ;;  %v6369_v24 = vpop.eup %6368  ;;  %v1866_v40 = vadd.f32 %v9657_v14, %v9499_v61 }
 0x55a   :  { %6370 = vrcp.f32 %v4214_v35  ;;  %v2723_v47 = vpop.f32.mrf.mxu3 }
 0x55b   :  { %v2724_v7 = vadd.f32 %v9555_v17, %v2723_v47  ;;  %v4673_v25 = vsub.f32 2.0, %v4545_v4  ;;  %6372 = vtanh.f32 %v1857_v16 }
 0x55d   :  { %v9693_v63 = vsel %vm3025_vm13, -1e+10, %v2724_v7  ;;  %v4801_v58 = vmul.f32 %v6367_v26, %v4673_v25  ;;  %v2901_v7 = vld [vmem:[%s10254_s7 + $0x368] sm:$0xff] }
 0x55e   :  { %v3492_v27 = vsel %vm3176_vm3, %v9693_v63, -inf  ;;  %vm3029_vm4 = vcmp.eq.f32.partialorder %v2901_v7, 0.0 }
 0x55f   :  { %5479 = vmatmul.msk.f32.gmra.mxu3 %vm1085_vm1, %v6369_v24  ;;  %3493 = vmax.xlane.f32.xlu0 %v3492_v27  ;;  %v4929_v11 = vmul.f32 %v9429_v36, %v4801_v58 }
 0x560   :  { %v6371_v29 = vpop.eup %6370 }
 0x561   :  { %v4546_v30 = vmul.f32 %v6371_v29, %v4214_v35  ;;  %v4217_v41 = vpop.xlane.xlu2 %4216  ;;  %5057 = vst.msk [vmem:[%s10255_s8 + $0x2c0] sm:$0xff] %vm3176_vm3, %v4929_v11  ;;  %v6373_v36 = vpop.eup %6372 }
 0x562   :  { %6374 = vrcp.f32 %v4217_v41  ;;  %v2726_v15 = vpop.f32.mrf.mxu3 }
 0x563   :  { %v4674_v57 = vsub.f32 2.0, %v4546_v30  ;;  %v2727_v37 = vadd.f32 %v9555_v17, %v2726_v15  ;;  %6376 = vtanh.f32 %v1860_v12 }
 0x565   :  { %v4802_v49 = vmul.f32 %v6371_v29, %v4674_v57  ;;  %v9709_v43 = vsel %vm3026_vm14, -1e+10, %v2727_v37  ;;  %v1869_v29 = vadd.f32 %v9657_v14, %v9515_v42  ;;  %v2902_v57 = vld [vmem:[%s10254_s7 + $0x370] sm:$0xff] }
 0x566   :  { %v3495_v32 = vsel %vm3176_vm3, %v9709_v43, -inf  ;;  %vm3030_vm5 = vcmp.eq.f32.partialorder %v2902_v57, 0.0  ;;  %v2906_v57 = vld [vmem:[%s10254_s7 + $0x390] sm:$0xff] }
 0x567   :  { %v4930_v5 = vmul.f32 %v9442_v13, %v4802_v49  ;;  %5480 = vmatmul.msk.f32.gmra.mxu3 %vm1085_vm1, %v6373_v36  ;;  %3496 = vmax.xlane.f32.xlu1 %v3495_v32  ;;  %vm3034_vm8 = vcmp.eq.f32.partialorder %v2906_v57, 0.0  ;;  %v2911_v57 = vld [vmem:[%s10254_s7 + $0x3b8] sm:$0xff] }
 0x568   :  { %v6375_v55 = vpop.eup %6374  ;;  %vm3039_vm12 = vcmp.eq.f32.partialorder %v2911_v57, 0.0 }
 0x569   :  { %5058 = vst.msk [vmem:[%s10255_s8 + $0x2c8] sm:$0xff] %vm3176_vm3, %v4930_v5  ;;  %v4547_v28 = vmul.f32 %v6375_v55, %v4217_v41  ;;  %v4220_v10 = vpop.xlane.xlu0 %4219  ;;  %v6377_v48 = vpop.eup %6376 }
 0x56a   :  { %v2729_v20 = vpop.f32.mrf.mxu3  ;;  %6378 = vrcp.f32 %v4220_v10 }
 0x56b   :  { %v4675_v45 = vsub.f32 2.0, %v4547_v28  ;;  %v2730_v13 = vadd.f32 %v9555_v17, %v2729_v20  ;;  %6380 = vtanh.f32 %v1863_v60  ;;  %v2903_v28 = vld [vmem:[%s10254_s7 + $0x378] sm:$0xff] }
 0x56c   :  { %vm3031_vm6 = vcmp.eq.f32.partialorder %v2903_v28, 0.0 }
 0x56d   :  { %v4803_v8 = vmul.f32 %v6375_v55, %v4675_v45  ;;  %v9725_v38 = vsel %vm3027_vm15, -1e+10, %v2730_v13 }
 0x56e   :  { %v3498_v44 = vsel %vm3176_vm3, %v9725_v38, -inf }
 0x56f   :  { %v4931_v18 = vmul.f32 %v9457_v52, %v4803_v8  ;;  %5481 = vmatmul.msk.f32.gmra.mxu3 %vm1085_vm1, %v6377_v48  ;;  %3499 = vmax.xlane.f32.xlu2 %v3498_v44 }
 0x570   :  { %v6379_v1 = vpop.eup %6378 }
 0x571   :  { %5059 = vst.msk [vmem:[%s10255_s8 + $0x2d0] sm:$0xff] %vm3176_vm3, %v4931_v18  ;;  %v4223_v9 = vpop.xlane.xlu1 %4222  ;;  %v4548_v6 = vmul.f32 %v6379_v1, %v4220_v10  ;;  %v6381_v35 = vpop.eup %6380 }
 0x572   :  { %6382 = vrcp.f32 %v4223_v9  ;;  %v2732_v46 = vpop.f32.mrf.mxu3 }
 0x573   :  { %v2733_v52 = vadd.f32 %v9555_v17, %v2732_v46  ;;  %v4676_v39 = vsub.f32 2.0, %v4548_v6  ;;  %6384 = vtanh.f32 %v1866_v40 }
 0x575   :  { %v9741_v26 = vsel %vm3028_vm2, -1e+10, %v2733_v52  ;;  %v4804_v4 = vmul.f32 %v6379_v1, %v4676_v39 }
 0x576   :  { %v3501_v47 = vsel %vm3176_vm3, %v9741_v26, -inf }
 0x577   :  { %5482 = vmatmul.msk.f32.gmra.mxu3 %vm1085_vm1, %v6381_v35  ;;  %3502 = vmax.xlane.f32.xlu0 %v3501_v47  ;;  %v4932_v25 = vmul.f32 %v9474_v33, %v4804_v4 }
 0x578   :  { %v6383_v16 = vpop.eup %6382 }
 0x579   :  { %v4549_v61 = vmul.f32 %v6383_v16, %v4223_v9  ;;  %v4226_v24 = vpop.xlane.xlu2 %4225  ;;  %5060 = vst.msk [vmem:[%s10255_s8 + $0x2d8] sm:$0xff] %vm3176_vm3, %v4932_v25  ;;  %v6385_v33 = vpop.eup %6384  ;;  %v2904_v9 = vld [vmem:[%s10254_s7 + $0x380] sm:$0xff] }
 0x57a   :  { %6386 = vrcp.f32 %v4226_v24  ;;  %v2735_v58 = vpop.f32.mrf.mxu3 }
 0x57b   :  { %v4677_v27 = vsub.f32 2.0, %v4549_v61  ;;  %v2736_v34 = vadd.f32 %v9555_v17, %v2735_v58  ;;  %6388 = vtanh.f32 %v1869_v29 }
 0x57d   :  { %v4805_v11 = vmul.f32 %v6383_v16, %v4677_v27  ;;  %v9757_v30 = vsel %vm3029_vm4, -1e+10, %v2736_v34 }
 0x57e   :  { %v3504_v41 = vsel %vm3176_vm3, %v9757_v30, -inf }
 0x57f   :  { %v4933_v15 = vmul.f32 %v9487_v56, %v4805_v11  ;;  %5483 = vmatmul.msk.f32.gmra.mxu3 %vm1085_vm1, %v6385_v33  ;;  %3505 = vmax.xlane.f32.xlu1 %v3504_v41 }
 0x580   :  { %v6387_v37 = vpop.eup %6386 }
 0x581   :  { %5061 = vst.msk [vmem:[%s10255_s8 + $0x2e0] sm:$0xff] %vm3176_vm3, %v4933_v15  ;;  %v4550_v42 = vmul.f32 %v6387_v37, %v4226_v24  ;;  %v4229_v14 = vpop.xlane.xlu0 %4228  ;;  %v6389_v5 = vpop.eup %6388 }
 0x582   :  { %v2738_v12 = vpop.f32.mrf.mxu3  ;;  %6390 = vrcp.f32 %v4229_v14 }
 0x583   :  { %v4678_v49 = vsub.f32 2.0, %v4550_v42  ;;  %v2739_v56 = vadd.f32 %v9555_v17, %v2738_v12 }
 0x585   :  { %v4806_v36 = vmul.f32 %v6387_v37, %v4678_v49  ;;  %v9771_v32 = vsel %vm3030_vm5, -1e+10, %v2739_v56 }
 0x586   :  { %v3507_v50 = vsel %vm3176_vm3, %v9771_v32, -inf }
 0x587   :  { %v4934_v55 = vmul.f32 %v9502_v2, %v4806_v36  ;;  %5484 = vmatmul.msk.f32.gmra.mxu3 %vm1085_vm1, %v6389_v5  ;;  %3508 = vmax.xlane.f32.xlu2 %v3507_v50  ;;  %vm3032_vm1 = vcmp.eq.f32.partialorder %v2904_v9, 0.0  ;;  %v2907_v50 = vld [vmem:[%s10254_s7 + $0x398] sm:$0xff] }
 0x588   :  { %v6391_v10 = vpop.eup %6390  ;;  %vm3035_vm9 = vcmp.eq.f32.partialorder %v2907_v50, 0.0 }
 0x589   :  { %5062 = vst.msk [vmem:[%s10255_s8 + $0x2e8] sm:$0xff] %vm3176_vm3, %v4934_v55  ;;  %v4232_v20 = vpop.xlane.xlu1 %4231  ;;  %v4551_v45 = vmul.f32 %v6391_v10, %v4229_v14 }
 0x58a   :  { %6392 = vrcp.f32 %v4232_v20  ;;  %v2741_v13 = vpop.f32.mrf.mxu3  ;;  %v3467_v60 = vpop.xlane.xlu0 %3466 }
 0x58b   :  { %v2742_v2 = vadd.f32 %v9555_v17, %v2741_v13  ;;  %v3657_v8 = vsub.f32 %v9539_v62, %v3467_v60  ;;  %v4679_v48 = vsub.f32 2.0, %v4551_v45 }
 0x58d   :  { %v9786_v44 = vsel %vm3031_vm6, -1e+10, %v2742_v2  ;;  %v3881_v18 = vmul.f32 1.442695, %v3657_v8  ;;  %v4807_v19 = vmul.f32 %v6391_v10, %v4679_v48  ;;  %v2908_v8 = vld [vmem:[%s10254_s7 + $0x3a0] sm:$0xff] }
 0x58e   :  { %v3510_v1 = vsel %vm3176_vm3, %v9786_v44, -inf  ;;  %vm3036_vm0 = vcmp.eq.f32.partialorder %v2908_v8, 0.0 }
 0x58f   :  { %6394 = vpow2.f32 %v3881_v18  ;;  %3511 = vmax.xlane.f32.xlu0 %v3510_v1  ;;  %v4935_v46 = vmul.f32 %v9519_v21, %v4807_v19 }
 0x590   :  { %v6393_v6 = vpop.eup %6392 }
 0x591   :  { %v4552_v52 = vmul.f32 %v6393_v6, %v4232_v20  ;;  %5063 = vst.msk [vmem:[%s10255_s8 + $0x2f0] sm:$0xff] %vm3176_vm3, %v4935_v46 }
 0x592   :  { %v2744_v62 = vpop.f32.mrf.mxu3  ;;  %v3470_v40 = vpop.xlane.xlu1 %3469 }
 0x593   :  { %v4680_v39 = vsub.f32 2.0, %v4552_v52  ;;  %v2745_v35 = vadd.f32 %v9555_v17, %v2744_v62  ;;  %v3658_v4 = vsub.f32 %v9560_v22, %v3470_v40  ;;  %v2905_v22 = vld [vmem:[%s10254_s7 + $0x388] sm:$0xff] }
 0x594   :  { %vm3033_vm7 = vcmp.eq.f32.partialorder %v2905_v22, 0.0  ;;  %v2909_v62 = vld [vmem:[%s10254_s7 + $0x3a8] sm:$0xff] }
 0x595   :  { %v9800_v47 = vpop.eup %6394  ;;  %v4808_v7 = vmul.f32 %v6393_v6, %v4680_v39  ;;  %v9802_v16 = vsel %vm3032_vm1, -1e+10, %v2745_v35  ;;  %v3883_v21 = vmul.f32 1.442695, %v3658_v4  ;;  %vm3037_vm10 = vcmp.eq.f32.partialorder %v2909_v62, 0.0 }
 0x596   :  { %v3513_v25 = vsel %vm3176_vm3, %v9802_v16, -inf  ;;  %v4233_v61 = vsel %vm3176_vm3, %v9800_v47, 0.0 }
 0x597   :  { %v4936_v24 = vmul.f32 %v9533_v59, %v4808_v7  ;;  %6396 = vpow2.f32 %v3883_v21  ;;  %3514 = vmax.xlane.f32.xlu1 %v3513_v25  ;;  %4234 = vadd.xlane.f32.xlu2 %v4233_v61 }
 0x599   :  { %5064 = vst.msk [vmem:[%s10255_s8 + $0x2f8] sm:$0xff] %vm3176_vm3, %v4936_v24  ;;  %v2910_v24 = vld [vmem:[%s10254_s7 + $0x3b0] sm:$0xff] }
 0x59a   :  { %v2747_v58 = vpop.f32.mrf.mxu3  ;;  %v3473_v27 = vpop.xlane.xlu2 %3472  ;;  %vm3038_vm11 = vcmp.eq.f32.partialorder %v2910_v24, 0.0 }
 0x59b   :  { %v2748_v34 = vadd.f32 %v9555_v17, %v2747_v58  ;;  %v3659_v29 = vsub.f32 %v9576_v23, %v3473_v27 }
 0x59d   :  { %v9818_v59 = vpop.eup %6396  ;;  %v9820_v11 = vsel %vm3033_vm7, -1e+10, %v2748_v34  ;;  %v3885_v33 = vmul.f32 1.442695, %v3659_v29 }
 0x59e   :  { %v4236_v41 = vsel %vm3176_vm3, %v9818_v59, 0.0  ;;  %v3516_v15 = vsel %vm3176_vm3, %v9820_v11, -inf }
 0x59f   :  { %6398 = vpow2.f32 %v3885_v33  ;;  %4237 = vadd.xlane.f32.xlu0 %v4236_v41  ;;  %3517 = vmax.xlane.f32.xlu2 %v3516_v15 }
 0x5a2   :  { %v2750_v37 = vpop.f32.mrf.mxu3  ;;  %v3476_v23 = vpop.xlane.xlu0 %3475 }
 0x5a3   :  { %v2751_v42 = vadd.f32 %v9555_v17, %v2750_v37  ;;  %v3660_v14 = vsub.f32 %v9592_v51, %v3476_v23 }
 0x5a5   :  { %v9831_v12 = vpop.eup %6398  ;;  %v9833_v49 = vsel %vm3034_vm8, -1e+10, %v2751_v42  ;;  %v3887_v56 = vmul.f32 1.442695, %v3660_v14 }
 0x5a6   :  { %v3519_v36 = vsel %vm3176_vm3, %v9833_v49, -inf  ;;  %v4239_v5 = vsel %vm3176_vm3, %v9831_v12, 0.0 }
 0x5a7   :  { %6400 = vpow2.f32 %v3887_v56  ;;  %3520 = vmax.xlane.f32.xlu0 %v3519_v36  ;;  %4240 = vadd.xlane.f32.xlu1 %v4239_v5 }
 0x5aa   :  { %v2753_v55 = vpop.f32.mrf.mxu3  ;;  %v3479_v51 = vpop.xlane.xlu1 %3478 }
 0x5ab   :  { %v2754_v28 = vadd.f32 %v9555_v17, %v2753_v55  ;;  %v3661_v10 = vsub.f32 %v9608_v3, %v3479_v51  ;;  %v2912_v55 = vld [vmem:[%s10254_s7 + $0x3c0] sm:$0xff] }
 0x5ac   :  { %vm3040_vm13 = vcmp.eq.f32.partialorder %v2912_v55, 0.0 }
 0x5ad   :  { %v9844_v20 = vpop.eup %6400  ;;  %v9846_v45 = vsel %vm3035_vm9, -1e+10, %v2754_v28  ;;  %v3889_v13 = vmul.f32 1.442695, %v3661_v10 }
 0x5ae   :  { %v3522_v60 = vsel %vm3176_vm3, %v9846_v45, -inf  ;;  %v4242_v2 = vsel %vm3176_vm3, %v9844_v20, 0.0 }
 0x5af   :  { %6402 = vpow2.f32 %v3889_v13  ;;  %3523 = vmax.xlane.f32.xlu1 %v3522_v60  ;;  %4243 = vadd.xlane.f32.xlu2 %v4242_v2 }
 0x5b2   :  { %v2756_v48 = vpop.f32.mrf.mxu3  ;;  %v3482_v3 = vpop.xlane.xlu2 %3481 }
 0x5b3   :  { %v2757_v18 = vadd.f32 %v9555_v17, %v2756_v48  ;;  %v3662_v19 = vsub.f32 %v9624_v0, %v3482_v3  ;;  %v2913_v3 = vld [vmem:[%s10254_s7 + $0x3c8] sm:$0xff] }
 0x5b4   :  { %vm3041_vm14 = vcmp.eq.f32.partialorder %v2913_v3, 0.0 }
 0x5b5   :  { %v9857_v1 = vpop.eup %6402  ;;  %v9859_v9 = vsel %vm3036_vm0, -1e+10, %v2757_v18  ;;  %v3891_v6 = vmul.f32 1.442695, %v3662_v19 }
 0x5b6   :  { %v4245_v46 = vsel %vm3176_vm3, %v9857_v1, 0.0  ;;  %v3525_v52 = vsel %vm3176_vm3, %v9859_v9, -inf }
 0x5b7   :  { %6404 = vpow2.f32 %v3891_v6  ;;  %4246 = vadd.xlane.f32.xlu0 %v4245_v46  ;;  %3526 = vmax.xlane.f32.xlu2 %v3525_v52 }
 0x5ba   :  { %v2759_v40 = vpop.f32.mrf.mxu3  ;;  %v3485_v0 = vpop.xlane.xlu0 %3484 }
 0x5bb   :  { %v2760_v39 = vadd.f32 %v9555_v17, %v2759_v40  ;;  %v3663_v35 = vsub.f32 %v9640_v53, %v3485_v0 }
 0x5bd   :  { %v9870_v4 = vpop.eup %6404  ;;  %v9872_v7 = vsel %vm3037_vm10, -1e+10, %v2760_v39  ;;  %v3893_v21 = vmul.f32 1.442695, %v3663_v35  ;;  %v2914_v39 = vld [vmem:[%s10254_s7 + $0x3d0] sm:$0xff] }
 0x5be   :  { %v3528_v25 = vsel %vm3176_vm3, %v9872_v7, -inf  ;;  %v4248_v61 = vsel %vm3176_vm3, %v9870_v4, 0.0  ;;  %vm3042_vm15 = vcmp.eq.f32.partialorder %v2914_v39, 0.0 }
 0x5bf   :  { %6406 = vpow2.f32 %v3893_v21  ;;  %3529 = vmax.xlane.f32.xlu0 %v3528_v25  ;;  %4249 = vadd.xlane.f32.xlu1 %v4248_v61 }
 0x5c2   :  { %v2762_v22 = vpop.f32.mrf.mxu3  ;;  %v3488_v53 = vpop.xlane.xlu1 %3487 }
 0x5c3   :  { %v2763_v58 = vadd.f32 %v9555_v17, %v2762_v22  ;;  %v3664_v27 = vsub.f32 %v9661_v31, %v3488_v53  ;;  %v2915_v22 = vld [vmem:[%s10254_s7 + $0x3d8] sm:$0xff] }
 0x5c4   :  { %vm3043_vm2 = vcmp.eq.f32.partialorder %v2915_v22, 0.0 }
 0x5c5   :  { %v9883_v34 = vpop.eup %6406  ;;  %v9885_v29 = vsel %vm3038_vm11, -1e+10, %v2763_v58  ;;  %v3895_v33 = vmul.f32 1.442695, %v3664_v27 }
 0x5c6   :  { %v3531_v41 = vsel %vm3176_vm3, %v9885_v29, -inf  ;;  %v4251_v15 = vsel %vm3176_vm3, %v9883_v34, 0.0 }
 0x5c7   :  { %6408 = vpow2.f32 %v3895_v33  ;;  %3532 = vmax.xlane.f32.xlu1 %v3531_v41  ;;  %4252 = vadd.xlane.f32.xlu2 %v4251_v15  ;;  %v2916_v41 = vld [vmem:[%s10254_s7 + $0x3e0] sm:$0xff] }
 0x5c8   :  { %vm3044_vm4 = vcmp.eq.f32.partialorder %v2916_v41, 0.0 }
 0x5ca   :  { %v2765_v37 = vpop.f32.mrf.mxu3  ;;  %v3491_v31 = vpop.xlane.xlu2 %3490 }
 0x5cb   :  { %v2766_v23 = vadd.f32 %v9555_v17, %v2765_v37  ;;  %v3665_v42 = vsub.f32 %v9677_v54, %v3491_v31 }
 0x5cd   :  { %v9896_v14 = vpop.eup %6408  ;;  %v9898_v56 = vsel %vm3039_vm12, -1e+10, %v2766_v23  ;;  %v3897_v36 = vmul.f32 1.442695, %v3665_v42 }
 0x5ce   :  { %v4254_v5 = vsel %vm3176_vm3, %v9896_v14, 0.0  ;;  %v3534_v50 = vsel %vm3176_vm3, %v9898_v56, -inf }
 0x5cf   :  { %6410 = vpow2.f32 %v3897_v36  ;;  %4255 = vadd.xlane.f32.xlu0 %v4254_v5  ;;  %3535 = vmax.xlane.f32.xlu2 %v3534_v50  ;;  %v2917_v36 = vld [vmem:[%s10254_s7 + $0x3e8] sm:$0xff] }
 0x5d0   :  { %vm3045_vm5 = vcmp.eq.f32.partialorder %v2917_v36, 0.0 }
 0x5d2   :  { %v2768_v51 = vpop.f32.mrf.mxu3  ;;  %v3494_v54 = vpop.xlane.xlu0 %3493 }
 0x5d3   :  { %v2769_v28 = vadd.f32 %v9555_v17, %v2768_v51  ;;  %v3666_v10 = vsub.f32 %v9693_v63, %v3494_v54 }
 0x5d5   :  { %v9909_v13 = vpop.eup %6410  ;;  %v9911_v60 = vsel %vm3040_vm13, -1e+10, %v2769_v28  ;;  %v3899_v2 = vmul.f32 1.442695, %v3666_v10 }
 0x5d6   :  { %v3537_v8 = vsel %vm3176_vm3, %v9911_v60, -inf  ;;  %v4257_v48 = vsel %vm3176_vm3, %v9909_v13, 0.0 }
 0x5d7   :  { %6412 = vpow2.f32 %v3899_v2  ;;  %3538 = vmax.xlane.f32.xlu0 %v3537_v8  ;;  %4258 = vadd.xlane.f32.xlu1 %v4257_v48  ;;  %v2918_v2 = vld [vmem:[%s10254_s7 + $0x3f0] sm:$0xff] }
 0x5d8   :  { %vm3046_vm6 = vcmp.eq.f32.partialorder %v2918_v2, 0.0 }
 0x5da   :  { %v2771_v18 = vpop.f32.mrf.mxu3  ;;  %v3497_v63 = vpop.xlane.xlu1 %3496 }
 0x5db   :  { %v2772_v19 = vadd.f32 %v9555_v17, %v2771_v18  ;;  %v3667_v6 = vsub.f32 %v9709_v43, %v3497_v63 }
 0x5dd   :  { %v9922_v46 = vpop.eup %6412  ;;  %v9924_v52 = vsel %vm3041_vm14, -1e+10, %v2772_v19  ;;  %v3901_v62 = vmul.f32 1.442695, %v3667_v6 }
 0x5de   :  { %v3540_v40 = vsel %vm3176_vm3, %v9924_v52, -inf  ;;  %v4260_v0 = vsel %vm3176_vm3, %v9922_v46, 0.0 }
 0x5df   :  { %6414 = vpow2.f32 %v3901_v62  ;;  %3541 = vmax.xlane.f32.xlu1 %v3540_v40  ;;  %4261 = vadd.xlane.f32.xlu2 %v4260_v0 }
 0x5e2   :  { %v2774_v35 = vpop.f32.mrf.mxu3  ;;  %v3500_v51 = vpop.xlane.xlu2 %3499 }
 0x5e3   :  { %v2775_v43 = vadd.f32 %v9555_v17, %v2774_v35  ;;  %v3668_v6 = vsub.f32 %v9725_v38, %v3500_v51  ;;  %v2919_v35 = vld [vmem:[%s10254_s7 + $0x3f8] sm:$0xff] }
 0x5e4   :  { %vm3047_vm1 = vcmp.eq.f32.partialorder %v2919_v35, 0.0 }
 0x5e5   :  { %v9934_v21 = vpop.eup %6414  ;;  %v9936_v25 = vsel %vm3042_vm15, -1e+10, %v2775_v43 }
 0x5e6   :  { %v4263_v61 = vsel %vm3176_vm3, %v9934_v21, 0.0  ;;  %v3543_v24 = vsel %vm3176_vm3, %v9936_v25, -inf }
 0x5e7   :  { %4264 = vadd.xlane.f32.xlu0 %v4263_v61  ;;  %3544 = vmax.xlane.f32.xlu2 %v3543_v24 }
 0x5ea   :  { %v2777_v53 = vpop.f32.mrf.mxu3  ;;  %v3503_v15 = vpop.xlane.xlu0 %3502 }
 0x5eb   :  { %v2778_v58 = vadd.f32 %v9555_v17, %v2777_v53  ;;  %v3669_v31 = vsub.f32 %v9741_v26, %v3503_v15 }
 0x5ed   :  { %v9946_v27 = vsel %vm3043_vm2, -1e+10, %v2778_v58  ;;  %v3905_v5 = vmul.f32 1.442695, %v3669_v31 }
 0x5ee   :  { %v3546_v33 = vsel %vm3176_vm3, %v9946_v27, -inf }
 0x5ef   :  { %3547 = vmax.xlane.f32.xlu0 %v3546_v33  ;;  %6416 = vpow2.f32 %v3905_v5 }
 0x5f2   :  { %v2780_v57 = vpop.f32.mrf.mxu3  ;;  %v3506_v50 = vpop.xlane.xlu1 %3505 }
 0x5f3   :  { %v2781_v37 = vadd.f32 %v9555_v17, %v2780_v57  ;;  %v3670_v26 = vsub.f32 %v9757_v30, %v3506_v50 }
 0x5f5   :  { %v9955_v23 = vsel %vm3044_vm4, -1e+10, %v2781_v37  ;;  %v3907_v8 = vmul.f32 1.442695, %v3670_v26  ;;  %v9971_v18 = vpop.eup %6416 }
 0x5f6   :  { %v3549_v42 = vsel %vm3176_vm3, %v9955_v23, -inf  ;;  %v4269_v39 = vsel %vm3176_vm3, %v9971_v18, 0.0 }
 0x5f7   :  { %3550 = vmax.xlane.f32.xlu1 %v3549_v42  ;;  %6418 = vpow2.f32 %v3907_v8 }
 0x5fa   :  { %v2783_v55 = vpop.f32.mrf.mxu3  ;;  %v3509_v63 = vpop.xlane.xlu2 %3508 }
 0x5fb   :  { %v2784_v54 = vadd.f32 %v9555_v17, %v2783_v55  ;;  %v3671_v33 = vsub.f32 %v9771_v32, %v3509_v63 }
 0x5fd   :  { %v9964_v28 = vsel %vm3045_vm5, -1e+10, %v2784_v54  ;;  %v9985_v61 = vpop.eup %6418 }
 0x5fe   :  { %v3552_v10 = vsel %vm3176_vm3, %v9964_v28, -inf  ;;  %v4272_v57 = vsel %vm3176_vm3, %v9985_v61, 0.0 }
 0x5ff   :  { %3553 = vmax.xlane.f32.xlu2 %v3552_v10 }
 0x602   :  { %v2786_v48 = vpop.f32.mrf.mxu3  ;;  %v3512_v3 = vpop.xlane.xlu0 %3511 }
 0x603   :  { %v2787_v19 = vadd.f32 %v9555_v17, %v2786_v48  ;;  %v3672_v30 = vsub.f32 %v9786_v44, %v3512_v3  ;;  %v3903_v44 = vmul.f32 1.442695, %v3668_v6 }
 0x605   :  { %v9976_v62 = vsel %vm3046_vm6, -1e+10, %v2787_v19  ;;  %v3911_v40 = vmul.f32 1.442695, %v3672_v30 }
 0x606   :  { %v3555_v0 = vsel %vm3176_vm3, %v9976_v62, -inf }
 0x607   :  { %6420 = vpow2.f32 %v3911_v40  ;;  %3556 = vmax.xlane.f32.xlu0 %v3555_v0  ;;  %4270 = vadd.xlane.f32.xlu2 %v4269_v39 }
 0x60a   :  { %v2789_v43 = vpop.f32.mrf.mxu3  ;;  %v3515_v38 = vpop.xlane.xlu1 %3514 }
 0x60b   :  { %v2790_v24 = vadd.f32 %v9555_v17, %v2789_v43  ;;  %v3673_v22 = vsub.f32 %v9802_v16, %v3515_v38  ;;  %v4235_v53 = vpop.xlane.xlu2 %4234  ;;  %v3909_v16 = vmul.f32 1.442695, %v3671_v33 }
 0x60c   :  { %6422 = vrcp.f32 %v4235_v53 }
 0x60d   :  { %v9989_v58 = vpop.eup %6420  ;;  %6424 = vpow2.f32 %v3903_v44  ;;  %v9992_v41 = vsel %vm3047_vm1, -1e+10, %v2790_v24  ;;  %v3913_v15 = vmul.f32 1.442695, %v3673_v22 }
 0x60e   :  { %v3558_v37 = vsel %vm3176_vm3, %v9992_v41, -inf  ;;  %v4278_v17 = vsel %vm3176_vm3, %v9989_v58, 0.0 }
 0x60f   :  { %6426 = vpow2.f32 %v3913_v15  ;;  %4273 = vadd.xlane.f32.xlu0 %v4272_v57  ;;  %3559 = vmax.xlane.f32.xlu1 %v3558_v37 }
 0x610   :  { %4279 = vadd.xlane.f32.xlu2 %v4278_v17 }
 0x612   :  { %v6423_v31 = vpop.eup %6422  ;;  %v4238_v42 = vpop.xlane.xlu0 %4237 }
 0x613   :  { %v10000_v32 = vpop.eup %6424  ;;  %v4553_v36 = vmul.f32 %v6423_v31, %v4235_v53  ;;  %v3518_v5 = vpop.xlane.xlu2 %3517  ;;  %6428 = vrcp.f32 %v4238_v42 }
 0x614   :  { %6430 = vpow2.f32 %v3909_v16  ;;  %v3674_v51 = vsub.f32 %v9820_v11, %v3518_v5  ;;  %v4266_v26 = vsel %vm3176_vm3, %v10000_v32, 0.0 }
 0x615   :  { %v10002_v50 = vpop.eup %6426  ;;  %v4681_v55 = vsub.f32 2.0, %v4553_v36 }
 0x616   :  { %v4281_v54 = vsel %vm3176_vm3, %v10002_v50, 0.0  ;;  %v3915_v48 = vmul.f32 1.442695, %v3674_v51 }
 0x617   :  { %v4809_v10 = vmul.f32 %v6423_v31, %v4681_v55  ;;  %4282 = vadd.xlane.f32.xlu0 %v4281_v54  ;;  %4267 = vadd.xlane.f32.xlu1 %v4266_v26 }
 0x619   :  { %v6429_v2 = vpop.eup %6428  ;;  %v4937_v8 = vmul.f32 %v9800_v47, %v4809_v10 }
 0x61a   :  { %v4554_v3 = vmul.f32 %v6429_v2, %v4238_v42  ;;  %v4241_v63 = vpop.xlane.xlu1 %4240  ;;  %v3521_v19 = vpop.xlane.xlu0 %3520 }
 0x61b   :  { %v10010_v30 = vpop.eup %6430  ;;  %5065 = vst.msk [vmem:[%s10255_s8 + $0x300] sm:$0xff] %vm3176_vm3, %v4937_v8  ;;  %6432 = vrcp.f32 %v4241_v63  ;;  %v3675_v11 = vsub.f32 %v9833_v49, %v3521_v19 }
 0x61c   :  { %v4682_v6 = vsub.f32 2.0, %v4554_v3  ;;  %6434 = vpow2.f32 %v3915_v48  ;;  %v4275_v47 = vsel %vm3176_vm3, %v10010_v30, 0.0 }
 0x61d   :  { %v3917_v40 = vmul.f32 1.442695, %v3675_v11 }
 0x61e   :  { %v4810_v0 = vmul.f32 %v6429_v2, %v4682_v6 }
 0x61f   :  { %6436 = vpow2.f32 %v3917_v40  ;;  %4276 = vadd.xlane.f32.xlu1 %v4275_v47 }
 0x620   :  { %v4938_v39 = vmul.f32 %v9818_v59, %v4810_v0 }
 0x621   :  { %v6433_v35 = vpop.eup %6432 }
 0x622   :  { %5066 = vst.msk [vmem:[%s10255_s8 + $0x308] sm:$0xff] %vm3176_vm3, %v4938_v39  ;;  %v4555_v44 = vmul.f32 %v6433_v35, %v4241_v63  ;;  %v3524_v43 = vpop.xlane.xlu1 %3523  ;;  %v4244_v49 = vpop.xlane.xlu2 %4243 }
 0x623   :  { %v10024_v38 = vpop.eup %6434  ;;  %v3676_v24 = vsub.f32 %v9846_v45, %v3524_v43  ;;  %6438 = vrcp.f32 %v4244_v49 }
 0x624   :  { %v4683_v22 = vsub.f32 2.0, %v4555_v44  ;;  %v4284_v59 = vsel %vm3176_vm3, %v10024_v38, 0.0 }
 0x625   :  { %v10027_v53 = vpop.eup %6436  ;;  %v3919_v33 = vmul.f32 1.442695, %v3676_v24 }
 0x626   :  { %v4811_v15 = vmul.f32 %v6433_v35, %v4683_v22  ;;  %v4287_v57 = vsel %vm3176_vm3, %v10027_v53, 0.0 }
 0x627   :  { %6440 = vpow2.f32 %v3919_v33  ;;  %4285 = vadd.xlane.f32.xlu1 %v4284_v59  ;;  %4288 = vadd.xlane.f32.xlu2 %v4287_v57 }
 0x628   :  { %v4939_v37 = vmul.f32 %v9831_v12, %v4811_v15 }
 0x629   :  { %v6439_v17 = vpop.eup %6438 }
 0x62a   :  { %5067 = vst.msk [vmem:[%s10255_s8 + $0x310] sm:$0xff] %vm3176_vm3, %v4939_v37  ;;  %v4556_v45 = vmul.f32 %v6439_v17, %v4244_v49  ;;  %v3527_v16 = vpop.xlane.xlu2 %3526  ;;  %v4247_v31 = vpop.xlane.xlu0 %4246 }
 0x62b   :  { %v3677_v42 = vsub.f32 %v9859_v9, %v3527_v16  ;;  %6442 = vrcp.f32 %v4247_v31 }
 0x62c   :  { %v4684_v36 = vsub.f32 2.0, %v4556_v45 }
 0x62d   :  { %v10039_v5 = vpop.eup %6440  ;;  %v3921_v55 = vmul.f32 1.442695, %v3677_v42 }
 0x62e   :  { %v4812_v51 = vmul.f32 %v6439_v17, %v4684_v36  ;;  %v4290_v12 = vsel %vm3176_vm3, %v10039_v5, 0.0 }
 0x62f   :  { %6444 = vpow2.f32 %v3921_v55  ;;  %4291 = vadd.xlane.f32.xlu0 %v4290_v12 }
 0x630   :  { %v4940_v54 = vmul.f32 %v9844_v20, %v4812_v51 }
 0x631   :  { %v6443_v26 = vpop.eup %6442 }
 0x632   :  { %5068 = vst.msk [vmem:[%s10255_s8 + $0x318] sm:$0xff] %vm3176_vm3, %v4940_v54  ;;  %v4557_v9 = vmul.f32 %v6443_v26, %v4247_v31  ;;  %v4250_v10 = vpop.xlane.xlu1 %4249  ;;  %v3530_v2 = vpop.xlane.xlu0 %3529 }
 0x633   :  { %6446 = vrcp.f32 %v4250_v10  ;;  %v3678_v8 = vsub.f32 %v9872_v7, %v3530_v2 }
 0x634   :  { %v4685_v48 = vsub.f32 2.0, %v4557_v9 }
 0x635   :  { %v10049_v3 = vpop.eup %6444  ;;  %v3923_v63 = vmul.f32 1.442695, %v3678_v8 }
 0x636   :  { %v4813_v19 = vmul.f32 %v6443_v26, %v4685_v48  ;;  %v4293_v20 = vsel %vm3176_vm3, %v10049_v3, 0.0 }
 0x637   :  { %6448 = vpow2.f32 %v3923_v63  ;;  %4294 = vadd.xlane.f32.xlu1 %v4293_v20 }
 0x638   :  { %v4941_v11 = vmul.f32 %v9857_v1, %v4813_v19 }
 0x639   :  { %v6447_v6 = vpop.eup %6446 }
 0x63a   :  { %5069 = vst.msk [vmem:[%s10255_s8 + $0x320] sm:$0xff] %vm3176_vm3, %v4941_v11  ;;  %v4558_v40 = vmul.f32 %v6447_v6, %v4250_v10  ;;  %v3533_v7 = vpop.xlane.xlu1 %3532  ;;  %v4253_v0 = vpop.xlane.xlu2 %4252 }
 0x63b   :  { %v3679_v47 = vsub.f32 %v9885_v29, %v3533_v7  ;;  %6450 = vrcp.f32 %v4253_v0 }
 0x63c   :  { %v4686_v39 = vsub.f32 2.0, %v4558_v40 }
 0x63d   :  { %v10059_v35 = vpop.eup %6448  ;;  %v3925_v44 = vmul.f32 1.442695, %v3679_v47 }
 0x63e   :  { %v4814_v43 = vmul.f32 %v6447_v6, %v4686_v39  ;;  %v4296_v1 = vsel %vm3176_vm3, %v10059_v35, 0.0 }
 0x63f   :  { %6452 = vpow2.f32 %v3925_v44  ;;  %4297 = vadd.xlane.f32.xlu2 %v4296_v1 }
 0x640   :  { %v4942_v49 = vmul.f32 %v9870_v4, %v4814_v43 }
 0x641   :  { %v6451_v24 = vpop.eup %6450 }
 0x642   :  { %5070 = vst.msk [vmem:[%s10255_s8 + $0x328] sm:$0xff] %vm3176_vm3, %v4942_v49  ;;  %v4559_v29 = vmul.f32 %v6451_v24, %v4253_v0  ;;  %v3536_v22 = vpop.xlane.xlu2 %3535  ;;  %v4256_v33 = vpop.xlane.xlu0 %4255 }
 0x643   :  { %v3680_v15 = vsub.f32 %v9898_v56, %v3536_v22  ;;  %6454 = vrcp.f32 %v4256_v33 }
 0x644   :  { %v4687_v59 = vsub.f32 2.0, %v4559_v29 }
 0x645   :  { %v10069_v57 = vpop.eup %6452  ;;  %v3927_v37 = vmul.f32 1.442695, %v3680_v15 }
 0x646   :  { %v4815_v17 = vmul.f32 %v6451_v24, %v4687_v59  ;;  %v4299_v4 = vsel %vm3176_vm3, %v10069_v57, 0.0 }
 0x647   :  { %6456 = vpow2.f32 %v3927_v37  ;;  %4300 = vadd.xlane.f32.xlu0 %v4299_v4 }
 0x648   :  { %v4943_v45 = vmul.f32 %v9883_v34, %v4815_v17 }
 0x649   :  { %v6455_v16 = vpop.eup %6454 }
 0x64a   :  { %5071 = vst.msk [vmem:[%s10255_s8 + $0x330] sm:$0xff] %vm3176_vm3, %v4943_v45  ;;  %v4560_v56 = vmul.f32 %v6455_v16, %v4256_v33  ;;  %v4259_v31 = vpop.xlane.xlu1 %4258  ;;  %v3539_v42 = vpop.xlane.xlu0 %3538 }
 0x64b   :  { %6458 = vrcp.f32 %v4259_v31  ;;  %v3681_v36 = vsub.f32 %v9911_v60, %v3539_v42 }
 0x64c   :  { %v4688_v55 = vsub.f32 2.0, %v4560_v56 }
 0x64d   :  { %v10079_v51 = vpop.eup %6456  ;;  %v3929_v12 = vmul.f32 1.442695, %v3681_v36 }
 0x64e   :  { %v4816_v54 = vmul.f32 %v6455_v16, %v4688_v55  ;;  %v4302_v34 = vsel %vm3176_vm3, %v10079_v51, 0.0 }
 0x64f   :  { %6460 = vpow2.f32 %v3929_v12  ;;  %4303 = vadd.xlane.f32.xlu1 %v4302_v34 }
 0x650   :  { %v4944_v26 = vmul.f32 %v9896_v14, %v4816_v54 }
 0x651   :  { %v6459_v9 = vpop.eup %6458 }
 0x652   :  { %5072 = vst.msk [vmem:[%s10255_s8 + $0x338] sm:$0xff] %vm3176_vm3, %v4944_v26  ;;  %v4561_v10 = vmul.f32 %v6459_v9, %v4259_v31  ;;  %v3542_v60 = vpop.xlane.xlu1 %3541  ;;  %v4262_v2 = vpop.xlane.xlu2 %4261 }
 0x653   :  { %v3682_v8 = vsub.f32 %v9924_v52, %v3542_v60  ;;  %6462 = vrcp.f32 %v4262_v2 }
 0x654   :  { %v4689_v48 = vsub.f32 2.0, %v4561_v10 }
 0x655   :  { %v10089_v63 = vpop.eup %6460  ;;  %v3931_v19 = vmul.f32 1.442695, %v3682_v8 }
 0x656   :  { %v4817_v20 = vmul.f32 %v6459_v9, %v4689_v48  ;;  %v4305_v14 = vsel %vm3176_vm3, %v10089_v63, 0.0 }
 0x657   :  { %6464 = vpow2.f32 %v3931_v19  ;;  %4306 = vadd.xlane.f32.xlu2 %v4305_v14 }
 0x658   :  { %v4945_v11 = vmul.f32 %v9909_v13, %v4817_v20 }
 0x659   :  { %v6463_v6 = vpop.eup %6462 }
 0x65a   :  { %5073 = vst.msk [vmem:[%s10255_s8 + $0x340] sm:$0xff] %vm3176_vm3, %v4945_v11  ;;  %v4562_v52 = vmul.f32 %v6463_v6, %v4262_v2  ;;  %v3545_v40 = vpop.xlane.xlu2 %3544  ;;  %v4265_v7 = vpop.xlane.xlu0 %4264 }
 0x65b   :  { %v3683_v0 = vsub.f32 %v9936_v25, %v3545_v40  ;;  %6466 = vrcp.f32 %v4265_v7 }
 0x65c   :  { %v4690_v47 = vsub.f32 2.0, %v4562_v52 }
 0x65d   :  { %v10099_v39 = vpop.eup %6464  ;;  %v3933_v44 = vmul.f32 1.442695, %v3683_v0 }
 0x65e   :  { %v4818_v43 = vmul.f32 %v6463_v6, %v4690_v47  ;;  %v4308_v13 = vsel %vm3176_vm3, %v10099_v39, 0.0 }
 0x65f   :  { %6468 = vpow2.f32 %v3933_v44  ;;  %4309 = vadd.xlane.f32.xlu0 %v4308_v13 }
 0x660   :  { %v4946_v1 = vmul.f32 %v9922_v46, %v4818_v43 }
 0x661   :  { %v6467_v49 = vpop.eup %6466 }
 0x662   :  { %5074 = vst.msk [vmem:[%s10255_s8 + $0x348] sm:$0xff] %vm3176_vm3, %v4946_v1  ;;  %v4563_v25 = vmul.f32 %v6467_v49, %v4265_v7  ;;  %v3548_v24 = vpop.xlane.xlu0 %3547 }
 0x663   :  { %v3684_v29 = vsub.f32 %v9946_v27, %v3548_v24 }
 0x664   :  { %v4691_v22 = vsub.f32 2.0, %v4563_v25 }
 0x665   :  { %v10109_v33 = vpop.eup %6468  ;;  %v3935_v15 = vmul.f32 1.442695, %v3684_v29 }
 0x666   :  { %v4819_v59 = vmul.f32 %v6467_v49, %v4691_v22  ;;  %v4311_v37 = vsel %vm3176_vm3, %v10109_v33, 0.0 }
 0x667   :  { %6470 = vpow2.f32 %v3935_v15  ;;  %4312 = vadd.xlane.f32.xlu1 %v4311_v37 }
 0x668   :  { %v4947_v46 = vmul.f32 %v9934_v21, %v4819_v59 }
 0x66a   :  { %5075 = vst.msk [vmem:[%s10255_s8 + $0x350] sm:$0xff] %vm3176_vm3, %v4947_v46  ;;  %v3551_v17 = vpop.xlane.xlu1 %3550 }
 0x66b   :  { %v3685_v27 = vsub.f32 %v9955_v23, %v3551_v17 }
 0x66d   :  { %v10119_v4 = vpop.eup %6470  ;;  %v3937_v45 = vmul.f32 1.442695, %v3685_v27 }
 0x66e   :  { %v4314_v16 = vsel %vm3176_vm3, %v10119_v4, 0.0 }
 0x66f   :  { %6472 = vpow2.f32 %v3937_v45  ;;  %4315 = vadd.xlane.f32.xlu2 %v4314_v16 }
 0x672   :  { %v3554_v56 = vpop.xlane.xlu2 %3553 }
 0x673   :  { %v3686_v31 = vsub.f32 %v9964_v28, %v3554_v56 }
 0x675   :  { %v10124_v21 = vpop.eup %6472  ;;  %v3939_v42 = vmul.f32 1.442695, %v3686_v31 }
 0x676   :  { %v4317_v36 = vsel %vm3176_vm3, %v10124_v21, 0.0 }
 0x677   :  { %6474 = vpow2.f32 %v3939_v42  ;;  %4318 = vadd.xlane.f32.xlu0 %v4317_v36 }
 0x67a   :  { %v4271_v23 = vpop.xlane.xlu2 %4270  ;;  %v3557_v55 = vpop.xlane.xlu0 %3556 }
 0x67b   :  { %6476 = vrcp.f32 %v4271_v23  ;;  %v3687_v12 = vsub.f32 %v9976_v62, %v3557_v55 }
 0x67d   :  { %v10129_v54 = vpop.eup %6474  ;;  %v3941_v34 = vmul.f32 1.442695, %v3687_v12 }
 0x67e   :  { %v4320_v26 = vsel %vm3176_vm3, %v10129_v54, 0.0 }
 0x67f   :  { %6478 = vpow2.f32 %v3941_v34  ;;  %4321 = vadd.xlane.f32.xlu1 %v4320_v26 }
 0x681   :  { %v6477_v28 = vpop.eup %6476 }
 0x682   :  { %v4565_v9 = vmul.f32 %v6477_v28, %v4271_v23  ;;  %v3560_v10 = vpop.xlane.xlu1 %3559  ;;  %v4274_v60 = vpop.xlane.xlu0 %4273 }
 0x683   :  { %v3688_v2 = vsub.f32 %v9992_v41, %v3560_v10  ;;  %v4280_v8 = vpop.xlane.xlu2 %4279  ;;  %6480 = vrcp.f32 %v4274_v60 }
 0x684   :  { %v4693_v48 = vsub.f32 2.0, %v4565_v9  ;;  %6482 = vrcp.f32 %v4280_v8 }
 0x685   :  { %v10134_v19 = vpop.eup %6478  ;;  %v3943_v62 = vmul.f32 1.442695, %v3688_v2 }
 0x686   :  { %v4821_v20 = vmul.f32 %v6477_v28, %v4693_v48  ;;  %v4323_v14 = vsel %vm3176_vm3, %v10134_v19, 0.0 }
 0x687   :  { %6484 = vpow2.f32 %v3943_v62  ;;  %4324 = vadd.xlane.f32.xlu2 %v4323_v14 }
 0x688   :  { %v4949_v11 = vmul.f32 %v9971_v18, %v4821_v20 }
 0x689   :  { %v6481_v6 = vpop.eup %6480 }
 0x68a   :  { %v6483_v52 = vpop.eup %6482  ;;  %5077 = vst.msk [vmem:[%s10255_s8 + $0x360] sm:$0xff] %vm3176_vm3, %v4949_v11  ;;  %v4566_v41 = vmul.f32 %v6481_v6, %v4274_v60  ;;  %v4268_v40 = vpop.xlane.xlu1 %4267 }
 0x68b   :  { %v4283_v7 = vpop.xlane.xlu0 %4282  ;;  %v4568_v0 = vmul.f32 %v6483_v52, %v4280_v8  ;;  %6486 = vrcp.f32 %v4268_v40 }
 0x68c   :  { %v4694_v47 = vsub.f32 2.0, %v4566_v41  ;;  %6488 = vrcp.f32 %v4283_v7 }
 0x68d   :  { %v10143_v44 = vpop.eup %6484  ;;  %v4696_v43 = vsub.f32 2.0, %v4568_v0 }
 0x68e   :  { %v4822_v13 = vmul.f32 %v6481_v6, %v4694_v47  ;;  %v4326_v18 = vsel %vm3176_vm3, %v10143_v44, 0.0 }
 0x68f   :  { %v4824_v1 = vmul.f32 %v6483_v52, %v4696_v43  ;;  %4327 = vadd.xlane.f32.xlu0 %v4326_v18 }
 0x690   :  { %v4950_v49 = vmul.f32 %v9985_v61, %v4822_v13 }
 0x691   :  { %v6487_v25 = vpop.eup %6486  ;;  %v4952_v24 = vmul.f32 %v9989_v58, %v4824_v1 }
 0x692   :  { %v6489_v29 = vpop.eup %6488  ;;  %5078 = vst.msk [vmem:[%s10255_s8 + $0x368] sm:$0xff] %vm3176_vm3, %v4950_v49  ;;  %v4564_v22 = vmul.f32 %v6487_v25, %v4268_v40  ;;  %v4277_v15 = vpop.xlane.xlu1 %4276 }
 0x693   :  { %5080 = vst.msk [vmem:[%s10255_s8 + $0x378] sm:$0xff] %vm3176_vm3, %v4952_v24  ;;  %v4569_v59 = vmul.f32 %v6489_v29, %v4283_v7  ;;  %6490 = vrcp.f32 %v4277_v15 }
 0x694   :  { %v4692_v37 = vsub.f32 2.0, %v4564_v22 }
 0x695   :  { %v4697_v61 = vsub.f32 2.0, %v4569_v59 }
 0x696   :  { %v4820_v46 = vmul.f32 %v6487_v25, %v4692_v37 }
 0x697   :  { %v4825_v17 = vmul.f32 %v6489_v29, %v4697_v61 }
 0x698   :  { %v4948_v58 = vmul.f32 %v10000_v32, %v4820_v46 }
 0x699   :  { %v6491_v27 = vpop.eup %6490  ;;  %v4953_v45 = vmul.f32 %v10002_v50, %v4825_v17 }
 0x69a   :  { %5076 = vst.msk [vmem:[%s10255_s8 + $0x358] sm:$0xff] %vm3176_vm3, %v4948_v58  ;;  %v4567_v16 = vmul.f32 %v6491_v27, %v4277_v15  ;;  %v4286_v56 = vpop.xlane.xlu1 %4285  ;;  %v4289_v31 = vpop.xlane.xlu2 %4288 }
 0x69b   :  { %5081 = vst.msk [vmem:[%s10255_s8 + $0x380] sm:$0xff] %vm3176_vm3, %v4953_v45  ;;  %6492 = vrcp.f32 %v4286_v56 }
 0x69c   :  { %v4695_v42 = vsub.f32 2.0, %v4567_v16  ;;  %6494 = vrcp.f32 %v4289_v31 }
 0x69e   :  { %v4823_v32 = vmul.f32 %v6491_v27, %v4695_v42 }
 0x6a0   :  { %v4951_v36 = vmul.f32 %v10010_v30, %v4823_v32 }
 0x6a1   :  { %v6493_v50 = vpop.eup %6492 }
 0x6a2   :  { %v6495_v23 = vpop.eup %6494  ;;  %5079 = vst.msk [vmem:[%s10255_s8 + $0x370] sm:$0xff] %vm3176_vm3, %v4951_v36  ;;  %v4570_v55 = vmul.f32 %v6493_v50, %v4286_v56  ;;  %v4292_v12 = vpop.xlane.xlu0 %4291 }
 0x6a3   :  { %v4571_v34 = vmul.f32 %v6495_v23, %v4289_v31  ;;  %6496 = vrcp.f32 %v4292_v12 }
 0x6a4   :  { %v4698_v26 = vsub.f32 2.0, %v4570_v55 }
 0x6a5   :  { %v4699_v28 = vsub.f32 2.0, %v4571_v34 }
 0x6a6   :  { %v4826_v9 = vmul.f32 %v6493_v50, %v4698_v26 }
 0x6a7   :  { %v4827_v10 = vmul.f32 %v6495_v23, %v4699_v28 }
 0x6a8   :  { %v4954_v60 = vmul.f32 %v10024_v38, %v4826_v9 }
 0x6a9   :  { %v6497_v2 = vpop.eup %6496  ;;  %v4955_v30 = vmul.f32 %v10027_v53, %v4827_v10 }
 0x6aa   :  { %5082 = vst.msk [vmem:[%s10255_s8 + $0x388] sm:$0xff] %vm3176_vm3, %v4954_v60  ;;  %v4572_v8 = vmul.f32 %v6497_v2, %v4292_v12  ;;  %v4295_v48 = vpop.xlane.xlu1 %4294 }
 0x6ab   :  { %5083 = vst.msk [vmem:[%s10255_s8 + $0x390] sm:$0xff] %vm3176_vm3, %v4955_v30  ;;  %6498 = vrcp.f32 %v4295_v48 }
 0x6ac   :  { %v4700_v62 = vsub.f32 2.0, %v4572_v8 }
 0x6ae   :  { %v4828_v20 = vmul.f32 %v6497_v2, %v4700_v62 }
 0x6b0   :  { %v4956_v38 = vmul.f32 %v10039_v5, %v4828_v20 }
 0x6b1   :  { %v6499_v14 = vpop.eup %6498 }
 0x6b2   :  { %5084 = vst.msk [vmem:[%s10255_s8 + $0x398] sm:$0xff] %vm3176_vm3, %v4956_v38  ;;  %v4573_v53 = vmul.f32 %v6499_v14, %v4295_v48  ;;  %v4298_v11 = vpop.xlane.xlu2 %4297 }
 0x6b3   :  { %6500 = vrcp.f32 %v4298_v11 }
 0x6b4   :  { %v4701_v6 = vsub.f32 2.0, %v4573_v53 }
 0x6b6   :  { %v4829_v52 = vmul.f32 %v6499_v14, %v4701_v6 }
 0x6b8   :  { %v4957_v41 = vmul.f32 %v10049_v3, %v4829_v52 }
 0x6b9   :  { %v6501_v40 = vpop.eup %6500 }
 0x6ba   :  { %5085 = vst.msk [vmem:[%s10255_s8 + $0x3a0] sm:$0xff] %vm3176_vm3, %v4957_v41  ;;  %v4574_v5 = vmul.f32 %v6501_v40, %v4298_v11  ;;  %v4301_v7 = vpop.xlane.xlu0 %4300 }
 0x6bb   :  { %6502 = vrcp.f32 %v4301_v7 }
 0x6bc   :  { %v4702_v0 = vsub.f32 2.0, %v4574_v5 }
 0x6be   :  { %v4830_v47 = vmul.f32 %v6501_v40, %v4702_v0 }
 0x6c0   :  { %v4958_v43 = vmul.f32 %v10059_v35, %v4830_v47 }
 0x6c1   :  { %v6503_v13 = vpop.eup %6502 }
 0x6c2   :  { %5086 = vst.msk [vmem:[%s10255_s8 + $0x3a8] sm:$0xff] %vm3176_vm3, %v4958_v43  ;;  %v4575_v3 = vmul.f32 %v6503_v13, %v4301_v7  ;;  %v4304_v18 = vpop.xlane.xlu1 %4303 }
 0x6c3   :  { %6504 = vrcp.f32 %v4304_v18 }
 0x6c4   :  { %v4703_v1 = vsub.f32 2.0, %v4575_v3 }
 0x6c6   :  { %v4831_v49 = vmul.f32 %v6503_v13, %v4703_v1 }
 0x6c8   :  { %v4959_v25 = vmul.f32 %v10069_v57, %v4831_v49 }
 0x6c9   :  { %v6505_v24 = vpop.eup %6504 }
 0x6ca   :  { %5087 = vst.msk [vmem:[%s10255_s8 + $0x3b0] sm:$0xff] %vm3176_vm3, %v4959_v25  ;;  %v4576_v35 = vmul.f32 %v6505_v24, %v4304_v18  ;;  %v4307_v29 = vpop.xlane.xlu2 %4306 }
 0x6cb   :  { %6506 = vrcp.f32 %v4307_v29 }
 0x6cc   :  { %v4704_v22 = vsub.f32 2.0, %v4576_v35 }
 0x6ce   :  { %v4832_v15 = vmul.f32 %v6505_v24, %v4704_v22 }
 0x6d0   :  { %v4960_v59 = vmul.f32 %v10079_v51, %v4832_v15 }
 0x6d1   :  { %v6507_v37 = vpop.eup %6506 }
 0x6d2   :  { %5088 = vst.msk [vmem:[%s10255_s8 + $0x3b8] sm:$0xff] %vm3176_vm3, %v4960_v59  ;;  %v4577_v57 = vmul.f32 %v6507_v37, %v4307_v29  ;;  %v4310_v61 = vpop.xlane.xlu0 %4309 }
 0x6d3   :  { %6508 = vrcp.f32 %v4310_v61 }
 0x6d4   :  { %v4705_v46 = vsub.f32 2.0, %v4577_v57 }
 0x6d6   :  { %v4833_v17 = vmul.f32 %v6507_v37, %v4705_v46 }
 0x6d8   :  { %v4961_v58 = vmul.f32 %v10089_v63, %v4833_v17 }
 0x6d9   :  { %v6509_v27 = vpop.eup %6508 }
 0x6da   :  { %5089 = vst.msk [vmem:[%s10255_s8 + $0x3c0] sm:$0xff] %vm3176_vm3, %v4961_v58  ;;  %v4578_v51 = vmul.f32 %v6509_v27, %v4310_v61  ;;  %v4313_v45 = vpop.xlane.xlu1 %4312 }
 0x6db   :  { %6510 = vrcp.f32 %v4313_v45 }
 0x6dc   :  { %v4706_v16 = vsub.f32 2.0, %v4578_v51 }
 0x6de   :  { %v4834_v56 = vmul.f32 %v6509_v27, %v4706_v16 }
 0x6e0   :  { %v4962_v31 = vmul.f32 %v10099_v39, %v4834_v56 }
 0x6e1   :  { %v6511_v42 = vpop.eup %6510 }
 0x6e2   :  { %5090 = vst.msk [vmem:[%s10255_s8 + $0x3c8] sm:$0xff] %vm3176_vm3, %v4962_v31  ;;  %v4579_v63 = vmul.f32 %v6511_v42, %v4313_v45  ;;  %v4316_v32 = vpop.xlane.xlu2 %4315 }
 0x6e3   :  { %6512 = vrcp.f32 %v4316_v32 }
 0x6e4   :  { %v4707_v36 = vsub.f32 2.0, %v4579_v63 }
 0x6e6   :  { %v4835_v50 = vmul.f32 %v6511_v42, %v4707_v36 }
 0x6e8   :  { %v4963_v23 = vmul.f32 %v10109_v33, %v4835_v50 }
 0x6e9   :  { %v6513_v55 = vpop.eup %6512 }
 0x6ea   :  { %5091 = vst.msk [vmem:[%s10255_s8 + $0x3d0] sm:$0xff] %vm3176_vm3, %v4963_v23  ;;  %v4580_v39 = vmul.f32 %v6513_v55, %v4316_v32  ;;  %v4319_v12 = vpop.xlane.xlu0 %4318 }
 0x6eb   :  { %6514 = vrcp.f32 %v4319_v12 }
 0x6ec   :  { %v4708_v34 = vsub.f32 2.0, %v4580_v39 }
 0x6ee   :  { %v4836_v26 = vmul.f32 %v6513_v55, %v4708_v34 }
 0x6f0   :  { %v4964_v28 = vmul.f32 %v10119_v4, %v4836_v26 }
 0x6f1   :  { %v6515_v9 = vpop.eup %6514 }
 0x6f2   :  { %5092 = vst.msk [vmem:[%s10255_s8 + $0x3d8] sm:$0xff] %vm3176_vm3, %v4964_v28  ;;  %v4581_v33 = vmul.f32 %v6515_v9, %v4319_v12  ;;  %v4322_v10 = vpop.xlane.xlu1 %4321 }
 0x6f3   :  { %6516 = vrcp.f32 %v4322_v10 }
 0x6f4   :  { %v4709_v60 = vsub.f32 2.0, %v4581_v33 }
 0x6f6   :  { %v4837_v2 = vmul.f32 %v6515_v9, %v4709_v60 }
 0x6f8   :  { %v4965_v30 = vmul.f32 %v10124_v21, %v4837_v2 }
 0x6f9   :  { %v6517_v8 = vpop.eup %6516 }
 0x6fa   :  { %5093 = vst.msk [vmem:[%s10255_s8 + $0x3e0] sm:$0xff] %vm3176_vm3, %v4965_v30  ;;  %v4582_v4 = vmul.f32 %v6517_v8, %v4322_v10  ;;  %v4325_v48 = vpop.xlane.xlu2 %4324 }
 0x6fb   :  { %6518 = vrcp.f32 %v4325_v48 }
 0x6fc   :  { %v4710_v62 = vsub.f32 2.0, %v4582_v4 }
 0x6fe   :  { %v4838_v20 = vmul.f32 %v6517_v8, %v4710_v62 }
 0x700   :  { %v4966_v38 = vmul.f32 %v10129_v54, %v4838_v20 }
 0x701   :  { %v6519_v14 = vpop.eup %6518 }
 0x702   :  { %5094 = vst.msk [vmem:[%s10255_s8 + $0x3e8] sm:$0xff] %vm3176_vm3, %v4966_v38  ;;  %v4583_v21 = vmul.f32 %v6519_v14, %v4325_v48  ;;  %v4328_v53 = vpop.xlane.xlu0 %4327 }
 0x703   :  { %6520 = vrcp.f32 %v4328_v53 }
 0x704   :  { %v4711_v11 = vsub.f32 2.0, %v4583_v21 }
 0x706   :  { %v4839_v6 = vmul.f32 %v6519_v14, %v4711_v11 }
 0x708   :  { %v4967_v52 = vmul.f32 %v10134_v19, %v4839_v6 }
 0x709   :  { %v6521_v41 = vpop.eup %6520 }
 0x70a   :  { %5095 = vst.msk [vmem:[%s10255_s8 + $0x3f0] sm:$0xff] %vm3176_vm3, %v4967_v52  ;;  %v4584_v54 = vmul.f32 %v6521_v41, %v4328_v53 }
 0x70c   :  { %v4712_v40 = vsub.f32 2.0, %v4584_v54 }
 0x70e   :  { %v4840_v5 = vmul.f32 %v6521_v41, %v4712_v40 }
 0x710   :  { %v4968_v7 = vmul.f32 %v10143_v44, %v4840_v5 }
 0x712   :  { %5096 = vst.msk [vmem:[%s10255_s8 + $0x3f8] sm:$0xff] %vm3176_vm3, %v4968_v7 }

</bundles_post_ra>
